<compile_context>
chip_gen: v6e
topology: v6e:2x2x1
jax: 0.10.0
libtpu: 0.0.40
codegen_flags: <defaults>
</compile_context>

<pallas_src>
import functools
import numpy as np
import jax
import jax.numpy as jnp
from jax import lax
from jax.experimental import pallas as pl
from jax.experimental.pallas import tpu as pltpu

LRELU_SLOPE = 0.1            # slope used inside the generator body
DEFAULT_LRELU_SLOPE = 0.01   # F.leaky_relu default slope right before conv_post
MAX_T_TILE = 1024            # output samples per time tile (multiple of 128)


def get_padding(kernel_size, dilation=1):
    return int((kernel_size * dilation - dilation) / 2)


def _round_up(a, m):
    return ((a + m - 1) // m) * m


def _cdiv(a, b):
    return -(-a // b)


def _transposed_phase_meta(u, k):
    """Static polyphase decomposition of ConvTranspose1d(stride=u, kernel=k) in HiFi-GAN padding
    convention.  Returns, per output phase c, (K_c, pad_left_c, pad_right_c, tap_offset_r)."""
    assert k >= u
    if (k - u) % 2 == 0:
        p, op = (k - u) // 2, 0
    else:
        p, op = (k - u) // 2 + 1, 1
    del op  # output length is exactly T*u for both branches
    pad_l = k - 1 - p
    metas = []
    for c in range(u):
        r = (pad_l - c) % u
        K_c = len(range(r, k, u))
        pl_c = (pad_l - c - r) // u
        pr_c = K_c - 1 - pl_c
        assert pl_c >= 0 and pr_c >= 0
        metas.append((K_c, pl_c, pr_c, r))
    return metas


# ---------------------------------------------------------------------------------------------
# Pallas kernels
# ---------------------------------------------------------------------------------------------
def _conv1d_kernel(x_ref, w_ref, b_ref, o_ref, *, K, dilation, t_tile, slope_in,
                   tanh_out, res_off):
    # x_ref : (1, C_in, T_in_pad)  bf16   whole padded strip for this batch element (resident)
    # w_ref : (C_out, K*C_in)      bf16   im2col-packed taps
    # b_ref : (C_out, 1)           f32
    # o_ref : (1, C_out, t_tile)
    halo = dilation * (K - 1)
    t0 = pl.multiple_of(pl.program_id(1) * t_tile, 128)
    xw = x_ref[0, :, pl.ds(t0, t_tile + halo)].astype(jnp.float32)
    res = xw[:, res_off:res_off + t_tile] if res_off is not None else None
    if slope_in is not None:
        xw = jnp.where(xw >= 0.0, xw, slope_in * xw)   # applied once per tile
    xa = xw.astype(jnp.bfloat16)
    if K == 1:
        cols = xa
    else:  # im2col: fold the K taps into the contraction dimension -> one MXU matmul
        cols = jnp.concatenate(
            [xa[:, k * dilation:k * dilation + t_tile] for k in range(K)], axis=0)
    acc = jnp.dot(w_ref[...], cols, preferred_element_type=jnp.float32) + b_ref[...]
    if res is not None:
        acc = acc + res
    if tanh_out:
        acc = jnp.tanh(acc)
    o_ref[0] = acc.astype(o_ref.dtype)


def _up_phases_kernel(x_ref, *refs, metas, t_tile, PL, PR, slope):
    # Fused polyphase ConvTranspose1d: read x once, apply lrelu once, emit all u phase convs.
    # x_ref : (1, C_in, T_in_pad) bf16 ; refs = (w_0..w_{u-1}, b_ref, o_ref)
    # w_c   : (C_out, K_c*C_in) bf16 ; b_ref : (C_out, 1) f32 ; o_ref : (1, u, C_out, t_tile)
    u = len(metas)
    w_refs = refs[:u]
    b_ref = refs[u]
    o_ref = refs[u + 1]
    width = t_tile + PL + PR
    t0 = pl.multiple_of(pl.program_id(1) * t_tile, 128)
    xw = x_ref[0, :, pl.ds(t0, width)].astype(jnp.float32)
    xa = jnp.where(xw >= 0.0, xw, slope * xw).astype(jnp.bfloat16)
    for c, (K_c, pl_c, _pr_c, _r) in enumerate(metas):
        off = PL - pl_c
        if K_c == 1:
            cols = xa[:, off:off + t_tile]
        else:
            cols = jnp.concatenate(
                [xa[:, off + j:off + j + t_tile] for j in range(K_c)], axis=0)
        acc = jnp.dot(w_refs[c][...], cols, preferred_element_type=jnp.float32) + b_ref[...]
        o_ref[0, c] = acc.astype(o_ref.dtype)


def _res_pair_kernel(x_ref, w1_ref, b1_ref, w2_ref, b2_ref, o_ref, *,
                     K, dilation, t_tile, p1, p2, t_real):
    # Fused  x + conv2(lrelu(conv1(lrelu(x))))  for one ResBlock1 (conv1, conv2) pair.
    # x_ref : (1, C, T_in_pad) bf16,  w*_ref : (C, K*C) bf16,  b*_ref : (C, 1) f32
    t0 = pl.multiple_of(pl.program_id(1) * t_tile, 128)
    width = t_tile + 2 * (p1 + p2)
    mid_w = t_tile + 2 * p2
    xw = x_ref[0, :, pl.ds(t0, width)].astype(jnp.float32)
    res = xw[:, p1 + p2:p1 + p2 + t_tile]
    xa = jnp.where(xw >= 0.0, xw, LRELU_SLOPE * xw).astype(jnp.bfloat16)
    if K == 1:
        cols1 = xa[:, :mid_w]
    else:
        cols1 = jnp.concatenate(
            [xa[:, j * dilation:j * dilation + mid_w] for j in range(K)], axis=0)
    h = jnp.dot(w1_ref[...], cols1, preferred_element_type=jnp.float32) + b1_ref[...]
    # conv2 must see zeros outside the real [0, T) range (PyTorch zero-pads conv2's input;
    # it does NOT evaluate conv1 on x's zero padding there).
    g = t0 - p2 + lax.broadcasted_iota(jnp.int32, (1, mid_w), 1)
    h = jnp.where((g >= 0) & (g < t_real), h, 0.0)
    ha = jnp.where(h >= 0.0, h, LRELU_SLOPE * h).astype(jnp.bfloat16)
    if K == 1:
        cols2 = ha[:, :t_tile]
    else:
        cols2 = jnp.concatenate([ha[:, j:j + t_tile] for j in range(K)], axis=0)
    y = jnp.dot(w2_ref[...], cols2, preferred_element_type=jnp.float32) + b2_ref[...]
    y = y + res
    o_ref[0] = y.astype(o_ref.dtype)


# ---------------------------------------------------------------------------------------------
# pallas_call wrappers
# ---------------------------------------------------------------------------------------------
def pallas_conv1d(x, w_packed, b_col, *, K, dilation=1, pad=(0, 0), slope_in=None,
                  tanh_out=False, residual=False, out_dtype=jnp.bfloat16):
    """PyTorch-semantics Conv1d (with optional fused leaky-relu input / residual add / tanh).

    x: (B, C_in, T) any float dtype; w_packed: (C_out, K*C_in) bf16; b_col: (C_out, 1) f32.
    """
    x = x.astype(jnp.bfloat16)
    B, c_in, T = x.shape
    c_out = w_packed.shape[0]
    assert w_packed.shape[1] == K * c_in
    halo = dilation * (K - 1)
    t_out = T + pad[0] + pad[1] - halo
    assert t_out >= 1
    if residual:
        assert c_out == c_in and pad[0] <= halo
    t_tile = min(MAX_T_TILE, _round_up(t_out, 128))
    n_t = _cdiv(t_out, t_tile)
    t_out_pad = n_t * t_tile
    t_in = t_out_pad + halo                                   # padded input strip length
    x_pad = jnp.pad(x, ((0, 0), (0, 0), (pad[0], t_in - T - pad[0])))
    kern = functools.partial(_conv1d_kernel, K=K, dilation=dilation, t_tile=t_tile,
                             slope_in=slope_in, tanh_out=tanh_out,
                             res_off=(pad[0] if residual else None))
    out = pl.pallas_call(
        kern,
        out_shape=jax.ShapeDtypeStruct((B, c_out, t_out_pad), out_dtype),
        grid=(B, n_t),
        in_specs=[
            pl.BlockSpec((1, c_in, t_in), lambda bb, tt: (bb, 0, 0)),
            pl.BlockSpec((c_out, K * c_in), lambda bb, tt: (0, 0)),
            pl.BlockSpec((c_out, 1), lambda bb, tt: (0, 0)),
        ],
        out_specs=pl.BlockSpec((1, c_out, t_tile), lambda bb, tt: (bb, 0, tt)),
        compiler_params=pltpu.CompilerParams(
            dimension_semantics=("parallel", "parallel")),
    )(x_pad, w_packed, b_col)
    return out if t_out == t_out_pad else out[:, :, :t_out]


def pallas_up_phases(x, phase_ws, b_col, metas):
    """Fused polyphase ConvTranspose1d: lrelu(x) -> u phase convs -> interleave to length T*u."""
    x = x.astype(jnp.bfloat16)
    B, c_in, T = x.shape
    u = len(metas)
    c_out = phase_ws[0].shape[0]
    PL = max(m[1] for m in metas)
    PR = max(m[2] for m in metas)
    t_out = T                                                  # per-phase output length
    t_tile = min(MAX_T_TILE, _round_up(t_out, 128))
    n_t = _cdiv(t_out, t_tile)
    t_out_pad = n_t * t_tile
    t_in = t_out_pad + PL + PR
    x_pad = jnp.pad(x, ((0, 0), (0, 0), (PL, t_in - T - PL)))
    kern = functools.partial(_up_phases_kernel, metas=tuple(metas), t_tile=t_tile,
                             PL=PL, PR=PR, slope=LRELU_SLOPE)
    out = pl.pallas_call(
        kern,
        out_shape=jax.ShapeDtypeStruct((B, u, c_out, t_out_pad), jnp.bfloat16),
        grid=(B, n_t),
        in_specs=[pl.BlockSpec((1, c_in, t_in), lambda bb, tt: (bb, 0, 0))]
                 + [pl.BlockSpec(w.shape, lambda bb, tt: (0, 0)) for w in phase_ws]
                 + [pl.BlockSpec((c_out, 1), lambda bb, tt: (0, 0))],
        out_specs=pl.BlockSpec((1, u, c_out, t_tile), lambda bb, tt: (bb, 0, 0, tt)),
        compiler_params=pltpu.CompilerParams(
            dimension_semantics=("parallel", "parallel")),
    )(x_pad, *phase_ws, b_col)
    if t_out_pad != t_out:
        out = out[:, :, :, :t_out]
    # interleave phases: (B,u,C,T) -> (B,C,T,u) -> (B,C,T*u), flat index = q*u + phase
    return jnp.transpose(out, (0, 2, 3, 1)).reshape(B, c_out, T * u)


def pallas_res_pair(x, w1p, b1, w2p, b2, *, K, dilation):
    """Fused ResBlock1 step: x + conv2(lrelu(conv1(lrelu(x)))), same-padded, length-preserving."""
    x = x.astype(jnp.bfloat16)
    B, C, T = x.shape
    p1 = get_padding(K, dilation)
    p2 = get_padding(K, 1)
    halo = 2 * (p1 + p2)
    t_tile = min(MAX_T_TILE, _round_up(T, 128))
    n_t = _cdiv(T, t_tile)
    t_out_pad = n_t * t_tile
    t_in = t_out_pad + halo
    x_pad = jnp.pad(x, ((0, 0), (0, 0), (p1 + p2, t_in - T - (p1 + p2))))
    kern = functools.partial(_res_pair_kernel, K=K, dilation=dilation, t_tile=t_tile,
                             p1=p1, p2=p2, t_real=T)
    out = pl.pallas_call(
        kern,
        out_shape=jax.ShapeDtypeStruct((B, C, t_out_pad), jnp.bfloat16),
        grid=(B, n_t),
        in_specs=[
            pl.BlockSpec((1, C, t_in), lambda bb, tt: (bb, 0, 0)),
            pl.BlockSpec((C, K * C), lambda bb, tt: (0, 0)),
            pl.BlockSpec((C, 1), lambda bb, tt: (0, 0)),
            pl.BlockSpec((C, K * C), lambda bb, tt: (0, 0)),
            pl.BlockSpec((C, 1), lambda bb, tt: (0, 0)),
        ],
        out_specs=pl.BlockSpec((1, C, t_tile), lambda bb, tt: (bb, 0, tt)),
        compiler_params=pltpu.CompilerParams(
            dimension_semantics=("parallel", "parallel")),
    )(x_pad, w1p, b1, w2p, b2)
    return out if T == t_out_pad else out[:, :, :T]


# ---------------------------------------------------------------------------------------------
# Parameter preparation (done ONCE): bf16 cast, im2col packing, polyphase decomposition.
# The returned pytree contains ONLY jnp arrays (safe to pass as a traced jit argument).
# ---------------------------------------------------------------------------------------------
def _pack_conv(wb):
    w, b = wb                                    # w: (C_out, C_in, K) f32, b: (C_out,) f32
    c_out, c_in, K = w.shape
    wp = jnp.transpose(w, (0, 2, 1)).reshape(c_out, K * c_in).astype(jnp.bfloat16)
    return {"w": wp, "b": b.reshape(c_out, 1).astype(jnp.float32)}


def prepare_params(params, cfg):
    prep = {"conv_pre": _pack_conv(params["conv_pre"]),
            "conv_post": _pack_conv(params["conv_post"]),
            "ups": [], "resblocks": []}
    for i, (u, k) in enumerate(zip(cfg["upsample_rates"], cfg["upsample_kernel_sizes"])):
        w, b = params["ups"][i]                  # equivalent regular-conv form (C_out, C_in, k)
        c_out, c_in, _ = w.shape
        phase_w = []
        for (K_c, _pl_c, _pr_c, r) in _transposed_phase_meta(u, k):
            taps = w[:, :, r::u]                 # (C_out, C_in, K_c)
            assert taps.shape[2] == K_c
            phase_w.append(jnp.transpose(taps, (0, 2, 1))
                           .reshape(c_out, K_c * c_in).astype(jnp.bfloat16))
        prep["ups"].append({"phase_w": phase_w,
                            "b": b.reshape(c_out, 1).astype(jnp.float32)})
    for rp in params["resblocks"]:
        if cfg["resblock"] == "1":
            prep["resblocks"].append({"convs1": [_pack_conv(c) for c in rp["convs1"]],
                                      "convs2": [_pack_conv(c) for c in rp["convs2"]]})
        else:
            prep["resblocks"].append({"convs": [_pack_conv(c) for c in rp["convs"]]})
    return prep


# ---------------------------------------------------------------------------------------------
# Generator forward (thin JAX glue around the Pallas kernels)
# ---------------------------------------------------------------------------------------------
def resblock1_forward(rp, x, k, dilations):
    for c1, c2, d in zip(rp["convs1"], rp["convs2"], dilations):
        x = pallas_res_pair(x, c1["w"], c1["b"], c2["w"], c2["b"], K=k, dilation=d)
    return x


def resblock2_forward(rp, x, k, dilations):
    for c, d in zip(rp["convs"], dilations):
        x = pallas_conv1d(x, c["w"], c["b"], K=k, dilation=d,
                          pad=(get_padding(k, d),) * 2, slope_in=LRELU_SLOPE, residual=True)
    return x


def generator_forward(prep, x, cfg):
    nk = len(cfg["resblock_kernel_sizes"])
    cp = prep["conv_pre"]
    K_pre = cp["w"].shape[1] // x.shape[1]                    # static (=7)
    x = pallas_conv1d(x, cp["w"], cp["b"], K=K_pre, pad=((K_pre - 1) // 2,) * 2)
    for i, (u, k) in enumerate(zip(cfg["upsample_rates"], cfg["upsample_kernel_sizes"])):
        up = prep["ups"][i]
        metas = _transposed_phase_meta(u, k)                  # static polyphase structure
        x = pallas_up_phases(x, up["phase_w"], up["b"], metas)
        xs = None
        for j, (rk, rd) in enumerate(zip(cfg["resblock_kernel_sizes"],
                                         cfg["resblock_dilation_sizes"])):
            rp = prep["resblocks"][i * nk + j]
            if cfg["resblock"] == "1":
                r = resblock1_forward(rp, x, rk, rd)
            else:
                r = resblock2_forward(rp, x, rk, rd)
            xs = r.astype(jnp.float32) if xs is None else xs + r.astype(jnp.float32)
        x = (xs / nk).astype(jnp.bfloat16)
    cp = prep["conv_post"]
    K_post = cp["w"].shape[1] // x.shape[1]                   # static (=7)
    x = pallas_conv1d(x, cp["w"], cp["b"], K=K_post, pad=((K_post - 1) // 2,) * 2,
                      slope_in=DEFAULT_LRELU_SLOPE, tanh_out=True, out_dtype=jnp.float32)
    return x


# ---------------------------------------------------------------------------------------------
# Pure-JAX reference (lax.conv_general_dilated), numerically mirroring the bf16/f32 boundaries
# ---------------------------------------------------------------------------------------------
def _ref_conv(x, w, b, *, dilation=1, pad=(0, 0), lhs_dil=1, slope=None):
    a = x.astype(jnp.float32)
    if slope is not None:
        a = jnp.where(a >= 0, a, slope * a)
    a = a.astype(jnp.bfloat16)
    y = lax.conv_general_dilated(a, w.astype(jnp.bfloat16), window_strides=(1,),
                                 padding=[pad], lhs_dilation=(lhs_dil,),
                                 rhs_dilation=(dilation,),
                                 dimension_numbers=("NCH", "OIH", "NCH"),
                                 preferred_element_type=jnp.float32)
    return y + b[None, :, None]


def ref_forward(params, mels, cfg):
    nk = len(cfg["resblock_kernel_sizes"])
    x = mels.astype(jnp.bfloat16)
    w, b = params["conv_pre"]
    x = _ref_conv(x, w, b, pad=(3, 3)).astype(jnp.bfloat16)
    for i, (u, k) in enumerate(zip(cfg["upsample_rates"], cfg["upsample_kernel_sizes"])):
        if (k - u) % 2 == 0:
            p, op = (k - u) // 2, 0
        else:
            p, op = (k - u) // 2 + 1, 1
        w, b = params["ups"][i]
        x = _ref_conv(x, w, b, pad=(k - 1 - p, k - 1 - p + op), lhs_dil=u,
                      slope=LRELU_SLOPE).astype(jnp.bfloat16)
        xs = None
        for j, (rk, rd) in enumerate(zip(cfg["resblock_kernel_sizes"],
                                         cfg["resblock_dilation_sizes"])):
            rp = params["resblocks"][i * nk + j]
            xx = x
            if cfg["resblock"] == "1":
                for (w1, b1), (w2, b2), d in zip(rp["convs1"], rp["convs2"], rd):
                    h = _ref_conv(xx, w1, b1, dilation=d,
                                  pad=(get_padding(rk, d),) * 2, slope=LRELU_SLOPE)
                    y = _ref_conv(h, w2, b2, dilation=1,
                                  pad=(get_padding(rk, 1),) * 2, slope=LRELU_SLOPE)
                    xx = (y + xx.astype(jnp.float32)).astype(jnp.bfloat16)
            else:
                for (w1, b1), d in zip(rp["convs"], rd):
                    y = _ref_conv(xx, w1, b1, dilation=d,
                                  pad=(get_padding(rk, d),) * 2, slope=LRELU_SLOPE)
                    xx = (y + xx.astype(jnp.float32)).astype(jnp.bfloat16)
            xs = xx.astype(jnp.float32) if xs is None else xs + xx.astype(jnp.float32)
        x = (xs / nk).astype(jnp.bfloat16)
    w, b = params["conv_post"]
    return jnp.tanh(_ref_conv(x, w, b, pad=(3, 3), slope=DEFAULT_LRELU_SLOPE))


# ---------------------------------------------------------------------------------------------
# Deterministic synthetic parameters (matches init_weights: normal(0, 0.01))
# ---------------------------------------------------------------------------------------------
def make_params(key, cfg):
    keys = iter(jax.random.split(key, 512))

    def conv_p(c_out, c_in, ks):
        kw, kb = jax.random.split(next(keys))
        w = 0.01 * jax.random.normal(kw, (c_out, c_in, ks), jnp.float32)
        b = 0.01 * jax.random.normal(kb, (c_out,), jnp.float32)
        return (w, b)

    params = {}
    c0 = cfg["upsample_initial_channel"]
    params["conv_pre"] = conv_p(c0, cfg["num_mels"], 7)
    # ConvTranspose1d weights stored directly in equivalent regular-conv form (C_out, C_in, K)
    params["ups"] = []
    for i, (u, k) in enumerate(zip(cfg["upsample_rates"], cfg["upsample_kernel_sizes"])):
        params["ups"].append(conv_p(c0 // (2 ** (i + 1)), c0 // (2 ** i), k))
    params["resblocks"] = []
    ch = c0
    for i in range(len(cfg["upsample_rates"])):
        ch = c0 // (2 ** (i + 1))
        for rk, rd in zip(cfg["resblock_kernel_sizes"], cfg["resblock_dilation_sizes"]):
            if cfg["resblock"] == "1":
                rp = {"convs1": [conv_p(ch, ch, rk) for _ in rd],
                      "convs2": [conv_p(ch, ch, rk) for _ in rd]}
            else:
                rp = {"convs": [conv_p(ch, ch, rk) for _ in rd]}
            params["resblocks"].append(rp)
    params["conv_post"] = conv_p(1, ch, 7)
    return params


if __name__ == "__main__":
    cfg1 = {  # ResBlock1 + two upsample stages
        "num_mels": 8,
        "upsample_initial_channel": 32,
        "upsample_rates": [4, 3],
        "upsample_kernel_sizes": [8, 7],
        "resblock": "1",
        "resblock_kernel_sizes": [3, 5],
        "resblock_dilation_sizes": [[1, 3, 5], [1, 3, 5]],
    }
    cfg2 = {  # ResBlock2 path
        "num_mels": 8,
        "upsample_initial_channel": 16,
        "upsample_rates": [4],
        "upsample_kernel_sizes": [8],
        "resblock": "2",
        "resblock_kernel_sizes": [3],
        "resblock_dilation_sizes": [[1, 3]],
    }

    key = jax.random.PRNGKey(0)
    for ci, cfg in enumerate([cfg1, cfg2]):
        pkey, xkey = jax.random.split(jax.random.fold_in(key, ci))
        params = make_params(pkey, cfg)
        prep = prepare_params(params, cfg)      # arrays only -> safe as a jit argument

        B, T = 2, 16
        mels = jax.random.normal(xkey, (B, cfg["num_mels"], T), jnp.float32)  # NCT layout

        fwd = jax.jit(functools.partial(generator_forward, cfg=cfg))
        wav = jax.block_until_ready(fwd(prep, mels))

        expected_T = T * int(np.prod(cfg["upsample_rates"]))
        assert wav.shape == (B, 1, expected_T), wav.shape

        ref = jax.block_until_ready(jax.jit(functools.partial(ref_forward, cfg=cfg))(params, mels))
        np.testing.assert_allclose(np.asarray(wav, np.float32), np.asarray(ref, np.float32),
                                   rtol=2e-2, atol=2e-4)

    print("KERNEL_OK")
</pallas_src>

<mosaic_0001>
module attributes {stable_mosaic.version = 11 : i64} {
  func.func @_conv1d_kernel(%arg0: i32, %arg1: i32, %arg2: memref<1x8x134xbf16, #tpu.memory_space<vmem>>, %arg3: memref<32x56xbf16, #tpu.memory_space<vmem>>, %arg4: memref<32x1xf32, #tpu.memory_space<vmem>>, %arg5: memref<1x32x128xbf16, #tpu.memory_space<vmem>>) attributes {dimension_semantics = [#tpu.dimension_semantics<parallel>, #tpu.dimension_semantics<parallel>], iteration_bounds = array<i64: 2, 1>, scalar_prefetch = 0 : i64, scratch_operands = 0 : i64, tpu.core_type = #tpu.core_type<tc>, window_params = [{transform_indices = @transform_0, window_bounds = array<i64: 1, 8, 134>}, {pipeline_mode = #tpu.pipeline_mode<synchronous>, transform_indices = @transform_1, window_bounds = array<i64: 32, 56>}, {pipeline_mode = #tpu.pipeline_mode<synchronous>, transform_indices = @transform_2, window_bounds = array<i64: 32, 1>}, {transform_indices = @transform_3, window_bounds = array<i64: 1, 32, 128>}]} {
    %c128_i32 = arith.constant 128 : i32
    %0 = arith.muli %arg1, %c128_i32 : i32
    %1 = tpu.assume_multiple %0, 128 : i32
    %c0 = arith.constant 0 : index
    %c0_0 = arith.constant 0 : index
    %2 = arith.index_cast %1 : i32 to index
    %3 = vector.load %arg2[%c0, %c0_0, %2] : memref<1x8x134xbf16, #tpu.memory_space<vmem>>, vector<1x8x134xbf16>
    %4 = vector.shape_cast %3 : vector<1x8x134xbf16> to vector<8x134xbf16>
    %5 = arith.extf %4 : vector<8x134xbf16> to vector<8x134xf32>
    %6 = arith.truncf %5 : vector<8x134xf32> to vector<8x134xbf16>
    %7 = vector.extract_strided_slice %6 {offsets = [0, 0], sizes = [8, 128], strides = [1, 1]} : vector<8x134xbf16> to vector<8x128xbf16>
    %8 = vector.extract_strided_slice %6 {offsets = [0, 1], sizes = [8, 128], strides = [1, 1]} : vector<8x134xbf16> to vector<8x128xbf16>
    %9 = vector.extract_strided_slice %6 {offsets = [0, 2], sizes = [8, 128], strides = [1, 1]} : vector<8x134xbf16> to vector<8x128xbf16>
    %10 = vector.extract_strided_slice %6 {offsets = [0, 3], sizes = [8, 128], strides = [1, 1]} : vector<8x134xbf16> to vector<8x128xbf16>
    %11 = vector.extract_strided_slice %6 {offsets = [0, 4], sizes = [8, 128], strides = [1, 1]} : vector<8x134xbf16> to vector<8x128xbf16>
    %12 = vector.extract_strided_slice %6 {offsets = [0, 5], sizes = [8, 128], strides = [1, 1]} : vector<8x134xbf16> to vector<8x128xbf16>
    %13 = vector.extract_strided_slice %6 {offsets = [0, 6], sizes = [8, 128], strides = [1, 1]} : vector<8x134xbf16> to vector<8x128xbf16>
    %14 = tpu.concatenate %7, %8, %9, %10, %11, %12, %13 in 0 : vector<8x128xbf16>, vector<8x128xbf16>, vector<8x128xbf16>, vector<8x128xbf16>, vector<8x128xbf16>, vector<8x128xbf16>, vector<8x128xbf16> -> vector<56x128xbf16>
    %c0_1 = arith.constant 0 : index
    %c0_2 = arith.constant 0 : index
    %15 = vector.load %arg3[%c0_1, %c0_2] : memref<32x56xbf16, #tpu.memory_space<vmem>>, vector<32x56xbf16>
    %cst = arith.constant dense<0.000000e+00> : vector<32x128xf32>
    %16 = tpu.matmul %15, %14, %cst {dimension_numbers = #tpu.dot_dimension_numbers<[1], [0], [0], [1], [0, 0, 1, 1], [], []>} : vector<32x56xbf16>, vector<56x128xbf16>, vector<32x128xf32> -> vector<32x128xf32>
    %c0_3 = arith.constant 0 : index
    %c0_4 = arith.constant 0 : index
    %17 = vector.load %arg4[%c0_3, %c0_4] : memref<32x1xf32, #tpu.memory_space<vmem>>, vector<32x1xf32>
    %18 = vector.broadcast %17 : vector<32x1xf32> to vector<32x128xf32>
    %19 = arith.addf %16, %18 : vector<32x128xf32>
    %20 = arith.truncf %19 : vector<32x128xf32> to vector<32x128xbf16>
    %c0_5 = arith.constant 0 : index
    %c0_6 = arith.constant 0 : index
    %c0_7 = arith.constant 0 : index
    %21 = vector.load %arg5[%c0_5, %c0_6, %c0_7] : memref<1x32x128xbf16, #tpu.memory_space<vmem>>, vector<1x32x128xbf16>
    %22 = vector.shape_cast %21 : vector<1x32x128xbf16> to vector<32x128xbf16>
    %23 = vector.shape_cast %20 : vector<32x128xbf16> to vector<1x32x128xbf16>
    tpu.vector_store %arg5[%c0_5, %c0_6, %c0_7], %23 {strides = array<i32>} : memref<1x32x128xbf16, #tpu.memory_space<vmem>>, vector<1x32x128xbf16>,
    return
  }
  func.func @transform_0(%arg0: i32, %arg1: i32) -> (i32, i32, i32) {
    %c0_i32 = arith.constant 0 : i32
    %c0_i32_0 = arith.constant 0 : i32
    %c0_i32_1 = arith.constant 0 : i32
    return %arg0, %c0_i32, %c0_i32_0 : i32, i32, i32
  }
  func.func @transform_1(%arg0: i32, %arg1: i32) -> (i32, i32) {
    %c0_i32 = arith.constant 0 : i32
    %c0_i32_0 = arith.constant 0 : i32
    %c0_i32_1 = arith.constant 0 : i32
    return %c0_i32, %c0_i32_0 : i32, i32
  }
  func.func @transform_2(%arg0: i32, %arg1: i32) -> (i32, i32) {
    %c0_i32 = arith.constant 0 : i32
    %c0_i32_0 = arith.constant 0 : i32
    %c0_i32_1 = arith.constant 0 : i32
    return %c0_i32, %c0_i32_0 : i32, i32
  }
  func.func @transform_3(%arg0: i32, %arg1: i32) -> (i32, i32, i32) {
    %c0_i32 = arith.constant 0 : i32
    %c0_i32_0 = arith.constant 0 : i32
    return %arg0, %c0_i32, %arg1 : i32, i32, i32
  }
}

module attributes {stable_mosaic.version = 11 : i64} {
  func.func @_up_phases_kernel(%arg0: i32, %arg1: i32, %arg2: memref<1x32x130xbf16, #tpu.memory_space<vmem>>, %arg3: memref<16x64xbf16, #tpu.memory_space<vmem>>, %arg4: memref<16x64xbf16, #tpu.memory_space<vmem>>, %arg5: memref<16x64xbf16, #tpu.memory_space<vmem>>, %arg6: memref<16x64xbf16, #tpu.memory_space<vmem>>, %arg7: memref<16x1xf32, #tpu.memory_space<vmem>>, %arg8: memref<1x4x16x128xbf16, #tpu.memory_space<vmem>>) attributes {dimension_semantics = [#tpu.dimension_semantics<parallel>, #tpu.dimension_semantics<parallel>], iteration_bounds = array<i64: 2, 1>, scalar_prefetch = 0 : i64, scratch_operands = 0 : i64, tpu.core_type = #tpu.core_type<tc>, window_params = [{transform_indices = @transform_0, window_bounds = array<i64: 1, 32, 130>}, {pipeline_mode = #tpu.pipeline_mode<synchronous>, transform_indices = @transform_1, window_bounds = array<i64: 16, 64>}, {pipeline_mode = #tpu.pipeline_mode<synchronous>, transform_indices = @transform_2, window_bounds = array<i64: 16, 64>}, {pipeline_mode = #tpu.pipeline_mode<synchronous>, transform_indices = @transform_3, window_bounds = array<i64: 16, 64>}, {pipeline_mode = #tpu.pipeline_mode<synchronous>, transform_indices = @transform_4, window_bounds = array<i64: 16, 64>}, {pipeline_mode = #tpu.pipeline_mode<synchronous>, transform_indices = @transform_5, window_bounds = array<i64: 16, 1>}, {transform_indices = @transform_6, window_bounds = array<i64: 1, 4, 16, 128>}]} {
    %c128_i32 = arith.constant 128 : i32
    %0 = arith.muli %arg1, %c128_i32 : i32
    %1 = tpu.assume_multiple %0, 128 : i32
    %c0 = arith.constant 0 : index
    %c0_0 = arith.constant 0 : index
    %2 = arith.index_cast %1 : i32 to index
    %3 = vector.load %arg2[%c0, %c0_0, %2] : memref<1x32x130xbf16, #tpu.memory_space<vmem>>, vector<1x32x130xbf16>
    %4 = vector.shape_cast %3 : vector<1x32x130xbf16> to vector<32x130xbf16>
    %5 = arith.extf %4 : vector<32x130xbf16> to vector<32x130xf32>
    %cst = arith.constant 0.000000e+00 : f32
    %6 = vector.broadcast %cst : f32 to vector<32x130xf32>
    %7 = arith.cmpf oge, %5, %6 : vector<32x130xf32>
    %cst_1 = arith.constant 1.000000e-01 : f32
    %8 = vector.broadcast %cst_1 : f32 to vector<32x130xf32>
    %9 = arith.mulf %8, %5 : vector<32x130xf32>
    %10 = arith.select %7, %5, %9 : vector<32x130xi1>, vector<32x130xf32>
    %11 = arith.truncf %10 : vector<32x130xf32> to vector<32x130xbf16>
    %12 = vector.extract_strided_slice %11 {offsets = [0, 0], sizes = [32, 128], strides = [1, 1]} : vector<32x130xbf16> to vector<32x128xbf16>
    %13 = vector.extract_strided_slice %11 {offsets = [0, 1], sizes = [32, 128], strides = [1, 1]} : vector<32x130xbf16> to vector<32x128xbf16>
    %14 = tpu.concatenate %12, %13 in 0 : vector<32x128xbf16>, vector<32x128xbf16> -> vector<64x128xbf16>
    %c0_2 = arith.constant 0 : index
    %c0_3 = arith.constant 0 : index
    %15 = vector.load %arg3[%c0_2, %c0_3] : memref<16x64xbf16, #tpu.memory_space<vmem>>, vector<16x64xbf16>
    %cst_4 = arith.constant dense<0.000000e+00> : vector<16x128xf32>
    %16 = tpu.matmul %15, %14, %cst_4 {dimension_numbers = #tpu.dot_dimension_numbers<[1], [0], [0], [1], [0, 0, 1, 1], [], []>} : vector<16x64xbf16>, vector<64x128xbf16>, vector<16x128xf32> -> vector<16x128xf32>
    %c0_5 = arith.constant 0 : index
    %c0_6 = arith.constant 0 : index
    %17 = vector.load %arg7[%c0_5, %c0_6] : memref<16x1xf32, #tpu.memory_space<vmem>>, vector<16x1xf32>
    %18 = vector.broadcast %17 : vector<16x1xf32> to vector<16x128xf32>
    %19 = arith.addf %16, %18 : vector<16x128xf32>
    %20 = arith.truncf %19 : vector<16x128xf32> to vector<16x128xbf16>
    %c0_7 = arith.constant 0 : index
    %c0_8 = arith.constant 0 : index
    %c0_9 = arith.constant 0 : index
    %c0_10 = arith.constant 0 : index
    %21 = vector.load %arg8[%c0_7, %c0_8, %c0_9, %c0_10] : memref<1x4x16x128xbf16, #tpu.memory_space<vmem>>, vector<1x1x16x128xbf16>
    %22 = vector.shape_cast %21 : vector<1x1x16x128xbf16> to vector<16x128xbf16>
    %23 = vector.shape_cast %20 : vector<16x128xbf16> to vector<1x1x16x128xbf16>
    tpu.vector_store %arg8[%c0_7, %c0_8, %c0_9, %c0_10], %23 {strides = array<i32>} : memref<1x4x16x128xbf16, #tpu.memory_space<vmem>>, vector<1x1x16x128xbf16>,
    %24 = vector.extract_strided_slice %11 {offsets = [0, 0], sizes = [32, 128], strides = [1, 1]} : vector<32x130xbf16> to vector<32x128xbf16>
    %25 = vector.extract_strided_slice %11 {offsets = [0, 1], sizes = [32, 128], strides = [1, 1]} : vector<32x130xbf16> to vector<32x128xbf16>
    %26 = tpu.concatenate %24, %25 in 0 : vector<32x128xbf16>, vector<32x128xbf16> -> vector<64x128xbf16>
    %c0_11 = arith.constant 0 : index
    %c0_12 = arith.constant 0 : index
    %27 = vector.load %arg4[%c0_11, %c0_12] : memref<16x64xbf16, #tpu.memory_space<vmem>>, vector<16x64xbf16>
    %cst_13 = arith.constant dense<0.000000e+00> : vector<16x128xf32>
    %28 = tpu.matmul %27, %26, %cst_13 {dimension_numbers = #tpu.dot_dimension_numbers<[1], [0], [0], [1], [0, 0, 1, 1], [], []>} : vector<16x64xbf16>, vector<64x128xbf16>, vector<16x128xf32> -> vector<16x128xf32>
    %c0_14 = arith.constant 0 : index
    %c0_15 = arith.constant 0 : index
    %29 = vector.load %arg7[%c0_14, %c0_15] : memref<16x1xf32, #tpu.memory_space<vmem>>, vector<16x1xf32>
    %30 = vector.broadcast %29 : vector<16x1xf32> to vector<16x128xf32>
    %31 = arith.addf %28, %30 : vector<16x128xf32>
    %32 = arith.truncf %31 : vector<16x128xf32> to vector<16x128xbf16>
    %c0_16 = arith.constant 0 : index
    %c1 = arith.constant 1 : index
    %c0_17 = arith.constant 0 : index
    %c0_18 = arith.constant 0 : index
    %33 = vector.load %arg8[%c0_16, %c1, %c0_17, %c0_18] : memref<1x4x16x128xbf16, #tpu.memory_space<vmem>>, vector<1x1x16x128xbf16>
    %34 = vector.shape_cast %33 : vector<1x1x16x128xbf16> to vector<16x128xbf16>
    %35 = vector.shape_cast %32 : vector<16x128xbf16> to vector<1x1x16x128xbf16>
    tpu.vector_store %arg8[%c0_16, %c1, %c0_17, %c0_18], %35 {strides = array<i32>} : memref<1x4x16x128xbf16, #tpu.memory_space<vmem>>, vector<1x1x16x128xbf16>,
    %36 = vector.extract_strided_slice %11 {offsets = [0, 1], sizes = [32, 128], strides = [1, 1]} : vector<32x130xbf16> to vector<32x128xbf16>
    %37 = vector.extract_strided_slice %11 {offsets = [0, 2], sizes = [32, 128], strides = [1, 1]} : vector<32x130xbf16> to vector<32x128xbf16>
    %38 = tpu.concatenate %36, %37 in 0 : vector<32x128xbf16>, vector<32x128xbf16> -> vector<64x128xbf16>
    %c0_19 = arith.constant 0 : index
    %c0_20 = arith.constant 0 : index
    %39 = vector.load %arg5[%c0_19, %c0_20] : memref<16x64xbf16, #tpu.memory_space<vmem>>, vector<16x64xbf16>
    %cst_21 = arith.constant dense<0.000000e+00> : vector<16x128xf32>
    %40 = tpu.matmul %39, %38, %cst_21 {dimension_numbers = #tpu.dot_dimension_numbers<[1], [0], [0], [1], [0, 0, 1, 1], [], []>} : vector<16x64xbf16>, vector<64x128xbf16>, vector<16x128xf32> -> vector<16x128xf32>
    %c0_22 = arith.constant 0 : index
    %c0_23 = arith.constant 0 : index
    %41 = vector.load %arg7[%c0_22, %c0_23] : memref<16x1xf32, #tpu.memory_space<vmem>>, vector<16x1xf32>
    %42 = vector.broadcast %41 : vector<16x1xf32> to vector<16x128xf32>
    %43 = arith.addf %40, %42 : vector<16x128xf32>
    %44 = arith.truncf %43 : vector<16x128xf32> to vector<16x128xbf16>
    %c0_24 = arith.constant 0 : index
    %c2 = arith.constant 2 : index
    %c0_25 = arith.constant 0 : index
    %c0_26 = arith.constant 0 : index
    %45 = vector.load %arg8[%c0_24, %c2, %c0_25, %c0_26] : memref<1x4x16x128xbf16, #tpu.memory_space<vmem>>, vector<1x1x16x128xbf16>
    %46 = vector.shape_cast %45 : vector<1x1x16x128xbf16> to vector<16x128xbf16>
    %47 = vector.shape_cast %44 : vector<16x128xbf16> to vector<1x1x16x128xbf16>
    tpu.vector_store %arg8[%c0_24, %c2, %c0_25, %c0_26], %47 {strides = array<i32>} : memref<1x4x16x128xbf16, #tpu.memory_space<vmem>>, vector<1x1x16x128xbf16>,
    %48 = vector.extract_strided_slice %11 {offsets = [0, 1], sizes = [32, 128], strides = [1, 1]} : vector<32x130xbf16> to vector<32x128xbf16>
    %49 = vector.extract_strided_slice %11 {offsets = [0, 2], sizes = [32, 128], strides = [1, 1]} : vector<32x130xbf16> to vector<32x128xbf16>
    %50 = tpu.concatenate %48, %49 in 0 : vector<32x128xbf16>, vector<32x128xbf16> -> vector<64x128xbf16>
    %c0_27 = arith.constant 0 : index
    %c0_28 = arith.constant 0 : index
    %51 = vector.load %arg6[%c0_27, %c0_28] : memref<16x64xbf16, #tpu.memory_space<vmem>>, vector<16x64xbf16>
    %cst_29 = arith.constant dense<0.000000e+00> : vector<16x128xf32>
    %52 = tpu.matmul %51, %50, %cst_29 {dimension_numbers = #tpu.dot_dimension_numbers<[1], [0], [0], [1], [0, 0, 1, 1], [], []>} : vector<16x64xbf16>, vector<64x128xbf16>, vector<16x128xf32> -> vector<16x128xf32>
    %c0_30 = arith.constant 0 : index
    %c0_31 = arith.constant 0 : index
    %53 = vector.load %arg7[%c0_30, %c0_31] : memref<16x1xf32, #tpu.memory_space<vmem>>, vector<16x1xf32>
    %54 = vector.broadcast %53 : vector<16x1xf32> to vector<16x128xf32>
    %55 = arith.addf %52, %54 : vector<16x128xf32>
    %56 = arith.truncf %55 : vector<16x128xf32> to vector<16x128xbf16>
    %c0_32 = arith.constant 0 : index
    %c3 = arith.constant 3 : index
    %c0_33 = arith.constant 0 : index
    %c0_34 = arith.constant 0 : index
    %57 = vector.load %arg8[%c0_32, %c3, %c0_33, %c0_34] : memref<1x4x16x128xbf16, #tpu.memory_space<vmem>>, vector<1x1x16x128xbf16>
    %58 = vector.shape_cast %57 : vector<1x1x16x128xbf16> to vector<16x128xbf16>
    %59 = vector.shape_cast %56 : vector<16x128xbf16> to vector<1x1x16x128xbf16>
    tpu.vector_store %arg8[%c0_32, %c3, %c0_33, %c0_34], %59 {strides = array<i32>} : memref<1x4x16x128xbf16, #tpu.memory_space<vmem>>, vector<1x1x16x128xbf16>,
    return
  }
  func.func @transform_0(%arg0: i32, %arg1: i32) -> (i32, i32, i32) {
    %c0_i32 = arith.constant 0 : i32
    %c0_i32_0 = arith.constant 0 : i32
    %c0_i32_1 = arith.constant 0 : i32
    return %arg0, %c0_i32, %c0_i32_0 : i32, i32, i32
  }
  func.func @transform_1(%arg0: i32, %arg1: i32) -> (i32, i32) {
    %c0_i32 = arith.constant 0 : i32
    %c0_i32_0 = arith.constant 0 : i32
    %c0_i32_1 = arith.constant 0 : i32
    return %c0_i32, %c0_i32_0 : i32, i32
  }
  func.func @transform_2(%arg0: i32, %arg1: i32) -> (i32, i32) {
    %c0_i32 = arith.constant 0 : i32
    %c0_i32_0 = arith.constant 0 : i32
    %c0_i32_1 = arith.constant 0 : i32
    return %c0_i32, %c0_i32_0 : i32, i32
  }
  func.func @transform_3(%arg0: i32, %arg1: i32) -> (i32, i32) {
    %c0_i32 = arith.constant 0 : i32
    %c0_i32_0 = arith.constant 0 : i32
    %c0_i32_1 = arith.constant 0 : i32
    return %c0_i32, %c0_i32_0 : i32, i32
  }
  func.func @transform_4(%arg0: i32, %arg1: i32) -> (i32, i32) {
    %c0_i32 = arith.constant 0 : i32
    %c0_i32_0 = arith.constant 0 : i32
    %c0_i32_1 = arith.constant 0 : i32
    return %c0_i32, %c0_i32_0 : i32, i32
  }
  func.func @transform_5(%arg0: i32, %arg1: i32) -> (i32, i32) {
    %c0_i32 = arith.constant 0 : i32
    %c0_i32_0 = arith.constant 0 : i32
    %c0_i32_1 = arith.constant 0 : i32
    return %c0_i32, %c0_i32_0 : i32, i32
  }
  func.func @transform_6(%arg0: i32, %arg1: i32) -> (i32, i32, i32, i32) {
    %c0_i32 = arith.constant 0 : i32
    %c0_i32_0 = arith.constant 0 : i32
    %c0_i32_1 = arith.constant 0 : i32
    return %arg0, %c0_i32, %c0_i32_0, %arg1 : i32, i32, i32, i32
  }
}

module attributes {stable_mosaic.version = 11 : i64} {
  func.func @_res_pair_kernel(%arg0: i32, %arg1: i32, %arg2: memref<1x16x132xbf16, #tpu.memory_space<vmem>>, %arg3: memref<16x48xbf16, #tpu.memory_space<vmem>>, %arg4: memref<16x1xf32, #tpu.memory_space<vmem>>, %arg5: memref<16x48xbf16, #tpu.memory_space<vmem>>, %arg6: memref<16x1xf32, #tpu.memory_space<vmem>>, %arg7: memref<1x16x128xbf16, #tpu.memory_space<vmem>>) attributes {dimension_semantics = [#tpu.dimension_semantics<parallel>, #tpu.dimension_semantics<parallel>], iteration_bounds = array<i64: 2, 1>, scalar_prefetch = 0 : i64, scratch_operands = 0 : i64, tpu.core_type = #tpu.core_type<tc>, window_params = [{transform_indices = @transform_0, window_bounds = array<i64: 1, 16, 132>}, {pipeline_mode = #tpu.pipeline_mode<synchronous>, transform_indices = @transform_1, window_bounds = array<i64: 16, 48>}, {pipeline_mode = #tpu.pipeline_mode<synchronous>, transform_indices = @transform_2, window_bounds = array<i64: 16, 1>}, {pipeline_mode = #tpu.pipeline_mode<synchronous>, transform_indices = @transform_3, window_bounds = array<i64: 16, 48>}, {pipeline_mode = #tpu.pipeline_mode<synchronous>, transform_indices = @transform_4, window_bounds = array<i64: 16, 1>}, {transform_indices = @transform_5, window_bounds = array<i64: 1, 16, 128>}]} {
    %c128_i32 = arith.constant 128 : i32
    %0 = arith.muli %arg1, %c128_i32 : i32
    %1 = tpu.assume_multiple %0, 128 : i32
    %c0 = arith.constant 0 : index
    %c0_0 = arith.constant 0 : index
    %2 = arith.index_cast %1 : i32 to index
    %3 = vector.load %arg2[%c0, %c0_0, %2] : memref<1x16x132xbf16, #tpu.memory_space<vmem>>, vector<1x16x132xbf16>
    %4 = vector.shape_cast %3 : vector<1x16x132xbf16> to vector<16x132xbf16>
    %5 = arith.extf %4 : vector<16x132xbf16> to vector<16x132xf32>
    %6 = vector.extract_strided_slice %5 {offsets = [0, 2], sizes = [16, 128], strides = [1, 1]} : vector<16x132xf32> to vector<16x128xf32>
    %cst = arith.constant 0.000000e+00 : f32
    %7 = vector.broadcast %cst : f32 to vector<16x132xf32>
    %8 = arith.cmpf oge, %5, %7 : vector<16x132xf32>
    %cst_1 = arith.constant 1.000000e-01 : f32
    %9 = vector.broadcast %cst_1 : f32 to vector<16x132xf32>
    %10 = arith.mulf %9, %5 : vector<16x132xf32>
    %11 = arith.select %8, %5, %10 : vector<16x132xi1>, vector<16x132xf32>
    %12 = arith.truncf %11 : vector<16x132xf32> to vector<16x132xbf16>
    %13 = vector.extract_strided_slice %12 {offsets = [0, 0], sizes = [16, 130], strides = [1, 1]} : vector<16x132xbf16> to vector<16x130xbf16>
    %14 = vector.extract_strided_slice %12 {offsets = [0, 1], sizes = [16, 130], strides = [1, 1]} : vector<16x132xbf16> to vector<16x130xbf16>
    %15 = vector.extract_strided_slice %12 {offsets = [0, 2], sizes = [16, 130], strides = [1, 1]} : vector<16x132xbf16> to vector<16x130xbf16>
    %16 = tpu.concatenate %13, %14, %15 in 0 : vector<16x130xbf16>, vector<16x130xbf16>, vector<16x130xbf16> -> vector<48x130xbf16>
    %c0_2 = arith.constant 0 : index
    %c0_3 = arith.constant 0 : index
    %17 = vector.load %arg3[%c0_2, %c0_3] : memref<16x48xbf16, #tpu.memory_space<vmem>>, vector<16x48xbf16>
    %cst_4 = arith.constant dense<0.000000e+00> : vector<16x130xf32>
    %18 = tpu.matmul %17, %16, %cst_4 {dimension_numbers = #tpu.dot_dimension_numbers<[1], [0], [0], [1], [0, 0, 1, 1], [], []>} : vector<16x48xbf16>, vector<48x130xbf16>, vector<16x130xf32> -> vector<16x130xf32>
    %c0_5 = arith.constant 0 : index
    %c0_6 = arith.constant 0 : index
    %19 = vector.load %arg4[%c0_5, %c0_6] : memref<16x1xf32, #tpu.memory_space<vmem>>, vector<16x1xf32>
    %20 = vector.broadcast %19 : vector<16x1xf32> to vector<16x130xf32>
    %21 = arith.addf %18, %20 : vector<16x130xf32>
    %c1_i32 = arith.constant 1 : i32
    %22 = arith.subi %1, %c1_i32 : i32
    %23 = tpu.iota {dimensions = array<i32: 1>} : vector<1x130xi32>
    %24 = vector.broadcast %22 : i32 to vector<1x130xi32>
    %25 = arith.addi %24, %23 : vector<1x130xi32>
    %c0_i32 = arith.constant 0 : i32
    %26 = vector.broadcast %c0_i32 : i32 to vector<1x130xi32>
    %27 = arith.cmpi sge, %25, %26 : vector<1x130xi32>
    %c64_i32 = arith.constant 64 : i32
    %28 = vector.broadcast %c64_i32 : i32 to vector<1x130xi32>
    %29 = arith.cmpi slt, %25, %28 : vector<1x130xi32>
    %30 = arith.andi %27, %29 : vector<1x130xi1>
    %cst_7 = arith.constant 0.000000e+00 : f32
    %31 = vector.shape_cast %30 : vector<1x130xi1> to vector<1x130xi1>
    %32 = vector.broadcast %31 : vector<1x130xi1> to vector<16x130xi1>
    %33 = vector.broadcast %cst_7 : f32 to vector<16x130xf32>
    %34 = arith.select %32, %21, %33 : vector<16x130xi1>, vector<16x130xf32>
    %cst_8 = arith.constant 0.000000e+00 : f32
    %35 = vector.broadcast %cst_8 : f32 to vector<16x130xf32>
    %36 = arith.cmpf oge, %34, %35 : vector<16x130xf32>
    %cst_9 = arith.constant 1.000000e-01 : f32
    %37 = vector.broadcast %cst_9 : f32 to vector<16x130xf32>
    %38 = arith.mulf %37, %34 : vector<16x130xf32>
    %39 = arith.select %36, %34, %38 : vector<16x130xi1>, vector<16x130xf32>
    %40 = arith.truncf %39 : vector<16x130xf32> to vector<16x130xbf16>
    %41 = vector.extract_strided_slice %40 {offsets = [0, 0], sizes = [16, 128], strides = [1, 1]} : vector<16x130xbf16> to vector<16x128xbf16>
    %42 = vector.extract_strided_slice %40 {offsets = [0, 1], sizes = [16, 128], strides = [1, 1]} : vector<16x130xbf16> to vector<16x128xbf16>
    %43 = vector.extract_strided_slice %40 {offsets = [0, 2], sizes = [16, 128], strides = [1, 1]} : vector<16x130xbf16> to vector<16x128xbf16>
    %44 = tpu.concatenate %41, %42, %43 in 0 : vector<16x128xbf16>, vector<16x128xbf16>, vector<16x128xbf16> -> vector<48x128xbf16>
    %c0_10 = arith.constant 0 : index
    %c0_11 = arith.constant 0 : index
    %45 = vector.load %arg5[%c0_10, %c0_11] : memref<16x48xbf16, #tpu.memory_space<vmem>>, vector<16x48xbf16>
    %cst_12 = arith.constant dense<0.000000e+00> : vector<16x128xf32>
    %46 = tpu.matmul %45, %44, %cst_12 {dimension_numbers = #tpu.dot_dimension_numbers<[1], [0], [0], [1], [0, 0, 1, 1], [], []>} : vector<16x48xbf16>, vector<48x128xbf16>, vector<16x128xf32> -> vector<16x128xf32>
    %c0_13 = arith.constant 0 : index
    %c0_14 = arith.constant 0 : index
    %47 = vector.load %arg6[%c0_13, %c0_14] : memref<16x1xf32, #tpu.memory_space<vmem>>, vector<16x1xf32>
    %48 = vector.broadcast %47 : vector<16x1xf32> to vector<16x128xf32>
    %49 = arith.addf %46, %48 : vector<16x128xf32>
    %50 = arith.addf %49, %6 : vector<16x128xf32>
    %51 = arith.truncf %50 : vector<16x128xf32> to vector<16x128xbf16>
    %c0_15 = arith.constant 0 : index
    %c0_16 = arith.constant 0 : index
    %c0_17 = arith.constant 0 : index
    %52 = vector.load %arg7[%c0_15, %c0_16, %c0_17] : memref<1x16x128xbf16, #tpu.memory_space<vmem>>, vector<1x16x128xbf16>
    %53 = vector.shape_cast %52 : vector<1x16x128xbf16> to vector<16x128xbf16>
    %54 = vector.shape_cast %51 : vector<16x128xbf16> to vector<1x16x128xbf16>
    tpu.vector_store %arg7[%c0_15, %c0_16, %c0_17], %54 {strides = array<i32>} : memref<1x16x128xbf16, #tpu.memory_space<vmem>>, vector<1x16x128xbf16>,
    return
  }
  func.func @transform_0(%arg0: i32, %arg1: i32) -> (i32, i32, i32) {
    %c0_i32 = arith.constant 0 : i32
    %c0_i32_0 = arith.constant 0 : i32
    %c0_i32_1 = arith.constant 0 : i32
    return %arg0, %c0_i32, %c0_i32_0 : i32, i32, i32
  }
  func.func @transform_1(%arg0: i32, %arg1: i32) -> (i32, i32) {
    %c0_i32 = arith.constant 0 : i32
    %c0_i32_0 = arith.constant 0 : i32
    %c0_i32_1 = arith.constant 0 : i32
    return %c0_i32, %c0_i32_0 : i32, i32
  }
  func.func @transform_2(%arg0: i32, %arg1: i32) -> (i32, i32) {
    %c0_i32 = arith.constant 0 : i32
    %c0_i32_0 = arith.constant 0 : i32
    %c0_i32_1 = arith.constant 0 : i32
    return %c0_i32, %c0_i32_0 : i32, i32
  }
  func.func @transform_3(%arg0: i32, %arg1: i32) -> (i32, i32) {
    %c0_i32 = arith.constant 0 : i32
    %c0_i32_0 = arith.constant 0 : i32
    %c0_i32_1 = arith.constant 0 : i32
    return %c0_i32, %c0_i32_0 : i32, i32
  }
  func.func @transform_4(%arg0: i32, %arg1: i32) -> (i32, i32) {
    %c0_i32 = arith.constant 0 : i32
    %c0_i32_0 = arith.constant 0 : i32
    %c0_i32_1 = arith.constant 0 : i32
    return %c0_i32, %c0_i32_0 : i32, i32
  }
  func.func @transform_5(%arg0: i32, %arg1: i32) -> (i32, i32, i32) {
    %c0_i32 = arith.constant 0 : i32
    %c0_i32_0 = arith.constant 0 : i32
    return %arg0, %c0_i32, %arg1 : i32, i32, i32
  }
}

module attributes {stable_mosaic.version = 11 : i64} {
  func.func @_res_pair_kernel(%arg0: i32, %arg1: i32, %arg2: memref<1x16x136xbf16, #tpu.memory_space<vmem>>, %arg3: memref<16x48xbf16, #tpu.memory_space<vmem>>, %arg4: memref<16x1xf32, #tpu.memory_space<vmem>>, %arg5: memref<16x48xbf16, #tpu.memory_space<vmem>>, %arg6: memref<16x1xf32, #tpu.memory_space<vmem>>, %arg7: memref<1x16x128xbf16, #tpu.memory_space<vmem>>) attributes {dimension_semantics = [#tpu.dimension_semantics<parallel>, #tpu.dimension_semantics<parallel>], iteration_bounds = array<i64: 2, 1>, scalar_prefetch = 0 : i64, scratch_operands = 0 : i64, tpu.core_type = #tpu.core_type<tc>, window_params = [{transform_indices = @transform_0, window_bounds = array<i64: 1, 16, 136>}, {pipeline_mode = #tpu.pipeline_mode<synchronous>, transform_indices = @transform_1, window_bounds = array<i64: 16, 48>}, {pipeline_mode = #tpu.pipeline_mode<synchronous>, transform_indices = @transform_2, window_bounds = array<i64: 16, 1>}, {pipeline_mode = #tpu.pipeline_mode<synchronous>, transform_indices = @transform_3, window_bounds = array<i64: 16, 48>}, {pipeline_mode = #tpu.pipeline_mode<synchronous>, transform_indices = @transform_4, window_bounds = array<i64: 16, 1>}, {transform_indices = @transform_5, window_bounds = array<i64: 1, 16, 128>}]} {
    %c128_i32 = arith.constant 128 : i32
    %0 = arith.muli %arg1, %c128_i32 : i32
    %1 = tpu.assume_multiple %0, 128 : i32
    %c0 = arith.constant 0 : index
    %c0_0 = arith.constant 0 : index
    %2 = arith.index_cast %1 : i32 to index
    %3 = vector.load %arg2[%c0, %c0_0, %2] : memref<1x16x136xbf16, #tpu.memory_space<vmem>>, vector<1x16x136xbf16>
    %4 = vector.shape_cast %3 : vector<1x16x136xbf16> to vector<16x136xbf16>
    %5 = arith.extf %4 : vector<16x136xbf16> to vector<16x136xf32>
    %6 = vector.extract_strided_slice %5 {offsets = [0, 4], sizes = [16, 128], strides = [1, 1]} : vector<16x136xf32> to vector<16x128xf32>
    %cst = arith.constant 0.000000e+00 : f32
    %7 = vector.broadcast %cst : f32 to vector<16x136xf32>
    %8 = arith.cmpf oge, %5, %7 : vector<16x136xf32>
    %cst_1 = arith.constant 1.000000e-01 : f32
    %9 = vector.broadcast %cst_1 : f32 to vector<16x136xf32>
    %10 = arith.mulf %9, %5 : vector<16x136xf32>
    %11 = arith.select %8, %5, %10 : vector<16x136xi1>, vector<16x136xf32>
    %12 = arith.truncf %11 : vector<16x136xf32> to vector<16x136xbf16>
    %13 = vector.extract_strided_slice %12 {offsets = [0, 0], sizes = [16, 130], strides = [1, 1]} : vector<16x136xbf16> to vector<16x130xbf16>
    %14 = vector.extract_strided_slice %12 {offsets = [0, 3], sizes = [16, 130], strides = [1, 1]} : vector<16x136xbf16> to vector<16x130xbf16>
    %15 = vector.extract_strided_slice %12 {offsets = [0, 6], sizes = [16, 130], strides = [1, 1]} : vector<16x136xbf16> to vector<16x130xbf16>
    %16 = tpu.concatenate %13, %14, %15 in 0 : vector<16x130xbf16>, vector<16x130xbf16>, vector<16x130xbf16> -> vector<48x130xbf16>
    %c0_2 = arith.constant 0 : index
    %c0_3 = arith.constant 0 : index
    %17 = vector.load %arg3[%c0_2, %c0_3] : memref<16x48xbf16, #tpu.memory_space<vmem>>, vector<16x48xbf16>
    %cst_4 = arith.constant dense<0.000000e+00> : vector<16x130xf32>
    %18 = tpu.matmul %17, %16, %cst_4 {dimension_numbers = #tpu.dot_dimension_numbers<[1], [0], [0], [1], [0, 0, 1, 1], [], []>} : vector<16x48xbf16>, vector<48x130xbf16>, vector<16x130xf32> -> vector<16x130xf32>
    %c0_5 = arith.constant 0 : index
    %c0_6 = arith.constant 0 : index
    %19 = vector.load %arg4[%c0_5, %c0_6] : memref<16x1xf32, #tpu.memory_space<vmem>>, vector<16x1xf32>
    %20 = vector.broadcast %19 : vector<16x1xf32> to vector<16x130xf32>
    %21 = arith.addf %18, %20 : vector<16x130xf32>
    %c1_i32 = arith.constant 1 : i32
    %22 = arith.subi %1, %c1_i32 : i32
    %23 = tpu.iota {dimensions = array<i32: 1>} : vector<1x130xi32>
    %24 = vector.broadcast %22 : i32 to vector<1x130xi32>
    %25 = arith.addi %24, %23 : vector<1x130xi32>
    %c0_i32 = arith.constant 0 : i32
    %26 = vector.broadcast %c0_i32 : i32 to vector<1x130xi32>
    %27 = arith.cmpi sge, %25, %26 : vector<1x130xi32>
    %c64_i32 = arith.constant 64 : i32
    %28 = vector.broadcast %c64_i32 : i32 to vector<1x130xi32>
    %29 = arith.cmpi slt, %25, %28 : vector<1x130xi32>
    %30 = arith.andi %27, %29 : vector<1x130xi1>
    %cst_7 = arith.constant 0.000000e+00 : f32
    %31 = vector.shape_cast %30 : vector<1x130xi1> to vector<1x130xi1>
    %32 = vector.broadcast %31 : vector<1x130xi1> to vector<16x130xi1>
    %33 = vector.broadcast %cst_7 : f32 to vector<16x130xf32>
    %34 = arith.select %32, %21, %33 : vector<16x130xi1>, vector<16x130xf32>
    %cst_8 = arith.constant 0.000000e+00 : f32
    %35 = vector.broadcast %cst_8 : f32 to vector<16x130xf32>
    %36 = arith.cmpf oge, %34, %35 : vector<16x130xf32>
    %cst_9 = arith.constant 1.000000e-01 : f32
    %37 = vector.broadcast %cst_9 : f32 to vector<16x130xf32>
    %38 = arith.mulf %37, %34 : vector<16x130xf32>
    %39 = arith.select %36, %34, %38 : vector<16x130xi1>, vector<16x130xf32>
    %40 = arith.truncf %39 : vector<16x130xf32> to vector<16x130xbf16>
    %41 = vector.extract_strided_slice %40 {offsets = [0, 0], sizes = [16, 128], strides = [1, 1]} : vector<16x130xbf16> to vector<16x128xbf16>
    %42 = vector.extract_strided_slice %40 {offsets = [0, 1], sizes = [16, 128], strides = [1, 1]} : vector<16x130xbf16> to vector<16x128xbf16>
    %43 = vector.extract_strided_slice %40 {offsets = [0, 2], sizes = [16, 128], strides = [1, 1]} : vector<16x130xbf16> to vector<16x128xbf16>
    %44 = tpu.concatenate %41, %42, %43 in 0 : vector<16x128xbf16>, vector<16x128xbf16>, vector<16x128xbf16> -> vector<48x128xbf16>
    %c0_10 = arith.constant 0 : index
    %c0_11 = arith.constant 0 : index
    %45 = vector.load %arg5[%c0_10, %c0_11] : memref<16x48xbf16, #tpu.memory_space<vmem>>, vector<16x48xbf16>
    %cst_12 = arith.constant dense<0.000000e+00> : vector<16x128xf32>
    %46 = tpu.matmul %45, %44, %cst_12 {dimension_numbers = #tpu.dot_dimension_numbers<[1], [0], [0], [1], [0, 0, 1, 1], [], []>} : vector<16x48xbf16>, vector<48x128xbf16>, vector<16x128xf32> -> vector<16x128xf32>
    %c0_13 = arith.constant 0 : index
    %c0_14 = arith.constant 0 : index
    %47 = vector.load %arg6[%c0_13, %c0_14] : memref<16x1xf32, #tpu.memory_space<vmem>>, vector<16x1xf32>
    %48 = vector.broadcast %47 : vector<16x1xf32> to vector<16x128xf32>
    %49 = arith.addf %46, %48 : vector<16x128xf32>
    %50 = arith.addf %49, %6 : vector<16x128xf32>
    %51 = arith.truncf %50 : vector<16x128xf32> to vector<16x128xbf16>
    %c0_15 = arith.constant 0 : index
    %c0_16 = arith.constant 0 : index
    %c0_17 = arith.constant 0 : index
    %52 = vector.load %arg7[%c0_15, %c0_16, %c0_17] : memref<1x16x128xbf16, #tpu.memory_space<vmem>>, vector<1x16x128xbf16>
    %53 = vector.shape_cast %52 : vector<1x16x128xbf16> to vector<16x128xbf16>
    %54 = vector.shape_cast %51 : vector<16x128xbf16> to vector<1x16x128xbf16>
    tpu.vector_store %arg7[%c0_15, %c0_16, %c0_17], %54 {strides = array<i32>} : memref<1x16x128xbf16, #tpu.memory_space<vmem>>, vector<1x16x128xbf16>,
    return
  }
  func.func @transform_0(%arg0: i32, %arg1: i32) -> (i32, i32, i32) {
    %c0_i32 = arith.constant 0 : i32
    %c0_i32_0 = arith.constant 0 : i32
    %c0_i32_1 = arith.constant 0 : i32
    return %arg0, %c0_i32, %c0_i32_0 : i32, i32, i32
  }
  func.func @transform_1(%arg0: i32, %arg1: i32) -> (i32, i32) {
    %c0_i32 = arith.constant 0 : i32
    %c0_i32_0 = arith.constant 0 : i32
    %c0_i32_1 = arith.constant 0 : i32
    return %c0_i32, %c0_i32_0 : i32, i32
  }
  func.func @transform_2(%arg0: i32, %arg1: i32) -> (i32, i32) {
    %c0_i32 = arith.constant 0 : i32
    %c0_i32_0 = arith.constant 0 : i32
    %c0_i32_1 = arith.constant 0 : i32
    return %c0_i32, %c0_i32_0 : i32, i32
  }
  func.func @transform_3(%arg0: i32, %arg1: i32) -> (i32, i32) {
    %c0_i32 = arith.constant 0 : i32
    %c0_i32_0 = arith.constant 0 : i32
    %c0_i32_1 = arith.constant 0 : i32
    return %c0_i32, %c0_i32_0 : i32, i32
  }
  func.func @transform_4(%arg0: i32, %arg1: i32) -> (i32, i32) {
    %c0_i32 = arith.constant 0 : i32
    %c0_i32_0 = arith.constant 0 : i32
    %c0_i32_1 = arith.constant 0 : i32
    return %c0_i32, %c0_i32_0 : i32, i32
  }
  func.func @transform_5(%arg0: i32, %arg1: i32) -> (i32, i32, i32) {
    %c0_i32 = arith.constant 0 : i32
    %c0_i32_0 = arith.constant 0 : i32
    return %arg0, %c0_i32, %arg1 : i32, i32, i32
  }
}

module attributes {stable_mosaic.version = 11 : i64} {
  func.func @_res_pair_kernel(%arg0: i32, %arg1: i32, %arg2: memref<1x16x140xbf16, #tpu.memory_space<vmem>>, %arg3: memref<16x48xbf16, #tpu.memory_space<vmem>>, %arg4: memref<16x1xf32, #tpu.memory_space<vmem>>, %arg5: memref<16x48xbf16, #tpu.memory_space<vmem>>, %arg6: memref<16x1xf32, #tpu.memory_space<vmem>>, %arg7: memref<1x16x128xbf16, #tpu.memory_space<vmem>>) attributes {dimension_semantics = [#tpu.dimension_semantics<parallel>, #tpu.dimension_semantics<parallel>], iteration_bounds = array<i64: 2, 1>, scalar_prefetch = 0 : i64, scratch_operands = 0 : i64, tpu.core_type = #tpu.core_type<tc>, window_params = [{transform_indices = @transform_0, window_bounds = array<i64: 1, 16, 140>}, {pipeline_mode = #tpu.pipeline_mode<synchronous>, transform_indices = @transform_1, window_bounds = array<i64: 16, 48>}, {pipeline_mode = #tpu.pipeline_mode<synchronous>, transform_indices = @transform_2, window_bounds = array<i64: 16, 1>}, {pipeline_mode = #tpu.pipeline_mode<synchronous>, transform_indices = @transform_3, window_bounds = array<i64: 16, 48>}, {pipeline_mode = #tpu.pipeline_mode<synchronous>, transform_indices = @transform_4, window_bounds = array<i64: 16, 1>}, {transform_indices = @transform_5, window_bounds = array<i64: 1, 16, 128>}]} {
    %c128_i32 = arith.constant 128 : i32
    %0 = arith.muli %arg1, %c128_i32 : i32
    %1 = tpu.assume_multiple %0, 128 : i32
    %c0 = arith.constant 0 : index
    %c0_0 = arith.constant 0 : index
    %2 = arith.index_cast %1 : i32 to index
    %3 = vector.load %arg2[%c0, %c0_0, %2] : memref<1x16x140xbf16, #tpu.memory_space<vmem>>, vector<1x16x140xbf16>
    %4 = vector.shape_cast %3 : vector<1x16x140xbf16> to vector<16x140xbf16>
    %5 = arith.extf %4 : vector<16x140xbf16> to vector<16x140xf32>
    %6 = vector.extract_strided_slice %5 {offsets = [0, 6], sizes = [16, 128], strides = [1, 1]} : vector<16x140xf32> to vector<16x128xf32>
    %cst = arith.constant 0.000000e+00 : f32
    %7 = vector.broadcast %cst : f32 to vector<16x140xf32>
    %8 = arith.cmpf oge, %5, %7 : vector<16x140xf32>
    %cst_1 = arith.constant 1.000000e-01 : f32
    %9 = vector.broadcast %cst_1 : f32 to vector<16x140xf32>
    %10 = arith.mulf %9, %5 : vector<16x140xf32>
    %11 = arith.select %8, %5, %10 : vector<16x140xi1>, vector<16x140xf32>
    %12 = arith.truncf %11 : vector<16x140xf32> to vector<16x140xbf16>
    %13 = vector.extract_strided_slice %12 {offsets = [0, 0], sizes = [16, 130], strides = [1, 1]} : vector<16x140xbf16> to vector<16x130xbf16>
    %14 = vector.extract_strided_slice %12 {offsets = [0, 5], sizes = [16, 130], strides = [1, 1]} : vector<16x140xbf16> to vector<16x130xbf16>
    %15 = vector.extract_strided_slice %12 {offsets = [0, 10], sizes = [16, 130], strides = [1, 1]} : vector<16x140xbf16> to vector<16x130xbf16>
    %16 = tpu.concatenate %13, %14, %15 in 0 : vector<16x130xbf16>, vector<16x130xbf16>, vector<16x130xbf16> -> vector<48x130xbf16>
    %c0_2 = arith.constant 0 : index
    %c0_3 = arith.constant 0 : index
    %17 = vector.load %arg3[%c0_2, %c0_3] : memref<16x48xbf16, #tpu.memory_space<vmem>>, vector<16x48xbf16>
    %cst_4 = arith.constant dense<0.000000e+00> : vector<16x130xf32>
    %18 = tpu.matmul %17, %16, %cst_4 {dimension_numbers = #tpu.dot_dimension_numbers<[1], [0], [0], [1], [0, 0, 1, 1], [], []>} : vector<16x48xbf16>, vector<48x130xbf16>, vector<16x130xf32> -> vector<16x130xf32>
    %c0_5 = arith.constant 0 : index
    %c0_6 = arith.constant 0 : index
    %19 = vector.load %arg4[%c0_5, %c0_6] : memref<16x1xf32, #tpu.memory_space<vmem>>, vector<16x1xf32>
    %20 = vector.broadcast %19 : vector<16x1xf32> to vector<16x130xf32>
    %21 = arith.addf %18, %20 : vector<16x130xf32>
    %c1_i32 = arith.constant 1 : i32
    %22 = arith.subi %1, %c1_i32 : i32
    %23 = tpu.iota {dimensions = array<i32: 1>} : vector<1x130xi32>
    %24 = vector.broadcast %22 : i32 to vector<1x130xi32>
    %25 = arith.addi %24, %23 : vector<1x130xi32>
    %c0_i32 = arith.constant 0 : i32
    %26 = vector.broadcast %c0_i32 : i32 to vector<1x130xi32>
    %27 = arith.cmpi sge, %25, %26 : vector<1x130xi32>
    %c64_i32 = arith.constant 64 : i32
    %28 = vector.broadcast %c64_i32 : i32 to vector<1x130xi32>
    %29 = arith.cmpi slt, %25, %28 : vector<1x130xi32>
    %30 = arith.andi %27, %29 : vector<1x130xi1>
    %cst_7 = arith.constant 0.000000e+00 : f32
    %31 = vector.shape_cast %30 : vector<1x130xi1> to vector<1x130xi1>
    %32 = vector.broadcast %31 : vector<1x130xi1> to vector<16x130xi1>
    %33 = vector.broadcast %cst_7 : f32 to vector<16x130xf32>
    %34 = arith.select %32, %21, %33 : vector<16x130xi1>, vector<16x130xf32>
    %cst_8 = arith.constant 0.000000e+00 : f32
    %35 = vector.broadcast %cst_8 : f32 to vector<16x130xf32>
    %36 = arith.cmpf oge, %34, %35 : vector<16x130xf32>
    %cst_9 = arith.constant 1.000000e-01 : f32
    %37 = vector.broadcast %cst_9 : f32 to vector<16x130xf32>
    %38 = arith.mulf %37, %34 : vector<16x130xf32>
    %39 = arith.select %36, %34, %38 : vector<16x130xi1>, vector<16x130xf32>
    %40 = arith.truncf %39 : vector<16x130xf32> to vector<16x130xbf16>
    %41 = vector.extract_strided_slice %40 {offsets = [0, 0], sizes = [16, 128], strides = [1, 1]} : vector<16x130xbf16> to vector<16x128xbf16>
    %42 = vector.extract_strided_slice %40 {offsets = [0, 1], sizes = [16, 128], strides = [1, 1]} : vector<16x130xbf16> to vector<16x128xbf16>
    %43 = vector.extract_strided_slice %40 {offsets = [0, 2], sizes = [16, 128], strides = [1, 1]} : vector<16x130xbf16> to vector<16x128xbf16>
    %44 = tpu.concatenate %41, %42, %43 in 0 : vector<16x128xbf16>, vector<16x128xbf16>, vector<16x128xbf16> -> vector<48x128xbf16>
    %c0_10 = arith.constant 0 : index
    %c0_11 = arith.constant 0 : index
    %45 = vector.load %arg5[%c0_10, %c0_11] : memref<16x48xbf16, #tpu.memory_space<vmem>>, vector<16x48xbf16>
    %cst_12 = arith.constant dense<0.000000e+00> : vector<16x128xf32>
    %46 = tpu.matmul %45, %44, %cst_12 {dimension_numbers = #tpu.dot_dimension_numbers<[1], [0], [0], [1], [0, 0, 1, 1], [], []>} : vector<16x48xbf16>, vector<48x128xbf16>, vector<16x128xf32> -> vector<16x128xf32>
    %c0_13 = arith.constant 0 : index
    %c0_14 = arith.constant 0 : index
    %47 = vector.load %arg6[%c0_13, %c0_14] : memref<16x1xf32, #tpu.memory_space<vmem>>, vector<16x1xf32>
    %48 = vector.broadcast %47 : vector<16x1xf32> to vector<16x128xf32>
    %49 = arith.addf %46, %48 : vector<16x128xf32>
    %50 = arith.addf %49, %6 : vector<16x128xf32>
    %51 = arith.truncf %50 : vector<16x128xf32> to vector<16x128xbf16>
    %c0_15 = arith.constant 0 : index
    %c0_16 = arith.constant 0 : index
    %c0_17 = arith.constant 0 : index
    %52 = vector.load %arg7[%c0_15, %c0_16, %c0_17] : memref<1x16x128xbf16, #tpu.memory_space<vmem>>, vector<1x16x128xbf16>
    %53 = vector.shape_cast %52 : vector<1x16x128xbf16> to vector<16x128xbf16>
    %54 = vector.shape_cast %51 : vector<16x128xbf16> to vector<1x16x128xbf16>
    tpu.vector_store %arg7[%c0_15, %c0_16, %c0_17], %54 {strides = array<i32>} : memref<1x16x128xbf16, #tpu.memory_space<vmem>>, vector<1x16x128xbf16>,
    return
  }
  func.func @transform_0(%arg0: i32, %arg1: i32) -> (i32, i32, i32) {
    %c0_i32 = arith.constant 0 : i32
    %c0_i32_0 = arith.constant 0 : i32
    %c0_i32_1 = arith.constant 0 : i32
    return %arg0, %c0_i32, %c0_i32_0 : i32, i32, i32
  }
  func.func @transform_1(%arg0: i32, %arg1: i32) -> (i32, i32) {
    %c0_i32 = arith.constant 0 : i32
    %c0_i32_0 = arith.constant 0 : i32
    %c0_i32_1 = arith.constant 0 : i32
    return %c0_i32, %c0_i32_0 : i32, i32
  }
  func.func @transform_2(%arg0: i32, %arg1: i32) -> (i32, i32) {
    %c0_i32 = arith.constant 0 : i32
    %c0_i32_0 = arith.constant 0 : i32
    %c0_i32_1 = arith.constant 0 : i32
    return %c0_i32, %c0_i32_0 : i32, i32
  }
  func.func @transform_3(%arg0: i32, %arg1: i32) -> (i32, i32) {
    %c0_i32 = arith.constant 0 : i32
    %c0_i32_0 = arith.constant 0 : i32
    %c0_i32_1 = arith.constant 0 : i32
    return %c0_i32, %c0_i32_0 : i32, i32
  }
  func.func @transform_4(%arg0: i32, %arg1: i32) -> (i32, i32) {
    %c0_i32 = arith.constant 0 : i32
    %c0_i32_0 = arith.constant 0 : i32
    %c0_i32_1 = arith.constant 0 : i32
    return %c0_i32, %c0_i32_0 : i32, i32
  }
  func.func @transform_5(%arg0: i32, %arg1: i32) -> (i32, i32, i32) {
    %c0_i32 = arith.constant 0 : i32
    %c0_i32_0 = arith.constant 0 : i32
    return %arg0, %c0_i32, %arg1 : i32, i32, i32
  }
}

module attributes {stable_mosaic.version = 11 : i64} {
  func.func @_res_pair_kernel(%arg0: i32, %arg1: i32, %arg2: memref<1x16x136xbf16, #tpu.memory_space<vmem>>, %arg3: memref<16x80xbf16, #tpu.memory_space<vmem>>, %arg4: memref<16x1xf32, #tpu.memory_space<vmem>>, %arg5: memref<16x80xbf16, #tpu.memory_space<vmem>>, %arg6: memref<16x1xf32, #tpu.memory_space<vmem>>, %arg7: memref<1x16x128xbf16, #tpu.memory_space<vmem>>) attributes {dimension_semantics = [#tpu.dimension_semantics<parallel>, #tpu.dimension_semantics<parallel>], iteration_bounds = array<i64: 2, 1>, scalar_prefetch = 0 : i64, scratch_operands = 0 : i64, tpu.core_type = #tpu.core_type<tc>, window_params = [{transform_indices = @transform_0, window_bounds = array<i64: 1, 16, 136>}, {pipeline_mode = #tpu.pipeline_mode<synchronous>, transform_indices = @transform_1, window_bounds = array<i64: 16, 80>}, {pipeline_mode = #tpu.pipeline_mode<synchronous>, transform_indices = @transform_2, window_bounds = array<i64: 16, 1>}, {pipeline_mode = #tpu.pipeline_mode<synchronous>, transform_indices = @transform_3, window_bounds = array<i64: 16, 80>}, {pipeline_mode = #tpu.pipeline_mode<synchronous>, transform_indices = @transform_4, window_bounds = array<i64: 16, 1>}, {transform_indices = @transform_5, window_bounds = array<i64: 1, 16, 128>}]} {
    %c128_i32 = arith.constant 128 : i32
    %0 = arith.muli %arg1, %c128_i32 : i32
    %1 = tpu.assume_multiple %0, 128 : i32
    %c0 = arith.constant 0 : index
    %c0_0 = arith.constant 0 : index
    %2 = arith.index_cast %1 : i32 to index
    %3 = vector.load %arg2[%c0, %c0_0, %2] : memref<1x16x136xbf16, #tpu.memory_space<vmem>>, vector<1x16x136xbf16>
    %4 = vector.shape_cast %3 : vector<1x16x136xbf16> to vector<16x136xbf16>
    %5 = arith.extf %4 : vector<16x136xbf16> to vector<16x136xf32>
    %6 = vector.extract_strided_slice %5 {offsets = [0, 4], sizes = [16, 128], strides = [1, 1]} : vector<16x136xf32> to vector<16x128xf32>
    %cst = arith.constant 0.000000e+00 : f32
    %7 = vector.broadcast %cst : f32 to vector<16x136xf32>
    %8 = arith.cmpf oge, %5, %7 : vector<16x136xf32>
    %cst_1 = arith.constant 1.000000e-01 : f32
    %9 = vector.broadcast %cst_1 : f32 to vector<16x136xf32>
    %10 = arith.mulf %9, %5 : vector<16x136xf32>
    %11 = arith.select %8, %5, %10 : vector<16x136xi1>, vector<16x136xf32>
    %12 = arith.truncf %11 : vector<16x136xf32> to vector<16x136xbf16>
    %13 = vector.extract_strided_slice %12 {offsets = [0, 0], sizes = [16, 132], strides = [1, 1]} : vector<16x136xbf16> to vector<16x132xbf16>
    %14 = vector.extract_strided_slice %12 {offsets = [0, 1], sizes = [16, 132], strides = [1, 1]} : vector<16x136xbf16> to vector<16x132xbf16>
    %15 = vector.extract_strided_slice %12 {offsets = [0, 2], sizes = [16, 132], strides = [1, 1]} : vector<16x136xbf16> to vector<16x132xbf16>
    %16 = vector.extract_strided_slice %12 {offsets = [0, 3], sizes = [16, 132], strides = [1, 1]} : vector<16x136xbf16> to vector<16x132xbf16>
    %17 = vector.extract_strided_slice %12 {offsets = [0, 4], sizes = [16, 132], strides = [1, 1]} : vector<16x136xbf16> to vector<16x132xbf16>
    %18 = tpu.concatenate %13, %14, %15, %16, %17 in 0 : vector<16x132xbf16>, vector<16x132xbf16>, vector<16x132xbf16>, vector<16x132xbf16>, vector<16x132xbf16> -> vector<80x132xbf16>
    %c0_2 = arith.constant 0 : index
    %c0_3 = arith.constant 0 : index
    %19 = vector.load %arg3[%c0_2, %c0_3] : memref<16x80xbf16, #tpu.memory_space<vmem>>, vector<16x80xbf16>
    %cst_4 = arith.constant dense<0.000000e+00> : vector<16x132xf32>
    %20 = tpu.matmul %19, %18, %cst_4 {dimension_numbers = #tpu.dot_dimension_numbers<[1], [0], [0], [1], [0, 0, 1, 1], [], []>} : vector<16x80xbf16>, vector<80x132xbf16>, vector<16x132xf32> -> vector<16x132xf32>
    %c0_5 = arith.constant 0 : index
    %c0_6 = arith.constant 0 : index
    %21 = vector.load %arg4[%c0_5, %c0_6] : memref<16x1xf32, #tpu.memory_space<vmem>>, vector<16x1xf32>
    %22 = vector.broadcast %21 : vector<16x1xf32> to vector<16x132xf32>
    %23 = arith.addf %20, %22 : vector<16x132xf32>
    %c2_i32 = arith.constant 2 : i32
    %24 = arith.subi %1, %c2_i32 : i32
    %25 = tpu.iota {dimensions = array<i32: 1>} : vector<1x132xi32>
    %26 = vector.broadcast %24 : i32 to vector<1x132xi32>
    %27 = arith.addi %26, %25 : vector<1x132xi32>
    %c0_i32 = arith.constant 0 : i32
    %28 = vector.broadcast %c0_i32 : i32 to vector<1x132xi32>
    %29 = arith.cmpi sge, %27, %28 : vector<1x132xi32>
    %c64_i32 = arith.constant 64 : i32
    %30 = vector.broadcast %c64_i32 : i32 to vector<1x132xi32>
    %31 = arith.cmpi slt, %27, %30 : vector<1x132xi32>
    %32 = arith.andi %29, %31 : vector<1x132xi1>
    %cst_7 = arith.constant 0.000000e+00 : f32
    %33 = vector.shape_cast %32 : vector<1x132xi1> to vector<1x132xi1>
    %34 = vector.broadcast %33 : vector<1x132xi1> to vector<16x132xi1>
    %35 = vector.broadcast %cst_7 : f32 to vector<16x132xf32>
    %36 = arith.select %34, %23, %35 : vector<16x132xi1>, vector<16x132xf32>
    %cst_8 = arith.constant 0.000000e+00 : f32
    %37 = vector.broadcast %cst_8 : f32 to vector<16x132xf32>
    %38 = arith.cmpf oge, %36, %37 : vector<16x132xf32>
    %cst_9 = arith.constant 1.000000e-01 : f32
    %39 = vector.broadcast %cst_9 : f32 to vector<16x132xf32>
    %40 = arith.mulf %39, %36 : vector<16x132xf32>
    %41 = arith.select %38, %36, %40 : vector<16x132xi1>, vector<16x132xf32>
    %42 = arith.truncf %41 : vector<16x132xf32> to vector<16x132xbf16>
    %43 = vector.extract_strided_slice %42 {offsets = [0, 0], sizes = [16, 128], strides = [1, 1]} : vector<16x132xbf16> to vector<16x128xbf16>
    %44 = vector.extract_strided_slice %42 {offsets = [0, 1], sizes = [16, 128], strides = [1, 1]} : vector<16x132xbf16> to vector<16x128xbf16>
    %45 = vector.extract_strided_slice %42 {offsets = [0, 2], sizes = [16, 128], strides = [1, 1]} : vector<16x132xbf16> to vector<16x128xbf16>
    %46 = vector.extract_strided_slice %42 {offsets = [0, 3], sizes = [16, 128], strides = [1, 1]} : vector<16x132xbf16> to vector<16x128xbf16>
    %47 = vector.extract_strided_slice %42 {offsets = [0, 4], sizes = [16, 128], strides = [1, 1]} : vector<16x132xbf16> to vector<16x128xbf16>
    %48 = tpu.concatenate %43, %44, %45, %46, %47 in 0 : vector<16x128xbf16>, vector<16x128xbf16>, vector<16x128xbf16>, vector<16x128xbf16>, vector<16x128xbf16> -> vector<80x128xbf16>
    %c0_10 = arith.constant 0 : index
    %c0_11 = arith.constant 0 : index
    %49 = vector.load %arg5[%c0_10, %c0_11] : memref<16x80xbf16, #tpu.memory_space<vmem>>, vector<16x80xbf16>
    %cst_12 = arith.constant dense<0.000000e+00> : vector<16x128xf32>
    %50 = tpu.matmul %49, %48, %cst_12 {dimension_numbers = #tpu.dot_dimension_numbers<[1], [0], [0], [1], [0, 0, 1, 1], [], []>} : vector<16x80xbf16>, vector<80x128xbf16>, vector<16x128xf32> -> vector<16x128xf32>
    %c0_13 = arith.constant 0 : index
    %c0_14 = arith.constant 0 : index
    %51 = vector.load %arg6[%c0_13, %c0_14] : memref<16x1xf32, #tpu.memory_space<vmem>>, vector<16x1xf32>
    %52 = vector.broadcast %51 : vector<16x1xf32> to vector<16x128xf32>
    %53 = arith.addf %50, %52 : vector<16x128xf32>
    %54 = arith.addf %53, %6 : vector<16x128xf32>
    %55 = arith.truncf %54 : vector<16x128xf32> to vector<16x128xbf16>
    %c0_15 = arith.constant 0 : index
    %c0_16 = arith.constant 0 : index
    %c0_17 = arith.constant 0 : index
    %56 = vector.load %arg7[%c0_15, %c0_16, %c0_17] : memref<1x16x128xbf16, #tpu.memory_space<vmem>>, vector<1x16x128xbf16>
    %57 = vector.shape_cast %56 : vector<1x16x128xbf16> to vector<16x128xbf16>
    %58 = vector.shape_cast %55 : vector<16x128xbf16> to vector<1x16x128xbf16>
    tpu.vector_store %arg7[%c0_15, %c0_16, %c0_17], %58 {strides = array<i32>} : memref<1x16x128xbf16, #tpu.memory_space<vmem>>, vector<1x16x128xbf16>,
    return
  }
  func.func @transform_0(%arg0: i32, %arg1: i32) -> (i32, i32, i32) {
    %c0_i32 = arith.constant 0 : i32
    %c0_i32_0 = arith.constant 0 : i32
    %c0_i32_1 = arith.constant 0 : i32
    return %arg0, %c0_i32, %c0_i32_0 : i32, i32, i32
  }
  func.func @transform_1(%arg0: i32, %arg1: i32) -> (i32, i32) {
    %c0_i32 = arith.constant 0 : i32
    %c0_i32_0 = arith.constant 0 : i32
    %c0_i32_1 = arith.constant 0 : i32
    return %c0_i32, %c0_i32_0 : i32, i32
  }
  func.func @transform_2(%arg0: i32, %arg1: i32) -> (i32, i32) {
    %c0_i32 = arith.constant 0 : i32
    %c0_i32_0 = arith.constant 0 : i32
    %c0_i32_1 = arith.constant 0 : i32
    return %c0_i32, %c0_i32_0 : i32, i32
  }
  func.func @transform_3(%arg0: i32, %arg1: i32) -> (i32, i32) {
    %c0_i32 = arith.constant 0 : i32
    %c0_i32_0 = arith.constant 0 : i32
    %c0_i32_1 = arith.constant 0 : i32
    return %c0_i32, %c0_i32_0 : i32, i32
  }
  func.func @transform_4(%arg0: i32, %arg1: i32) -> (i32, i32) {
    %c0_i32 = arith.constant 0 : i32
    %c0_i32_0 = arith.constant 0 : i32
    %c0_i32_1 = arith.constant 0 : i32
    return %c0_i32, %c0_i32_0 : i32, i32
  }
  func.func @transform_5(%arg0: i32, %arg1: i32) -> (i32, i32, i32) {
    %c0_i32 = arith.constant 0 : i32
    %c0_i32_0 = arith.constant 0 : i32
    return %arg0, %c0_i32, %arg1 : i32, i32, i32
  }
}

module attributes {stable_mosaic.version = 11 : i64} {
  func.func @_res_pair_kernel(%arg0: i32, %arg1: i32, %arg2: memref<1x16x152xbf16, #tpu.memory_space<vmem>>, %arg3: memref<16x80xbf16, #tpu.memory_space<vmem>>, %arg4: memref<16x1xf32, #tpu.memory_space<vmem>>, %arg5: memref<16x80xbf16, #tpu.memory_space<vmem>>, %arg6: memref<16x1xf32, #tpu.memory_space<vmem>>, %arg7: memref<1x16x128xbf16, #tpu.memory_space<vmem>>) attributes {dimension_semantics = [#tpu.dimension_semantics<parallel>, #tpu.dimension_semantics<parallel>], iteration_bounds = array<i64: 2, 1>, scalar_prefetch = 0 : i64, scratch_operands = 0 : i64, tpu.core_type = #tpu.core_type<tc>, window_params = [{transform_indices = @transform_0, window_bounds = array<i64: 1, 16, 152>}, {pipeline_mode = #tpu.pipeline_mode<synchronous>, transform_indices = @transform_1, window_bounds = array<i64: 16, 80>}, {pipeline_mode = #tpu.pipeline_mode<synchronous>, transform_indices = @transform_2, window_bounds = array<i64: 16, 1>}, {pipeline_mode = #tpu.pipeline_mode<synchronous>, transform_indices = @transform_3, window_bounds = array<i64: 16, 80>}, {pipeline_mode = #tpu.pipeline_mode<synchronous>, transform_indices = @transform_4, window_bounds = array<i64: 16, 1>}, {transform_indices = @transform_5, window_bounds = array<i64: 1, 16, 128>}]} {
    %c128_i32 = arith.constant 128 : i32
    %0 = arith.muli %arg1, %c128_i32 : i32
    %1 = tpu.assume_multiple %0, 128 : i32
    %c0 = arith.constant 0 : index
    %c0_0 = arith.constant 0 : index
    %2 = arith.index_cast %1 : i32 to index
    %3 = vector.load %arg2[%c0, %c0_0, %2] : memref<1x16x152xbf16, #tpu.memory_space<vmem>>, vector<1x16x152xbf16>
    %4 = vector.shape_cast %3 : vector<1x16x152xbf16> to vector<16x152xbf16>
    %5 = arith.extf %4 : vector<16x152xbf16> to vector<16x152xf32>
    %6 = vector.extract_strided_slice %5 {offsets = [0, 12], sizes = [16, 128], strides = [1, 1]} : vector<16x152xf32> to vector<16x128xf32>
    %cst = arith.constant 0.000000e+00 : f32
    %7 = vector.broadcast %cst : f32 to vector<16x152xf32>
    %8 = arith.cmpf oge, %5, %7 : vector<16x152xf32>
    %cst_1 = arith.constant 1.000000e-01 : f32
    %9 = vector.broadcast %cst_1 : f32 to vector<16x152xf32>
    %10 = arith.mulf %9, %5 : vector<16x152xf32>
    %11 = arith.select %8, %5, %10 : vector<16x152xi1>, vector<16x152xf32>
    %12 = arith.truncf %11 : vector<16x152xf32> to vector<16x152xbf16>
    %13 = vector.extract_strided_slice %12 {offsets = [0, 0], sizes = [16, 132], strides = [1, 1]} : vector<16x152xbf16> to vector<16x132xbf16>
    %14 = vector.extract_strided_slice %12 {offsets = [0, 5], sizes = [16, 132], strides = [1, 1]} : vector<16x152xbf16> to vector<16x132xbf16>
    %15 = vector.extract_strided_slice %12 {offsets = [0, 10], sizes = [16, 132], strides = [1, 1]} : vector<16x152xbf16> to vector<16x132xbf16>
    %16 = vector.extract_strided_slice %12 {offsets = [0, 15], sizes = [16, 132], strides = [1, 1]} : vector<16x152xbf16> to vector<16x132xbf16>
    %17 = vector.extract_strided_slice %12 {offsets = [0, 20], sizes = [16, 132], strides = [1, 1]} : vector<16x152xbf16> to vector<16x132xbf16>
    %18 = tpu.concatenate %13, %14, %15, %16, %17 in 0 : vector<16x132xbf16>, vector<16x132xbf16>, vector<16x132xbf16>, vector<16x132xbf16>, vector<16x132xbf16> -> vector<80x132xbf16>
    %c0_2 = arith.constant 0 : index
    %c0_3 = arith.constant 0 : index
    %19 = vector.load %arg3[%c0_2, %c0_3] : memref<16x80xbf16, #tpu.memory_space<vmem>>, vector<16x80xbf16>
    %cst_4 = arith.constant dense<0.000000e+00> : vector<16x132xf32>
    %20 = tpu.matmul %19, %18, %cst_4 {dimension_numbers = #tpu.dot_dimension_numbers<[1], [0], [0], [1], [0, 0, 1, 1], [], []>} : vector<16x80xbf16>, vector<80x132xbf16>, vector<16x132xf32> -> vector<16x132xf32>
    %c0_5 = arith.constant 0 : index
    %c0_6 = arith.constant 0 : index
    %21 = vector.load %arg4[%c0_5, %c0_6] : memref<16x1xf32, #tpu.memory_space<vmem>>, vector<16x1xf32>
    %22 = vector.broadcast %21 : vector<16x1xf32> to vector<16x132xf32>
    %23 = arith.addf %20, %22 : vector<16x132xf32>
    %c2_i32 = arith.constant 2 : i32
    %24 = arith.subi %1, %c2_i32 : i32
    %25 = tpu.iota {dimensions = array<i32: 1>} : vector<1x132xi32>
    %26 = vector.broadcast %24 : i32 to vector<1x132xi32>
    %27 = arith.addi %26, %25 : vector<1x132xi32>
    %c0_i32 = arith.constant 0 : i32
    %28 = vector.broadcast %c0_i32 : i32 to vector<1x132xi32>
    %29 = arith.cmpi sge, %27, %28 : vector<1x132xi32>
    %c64_i32 = arith.constant 64 : i32
    %30 = vector.broadcast %c64_i32 : i32 to vector<1x132xi32>
    %31 = arith.cmpi slt, %27, %30 : vector<1x132xi32>
    %32 = arith.andi %29, %31 : vector<1x132xi1>
    %cst_7 = arith.constant 0.000000e+00 : f32
    %33 = vector.shape_cast %32 : vector<1x132xi1> to vector<1x132xi1>
    %34 = vector.broadcast %33 : vector<1x132xi1> to vector<16x132xi1>
    %35 = vector.broadcast %cst_7 : f32 to vector<16x132xf32>
    %36 = arith.select %34, %23, %35 : vector<16x132xi1>, vector<16x132xf32>
    %cst_8 = arith.constant 0.000000e+00 : f32
    %37 = vector.broadcast %cst_8 : f32 to vector<16x132xf32>
    %38 = arith.cmpf oge, %36, %37 : vector<16x132xf32>
    %cst_9 = arith.constant 1.000000e-01 : f32
    %39 = vector.broadcast %cst_9 : f32 to vector<16x132xf32>
    %40 = arith.mulf %39, %36 : vector<16x132xf32>
    %41 = arith.select %38, %36, %40 : vector<16x132xi1>, vector<16x132xf32>
    %42 = arith.truncf %41 : vector<16x132xf32> to vector<16x132xbf16>
    %43 = vector.extract_strided_slice %42 {offsets = [0, 0], sizes = [16, 128], strides = [1, 1]} : vector<16x132xbf16> to vector<16x128xbf16>
    %44 = vector.extract_strided_slice %42 {offsets = [0, 1], sizes = [16, 128], strides = [1, 1]} : vector<16x132xbf16> to vector<16x128xbf16>
    %45 = vector.extract_strided_slice %42 {offsets = [0, 2], sizes = [16, 128], strides = [1, 1]} : vector<16x132xbf16> to vector<16x128xbf16>
    %46 = vector.extract_strided_slice %42 {offsets = [0, 3], sizes = [16, 128], strides = [1, 1]} : vector<16x132xbf16> to vector<16x128xbf16>
    %47 = vector.extract_strided_slice %42 {offsets = [0, 4], sizes = [16, 128], strides = [1, 1]} : vector<16x132xbf16> to vector<16x128xbf16>
    %48 = tpu.concatenate %43, %44, %45, %46, %47 in 0 : vector<16x128xbf16>, vector<16x128xbf16>, vector<16x128xbf16>, vector<16x128xbf16>, vector<16x128xbf16> -> vector<80x128xbf16>
    %c0_10 = arith.constant 0 : index
    %c0_11 = arith.constant 0 : index
    %49 = vector.load %arg5[%c0_10, %c0_11] : memref<16x80xbf16, #tpu.memory_space<vmem>>, vector<16x80xbf16>
    %cst_12 = arith.constant dense<0.000000e+00> : vector<16x128xf32>
    %50 = tpu.matmul %49, %48, %cst_12 {dimension_numbers = #tpu.dot_dimension_numbers<[1], [0], [0], [1], [0, 0, 1, 1], [], []>} : vector<16x80xbf16>, vector<80x128xbf16>, vector<16x128xf32> -> vector<16x128xf32>
    %c0_13 = arith.constant 0 : index
    %c0_14 = arith.constant 0 : index
    %51 = vector.load %arg6[%c0_13, %c0_14] : memref<16x1xf32, #tpu.memory_space<vmem>>, vector<16x1xf32>
    %52 = vector.broadcast %51 : vector<16x1xf32> to vector<16x128xf32>
    %53 = arith.addf %50, %52 : vector<16x128xf32>
    %54 = arith.addf %53, %6 : vector<16x128xf32>
    %55 = arith.truncf %54 : vector<16x128xf32> to vector<16x128xbf16>
    %c0_15 = arith.constant 0 : index
    %c0_16 = arith.constant 0 : index
    %c0_17 = arith.constant 0 : index
    %56 = vector.load %arg7[%c0_15, %c0_16, %c0_17] : memref<1x16x128xbf16, #tpu.memory_space<vmem>>, vector<1x16x128xbf16>
    %57 = vector.shape_cast %56 : vector<1x16x128xbf16> to vector<16x128xbf16>
    %58 = vector.shape_cast %55 : vector<16x128xbf16> to vector<1x16x128xbf16>
    tpu.vector_store %arg7[%c0_15, %c0_16, %c0_17], %58 {strides = array<i32>} : memref<1x16x128xbf16, #tpu.memory_space<vmem>>, vector<1x16x128xbf16>,
    return
  }
  func.func @transform_0(%arg0: i32, %arg1: i32) -> (i32, i32, i32) {
    %c0_i32 = arith.constant 0 : i32
    %c0_i32_0 = arith.constant 0 : i32
    %c0_i32_1 = arith.constant 0 : i32
    return %arg0, %c0_i32, %c0_i32_0 : i32, i32, i32
  }
  func.func @transform_1(%arg0: i32, %arg1: i32) -> (i32, i32) {
    %c0_i32 = arith.constant 0 : i32
    %c0_i32_0 = arith.constant 0 : i32
    %c0_i32_1 = arith.constant 0 : i32
    return %c0_i32, %c0_i32_0 : i32, i32
  }
  func.func @transform_2(%arg0: i32, %arg1: i32) -> (i32, i32) {
    %c0_i32 = arith.constant 0 : i32
    %c0_i32_0 = arith.constant 0 : i32
    %c0_i32_1 = arith.constant 0 : i32
    return %c0_i32, %c0_i32_0 : i32, i32
  }
  func.func @transform_3(%arg0: i32, %arg1: i32) -> (i32, i32) {
    %c0_i32 = arith.constant 0 : i32
    %c0_i32_0 = arith.constant 0 : i32
    %c0_i32_1 = arith.constant 0 : i32
    return %c0_i32, %c0_i32_0 : i32, i32
  }
  func.func @transform_4(%arg0: i32, %arg1: i32) -> (i32, i32) {
    %c0_i32 = arith.constant 0 : i32
    %c0_i32_0 = arith.constant 0 : i32
    %c0_i32_1 = arith.constant 0 : i32
    return %c0_i32, %c0_i32_0 : i32, i32
  }
  func.func @transform_5(%arg0: i32, %arg1: i32) -> (i32, i32, i32) {
    %c0_i32 = arith.constant 0 : i32
    %c0_i32_0 = arith.constant 0 : i32
    return %arg0, %c0_i32, %arg1 : i32, i32, i32
  }
}

module attributes {stable_mosaic.version = 11 : i64} {
  func.func @_res_pair_kernel(%arg0: i32, %arg1: i32, %arg2: memref<1x16x144xbf16, #tpu.memory_space<vmem>>, %arg3: memref<16x80xbf16, #tpu.memory_space<vmem>>, %arg4: memref<16x1xf32, #tpu.memory_space<vmem>>, %arg5: memref<16x80xbf16, #tpu.memory_space<vmem>>, %arg6: memref<16x1xf32, #tpu.memory_space<vmem>>, %arg7: memref<1x16x128xbf16, #tpu.memory_space<vmem>>) attributes {dimension_semantics = [#tpu.dimension_semantics<parallel>, #tpu.dimension_semantics<parallel>], iteration_bounds = array<i64: 2, 1>, scalar_prefetch = 0 : i64, scratch_operands = 0 : i64, tpu.core_type = #tpu.core_type<tc>, window_params = [{transform_indices = @transform_0, window_bounds = array<i64: 1, 16, 144>}, {pipeline_mode = #tpu.pipeline_mode<synchronous>, transform_indices = @transform_1, window_bounds = array<i64: 16, 80>}, {pipeline_mode = #tpu.pipeline_mode<synchronous>, transform_indices = @transform_2, window_bounds = array<i64: 16, 1>}, {pipeline_mode = #tpu.pipeline_mode<synchronous>, transform_indices = @transform_3, window_bounds = array<i64: 16, 80>}, {pipeline_mode = #tpu.pipeline_mode<synchronous>, transform_indices = @transform_4, window_bounds = array<i64: 16, 1>}, {transform_indices = @transform_5, window_bounds = array<i64: 1, 16, 128>}]} {
    %c128_i32 = arith.constant 128 : i32
    %0 = arith.muli %arg1, %c128_i32 : i32
    %1 = tpu.assume_multiple %0, 128 : i32
    %c0 = arith.constant 0 : index
    %c0_0 = arith.constant 0 : index
    %2 = arith.index_cast %1 : i32 to index
    %3 = vector.load %arg2[%c0, %c0_0, %2] : memref<1x16x144xbf16, #tpu.memory_space<vmem>>, vector<1x16x144xbf16>
    %4 = vector.shape_cast %3 : vector<1x16x144xbf16> to vector<16x144xbf16>
    %5 = arith.extf %4 : vector<16x144xbf16> to vector<16x144xf32>
    %6 = vector.extract_strided_slice %5 {offsets = [0, 8], sizes = [16, 128], strides = [1, 1]} : vector<16x144xf32> to vector<16x128xf32>
    %cst = arith.constant 0.000000e+00 : f32
    %7 = vector.broadcast %cst : f32 to vector<16x144xf32>
    %8 = arith.cmpf oge, %5, %7 : vector<16x144xf32>
    %cst_1 = arith.constant 1.000000e-01 : f32
    %9 = vector.broadcast %cst_1 : f32 to vector<16x144xf32>
    %10 = arith.mulf %9, %5 : vector<16x144xf32>
    %11 = arith.select %8, %5, %10 : vector<16x144xi1>, vector<16x144xf32>
    %12 = arith.truncf %11 : vector<16x144xf32> to vector<16x144xbf16>
    %13 = vector.extract_strided_slice %12 {offsets = [0, 0], sizes = [16, 132], strides = [1, 1]} : vector<16x144xbf16> to vector<16x132xbf16>
    %14 = vector.extract_strided_slice %12 {offsets = [0, 3], sizes = [16, 132], strides = [1, 1]} : vector<16x144xbf16> to vector<16x132xbf16>
    %15 = vector.extract_strided_slice %12 {offsets = [0, 6], sizes = [16, 132], strides = [1, 1]} : vector<16x144xbf16> to vector<16x132xbf16>
    %16 = vector.extract_strided_slice %12 {offsets = [0, 9], sizes = [16, 132], strides = [1, 1]} : vector<16x144xbf16> to vector<16x132xbf16>
    %17 = vector.extract_strided_slice %12 {offsets = [0, 12], sizes = [16, 132], strides = [1, 1]} : vector<16x144xbf16> to vector<16x132xbf16>
    %18 = tpu.concatenate %13, %14, %15, %16, %17 in 0 : vector<16x132xbf16>, vector<16x132xbf16>, vector<16x132xbf16>, vector<16x132xbf16>, vector<16x132xbf16> -> vector<80x132xbf16>
    %c0_2 = arith.constant 0 : index
    %c0_3 = arith.constant 0 : index
    %19 = vector.load %arg3[%c0_2, %c0_3] : memref<16x80xbf16, #tpu.memory_space<vmem>>, vector<16x80xbf16>
    %cst_4 = arith.constant dense<0.000000e+00> : vector<16x132xf32>
    %20 = tpu.matmul %19, %18, %cst_4 {dimension_numbers = #tpu.dot_dimension_numbers<[1], [0], [0], [1], [0, 0, 1, 1], [], []>} : vector<16x80xbf16>, vector<80x132xbf16>, vector<16x132xf32> -> vector<16x132xf32>
    %c0_5 = arith.constant 0 : index
    %c0_6 = arith.constant 0 : index
    %21 = vector.load %arg4[%c0_5, %c0_6] : memref<16x1xf32, #tpu.memory_space<vmem>>, vector<16x1xf32>
    %22 = vector.broadcast %21 : vector<16x1xf32> to vector<16x132xf32>
    %23 = arith.addf %20, %22 : vector<16x132xf32>
    %c2_i32 = arith.constant 2 : i32
    %24 = arith.subi %1, %c2_i32 : i32
    %25 = tpu.iota {dimensions = array<i32: 1>} : vector<1x132xi32>
    %26 = vector.broadcast %24 : i32 to vector<1x132xi32>
    %27 = arith.addi %26, %25 : vector<1x132xi32>
    %c0_i32 = arith.constant 0 : i32
    %28 = vector.broadcast %c0_i32 : i32 to vector<1x132xi32>
    %29 = arith.cmpi sge, %27, %28 : vector<1x132xi32>
    %c64_i32 = arith.constant 64 : i32
    %30 = vector.broadcast %c64_i32 : i32 to vector<1x132xi32>
    %31 = arith.cmpi slt, %27, %30 : vector<1x132xi32>
    %32 = arith.andi %29, %31 : vector<1x132xi1>
    %cst_7 = arith.constant 0.000000e+00 : f32
    %33 = vector.shape_cast %32 : vector<1x132xi1> to vector<1x132xi1>
    %34 = vector.broadcast %33 : vector<1x132xi1> to vector<16x132xi1>
    %35 = vector.broadcast %cst_7 : f32 to vector<16x132xf32>
    %36 = arith.select %34, %23, %35 : vector<16x132xi1>, vector<16x132xf32>
    %cst_8 = arith.constant 0.000000e+00 : f32
    %37 = vector.broadcast %cst_8 : f32 to vector<16x132xf32>
    %38 = arith.cmpf oge, %36, %37 : vector<16x132xf32>
    %cst_9 = arith.constant 1.000000e-01 : f32
    %39 = vector.broadcast %cst_9 : f32 to vector<16x132xf32>
    %40 = arith.mulf %39, %36 : vector<16x132xf32>
    %41 = arith.select %38, %36, %40 : vector<16x132xi1>, vector<16x132xf32>
    %42 = arith.truncf %41 : vector<16x132xf32> to vector<16x132xbf16>
    %43 = vector.extract_strided_slice %42 {offsets = [0, 0], sizes = [16, 128], strides = [1, 1]} : vector<16x132xbf16> to vector<16x128xbf16>
    %44 = vector.extract_strided_slice %42 {offsets = [0, 1], sizes = [16, 128], strides = [1, 1]} : vector<16x132xbf16> to vector<16x128xbf16>
    %45 = vector.extract_strided_slice %42 {offsets = [0, 2], sizes = [16, 128], strides = [1, 1]} : vector<16x132xbf16> to vector<16x128xbf16>
    %46 = vector.extract_strided_slice %42 {offsets = [0, 3], sizes = [16, 128], strides = [1, 1]} : vector<16x132xbf16> to vector<16x128xbf16>
    %47 = vector.extract_strided_slice %42 {offsets = [0, 4], sizes = [16, 128], strides = [1, 1]} : vector<16x132xbf16> to vector<16x128xbf16>
    %48 = tpu.concatenate %43, %44, %45, %46, %47 in 0 : vector<16x128xbf16>, vector<16x128xbf16>, vector<16x128xbf16>, vector<16x128xbf16>, vector<16x128xbf16> -> vector<80x128xbf16>
    %c0_10 = arith.constant 0 : index
    %c0_11 = arith.constant 0 : index
    %49 = vector.load %arg5[%c0_10, %c0_11] : memref<16x80xbf16, #tpu.memory_space<vmem>>, vector<16x80xbf16>
    %cst_12 = arith.constant dense<0.000000e+00> : vector<16x128xf32>
    %50 = tpu.matmul %49, %48, %cst_12 {dimension_numbers = #tpu.dot_dimension_numbers<[1], [0], [0], [1], [0, 0, 1, 1], [], []>} : vector<16x80xbf16>, vector<80x128xbf16>, vector<16x128xf32> -> vector<16x128xf32>
    %c0_13 = arith.constant 0 : index
    %c0_14 = arith.constant 0 : index
    %51 = vector.load %arg6[%c0_13, %c0_14] : memref<16x1xf32, #tpu.memory_space<vmem>>, vector<16x1xf32>
    %52 = vector.broadcast %51 : vector<16x1xf32> to vector<16x128xf32>
    %53 = arith.addf %50, %52 : vector<16x128xf32>
    %54 = arith.addf %53, %6 : vector<16x128xf32>
    %55 = arith.truncf %54 : vector<16x128xf32> to vector<16x128xbf16>
    %c0_15 = arith.constant 0 : index
    %c0_16 = arith.constant 0 : index
    %c0_17 = arith.constant 0 : index
    %56 = vector.load %arg7[%c0_15, %c0_16, %c0_17] : memref<1x16x128xbf16, #tpu.memory_space<vmem>>, vector<1x16x128xbf16>
    %57 = vector.shape_cast %56 : vector<1x16x128xbf16> to vector<16x128xbf16>
    %58 = vector.shape_cast %55 : vector<16x128xbf16> to vector<1x16x128xbf16>
    tpu.vector_store %arg7[%c0_15, %c0_16, %c0_17], %58 {strides = array<i32>} : memref<1x16x128xbf16, #tpu.memory_space<vmem>>, vector<1x16x128xbf16>,
    return
  }
  func.func @transform_0(%arg0: i32, %arg1: i32) -> (i32, i32, i32) {
    %c0_i32 = arith.constant 0 : i32
    %c0_i32_0 = arith.constant 0 : i32
    %c0_i32_1 = arith.constant 0 : i32
    return %arg0, %c0_i32, %c0_i32_0 : i32, i32, i32
  }
  func.func @transform_1(%arg0: i32, %arg1: i32) -> (i32, i32) {
    %c0_i32 = arith.constant 0 : i32
    %c0_i32_0 = arith.constant 0 : i32
    %c0_i32_1 = arith.constant 0 : i32
    return %c0_i32, %c0_i32_0 : i32, i32
  }
  func.func @transform_2(%arg0: i32, %arg1: i32) -> (i32, i32) {
    %c0_i32 = arith.constant 0 : i32
    %c0_i32_0 = arith.constant 0 : i32
    %c0_i32_1 = arith.constant 0 : i32
    return %c0_i32, %c0_i32_0 : i32, i32
  }
  func.func @transform_3(%arg0: i32, %arg1: i32) -> (i32, i32) {
    %c0_i32 = arith.constant 0 : i32
    %c0_i32_0 = arith.constant 0 : i32
    %c0_i32_1 = arith.constant 0 : i32
    return %c0_i32, %c0_i32_0 : i32, i32
  }
  func.func @transform_4(%arg0: i32, %arg1: i32) -> (i32, i32) {
    %c0_i32 = arith.constant 0 : i32
    %c0_i32_0 = arith.constant 0 : i32
    %c0_i32_1 = arith.constant 0 : i32
    return %c0_i32, %c0_i32_0 : i32, i32
  }
  func.func @transform_5(%arg0: i32, %arg1: i32) -> (i32, i32, i32) {
    %c0_i32 = arith.constant 0 : i32
    %c0_i32_0 = arith.constant 0 : i32
    return %arg0, %c0_i32, %arg1 : i32, i32, i32
  }
}

module attributes {stable_mosaic.version = 11 : i64} {
  func.func @_up_phases_kernel(%arg0: i32, %arg1: i32, %arg2: memref<1x16x130xbf16, #tpu.memory_space<vmem>>, %arg3: memref<8x32xbf16, #tpu.memory_space<vmem>>, %arg4: memref<8x48xbf16, #tpu.memory_space<vmem>>, %arg5: memref<8x32xbf16, #tpu.memory_space<vmem>>, %arg6: memref<8x1xf32, #tpu.memory_space<vmem>>, %arg7: memref<1x3x8x128xbf16, #tpu.memory_space<vmem>>) attributes {dimension_semantics = [#tpu.dimension_semantics<parallel>, #tpu.dimension_semantics<parallel>], iteration_bounds = array<i64: 2, 1>, scalar_prefetch = 0 : i64, scratch_operands = 0 : i64, tpu.core_type = #tpu.core_type<tc>, window_params = [{transform_indices = @transform_0, window_bounds = array<i64: 1, 16, 130>}, {pipeline_mode = #tpu.pipeline_mode<synchronous>, transform_indices = @transform_1, window_bounds = array<i64: 8, 32>}, {pipeline_mode = #tpu.pipeline_mode<synchronous>, transform_indices = @transform_2, window_bounds = array<i64: 8, 48>}, {pipeline_mode = #tpu.pipeline_mode<synchronous>, transform_indices = @transform_3, window_bounds = array<i64: 8, 32>}, {pipeline_mode = #tpu.pipeline_mode<synchronous>, transform_indices = @transform_4, window_bounds = array<i64: 8, 1>}, {transform_indices = @transform_5, window_bounds = array<i64: 1, 3, 8, 128>}]} {
    %c128_i32 = arith.constant 128 : i32
    %0 = arith.muli %arg1, %c128_i32 : i32
    %1 = tpu.assume_multiple %0, 128 : i32
    %c0 = arith.constant 0 : index
    %c0_0 = arith.constant 0 : index
    %2 = arith.index_cast %1 : i32 to index
    %3 = vector.load %arg2[%c0, %c0_0, %2] : memref<1x16x130xbf16, #tpu.memory_space<vmem>>, vector<1x16x130xbf16>
    %4 = vector.shape_cast %3 : vector<1x16x130xbf16> to vector<16x130xbf16>
    %5 = arith.extf %4 : vector<16x130xbf16> to vector<16x130xf32>
    %cst = arith.constant 0.000000e+00 : f32
    %6 = vector.broadcast %cst : f32 to vector<16x130xf32>
    %7 = arith.cmpf oge, %5, %6 : vector<16x130xf32>
    %cst_1 = arith.constant 1.000000e-01 : f32
    %8 = vector.broadcast %cst_1 : f32 to vector<16x130xf32>
    %9 = arith.mulf %8, %5 : vector<16x130xf32>
    %10 = arith.select %7, %5, %9 : vector<16x130xi1>, vector<16x130xf32>
    %11 = arith.truncf %10 : vector<16x130xf32> to vector<16x130xbf16>
    %12 = vector.extract_strided_slice %11 {offsets = [0, 0], sizes = [16, 128], strides = [1, 1]} : vector<16x130xbf16> to vector<16x128xbf16>
    %13 = vector.extract_strided_slice %11 {offsets = [0, 1], sizes = [16, 128], strides = [1, 1]} : vector<16x130xbf16> to vector<16x128xbf16>
    %14 = tpu.concatenate %12, %13 in 0 : vector<16x128xbf16>, vector<16x128xbf16> -> vector<32x128xbf16>
    %c0_2 = arith.constant 0 : index
    %c0_3 = arith.constant 0 : index
    %15 = vector.load %arg3[%c0_2, %c0_3] : memref<8x32xbf16, #tpu.memory_space<vmem>>, vector<8x32xbf16>
    %cst_4 = arith.constant dense<0.000000e+00> : vector<8x128xf32>
    %16 = tpu.matmul %15, %14, %cst_4 {dimension_numbers = #tpu.dot_dimension_numbers<[1], [0], [0], [1], [0, 0, 1, 1], [], []>} : vector<8x32xbf16>, vector<32x128xbf16>, vector<8x128xf32> -> vector<8x128xf32>
    %c0_5 = arith.constant 0 : index
    %c0_6 = arith.constant 0 : index
    %17 = vector.load %arg6[%c0_5, %c0_6] : memref<8x1xf32, #tpu.memory_space<vmem>>, vector<8x1xf32>
    %18 = vector.broadcast %17 : vector<8x1xf32> to vector<8x128xf32>
    %19 = arith.addf %16, %18 : vector<8x128xf32>
    %20 = arith.truncf %19 : vector<8x128xf32> to vector<8x128xbf16>
    %c0_7 = arith.constant 0 : index
    %c0_8 = arith.constant 0 : index
    %c0_9 = arith.constant 0 : index
    %c0_10 = arith.constant 0 : index
    %21 = vector.load %arg7[%c0_7, %c0_8, %c0_9, %c0_10] : memref<1x3x8x128xbf16, #tpu.memory_space<vmem>>, vector<1x1x8x128xbf16>
    %22 = vector.shape_cast %21 : vector<1x1x8x128xbf16> to vector<8x128xbf16>
    %23 = vector.shape_cast %20 : vector<8x128xbf16> to vector<1x1x8x128xbf16>
    tpu.vector_store %arg7[%c0_7, %c0_8, %c0_9, %c0_10], %23 {strides = array<i32>} : memref<1x3x8x128xbf16, #tpu.memory_space<vmem>>, vector<1x1x8x128xbf16>,
    %24 = vector.extract_strided_slice %11 {offsets = [0, 0], sizes = [16, 128], strides = [1, 1]} : vector<16x130xbf16> to vector<16x128xbf16>
    %25 = vector.extract_strided_slice %11 {offsets = [0, 1], sizes = [16, 128], strides = [1, 1]} : vector<16x130xbf16> to vector<16x128xbf16>
    %26 = vector.extract_strided_slice %11 {offsets = [0, 2], sizes = [16, 128], strides = [1, 1]} : vector<16x130xbf16> to vector<16x128xbf16>
    %27 = tpu.concatenate %24, %25, %26 in 0 : vector<16x128xbf16>, vector<16x128xbf16>, vector<16x128xbf16> -> vector<48x128xbf16>
    %c0_11 = arith.constant 0 : index
    %c0_12 = arith.constant 0 : index
    %28 = vector.load %arg4[%c0_11, %c0_12] : memref<8x48xbf16, #tpu.memory_space<vmem>>, vector<8x48xbf16>
    %cst_13 = arith.constant dense<0.000000e+00> : vector<8x128xf32>
    %29 = tpu.matmul %28, %27, %cst_13 {dimension_numbers = #tpu.dot_dimension_numbers<[1], [0], [0], [1], [0, 0, 1, 1], [], []>} : vector<8x48xbf16>, vector<48x128xbf16>, vector<8x128xf32> -> vector<8x128xf32>
    %c0_14 = arith.constant 0 : index
    %c0_15 = arith.constant 0 : index
    %30 = vector.load %arg6[%c0_14, %c0_15] : memref<8x1xf32, #tpu.memory_space<vmem>>, vector<8x1xf32>
    %31 = vector.broadcast %30 : vector<8x1xf32> to vector<8x128xf32>
    %32 = arith.addf %29, %31 : vector<8x128xf32>
    %33 = arith.truncf %32 : vector<8x128xf32> to vector<8x128xbf16>
    %c0_16 = arith.constant 0 : index
    %c1 = arith.constant 1 : index
    %c0_17 = arith.constant 0 : index
    %c0_18 = arith.constant 0 : index
    %34 = vector.load %arg7[%c0_16, %c1, %c0_17, %c0_18] : memref<1x3x8x128xbf16, #tpu.memory_space<vmem>>, vector<1x1x8x128xbf16>
    %35 = vector.shape_cast %34 : vector<1x1x8x128xbf16> to vector<8x128xbf16>
    %36 = vector.shape_cast %33 : vector<8x128xbf16> to vector<1x1x8x128xbf16>
    tpu.vector_store %arg7[%c0_16, %c1, %c0_17, %c0_18], %36 {strides = array<i32>} : memref<1x3x8x128xbf16, #tpu.memory_space<vmem>>, vector<1x1x8x128xbf16>,
    %37 = vector.extract_strided_slice %11 {offsets = [0, 1], sizes = [16, 128], strides = [1, 1]} : vector<16x130xbf16> to vector<16x128xbf16>
    %38 = vector.extract_strided_slice %11 {offsets = [0, 2], sizes = [16, 128], strides = [1, 1]} : vector<16x130xbf16> to vector<16x128xbf16>
    %39 = tpu.concatenate %37, %38 in 0 : vector<16x128xbf16>, vector<16x128xbf16> -> vector<32x128xbf16>
    %c0_19 = arith.constant 0 : index
    %c0_20 = arith.constant 0 : index
    %40 = vector.load %arg5[%c0_19, %c0_20] : memref<8x32xbf16, #tpu.memory_space<vmem>>, vector<8x32xbf16>
    %cst_21 = arith.constant dense<0.000000e+00> : vector<8x128xf32>
    %41 = tpu.matmul %40, %39, %cst_21 {dimension_numbers = #tpu.dot_dimension_numbers<[1], [0], [0], [1], [0, 0, 1, 1], [], []>} : vector<8x32xbf16>, vector<32x128xbf16>, vector<8x128xf32> -> vector<8x128xf32>
    %c0_22 = arith.constant 0 : index
    %c0_23 = arith.constant 0 : index
    %42 = vector.load %arg6[%c0_22, %c0_23] : memref<8x1xf32, #tpu.memory_space<vmem>>, vector<8x1xf32>
    %43 = vector.broadcast %42 : vector<8x1xf32> to vector<8x128xf32>
    %44 = arith.addf %41, %43 : vector<8x128xf32>
    %45 = arith.truncf %44 : vector<8x128xf32> to vector<8x128xbf16>
    %c0_24 = arith.constant 0 : index
    %c2 = arith.constant 2 : index
    %c0_25 = arith.constant 0 : index
    %c0_26 = arith.constant 0 : index
    %46 = vector.load %arg7[%c0_24, %c2, %c0_25, %c0_26] : memref<1x3x8x128xbf16, #tpu.memory_space<vmem>>, vector<1x1x8x128xbf16>
    %47 = vector.shape_cast %46 : vector<1x1x8x128xbf16> to vector<8x128xbf16>
    %48 = vector.shape_cast %45 : vector<8x128xbf16> to vector<1x1x8x128xbf16>
    tpu.vector_store %arg7[%c0_24, %c2, %c0_25, %c0_26], %48 {strides = array<i32>} : memref<1x3x8x128xbf16, #tpu.memory_space<vmem>>, vector<1x1x8x128xbf16>,
    return
  }
  func.func @transform_0(%arg0: i32, %arg1: i32) -> (i32, i32, i32) {
    %c0_i32 = arith.constant 0 : i32
    %c0_i32_0 = arith.constant 0 : i32
    %c0_i32_1 = arith.constant 0 : i32
    return %arg0, %c0_i32, %c0_i32_0 : i32, i32, i32
  }
  func.func @transform_1(%arg0: i32, %arg1: i32) -> (i32, i32) {
    %c0_i32 = arith.constant 0 : i32
    %c0_i32_0 = arith.constant 0 : i32
    %c0_i32_1 = arith.constant 0 : i32
    return %c0_i32, %c0_i32_0 : i32, i32
  }
  func.func @transform_2(%arg0: i32, %arg1: i32) -> (i32, i32) {
    %c0_i32 = arith.constant 0 : i32
    %c0_i32_0 = arith.constant 0 : i32
    %c0_i32_1 = arith.constant 0 : i32
    return %c0_i32, %c0_i32_0 : i32, i32
  }
  func.func @transform_3(%arg0: i32, %arg1: i32) -> (i32, i32) {
    %c0_i32 = arith.constant 0 : i32
    %c0_i32_0 = arith.constant 0 : i32
    %c0_i32_1 = arith.constant 0 : i32
    return %c0_i32, %c0_i32_0 : i32, i32
  }
  func.func @transform_4(%arg0: i32, %arg1: i32) -> (i32, i32) {
    %c0_i32 = arith.constant 0 : i32
    %c0_i32_0 = arith.constant 0 : i32
    %c0_i32_1 = arith.constant 0 : i32
    return %c0_i32, %c0_i32_0 : i32, i32
  }
  func.func @transform_5(%arg0: i32, %arg1: i32) -> (i32, i32, i32, i32) {
    %c0_i32 = arith.constant 0 : i32
    %c0_i32_0 = arith.constant 0 : i32
    %c0_i32_1 = arith.constant 0 : i32
    return %arg0, %c0_i32, %c0_i32_0, %arg1 : i32, i32, i32, i32
  }
}

module attributes {stable_mosaic.version = 11 : i64} {
  func.func @_res_pair_kernel(%arg0: i32, %arg1: i32, %arg2: memref<1x8x264xbf16, #tpu.memory_space<vmem>>, %arg3: memref<8x24xbf16, #tpu.memory_space<vmem>>, %arg4: memref<8x1xf32, #tpu.memory_space<vmem>>, %arg5: memref<8x24xbf16, #tpu.memory_space<vmem>>, %arg6: memref<8x1xf32, #tpu.memory_space<vmem>>, %arg7: memref<1x8x256xbf16, #tpu.memory_space<vmem>>) attributes {dimension_semantics = [#tpu.dimension_semantics<parallel>, #tpu.dimension_semantics<parallel>], iteration_bounds = array<i64: 2, 1>, scalar_prefetch = 0 : i64, scratch_operands = 0 : i64, tpu.core_type = #tpu.core_type<tc>, window_params = [{transform_indices = @transform_0, window_bounds = array<i64: 1, 8, 264>}, {pipeline_mode = #tpu.pipeline_mode<synchronous>, transform_indices = @transform_1, window_bounds = array<i64: 8, 24>}, {pipeline_mode = #tpu.pipeline_mode<synchronous>, transform_indices = @transform_2, window_bounds = array<i64: 8, 1>}, {pipeline_mode = #tpu.pipeline_mode<synchronous>, transform_indices = @transform_3, window_bounds = array<i64: 8, 24>}, {pipeline_mode = #tpu.pipeline_mode<synchronous>, transform_indices = @transform_4, window_bounds = array<i64: 8, 1>}, {transform_indices = @transform_5, window_bounds = array<i64: 1, 8, 256>}]} {
    %c256_i32 = arith.constant 256 : i32
    %0 = arith.muli %arg1, %c256_i32 : i32
    %1 = tpu.assume_multiple %0, 128 : i32
    %c0 = arith.constant 0 : index
    %c0_0 = arith.constant 0 : index
    %2 = arith.index_cast %1 : i32 to index
    %3 = vector.load %arg2[%c0, %c0_0, %2] : memref<1x8x264xbf16, #tpu.memory_space<vmem>>, vector<1x8x264xbf16>
    %4 = vector.shape_cast %3 : vector<1x8x264xbf16> to vector<8x264xbf16>
    %5 = arith.extf %4 : vector<8x264xbf16> to vector<8x264xf32>
    %6 = vector.extract_strided_slice %5 {offsets = [0, 4], sizes = [8, 256], strides = [1, 1]} : vector<8x264xf32> to vector<8x256xf32>
    %cst = arith.constant 0.000000e+00 : f32
    %7 = vector.broadcast %cst : f32 to vector<8x264xf32>
    %8 = arith.cmpf oge, %5, %7 : vector<8x264xf32>
    %cst_1 = arith.constant 1.000000e-01 : f32
    %9 = vector.broadcast %cst_1 : f32 to vector<8x264xf32>
    %10 = arith.mulf %9, %5 : vector<8x264xf32>
    %11 = arith.select %8, %5, %10 : vector<8x264xi1>, vector<8x264xf32>
    %12 = arith.truncf %11 : vector<8x264xf32> to vector<8x264xbf16>
    %13 = vector.extract_strided_slice %12 {offsets = [0, 0], sizes = [8, 258], strides = [1, 1]} : vector<8x264xbf16> to vector<8x258xbf16>
    %14 = vector.extract_strided_slice %12 {offsets = [0, 3], sizes = [8, 258], strides = [1, 1]} : vector<8x264xbf16> to vector<8x258xbf16>
    %15 = vector.extract_strided_slice %12 {offsets = [0, 6], sizes = [8, 258], strides = [1, 1]} : vector<8x264xbf16> to vector<8x258xbf16>
    %16 = tpu.concatenate %13, %14, %15 in 0 : vector<8x258xbf16>, vector<8x258xbf16>, vector<8x258xbf16> -> vector<24x258xbf16>
    %c0_2 = arith.constant 0 : index
    %c0_3 = arith.constant 0 : index
    %17 = vector.load %arg3[%c0_2, %c0_3] : memref<8x24xbf16, #tpu.memory_space<vmem>>, vector<8x24xbf16>
    %cst_4 = arith.constant dense<0.000000e+00> : vector<8x258xf32>
    %18 = tpu.matmul %17, %16, %cst_4 {dimension_numbers = #tpu.dot_dimension_numbers<[1], [0], [0], [1], [0, 0, 1, 1], [], []>} : vector<8x24xbf16>, vector<24x258xbf16>, vector<8x258xf32> -> vector<8x258xf32>
    %c0_5 = arith.constant 0 : index
    %c0_6 = arith.constant 0 : index
    %19 = vector.load %arg4[%c0_5, %c0_6] : memref<8x1xf32, #tpu.memory_space<vmem>>, vector<8x1xf32>
    %20 = vector.broadcast %19 : vector<8x1xf32> to vector<8x258xf32>
    %21 = arith.addf %18, %20 : vector<8x258xf32>
    %c1_i32 = arith.constant 1 : i32
    %22 = arith.subi %1, %c1_i32 : i32
    %23 = tpu.iota {dimensions = array<i32: 1>} : vector<1x258xi32>
    %24 = vector.broadcast %22 : i32 to vector<1x258xi32>
    %25 = arith.addi %24, %23 : vector<1x258xi32>
    %c0_i32 = arith.constant 0 : i32
    %26 = vector.broadcast %c0_i32 : i32 to vector<1x258xi32>
    %27 = arith.cmpi sge, %25, %26 : vector<1x258xi32>
    %c192_i32 = arith.constant 192 : i32
    %28 = vector.broadcast %c192_i32 : i32 to vector<1x258xi32>
    %29 = arith.cmpi slt, %25, %28 : vector<1x258xi32>
    %30 = arith.andi %27, %29 : vector<1x258xi1>
    %cst_7 = arith.constant 0.000000e+00 : f32
    %31 = vector.shape_cast %30 : vector<1x258xi1> to vector<1x258xi1>
    %32 = vector.broadcast %31 : vector<1x258xi1> to vector<8x258xi1>
    %33 = vector.broadcast %cst_7 : f32 to vector<8x258xf32>
    %34 = arith.select %32, %21, %33 : vector<8x258xi1>, vector<8x258xf32>
    %cst_8 = arith.constant 0.000000e+00 : f32
    %35 = vector.broadcast %cst_8 : f32 to vector<8x258xf32>
    %36 = arith.cmpf oge, %34, %35 : vector<8x258xf32>
    %cst_9 = arith.constant 1.000000e-01 : f32
    %37 = vector.broadcast %cst_9 : f32 to vector<8x258xf32>
    %38 = arith.mulf %37, %34 : vector<8x258xf32>
    %39 = arith.select %36, %34, %38 : vector<8x258xi1>, vector<8x258xf32>
    %40 = arith.truncf %39 : vector<8x258xf32> to vector<8x258xbf16>
    %41 = vector.extract_strided_slice %40 {offsets = [0, 0], sizes = [8, 256], strides = [1, 1]} : vector<8x258xbf16> to vector<8x256xbf16>
    %42 = vector.extract_strided_slice %40 {offsets = [0, 1], sizes = [8, 256], strides = [1, 1]} : vector<8x258xbf16> to vector<8x256xbf16>
    %43 = vector.extract_strided_slice %40 {offsets = [0, 2], sizes = [8, 256], strides = [1, 1]} : vector<8x258xbf16> to vector<8x256xbf16>
    %44 = tpu.concatenate %41, %42, %43 in 0 : vector<8x256xbf16>, vector<8x256xbf16>, vector<8x256xbf16> -> vector<24x256xbf16>
    %c0_10 = arith.constant 0 : index
    %c0_11 = arith.constant 0 : index
    %45 = vector.load %arg5[%c0_10, %c0_11] : memref<8x24xbf16, #tpu.memory_space<vmem>>, vector<8x24xbf16>
    %cst_12 = arith.constant dense<0.000000e+00> : vector<8x256xf32>
    %46 = tpu.matmul %45, %44, %cst_12 {dimension_numbers = #tpu.dot_dimension_numbers<[1], [0], [0], [1], [0, 0, 1, 1], [], []>} : vector<8x24xbf16>, vector<24x256xbf16>, vector<8x256xf32> -> vector<8x256xf32>
    %c0_13 = arith.constant 0 : index
    %c0_14 = arith.constant 0 : index
    %47 = vector.load %arg6[%c0_13, %c0_14] : memref<8x1xf32, #tpu.memory_space<vmem>>, vector<8x1xf32>
    %48 = vector.broadcast %47 : vector<8x1xf32> to vector<8x256xf32>
    %49 = arith.addf %46, %48 : vector<8x256xf32>
    %50 = arith.addf %49, %6 : vector<8x256xf32>
    %51 = arith.truncf %50 : vector<8x256xf32> to vector<8x256xbf16>
    %c0_15 = arith.constant 0 : index
    %c0_16 = arith.constant 0 : index
    %c0_17 = arith.constant 0 : index
    %52 = vector.load %arg7[%c0_15, %c0_16, %c0_17] : memref<1x8x256xbf16, #tpu.memory_space<vmem>>, vector<1x8x256xbf16>
    %53 = vector.shape_cast %52 : vector<1x8x256xbf16> to vector<8x256xbf16>
    %54 = vector.shape_cast %51 : vector<8x256xbf16> to vector<1x8x256xbf16>
    tpu.vector_store %arg7[%c0_15, %c0_16, %c0_17], %54 {strides = array<i32>} : memref<1x8x256xbf16, #tpu.memory_space<vmem>>, vector<1x8x256xbf16>,
    return
  }
  func.func @transform_0(%arg0: i32, %arg1: i32) -> (i32, i32, i32) {
    %c0_i32 = arith.constant 0 : i32
    %c0_i32_0 = arith.constant 0 : i32
    %c0_i32_1 = arith.constant 0 : i32
    return %arg0, %c0_i32, %c0_i32_0 : i32, i32, i32
  }
  func.func @transform_1(%arg0: i32, %arg1: i32) -> (i32, i32) {
    %c0_i32 = arith.constant 0 : i32
    %c0_i32_0 = arith.constant 0 : i32
    %c0_i32_1 = arith.constant 0 : i32
    return %c0_i32, %c0_i32_0 : i32, i32
  }
  func.func @transform_2(%arg0: i32, %arg1: i32) -> (i32, i32) {
    %c0_i32 = arith.constant 0 : i32
    %c0_i32_0 = arith.constant 0 : i32
    %c0_i32_1 = arith.constant 0 : i32
    return %c0_i32, %c0_i32_0 : i32, i32
  }
  func.func @transform_3(%arg0: i32, %arg1: i32) -> (i32, i32) {
    %c0_i32 = arith.constant 0 : i32
    %c0_i32_0 = arith.constant 0 : i32
    %c0_i32_1 = arith.constant 0 : i32
    return %c0_i32, %c0_i32_0 : i32, i32
  }
  func.func @transform_4(%arg0: i32, %arg1: i32) -> (i32, i32) {
    %c0_i32 = arith.constant 0 : i32
    %c0_i32_0 = arith.constant 0 : i32
    %c0_i32_1 = arith.constant 0 : i32
    return %c0_i32, %c0_i32_0 : i32, i32
  }
  func.func @transform_5(%arg0: i32, %arg1: i32) -> (i32, i32, i32) {
    %c0_i32 = arith.constant 0 : i32
    %c0_i32_0 = arith.constant 0 : i32
    return %arg0, %c0_i32, %arg1 : i32, i32, i32
  }
}

module attributes {stable_mosaic.version = 11 : i64} {
  func.func @_res_pair_kernel(%arg0: i32, %arg1: i32, %arg2: memref<1x8x260xbf16, #tpu.memory_space<vmem>>, %arg3: memref<8x24xbf16, #tpu.memory_space<vmem>>, %arg4: memref<8x1xf32, #tpu.memory_space<vmem>>, %arg5: memref<8x24xbf16, #tpu.memory_space<vmem>>, %arg6: memref<8x1xf32, #tpu.memory_space<vmem>>, %arg7: memref<1x8x256xbf16, #tpu.memory_space<vmem>>) attributes {dimension_semantics = [#tpu.dimension_semantics<parallel>, #tpu.dimension_semantics<parallel>], iteration_bounds = array<i64: 2, 1>, scalar_prefetch = 0 : i64, scratch_operands = 0 : i64, tpu.core_type = #tpu.core_type<tc>, window_params = [{transform_indices = @transform_0, window_bounds = array<i64: 1, 8, 260>}, {pipeline_mode = #tpu.pipeline_mode<synchronous>, transform_indices = @transform_1, window_bounds = array<i64: 8, 24>}, {pipeline_mode = #tpu.pipeline_mode<synchronous>, transform_indices = @transform_2, window_bounds = array<i64: 8, 1>}, {pipeline_mode = #tpu.pipeline_mode<synchronous>, transform_indices = @transform_3, window_bounds = array<i64: 8, 24>}, {pipeline_mode = #tpu.pipeline_mode<synchronous>, transform_indices = @transform_4, window_bounds = array<i64: 8, 1>}, {transform_indices = @transform_5, window_bounds = array<i64: 1, 8, 256>}]} {
    %c256_i32 = arith.constant 256 : i32
    %0 = arith.muli %arg1, %c256_i32 : i32
    %1 = tpu.assume_multiple %0, 128 : i32
    %c0 = arith.constant 0 : index
    %c0_0 = arith.constant 0 : index
    %2 = arith.index_cast %1 : i32 to index
    %3 = vector.load %arg2[%c0, %c0_0, %2] : memref<1x8x260xbf16, #tpu.memory_space<vmem>>, vector<1x8x260xbf16>
    %4 = vector.shape_cast %3 : vector<1x8x260xbf16> to vector<8x260xbf16>
    %5 = arith.extf %4 : vector<8x260xbf16> to vector<8x260xf32>
    %6 = vector.extract_strided_slice %5 {offsets = [0, 2], sizes = [8, 256], strides = [1, 1]} : vector<8x260xf32> to vector<8x256xf32>
    %cst = arith.constant 0.000000e+00 : f32
    %7 = vector.broadcast %cst : f32 to vector<8x260xf32>
    %8 = arith.cmpf oge, %5, %7 : vector<8x260xf32>
    %cst_1 = arith.constant 1.000000e-01 : f32
    %9 = vector.broadcast %cst_1 : f32 to vector<8x260xf32>
    %10 = arith.mulf %9, %5 : vector<8x260xf32>
    %11 = arith.select %8, %5, %10 : vector<8x260xi1>, vector<8x260xf32>
    %12 = arith.truncf %11 : vector<8x260xf32> to vector<8x260xbf16>
    %13 = vector.extract_strided_slice %12 {offsets = [0, 0], sizes = [8, 258], strides = [1, 1]} : vector<8x260xbf16> to vector<8x258xbf16>
    %14 = vector.extract_strided_slice %12 {offsets = [0, 1], sizes = [8, 258], strides = [1, 1]} : vector<8x260xbf16> to vector<8x258xbf16>
    %15 = vector.extract_strided_slice %12 {offsets = [0, 2], sizes = [8, 258], strides = [1, 1]} : vector<8x260xbf16> to vector<8x258xbf16>
    %16 = tpu.concatenate %13, %14, %15 in 0 : vector<8x258xbf16>, vector<8x258xbf16>, vector<8x258xbf16> -> vector<24x258xbf16>
    %c0_2 = arith.constant 0 : index
    %c0_3 = arith.constant 0 : index
    %17 = vector.load %arg3[%c0_2, %c0_3] : memref<8x24xbf16, #tpu.memory_space<vmem>>, vector<8x24xbf16>
    %cst_4 = arith.constant dense<0.000000e+00> : vector<8x258xf32>
    %18 = tpu.matmul %17, %16, %cst_4 {dimension_numbers = #tpu.dot_dimension_numbers<[1], [0], [0], [1], [0, 0, 1, 1], [], []>} : vector<8x24xbf16>, vector<24x258xbf16>, vector<8x258xf32> -> vector<8x258xf32>
    %c0_5 = arith.constant 0 : index
    %c0_6 = arith.constant 0 : index
    %19 = vector.load %arg4[%c0_5, %c0_6] : memref<8x1xf32, #tpu.memory_space<vmem>>, vector<8x1xf32>
    %20 = vector.broadcast %19 : vector<8x1xf32> to vector<8x258xf32>
    %21 = arith.addf %18, %20 : vector<8x258xf32>
    %c1_i32 = arith.constant 1 : i32
    %22 = arith.subi %1, %c1_i32 : i32
    %23 = tpu.iota {dimensions = array<i32: 1>} : vector<1x258xi32>
    %24 = vector.broadcast %22 : i32 to vector<1x258xi32>
    %25 = arith.addi %24, %23 : vector<1x258xi32>
    %c0_i32 = arith.constant 0 : i32
    %26 = vector.broadcast %c0_i32 : i32 to vector<1x258xi32>
    %27 = arith.cmpi sge, %25, %26 : vector<1x258xi32>
    %c192_i32 = arith.constant 192 : i32
    %28 = vector.broadcast %c192_i32 : i32 to vector<1x258xi32>
    %29 = arith.cmpi slt, %25, %28 : vector<1x258xi32>
    %30 = arith.andi %27, %29 : vector<1x258xi1>
    %cst_7 = arith.constant 0.000000e+00 : f32
    %31 = vector.shape_cast %30 : vector<1x258xi1> to vector<1x258xi1>
    %32 = vector.broadcast %31 : vector<1x258xi1> to vector<8x258xi1>
    %33 = vector.broadcast %cst_7 : f32 to vector<8x258xf32>
    %34 = arith.select %32, %21, %33 : vector<8x258xi1>, vector<8x258xf32>
    %cst_8 = arith.constant 0.000000e+00 : f32
    %35 = vector.broadcast %cst_8 : f32 to vector<8x258xf32>
    %36 = arith.cmpf oge, %34, %35 : vector<8x258xf32>
    %cst_9 = arith.constant 1.000000e-01 : f32
    %37 = vector.broadcast %cst_9 : f32 to vector<8x258xf32>
    %38 = arith.mulf %37, %34 : vector<8x258xf32>
    %39 = arith.select %36, %34, %38 : vector<8x258xi1>, vector<8x258xf32>
    %40 = arith.truncf %39 : vector<8x258xf32> to vector<8x258xbf16>
    %41 = vector.extract_strided_slice %40 {offsets = [0, 0], sizes = [8, 256], strides = [1, 1]} : vector<8x258xbf16> to vector<8x256xbf16>
    %42 = vector.extract_strided_slice %40 {offsets = [0, 1], sizes = [8, 256], strides = [1, 1]} : vector<8x258xbf16> to vector<8x256xbf16>
    %43 = vector.extract_strided_slice %40 {offsets = [0, 2], sizes = [8, 256], strides = [1, 1]} : vector<8x258xbf16> to vector<8x256xbf16>
    %44 = tpu.concatenate %41, %42, %43 in 0 : vector<8x256xbf16>, vector<8x256xbf16>, vector<8x256xbf16> -> vector<24x256xbf16>
    %c0_10 = arith.constant 0 : index
    %c0_11 = arith.constant 0 : index
    %45 = vector.load %arg5[%c0_10, %c0_11] : memref<8x24xbf16, #tpu.memory_space<vmem>>, vector<8x24xbf16>
    %cst_12 = arith.constant dense<0.000000e+00> : vector<8x256xf32>
    %46 = tpu.matmul %45, %44, %cst_12 {dimension_numbers = #tpu.dot_dimension_numbers<[1], [0], [0], [1], [0, 0, 1, 1], [], []>} : vector<8x24xbf16>, vector<24x256xbf16>, vector<8x256xf32> -> vector<8x256xf32>
    %c0_13 = arith.constant 0 : index
    %c0_14 = arith.constant 0 : index
    %47 = vector.load %arg6[%c0_13, %c0_14] : memref<8x1xf32, #tpu.memory_space<vmem>>, vector<8x1xf32>
    %48 = vector.broadcast %47 : vector<8x1xf32> to vector<8x256xf32>
    %49 = arith.addf %46, %48 : vector<8x256xf32>
    %50 = arith.addf %49, %6 : vector<8x256xf32>
    %51 = arith.truncf %50 : vector<8x256xf32> to vector<8x256xbf16>
    %c0_15 = arith.constant 0 : index
    %c0_16 = arith.constant 0 : index
    %c0_17 = arith.constant 0 : index
    %52 = vector.load %arg7[%c0_15, %c0_16, %c0_17] : memref<1x8x256xbf16, #tpu.memory_space<vmem>>, vector<1x8x256xbf16>
    %53 = vector.shape_cast %52 : vector<1x8x256xbf16> to vector<8x256xbf16>
    %54 = vector.shape_cast %51 : vector<8x256xbf16> to vector<1x8x256xbf16>
    tpu.vector_store %arg7[%c0_15, %c0_16, %c0_17], %54 {strides = array<i32>} : memref<1x8x256xbf16, #tpu.memory_space<vmem>>, vector<1x8x256xbf16>,
    return
  }
  func.func @transform_0(%arg0: i32, %arg1: i32) -> (i32, i32, i32) {
    %c0_i32 = arith.constant 0 : i32
    %c0_i32_0 = arith.constant 0 : i32
    %c0_i32_1 = arith.constant 0 : i32
    return %arg0, %c0_i32, %c0_i32_0 : i32, i32, i32
  }
  func.func @transform_1(%arg0: i32, %arg1: i32) -> (i32, i32) {
    %c0_i32 = arith.constant 0 : i32
    %c0_i32_0 = arith.constant 0 : i32
    %c0_i32_1 = arith.constant 0 : i32
    return %c0_i32, %c0_i32_0 : i32, i32
  }
  func.func @transform_2(%arg0: i32, %arg1: i32) -> (i32, i32) {
    %c0_i32 = arith.constant 0 : i32
    %c0_i32_0 = arith.constant 0 : i32
    %c0_i32_1 = arith.constant 0 : i32
    return %c0_i32, %c0_i32_0 : i32, i32
  }
  func.func @transform_3(%arg0: i32, %arg1: i32) -> (i32, i32) {
    %c0_i32 = arith.constant 0 : i32
    %c0_i32_0 = arith.constant 0 : i32
    %c0_i32_1 = arith.constant 0 : i32
    return %c0_i32, %c0_i32_0 : i32, i32
  }
  func.func @transform_4(%arg0: i32, %arg1: i32) -> (i32, i32) {
    %c0_i32 = arith.constant 0 : i32
    %c0_i32_0 = arith.constant 0 : i32
    %c0_i32_1 = arith.constant 0 : i32
    return %c0_i32, %c0_i32_0 : i32, i32
  }
  func.func @transform_5(%arg0: i32, %arg1: i32) -> (i32, i32, i32) {
    %c0_i32 = arith.constant 0 : i32
    %c0_i32_0 = arith.constant 0 : i32
    return %arg0, %c0_i32, %arg1 : i32, i32, i32
  }
}

module attributes {stable_mosaic.version = 11 : i64} {
  func.func @_res_pair_kernel(%arg0: i32, %arg1: i32, %arg2: memref<1x8x268xbf16, #tpu.memory_space<vmem>>, %arg3: memref<8x24xbf16, #tpu.memory_space<vmem>>, %arg4: memref<8x1xf32, #tpu.memory_space<vmem>>, %arg5: memref<8x24xbf16, #tpu.memory_space<vmem>>, %arg6: memref<8x1xf32, #tpu.memory_space<vmem>>, %arg7: memref<1x8x256xbf16, #tpu.memory_space<vmem>>) attributes {dimension_semantics = [#tpu.dimension_semantics<parallel>, #tpu.dimension_semantics<parallel>], iteration_bounds = array<i64: 2, 1>, scalar_prefetch = 0 : i64, scratch_operands = 0 : i64, tpu.core_type = #tpu.core_type<tc>, window_params = [{transform_indices = @transform_0, window_bounds = array<i64: 1, 8, 268>}, {pipeline_mode = #tpu.pipeline_mode<synchronous>, transform_indices = @transform_1, window_bounds = array<i64: 8, 24>}, {pipeline_mode = #tpu.pipeline_mode<synchronous>, transform_indices = @transform_2, window_bounds = array<i64: 8, 1>}, {pipeline_mode = #tpu.pipeline_mode<synchronous>, transform_indices = @transform_3, window_bounds = array<i64: 8, 24>}, {pipeline_mode = #tpu.pipeline_mode<synchronous>, transform_indices = @transform_4, window_bounds = array<i64: 8, 1>}, {transform_indices = @transform_5, window_bounds = array<i64: 1, 8, 256>}]} {
    %c256_i32 = arith.constant 256 : i32
    %0 = arith.muli %arg1, %c256_i32 : i32
    %1 = tpu.assume_multiple %0, 128 : i32
    %c0 = arith.constant 0 : index
    %c0_0 = arith.constant 0 : index
    %2 = arith.index_cast %1 : i32 to index
    %3 = vector.load %arg2[%c0, %c0_0, %2] : memref<1x8x268xbf16, #tpu.memory_space<vmem>>, vector<1x8x268xbf16>
    %4 = vector.shape_cast %3 : vector<1x8x268xbf16> to vector<8x268xbf16>
    %5 = arith.extf %4 : vector<8x268xbf16> to vector<8x268xf32>
    %6 = vector.extract_strided_slice %5 {offsets = [0, 6], sizes = [8, 256], strides = [1, 1]} : vector<8x268xf32> to vector<8x256xf32>
    %cst = arith.constant 0.000000e+00 : f32
    %7 = vector.broadcast %cst : f32 to vector<8x268xf32>
    %8 = arith.cmpf oge, %5, %7 : vector<8x268xf32>
    %cst_1 = arith.constant 1.000000e-01 : f32
    %9 = vector.broadcast %cst_1 : f32 to vector<8x268xf32>
    %10 = arith.mulf %9, %5 : vector<8x268xf32>
    %11 = arith.select %8, %5, %10 : vector<8x268xi1>, vector<8x268xf32>
    %12 = arith.truncf %11 : vector<8x268xf32> to vector<8x268xbf16>
    %13 = vector.extract_strided_slice %12 {offsets = [0, 0], sizes = [8, 258], strides = [1, 1]} : vector<8x268xbf16> to vector<8x258xbf16>
    %14 = vector.extract_strided_slice %12 {offsets = [0, 5], sizes = [8, 258], strides = [1, 1]} : vector<8x268xbf16> to vector<8x258xbf16>
    %15 = vector.extract_strided_slice %12 {offsets = [0, 10], sizes = [8, 258], strides = [1, 1]} : vector<8x268xbf16> to vector<8x258xbf16>
    %16 = tpu.concatenate %13, %14, %15 in 0 : vector<8x258xbf16>, vector<8x258xbf16>, vector<8x258xbf16> -> vector<24x258xbf16>
    %c0_2 = arith.constant 0 : index
    %c0_3 = arith.constant 0 : index
    %17 = vector.load %arg3[%c0_2, %c0_3] : memref<8x24xbf16, #tpu.memory_space<vmem>>, vector<8x24xbf16>
    %cst_4 = arith.constant dense<0.000000e+00> : vector<8x258xf32>
    %18 = tpu.matmul %17, %16, %cst_4 {dimension_numbers = #tpu.dot_dimension_numbers<[1], [0], [0], [1], [0, 0, 1, 1], [], []>} : vector<8x24xbf16>, vector<24x258xbf16>, vector<8x258xf32> -> vector<8x258xf32>
    %c0_5 = arith.constant 0 : index
    %c0_6 = arith.constant 0 : index
    %19 = vector.load %arg4[%c0_5, %c0_6] : memref<8x1xf32, #tpu.memory_space<vmem>>, vector<8x1xf32>
    %20 = vector.broadcast %19 : vector<8x1xf32> to vector<8x258xf32>
    %21 = arith.addf %18, %20 : vector<8x258xf32>
    %c1_i32 = arith.constant 1 : i32
    %22 = arith.subi %1, %c1_i32 : i32
    %23 = tpu.iota {dimensions = array<i32: 1>} : vector<1x258xi32>
    %24 = vector.broadcast %22 : i32 to vector<1x258xi32>
    %25 = arith.addi %24, %23 : vector<1x258xi32>
    %c0_i32 = arith.constant 0 : i32
    %26 = vector.broadcast %c0_i32 : i32 to vector<1x258xi32>
    %27 = arith.cmpi sge, %25, %26 : vector<1x258xi32>
    %c192_i32 = arith.constant 192 : i32
    %28 = vector.broadcast %c192_i32 : i32 to vector<1x258xi32>
    %29 = arith.cmpi slt, %25, %28 : vector<1x258xi32>
    %30 = arith.andi %27, %29 : vector<1x258xi1>
    %cst_7 = arith.constant 0.000000e+00 : f32
    %31 = vector.shape_cast %30 : vector<1x258xi1> to vector<1x258xi1>
    %32 = vector.broadcast %31 : vector<1x258xi1> to vector<8x258xi1>
    %33 = vector.broadcast %cst_7 : f32 to vector<8x258xf32>
    %34 = arith.select %32, %21, %33 : vector<8x258xi1>, vector<8x258xf32>
    %cst_8 = arith.constant 0.000000e+00 : f32
    %35 = vector.broadcast %cst_8 : f32 to vector<8x258xf32>
    %36 = arith.cmpf oge, %34, %35 : vector<8x258xf32>
    %cst_9 = arith.constant 1.000000e-01 : f32
    %37 = vector.broadcast %cst_9 : f32 to vector<8x258xf32>
    %38 = arith.mulf %37, %34 : vector<8x258xf32>
    %39 = arith.select %36, %34, %38 : vector<8x258xi1>, vector<8x258xf32>
    %40 = arith.truncf %39 : vector<8x258xf32> to vector<8x258xbf16>
    %41 = vector.extract_strided_slice %40 {offsets = [0, 0], sizes = [8, 256], strides = [1, 1]} : vector<8x258xbf16> to vector<8x256xbf16>
    %42 = vector.extract_strided_slice %40 {offsets = [0, 1], sizes = [8, 256], strides = [1, 1]} : vector<8x258xbf16> to vector<8x256xbf16>
    %43 = vector.extract_strided_slice %40 {offsets = [0, 2], sizes = [8, 256], strides = [1, 1]} : vector<8x258xbf16> to vector<8x256xbf16>
    %44 = tpu.concatenate %41, %42, %43 in 0 : vector<8x256xbf16>, vector<8x256xbf16>, vector<8x256xbf16> -> vector<24x256xbf16>
    %c0_10 = arith.constant 0 : index
    %c0_11 = arith.constant 0 : index
    %45 = vector.load %arg5[%c0_10, %c0_11] : memref<8x24xbf16, #tpu.memory_space<vmem>>, vector<8x24xbf16>
    %cst_12 = arith.constant dense<0.000000e+00> : vector<8x256xf32>
    %46 = tpu.matmul %45, %44, %cst_12 {dimension_numbers = #tpu.dot_dimension_numbers<[1], [0], [0], [1], [0, 0, 1, 1], [], []>} : vector<8x24xbf16>, vector<24x256xbf16>, vector<8x256xf32> -> vector<8x256xf32>
    %c0_13 = arith.constant 0 : index
    %c0_14 = arith.constant 0 : index
    %47 = vector.load %arg6[%c0_13, %c0_14] : memref<8x1xf32, #tpu.memory_space<vmem>>, vector<8x1xf32>
    %48 = vector.broadcast %47 : vector<8x1xf32> to vector<8x256xf32>
    %49 = arith.addf %46, %48 : vector<8x256xf32>
    %50 = arith.addf %49, %6 : vector<8x256xf32>
    %51 = arith.truncf %50 : vector<8x256xf32> to vector<8x256xbf16>
    %c0_15 = arith.constant 0 : index
    %c0_16 = arith.constant 0 : index
    %c0_17 = arith.constant 0 : index
    %52 = vector.load %arg7[%c0_15, %c0_16, %c0_17] : memref<1x8x256xbf16, #tpu.memory_space<vmem>>, vector<1x8x256xbf16>
    %53 = vector.shape_cast %52 : vector<1x8x256xbf16> to vector<8x256xbf16>
    %54 = vector.shape_cast %51 : vector<8x256xbf16> to vector<1x8x256xbf16>
    tpu.vector_store %arg7[%c0_15, %c0_16, %c0_17], %54 {strides = array<i32>} : memref<1x8x256xbf16, #tpu.memory_space<vmem>>, vector<1x8x256xbf16>,
    return
  }
  func.func @transform_0(%arg0: i32, %arg1: i32) -> (i32, i32, i32) {
    %c0_i32 = arith.constant 0 : i32
    %c0_i32_0 = arith.constant 0 : i32
    %c0_i32_1 = arith.constant 0 : i32
    return %arg0, %c0_i32, %c0_i32_0 : i32, i32, i32
  }
  func.func @transform_1(%arg0: i32, %arg1: i32) -> (i32, i32) {
    %c0_i32 = arith.constant 0 : i32
    %c0_i32_0 = arith.constant 0 : i32
    %c0_i32_1 = arith.constant 0 : i32
    return %c0_i32, %c0_i32_0 : i32, i32
  }
  func.func @transform_2(%arg0: i32, %arg1: i32) -> (i32, i32) {
    %c0_i32 = arith.constant 0 : i32
    %c0_i32_0 = arith.constant 0 : i32
    %c0_i32_1 = arith.constant 0 : i32
    return %c0_i32, %c0_i32_0 : i32, i32
  }
  func.func @transform_3(%arg0: i32, %arg1: i32) -> (i32, i32) {
    %c0_i32 = arith.constant 0 : i32
    %c0_i32_0 = arith.constant 0 : i32
    %c0_i32_1 = arith.constant 0 : i32
    return %c0_i32, %c0_i32_0 : i32, i32
  }
  func.func @transform_4(%arg0: i32, %arg1: i32) -> (i32, i32) {
    %c0_i32 = arith.constant 0 : i32
    %c0_i32_0 = arith.constant 0 : i32
    %c0_i32_1 = arith.constant 0 : i32
    return %c0_i32, %c0_i32_0 : i32, i32
  }
  func.func @transform_5(%arg0: i32, %arg1: i32) -> (i32, i32, i32) {
    %c0_i32 = arith.constant 0 : i32
    %c0_i32_0 = arith.constant 0 : i32
    return %arg0, %c0_i32, %arg1 : i32, i32, i32
  }
}

module attributes {stable_mosaic.version = 11 : i64} {
  func.func @_res_pair_kernel(%arg0: i32, %arg1: i32, %arg2: memref<1x8x264xbf16, #tpu.memory_space<vmem>>, %arg3: memref<8x40xbf16, #tpu.memory_space<vmem>>, %arg4: memref<8x1xf32, #tpu.memory_space<vmem>>, %arg5: memref<8x40xbf16, #tpu.memory_space<vmem>>, %arg6: memref<8x1xf32, #tpu.memory_space<vmem>>, %arg7: memref<1x8x256xbf16, #tpu.memory_space<vmem>>) attributes {dimension_semantics = [#tpu.dimension_semantics<parallel>, #tpu.dimension_semantics<parallel>], iteration_bounds = array<i64: 2, 1>, scalar_prefetch = 0 : i64, scratch_operands = 0 : i64, tpu.core_type = #tpu.core_type<tc>, window_params = [{transform_indices = @transform_0, window_bounds = array<i64: 1, 8, 264>}, {pipeline_mode = #tpu.pipeline_mode<synchronous>, transform_indices = @transform_1, window_bounds = array<i64: 8, 40>}, {pipeline_mode = #tpu.pipeline_mode<synchronous>, transform_indices = @transform_2, window_bounds = array<i64: 8, 1>}, {pipeline_mode = #tpu.pipeline_mode<synchronous>, transform_indices = @transform_3, window_bounds = array<i64: 8, 40>}, {pipeline_mode = #tpu.pipeline_mode<synchronous>, transform_indices = @transform_4, window_bounds = array<i64: 8, 1>}, {transform_indices = @transform_5, window_bounds = array<i64: 1, 8, 256>}]} {
    %c256_i32 = arith.constant 256 : i32
    %0 = arith.muli %arg1, %c256_i32 : i32
    %1 = tpu.assume_multiple %0, 128 : i32
    %c0 = arith.constant 0 : index
    %c0_0 = arith.constant 0 : index
    %2 = arith.index_cast %1 : i32 to index
    %3 = vector.load %arg2[%c0, %c0_0, %2] : memref<1x8x264xbf16, #tpu.memory_space<vmem>>, vector<1x8x264xbf16>
    %4 = vector.shape_cast %3 : vector<1x8x264xbf16> to vector<8x264xbf16>
    %5 = arith.extf %4 : vector<8x264xbf16> to vector<8x264xf32>
    %6 = vector.extract_strided_slice %5 {offsets = [0, 4], sizes = [8, 256], strides = [1, 1]} : vector<8x264xf32> to vector<8x256xf32>
    %cst = arith.constant 0.000000e+00 : f32
    %7 = vector.broadcast %cst : f32 to vector<8x264xf32>
    %8 = arith.cmpf oge, %5, %7 : vector<8x264xf32>
    %cst_1 = arith.constant 1.000000e-01 : f32
    %9 = vector.broadcast %cst_1 : f32 to vector<8x264xf32>
    %10 = arith.mulf %9, %5 : vector<8x264xf32>
    %11 = arith.select %8, %5, %10 : vector<8x264xi1>, vector<8x264xf32>
    %12 = arith.truncf %11 : vector<8x264xf32> to vector<8x264xbf16>
    %13 = vector.extract_strided_slice %12 {offsets = [0, 0], sizes = [8, 260], strides = [1, 1]} : vector<8x264xbf16> to vector<8x260xbf16>
    %14 = vector.extract_strided_slice %12 {offsets = [0, 1], sizes = [8, 260], strides = [1, 1]} : vector<8x264xbf16> to vector<8x260xbf16>
    %15 = vector.extract_strided_slice %12 {offsets = [0, 2], sizes = [8, 260], strides = [1, 1]} : vector<8x264xbf16> to vector<8x260xbf16>
    %16 = vector.extract_strided_slice %12 {offsets = [0, 3], sizes = [8, 260], strides = [1, 1]} : vector<8x264xbf16> to vector<8x260xbf16>
    %17 = vector.extract_strided_slice %12 {offsets = [0, 4], sizes = [8, 260], strides = [1, 1]} : vector<8x264xbf16> to vector<8x260xbf16>
    %18 = tpu.concatenate %13, %14, %15, %16, %17 in 0 : vector<8x260xbf16>, vector<8x260xbf16>, vector<8x260xbf16>, vector<8x260xbf16>, vector<8x260xbf16> -> vector<40x260xbf16>
    %c0_2 = arith.constant 0 : index
    %c0_3 = arith.constant 0 : index
    %19 = vector.load %arg3[%c0_2, %c0_3] : memref<8x40xbf16, #tpu.memory_space<vmem>>, vector<8x40xbf16>
    %cst_4 = arith.constant dense<0.000000e+00> : vector<8x260xf32>
    %20 = tpu.matmul %19, %18, %cst_4 {dimension_numbers = #tpu.dot_dimension_numbers<[1], [0], [0], [1], [0, 0, 1, 1], [], []>} : vector<8x40xbf16>, vector<40x260xbf16>, vector<8x260xf32> -> vector<8x260xf32>
    %c0_5 = arith.constant 0 : index
    %c0_6 = arith.constant 0 : index
    %21 = vector.load %arg4[%c0_5, %c0_6] : memref<8x1xf32, #tpu.memory_space<vmem>>, vector<8x1xf32>
    %22 = vector.broadcast %21 : vector<8x1xf32> to vector<8x260xf32>
    %23 = arith.addf %20, %22 : vector<8x260xf32>
    %c2_i32 = arith.constant 2 : i32
    %24 = arith.subi %1, %c2_i32 : i32
    %25 = tpu.iota {dimensions = array<i32: 1>} : vector<1x260xi32>
    %26 = vector.broadcast %24 : i32 to vector<1x260xi32>
    %27 = arith.addi %26, %25 : vector<1x260xi32>
    %c0_i32 = arith.constant 0 : i32
    %28 = vector.broadcast %c0_i32 : i32 to vector<1x260xi32>
    %29 = arith.cmpi sge, %27, %28 : vector<1x260xi32>
    %c192_i32 = arith.constant 192 : i32
    %30 = vector.broadcast %c192_i32 : i32 to vector<1x260xi32>
    %31 = arith.cmpi slt, %27, %30 : vector<1x260xi32>
    %32 = arith.andi %29, %31 : vector<1x260xi1>
    %cst_7 = arith.constant 0.000000e+00 : f32
    %33 = vector.shape_cast %32 : vector<1x260xi1> to vector<1x260xi1>
    %34 = vector.broadcast %33 : vector<1x260xi1> to vector<8x260xi1>
    %35 = vector.broadcast %cst_7 : f32 to vector<8x260xf32>
    %36 = arith.select %34, %23, %35 : vector<8x260xi1>, vector<8x260xf32>
    %cst_8 = arith.constant 0.000000e+00 : f32
    %37 = vector.broadcast %cst_8 : f32 to vector<8x260xf32>
    %38 = arith.cmpf oge, %36, %37 : vector<8x260xf32>
    %cst_9 = arith.constant 1.000000e-01 : f32
    %39 = vector.broadcast %cst_9 : f32 to vector<8x260xf32>
    %40 = arith.mulf %39, %36 : vector<8x260xf32>
    %41 = arith.select %38, %36, %40 : vector<8x260xi1>, vector<8x260xf32>
    %42 = arith.truncf %41 : vector<8x260xf32> to vector<8x260xbf16>
    %43 = vector.extract_strided_slice %42 {offsets = [0, 0], sizes = [8, 256], strides = [1, 1]} : vector<8x260xbf16> to vector<8x256xbf16>
    %44 = vector.extract_strided_slice %42 {offsets = [0, 1], sizes = [8, 256], strides = [1, 1]} : vector<8x260xbf16> to vector<8x256xbf16>
    %45 = vector.extract_strided_slice %42 {offsets = [0, 2], sizes = [8, 256], strides = [1, 1]} : vector<8x260xbf16> to vector<8x256xbf16>
    %46 = vector.extract_strided_slice %42 {offsets = [0, 3], sizes = [8, 256], strides = [1, 1]} : vector<8x260xbf16> to vector<8x256xbf16>
    %47 = vector.extract_strided_slice %42 {offsets = [0, 4], sizes = [8, 256], strides = [1, 1]} : vector<8x260xbf16> to vector<8x256xbf16>
    %48 = tpu.concatenate %43, %44, %45, %46, %47 in 0 : vector<8x256xbf16>, vector<8x256xbf16>, vector<8x256xbf16>, vector<8x256xbf16>, vector<8x256xbf16> -> vector<40x256xbf16>
    %c0_10 = arith.constant 0 : index
    %c0_11 = arith.constant 0 : index
    %49 = vector.load %arg5[%c0_10, %c0_11] : memref<8x40xbf16, #tpu.memory_space<vmem>>, vector<8x40xbf16>
    %cst_12 = arith.constant dense<0.000000e+00> : vector<8x256xf32>
    %50 = tpu.matmul %49, %48, %cst_12 {dimension_numbers = #tpu.dot_dimension_numbers<[1], [0], [0], [1], [0, 0, 1, 1], [], []>} : vector<8x40xbf16>, vector<40x256xbf16>, vector<8x256xf32> -> vector<8x256xf32>
    %c0_13 = arith.constant 0 : index
    %c0_14 = arith.constant 0 : index
    %51 = vector.load %arg6[%c0_13, %c0_14] : memref<8x1xf32, #tpu.memory_space<vmem>>, vector<8x1xf32>
    %52 = vector.broadcast %51 : vector<8x1xf32> to vector<8x256xf32>
    %53 = arith.addf %50, %52 : vector<8x256xf32>
    %54 = arith.addf %53, %6 : vector<8x256xf32>
    %55 = arith.truncf %54 : vector<8x256xf32> to vector<8x256xbf16>
    %c0_15 = arith.constant 0 : index
    %c0_16 = arith.constant 0 : index
    %c0_17 = arith.constant 0 : index
    %56 = vector.load %arg7[%c0_15, %c0_16, %c0_17] : memref<1x8x256xbf16, #tpu.memory_space<vmem>>, vector<1x8x256xbf16>
    %57 = vector.shape_cast %56 : vector<1x8x256xbf16> to vector<8x256xbf16>
    %58 = vector.shape_cast %55 : vector<8x256xbf16> to vector<1x8x256xbf16>
    tpu.vector_store %arg7[%c0_15, %c0_16, %c0_17], %58 {strides = array<i32>} : memref<1x8x256xbf16, #tpu.memory_space<vmem>>, vector<1x8x256xbf16>,
    return
  }
  func.func @transform_0(%arg0: i32, %arg1: i32) -> (i32, i32, i32) {
    %c0_i32 = arith.constant 0 : i32
    %c0_i32_0 = arith.constant 0 : i32
    %c0_i32_1 = arith.constant 0 : i32
    return %arg0, %c0_i32, %c0_i32_0 : i32, i32, i32
  }
  func.func @transform_1(%arg0: i32, %arg1: i32) -> (i32, i32) {
    %c0_i32 = arith.constant 0 : i32
    %c0_i32_0 = arith.constant 0 : i32
    %c0_i32_1 = arith.constant 0 : i32
    return %c0_i32, %c0_i32_0 : i32, i32
  }
  func.func @transform_2(%arg0: i32, %arg1: i32) -> (i32, i32) {
    %c0_i32 = arith.constant 0 : i32
    %c0_i32_0 = arith.constant 0 : i32
    %c0_i32_1 = arith.constant 0 : i32
    return %c0_i32, %c0_i32_0 : i32, i32
  }
  func.func @transform_3(%arg0: i32, %arg1: i32) -> (i32, i32) {
    %c0_i32 = arith.constant 0 : i32
    %c0_i32_0 = arith.constant 0 : i32
    %c0_i32_1 = arith.constant 0 : i32
    return %c0_i32, %c0_i32_0 : i32, i32
  }
  func.func @transform_4(%arg0: i32, %arg1: i32) -> (i32, i32) {
    %c0_i32 = arith.constant 0 : i32
    %c0_i32_0 = arith.constant 0 : i32
    %c0_i32_1 = arith.constant 0 : i32
    return %c0_i32, %c0_i32_0 : i32, i32
  }
  func.func @transform_5(%arg0: i32, %arg1: i32) -> (i32, i32, i32) {
    %c0_i32 = arith.constant 0 : i32
    %c0_i32_0 = arith.constant 0 : i32
    return %arg0, %c0_i32, %arg1 : i32, i32, i32
  }
}

module attributes {stable_mosaic.version = 11 : i64} {
  func.func @_res_pair_kernel(%arg0: i32, %arg1: i32, %arg2: memref<1x8x272xbf16, #tpu.memory_space<vmem>>, %arg3: memref<8x40xbf16, #tpu.memory_space<vmem>>, %arg4: memref<8x1xf32, #tpu.memory_space<vmem>>, %arg5: memref<8x40xbf16, #tpu.memory_space<vmem>>, %arg6: memref<8x1xf32, #tpu.memory_space<vmem>>, %arg7: memref<1x8x256xbf16, #tpu.memory_space<vmem>>) attributes {dimension_semantics = [#tpu.dimension_semantics<parallel>, #tpu.dimension_semantics<parallel>], iteration_bounds = array<i64: 2, 1>, scalar_prefetch = 0 : i64, scratch_operands = 0 : i64, tpu.core_type = #tpu.core_type<tc>, window_params = [{transform_indices = @transform_0, window_bounds = array<i64: 1, 8, 272>}, {pipeline_mode = #tpu.pipeline_mode<synchronous>, transform_indices = @transform_1, window_bounds = array<i64: 8, 40>}, {pipeline_mode = #tpu.pipeline_mode<synchronous>, transform_indices = @transform_2, window_bounds = array<i64: 8, 1>}, {pipeline_mode = #tpu.pipeline_mode<synchronous>, transform_indices = @transform_3, window_bounds = array<i64: 8, 40>}, {pipeline_mode = #tpu.pipeline_mode<synchronous>, transform_indices = @transform_4, window_bounds = array<i64: 8, 1>}, {transform_indices = @transform_5, window_bounds = array<i64: 1, 8, 256>}]} {
    %c256_i32 = arith.constant 256 : i32
    %0 = arith.muli %arg1, %c256_i32 : i32
    %1 = tpu.assume_multiple %0, 128 : i32
    %c0 = arith.constant 0 : index
    %c0_0 = arith.constant 0 : index
    %2 = arith.index_cast %1 : i32 to index
    %3 = vector.load %arg2[%c0, %c0_0, %2] : memref<1x8x272xbf16, #tpu.memory_space<vmem>>, vector<1x8x272xbf16>
    %4 = vector.shape_cast %3 : vector<1x8x272xbf16> to vector<8x272xbf16>
    %5 = arith.extf %4 : vector<8x272xbf16> to vector<8x272xf32>
    %6 = vector.extract_strided_slice %5 {offsets = [0, 8], sizes = [8, 256], strides = [1, 1]} : vector<8x272xf32> to vector<8x256xf32>
    %cst = arith.constant 0.000000e+00 : f32
    %7 = vector.broadcast %cst : f32 to vector<8x272xf32>
    %8 = arith.cmpf oge, %5, %7 : vector<8x272xf32>
    %cst_1 = arith.constant 1.000000e-01 : f32
    %9 = vector.broadcast %cst_1 : f32 to vector<8x272xf32>
    %10 = arith.mulf %9, %5 : vector<8x272xf32>
    %11 = arith.select %8, %5, %10 : vector<8x272xi1>, vector<8x272xf32>
    %12 = arith.truncf %11 : vector<8x272xf32> to vector<8x272xbf16>
    %13 = vector.extract_strided_slice %12 {offsets = [0, 0], sizes = [8, 260], strides = [1, 1]} : vector<8x272xbf16> to vector<8x260xbf16>
    %14 = vector.extract_strided_slice %12 {offsets = [0, 3], sizes = [8, 260], strides = [1, 1]} : vector<8x272xbf16> to vector<8x260xbf16>
    %15 = vector.extract_strided_slice %12 {offsets = [0, 6], sizes = [8, 260], strides = [1, 1]} : vector<8x272xbf16> to vector<8x260xbf16>
    %16 = vector.extract_strided_slice %12 {offsets = [0, 9], sizes = [8, 260], strides = [1, 1]} : vector<8x272xbf16> to vector<8x260xbf16>
    %17 = vector.extract_strided_slice %12 {offsets = [0, 12], sizes = [8, 260], strides = [1, 1]} : vector<8x272xbf16> to vector<8x260xbf16>
    %18 = tpu.concatenate %13, %14, %15, %16, %17 in 0 : vector<8x260xbf16>, vector<8x260xbf16>, vector<8x260xbf16>, vector<8x260xbf16>, vector<8x260xbf16> -> vector<40x260xbf16>
    %c0_2 = arith.constant 0 : index
    %c0_3 = arith.constant 0 : index
    %19 = vector.load %arg3[%c0_2, %c0_3] : memref<8x40xbf16, #tpu.memory_space<vmem>>, vector<8x40xbf16>
    %cst_4 = arith.constant dense<0.000000e+00> : vector<8x260xf32>
    %20 = tpu.matmul %19, %18, %cst_4 {dimension_numbers = #tpu.dot_dimension_numbers<[1], [0], [0], [1], [0, 0, 1, 1], [], []>} : vector<8x40xbf16>, vector<40x260xbf16>, vector<8x260xf32> -> vector<8x260xf32>
    %c0_5 = arith.constant 0 : index
    %c0_6 = arith.constant 0 : index
    %21 = vector.load %arg4[%c0_5, %c0_6] : memref<8x1xf32, #tpu.memory_space<vmem>>, vector<8x1xf32>
    %22 = vector.broadcast %21 : vector<8x1xf32> to vector<8x260xf32>
    %23 = arith.addf %20, %22 : vector<8x260xf32>
    %c2_i32 = arith.constant 2 : i32
    %24 = arith.subi %1, %c2_i32 : i32
    %25 = tpu.iota {dimensions = array<i32: 1>} : vector<1x260xi32>
    %26 = vector.broadcast %24 : i32 to vector<1x260xi32>
    %27 = arith.addi %26, %25 : vector<1x260xi32>
    %c0_i32 = arith.constant 0 : i32
    %28 = vector.broadcast %c0_i32 : i32 to vector<1x260xi32>
    %29 = arith.cmpi sge, %27, %28 : vector<1x260xi32>
    %c192_i32 = arith.constant 192 : i32
    %30 = vector.broadcast %c192_i32 : i32 to vector<1x260xi32>
    %31 = arith.cmpi slt, %27, %30 : vector<1x260xi32>
    %32 = arith.andi %29, %31 : vector<1x260xi1>
    %cst_7 = arith.constant 0.000000e+00 : f32
    %33 = vector.shape_cast %32 : vector<1x260xi1> to vector<1x260xi1>
    %34 = vector.broadcast %33 : vector<1x260xi1> to vector<8x260xi1>
    %35 = vector.broadcast %cst_7 : f32 to vector<8x260xf32>
    %36 = arith.select %34, %23, %35 : vector<8x260xi1>, vector<8x260xf32>
    %cst_8 = arith.constant 0.000000e+00 : f32
    %37 = vector.broadcast %cst_8 : f32 to vector<8x260xf32>
    %38 = arith.cmpf oge, %36, %37 : vector<8x260xf32>
    %cst_9 = arith.constant 1.000000e-01 : f32
    %39 = vector.broadcast %cst_9 : f32 to vector<8x260xf32>
    %40 = arith.mulf %39, %36 : vector<8x260xf32>
    %41 = arith.select %38, %36, %40 : vector<8x260xi1>, vector<8x260xf32>
    %42 = arith.truncf %41 : vector<8x260xf32> to vector<8x260xbf16>
    %43 = vector.extract_strided_slice %42 {offsets = [0, 0], sizes = [8, 256], strides = [1, 1]} : vector<8x260xbf16> to vector<8x256xbf16>
    %44 = vector.extract_strided_slice %42 {offsets = [0, 1], sizes = [8, 256], strides = [1, 1]} : vector<8x260xbf16> to vector<8x256xbf16>
    %45 = vector.extract_strided_slice %42 {offsets = [0, 2], sizes = [8, 256], strides = [1, 1]} : vector<8x260xbf16> to vector<8x256xbf16>
    %46 = vector.extract_strided_slice %42 {offsets = [0, 3], sizes = [8, 256], strides = [1, 1]} : vector<8x260xbf16> to vector<8x256xbf16>
    %47 = vector.extract_strided_slice %42 {offsets = [0, 4], sizes = [8, 256], strides = [1, 1]} : vector<8x260xbf16> to vector<8x256xbf16>
    %48 = tpu.concatenate %43, %44, %45, %46, %47 in 0 : vector<8x256xbf16>, vector<8x256xbf16>, vector<8x256xbf16>, vector<8x256xbf16>, vector<8x256xbf16> -> vector<40x256xbf16>
    %c0_10 = arith.constant 0 : index
    %c0_11 = arith.constant 0 : index
    %49 = vector.load %arg5[%c0_10, %c0_11] : memref<8x40xbf16, #tpu.memory_space<vmem>>, vector<8x40xbf16>
    %cst_12 = arith.constant dense<0.000000e+00> : vector<8x256xf32>
    %50 = tpu.matmul %49, %48, %cst_12 {dimension_numbers = #tpu.dot_dimension_numbers<[1], [0], [0], [1], [0, 0, 1, 1], [], []>} : vector<8x40xbf16>, vector<40x256xbf16>, vector<8x256xf32> -> vector<8x256xf32>
    %c0_13 = arith.constant 0 : index
    %c0_14 = arith.constant 0 : index
    %51 = vector.load %arg6[%c0_13, %c0_14] : memref<8x1xf32, #tpu.memory_space<vmem>>, vector<8x1xf32>
    %52 = vector.broadcast %51 : vector<8x1xf32> to vector<8x256xf32>
    %53 = arith.addf %50, %52 : vector<8x256xf32>
    %54 = arith.addf %53, %6 : vector<8x256xf32>
    %55 = arith.truncf %54 : vector<8x256xf32> to vector<8x256xbf16>
    %c0_15 = arith.constant 0 : index
    %c0_16 = arith.constant 0 : index
    %c0_17 = arith.constant 0 : index
    %56 = vector.load %arg7[%c0_15, %c0_16, %c0_17] : memref<1x8x256xbf16, #tpu.memory_space<vmem>>, vector<1x8x256xbf16>
    %57 = vector.shape_cast %56 : vector<1x8x256xbf16> to vector<8x256xbf16>
    %58 = vector.shape_cast %55 : vector<8x256xbf16> to vector<1x8x256xbf16>
    tpu.vector_store %arg7[%c0_15, %c0_16, %c0_17], %58 {strides = array<i32>} : memref<1x8x256xbf16, #tpu.memory_space<vmem>>, vector<1x8x256xbf16>,
    return
  }
  func.func @transform_0(%arg0: i32, %arg1: i32) -> (i32, i32, i32) {
    %c0_i32 = arith.constant 0 : i32
    %c0_i32_0 = arith.constant 0 : i32
    %c0_i32_1 = arith.constant 0 : i32
    return %arg0, %c0_i32, %c0_i32_0 : i32, i32, i32
  }
  func.func @transform_1(%arg0: i32, %arg1: i32) -> (i32, i32) {
    %c0_i32 = arith.constant 0 : i32
    %c0_i32_0 = arith.constant 0 : i32
    %c0_i32_1 = arith.constant 0 : i32
    return %c0_i32, %c0_i32_0 : i32, i32
  }
  func.func @transform_2(%arg0: i32, %arg1: i32) -> (i32, i32) {
    %c0_i32 = arith.constant 0 : i32
    %c0_i32_0 = arith.constant 0 : i32
    %c0_i32_1 = arith.constant 0 : i32
    return %c0_i32, %c0_i32_0 : i32, i32
  }
  func.func @transform_3(%arg0: i32, %arg1: i32) -> (i32, i32) {
    %c0_i32 = arith.constant 0 : i32
    %c0_i32_0 = arith.constant 0 : i32
    %c0_i32_1 = arith.constant 0 : i32
    return %c0_i32, %c0_i32_0 : i32, i32
  }
  func.func @transform_4(%arg0: i32, %arg1: i32) -> (i32, i32) {
    %c0_i32 = arith.constant 0 : i32
    %c0_i32_0 = arith.constant 0 : i32
    %c0_i32_1 = arith.constant 0 : i32
    return %c0_i32, %c0_i32_0 : i32, i32
  }
  func.func @transform_5(%arg0: i32, %arg1: i32) -> (i32, i32, i32) {
    %c0_i32 = arith.constant 0 : i32
    %c0_i32_0 = arith.constant 0 : i32
    return %arg0, %c0_i32, %arg1 : i32, i32, i32
  }
}

module attributes {stable_mosaic.version = 11 : i64} {
  func.func @_res_pair_kernel(%arg0: i32, %arg1: i32, %arg2: memref<1x8x280xbf16, #tpu.memory_space<vmem>>, %arg3: memref<8x40xbf16, #tpu.memory_space<vmem>>, %arg4: memref<8x1xf32, #tpu.memory_space<vmem>>, %arg5: memref<8x40xbf16, #tpu.memory_space<vmem>>, %arg6: memref<8x1xf32, #tpu.memory_space<vmem>>, %arg7: memref<1x8x256xbf16, #tpu.memory_space<vmem>>) attributes {dimension_semantics = [#tpu.dimension_semantics<parallel>, #tpu.dimension_semantics<parallel>], iteration_bounds = array<i64: 2, 1>, scalar_prefetch = 0 : i64, scratch_operands = 0 : i64, tpu.core_type = #tpu.core_type<tc>, window_params = [{transform_indices = @transform_0, window_bounds = array<i64: 1, 8, 280>}, {pipeline_mode = #tpu.pipeline_mode<synchronous>, transform_indices = @transform_1, window_bounds = array<i64: 8, 40>}, {pipeline_mode = #tpu.pipeline_mode<synchronous>, transform_indices = @transform_2, window_bounds = array<i64: 8, 1>}, {pipeline_mode = #tpu.pipeline_mode<synchronous>, transform_indices = @transform_3, window_bounds = array<i64: 8, 40>}, {pipeline_mode = #tpu.pipeline_mode<synchronous>, transform_indices = @transform_4, window_bounds = array<i64: 8, 1>}, {transform_indices = @transform_5, window_bounds = array<i64: 1, 8, 256>}]} {
    %c256_i32 = arith.constant 256 : i32
    %0 = arith.muli %arg1, %c256_i32 : i32
    %1 = tpu.assume_multiple %0, 128 : i32
    %c0 = arith.constant 0 : index
    %c0_0 = arith.constant 0 : index
    %2 = arith.index_cast %1 : i32 to index
    %3 = vector.load %arg2[%c0, %c0_0, %2] : memref<1x8x280xbf16, #tpu.memory_space<vmem>>, vector<1x8x280xbf16>
    %4 = vector.shape_cast %3 : vector<1x8x280xbf16> to vector<8x280xbf16>
    %5 = arith.extf %4 : vector<8x280xbf16> to vector<8x280xf32>
    %6 = vector.extract_strided_slice %5 {offsets = [0, 12], sizes = [8, 256], strides = [1, 1]} : vector<8x280xf32> to vector<8x256xf32>
    %cst = arith.constant 0.000000e+00 : f32
    %7 = vector.broadcast %cst : f32 to vector<8x280xf32>
    %8 = arith.cmpf oge, %5, %7 : vector<8x280xf32>
    %cst_1 = arith.constant 1.000000e-01 : f32
    %9 = vector.broadcast %cst_1 : f32 to vector<8x280xf32>
    %10 = arith.mulf %9, %5 : vector<8x280xf32>
    %11 = arith.select %8, %5, %10 : vector<8x280xi1>, vector<8x280xf32>
    %12 = arith.truncf %11 : vector<8x280xf32> to vector<8x280xbf16>
    %13 = vector.extract_strided_slice %12 {offsets = [0, 0], sizes = [8, 260], strides = [1, 1]} : vector<8x280xbf16> to vector<8x260xbf16>
    %14 = vector.extract_strided_slice %12 {offsets = [0, 5], sizes = [8, 260], strides = [1, 1]} : vector<8x280xbf16> to vector<8x260xbf16>
    %15 = vector.extract_strided_slice %12 {offsets = [0, 10], sizes = [8, 260], strides = [1, 1]} : vector<8x280xbf16> to vector<8x260xbf16>
    %16 = vector.extract_strided_slice %12 {offsets = [0, 15], sizes = [8, 260], strides = [1, 1]} : vector<8x280xbf16> to vector<8x260xbf16>
    %17 = vector.extract_strided_slice %12 {offsets = [0, 20], sizes = [8, 260], strides = [1, 1]} : vector<8x280xbf16> to vector<8x260xbf16>
    %18 = tpu.concatenate %13, %14, %15, %16, %17 in 0 : vector<8x260xbf16>, vector<8x260xbf16>, vector<8x260xbf16>, vector<8x260xbf16>, vector<8x260xbf16> -> vector<40x260xbf16>
    %c0_2 = arith.constant 0 : index
    %c0_3 = arith.constant 0 : index
    %19 = vector.load %arg3[%c0_2, %c0_3] : memref<8x40xbf16, #tpu.memory_space<vmem>>, vector<8x40xbf16>
    %cst_4 = arith.constant dense<0.000000e+00> : vector<8x260xf32>
    %20 = tpu.matmul %19, %18, %cst_4 {dimension_numbers = #tpu.dot_dimension_numbers<[1], [0], [0], [1], [0, 0, 1, 1], [], []>} : vector<8x40xbf16>, vector<40x260xbf16>, vector<8x260xf32> -> vector<8x260xf32>
    %c0_5 = arith.constant 0 : index
    %c0_6 = arith.constant 0 : index
    %21 = vector.load %arg4[%c0_5, %c0_6] : memref<8x1xf32, #tpu.memory_space<vmem>>, vector<8x1xf32>
    %22 = vector.broadcast %21 : vector<8x1xf32> to vector<8x260xf32>
    %23 = arith.addf %20, %22 : vector<8x260xf32>
    %c2_i32 = arith.constant 2 : i32
    %24 = arith.subi %1, %c2_i32 : i32
    %25 = tpu.iota {dimensions = array<i32: 1>} : vector<1x260xi32>
    %26 = vector.broadcast %24 : i32 to vector<1x260xi32>
    %27 = arith.addi %26, %25 : vector<1x260xi32>
    %c0_i32 = arith.constant 0 : i32
    %28 = vector.broadcast %c0_i32 : i32 to vector<1x260xi32>
    %29 = arith.cmpi sge, %27, %28 : vector<1x260xi32>
    %c192_i32 = arith.constant 192 : i32
    %30 = vector.broadcast %c192_i32 : i32 to vector<1x260xi32>
    %31 = arith.cmpi slt, %27, %30 : vector<1x260xi32>
    %32 = arith.andi %29, %31 : vector<1x260xi1>
    %cst_7 = arith.constant 0.000000e+00 : f32
    %33 = vector.shape_cast %32 : vector<1x260xi1> to vector<1x260xi1>
    %34 = vector.broadcast %33 : vector<1x260xi1> to vector<8x260xi1>
    %35 = vector.broadcast %cst_7 : f32 to vector<8x260xf32>
    %36 = arith.select %34, %23, %35 : vector<8x260xi1>, vector<8x260xf32>
    %cst_8 = arith.constant 0.000000e+00 : f32
    %37 = vector.broadcast %cst_8 : f32 to vector<8x260xf32>
    %38 = arith.cmpf oge, %36, %37 : vector<8x260xf32>
    %cst_9 = arith.constant 1.000000e-01 : f32
    %39 = vector.broadcast %cst_9 : f32 to vector<8x260xf32>
    %40 = arith.mulf %39, %36 : vector<8x260xf32>
    %41 = arith.select %38, %36, %40 : vector<8x260xi1>, vector<8x260xf32>
    %42 = arith.truncf %41 : vector<8x260xf32> to vector<8x260xbf16>
    %43 = vector.extract_strided_slice %42 {offsets = [0, 0], sizes = [8, 256], strides = [1, 1]} : vector<8x260xbf16> to vector<8x256xbf16>
    %44 = vector.extract_strided_slice %42 {offsets = [0, 1], sizes = [8, 256], strides = [1, 1]} : vector<8x260xbf16> to vector<8x256xbf16>
    %45 = vector.extract_strided_slice %42 {offsets = [0, 2], sizes = [8, 256], strides = [1, 1]} : vector<8x260xbf16> to vector<8x256xbf16>
    %46 = vector.extract_strided_slice %42 {offsets = [0, 3], sizes = [8, 256], strides = [1, 1]} : vector<8x260xbf16> to vector<8x256xbf16>
    %47 = vector.extract_strided_slice %42 {offsets = [0, 4], sizes = [8, 256], strides = [1, 1]} : vector<8x260xbf16> to vector<8x256xbf16>
    %48 = tpu.concatenate %43, %44, %45, %46, %47 in 0 : vector<8x256xbf16>, vector<8x256xbf16>, vector<8x256xbf16>, vector<8x256xbf16>, vector<8x256xbf16> -> vector<40x256xbf16>
    %c0_10 = arith.constant 0 : index
    %c0_11 = arith.constant 0 : index
    %49 = vector.load %arg5[%c0_10, %c0_11] : memref<8x40xbf16, #tpu.memory_space<vmem>>, vector<8x40xbf16>
    %cst_12 = arith.constant dense<0.000000e+00> : vector<8x256xf32>
    %50 = tpu.matmul %49, %48, %cst_12 {dimension_numbers = #tpu.dot_dimension_numbers<[1], [0], [0], [1], [0, 0, 1, 1], [], []>} : vector<8x40xbf16>, vector<40x256xbf16>, vector<8x256xf32> -> vector<8x256xf32>
    %c0_13 = arith.constant 0 : index
    %c0_14 = arith.constant 0 : index
    %51 = vector.load %arg6[%c0_13, %c0_14] : memref<8x1xf32, #tpu.memory_space<vmem>>, vector<8x1xf32>
    %52 = vector.broadcast %51 : vector<8x1xf32> to vector<8x256xf32>
    %53 = arith.addf %50, %52 : vector<8x256xf32>
    %54 = arith.addf %53, %6 : vector<8x256xf32>
    %55 = arith.truncf %54 : vector<8x256xf32> to vector<8x256xbf16>
    %c0_15 = arith.constant 0 : index
    %c0_16 = arith.constant 0 : index
    %c0_17 = arith.constant 0 : index
    %56 = vector.load %arg7[%c0_15, %c0_16, %c0_17] : memref<1x8x256xbf16, #tpu.memory_space<vmem>>, vector<1x8x256xbf16>
    %57 = vector.shape_cast %56 : vector<1x8x256xbf16> to vector<8x256xbf16>
    %58 = vector.shape_cast %55 : vector<8x256xbf16> to vector<1x8x256xbf16>
    tpu.vector_store %arg7[%c0_15, %c0_16, %c0_17], %58 {strides = array<i32>} : memref<1x8x256xbf16, #tpu.memory_space<vmem>>, vector<1x8x256xbf16>,
    return
  }
  func.func @transform_0(%arg0: i32, %arg1: i32) -> (i32, i32, i32) {
    %c0_i32 = arith.constant 0 : i32
    %c0_i32_0 = arith.constant 0 : i32
    %c0_i32_1 = arith.constant 0 : i32
    return %arg0, %c0_i32, %c0_i32_0 : i32, i32, i32
  }
  func.func @transform_1(%arg0: i32, %arg1: i32) -> (i32, i32) {
    %c0_i32 = arith.constant 0 : i32
    %c0_i32_0 = arith.constant 0 : i32
    %c0_i32_1 = arith.constant 0 : i32
    return %c0_i32, %c0_i32_0 : i32, i32
  }
  func.func @transform_2(%arg0: i32, %arg1: i32) -> (i32, i32) {
    %c0_i32 = arith.constant 0 : i32
    %c0_i32_0 = arith.constant 0 : i32
    %c0_i32_1 = arith.constant 0 : i32
    return %c0_i32, %c0_i32_0 : i32, i32
  }
  func.func @transform_3(%arg0: i32, %arg1: i32) -> (i32, i32) {
    %c0_i32 = arith.constant 0 : i32
    %c0_i32_0 = arith.constant 0 : i32
    %c0_i32_1 = arith.constant 0 : i32
    return %c0_i32, %c0_i32_0 : i32, i32
  }
  func.func @transform_4(%arg0: i32, %arg1: i32) -> (i32, i32) {
    %c0_i32 = arith.constant 0 : i32
    %c0_i32_0 = arith.constant 0 : i32
    %c0_i32_1 = arith.constant 0 : i32
    return %c0_i32, %c0_i32_0 : i32, i32
  }
  func.func @transform_5(%arg0: i32, %arg1: i32) -> (i32, i32, i32) {
    %c0_i32 = arith.constant 0 : i32
    %c0_i32_0 = arith.constant 0 : i32
    return %arg0, %c0_i32, %arg1 : i32, i32, i32
  }
}

module attributes {stable_mosaic.version = 11 : i64} {
  func.func @_conv1d_kernel(%arg0: i32, %arg1: i32, %arg2: memref<1x8x262xbf16, #tpu.memory_space<vmem>>, %arg3: memref<1x56xbf16, #tpu.memory_space<vmem>>, %arg4: memref<1x1xf32, #tpu.memory_space<vmem>>, %arg5: memref<1x1x256xf32, #tpu.memory_space<vmem>>) attributes {dimension_semantics = [#tpu.dimension_semantics<parallel>, #tpu.dimension_semantics<parallel>], iteration_bounds = array<i64: 2, 1>, scalar_prefetch = 0 : i64, scratch_operands = 0 : i64, tpu.core_type = #tpu.core_type<tc>, window_params = [{transform_indices = @transform_0, window_bounds = array<i64: 1, 8, 262>}, {pipeline_mode = #tpu.pipeline_mode<synchronous>, transform_indices = @transform_1, window_bounds = array<i64: 1, 56>}, {pipeline_mode = #tpu.pipeline_mode<synchronous>, transform_indices = @transform_2, window_bounds = array<i64: 1, 1>}, {transform_indices = @transform_3, window_bounds = array<i64: 1, 1, 256>}]} {
    %c256_i32 = arith.constant 256 : i32
    %0 = arith.muli %arg1, %c256_i32 : i32
    %1 = tpu.assume_multiple %0, 128 : i32
    %c0 = arith.constant 0 : index
    %c0_0 = arith.constant 0 : index
    %2 = arith.index_cast %1 : i32 to index
    %3 = vector.load %arg2[%c0, %c0_0, %2] : memref<1x8x262xbf16, #tpu.memory_space<vmem>>, vector<1x8x262xbf16>
    %4 = vector.shape_cast %3 : vector<1x8x262xbf16> to vector<8x262xbf16>
    %5 = arith.extf %4 : vector<8x262xbf16> to vector<8x262xf32>
    %cst = arith.constant 0.000000e+00 : f32
    %6 = vector.broadcast %cst : f32 to vector<8x262xf32>
    %7 = arith.cmpf oge, %5, %6 : vector<8x262xf32>
    %cst_1 = arith.constant 0.00999999977 : f32
    %8 = vector.broadcast %cst_1 : f32 to vector<8x262xf32>
    %9 = arith.mulf %8, %5 : vector<8x262xf32>
    %10 = arith.select %7, %5, %9 : vector<8x262xi1>, vector<8x262xf32>
    %11 = arith.truncf %10 : vector<8x262xf32> to vector<8x262xbf16>
    %12 = vector.extract_strided_slice %11 {offsets = [0, 0], sizes = [8, 256], strides = [1, 1]} : vector<8x262xbf16> to vector<8x256xbf16>
    %13 = vector.extract_strided_slice %11 {offsets = [0, 1], sizes = [8, 256], strides = [1, 1]} : vector<8x262xbf16> to vector<8x256xbf16>
    %14 = vector.extract_strided_slice %11 {offsets = [0, 2], sizes = [8, 256], strides = [1, 1]} : vector<8x262xbf16> to vector<8x256xbf16>
    %15 = vector.extract_strided_slice %11 {offsets = [0, 3], sizes = [8, 256], strides = [1, 1]} : vector<8x262xbf16> to vector<8x256xbf16>
    %16 = vector.extract_strided_slice %11 {offsets = [0, 4], sizes = [8, 256], strides = [1, 1]} : vector<8x262xbf16> to vector<8x256xbf16>
    %17 = vector.extract_strided_slice %11 {offsets = [0, 5], sizes = [8, 256], strides = [1, 1]} : vector<8x262xbf16> to vector<8x256xbf16>
    %18 = vector.extract_strided_slice %11 {offsets = [0, 6], sizes = [8, 256], strides = [1, 1]} : vector<8x262xbf16> to vector<8x256xbf16>
    %19 = tpu.concatenate %12, %13, %14, %15, %16, %17, %18 in 0 : vector<8x256xbf16>, vector<8x256xbf16>, vector<8x256xbf16>, vector<8x256xbf16>, vector<8x256xbf16>, vector<8x256xbf16>, vector<8x256xbf16> -> vector<56x256xbf16>
    %c0_2 = arith.constant 0 : index
    %c0_3 = arith.constant 0 : index
    %20 = vector.load %arg3[%c0_2, %c0_3] : memref<1x56xbf16, #tpu.memory_space<vmem>>, vector<1x56xbf16>
    %cst_4 = arith.constant dense<0.000000e+00> : vector<1x256xf32>
    %21 = tpu.matmul %20, %19, %cst_4 {dimension_numbers = #tpu.dot_dimension_numbers<[1], [0], [0], [1], [0, 0, 1, 1], [], []>} : vector<1x56xbf16>, vector<56x256xbf16>, vector<1x256xf32> -> vector<1x256xf32>
    %c0_5 = arith.constant 0 : index
    %c0_6 = arith.constant 0 : index
    %22 = vector.load %arg4[%c0_5, %c0_6] : memref<1x1xf32, #tpu.memory_space<vmem>>, vector<1x1xf32>
    %23 = vector.broadcast %22 : vector<1x1xf32> to vector<1x256xf32>
    %24 = arith.addf %21, %23 : vector<1x256xf32>
    %25 = math.tanh %24 : vector<1x256xf32>
    %c0_7 = arith.constant 0 : index
    %c0_8 = arith.constant 0 : index
    %c0_9 = arith.constant 0 : index
    %26 = vector.load %arg5[%c0_7, %c0_8, %c0_9] : memref<1x1x256xf32, #tpu.memory_space<vmem>>, vector<1x1x256xf32>
    %27 = vector.shape_cast %26 : vector<1x1x256xf32> to vector<1x256xf32>
    %28 = vector.shape_cast %25 : vector<1x256xf32> to vector<1x1x256xf32>
    tpu.vector_store %arg5[%c0_7, %c0_8, %c0_9], %28 {strides = array<i32>} : memref<1x1x256xf32, #tpu.memory_space<vmem>>, vector<1x1x256xf32>,
    return
  }
  func.func @transform_0(%arg0: i32, %arg1: i32) -> (i32, i32, i32) {
    %c0_i32 = arith.constant 0 : i32
    %c0_i32_0 = arith.constant 0 : i32
    %c0_i32_1 = arith.constant 0 : i32
    return %arg0, %c0_i32, %c0_i32_0 : i32, i32, i32
  }
  func.func @transform_1(%arg0: i32, %arg1: i32) -> (i32, i32) {
    %c0_i32 = arith.constant 0 : i32
    %c0_i32_0 = arith.constant 0 : i32
    %c0_i32_1 = arith.constant 0 : i32
    return %c0_i32, %c0_i32_0 : i32, i32
  }
  func.func @transform_2(%arg0: i32, %arg1: i32) -> (i32, i32) {
    %c0_i32 = arith.constant 0 : i32
    %c0_i32_0 = arith.constant 0 : i32
    %c0_i32_1 = arith.constant 0 : i32
    return %c0_i32, %c0_i32_0 : i32, i32
  }
  func.func @transform_3(%arg0: i32, %arg1: i32) -> (i32, i32, i32) {
    %c0_i32 = arith.constant 0 : i32
    %c0_i32_0 = arith.constant 0 : i32
    return %arg0, %c0_i32, %arg1 : i32, i32, i32
  }
}

</mosaic_0001>

<bundles_post_ra>
// kernel: generator_forward.16
= control target key start
LH: loop header
LB: loop body
LE: loop exit
PB: predicated region body
PF: predicated region fallthrough
CT: control target
= control target key end

     0   :  { %s593_s12 = smov 0   ;;  %s595_s13 = smov 0   ;;  %s662_s0 = inlined_call_operand.vmem [shape: bf16[2,8,134], index: 0, kind: input, shape index: {}]   ;;  %s663_s1 = inlined_call_operand.vmem [shape: bf16[32,56], index: 1, kind: input, shape index: {}]   ;;  %s664_s2 = inlined_call_operand.vmem [shape: f32[32,1], index: 2, kind: input, shape index: {}]   ;;  %s665_s3 = inlined_call_operand.vmem [shape: bf16[2,32,128], index: 3, kind: output, shape index: {}]  }
   0x1   :  { %s597_s14 = smov 0  }
   0x2 LB: > { %s25_s15 = sadd.s32 1, %s560_s13  ;;  %p452_p0 = scmp.ge.s32.totalorder %s564_s14, 1  ;;  %s564_s14 = sphi %s597_s14, %s13_s14   ;;  %s560_s13 = sphi %s595_s13, %s667_s13   ;;  %s556_s12 = sphi %s593_s12, %s666_s12  }
   0x3   : > { %p27_p1 = scmp.ge.s32.totalorder %s25_s15, 2  ;;  %p151_p2 = scmp.lt.s32.totalorder %s564_s14, 3 }
   0x5   : > { %s669_s15 = smov (%p27_p1, %s25_s15), 0  ;;  %p152_p3 = pnand %p452_p0, %p151_p2 }
   0x6   : > { %p178_p4 = scmp.lt.s32.totalorder (!%p152_p3), %s556_s12, 1  ;;  %s566_s20 = smov (!%p152_p3), 124  }
   0x7   : > { %155 = sbr.rel (%p152_p3) target bundleno = 363 (0x16b), region = 32  ;;  %s567_s21 = smov (!%p152_p3), 122  }
   0x8   : > { %s568_s22 = smov (!%p152_p3), 123   ;;  %s569_s25 = smov (!%p152_p3), 126  }
   0x9   : > { %s571_s26 = smov (!%p152_p3), 125   ;;  %s572_s27 = smov (!%p152_p3), 127  }
   0xc   : > { %s671_s12 = smov (!%p178_p4, %s556_s12), 1  ;;  %v540_v3 = vld [vmem:[%s663_s1] sm:$0xff]   ;;  %vm290_vm0 = vcmask 457728   ;;  %v570_v4 = vmov 0   ;;  %v257_v5 = vld [vmem:[%s664_s2 + $0x8] sm:$0xff]  ;;  %v258_v7 = vld [vmem:[%s664_s2 + $0x10] sm:$0xff] }
   0xd   : > { %s469_s16 = sshll.u32 %s671_s12, 3  ;;  %500 = vmatprep.mubr.msk.bf16.mxu0 %vm290_vm0, %v540_v3  ;;  %537 = vset.pattern.permute.xlu1 %v570_v4  ;;  %v256_v6 = vld [vmem:[%s664_s2] sm:$0xff]  ;;  %v259_v8 = vld [vmem:[%s664_s2 + $0x18] sm:$0xff]  ;;  %vm237_vm1 = vcmask 998400   ;;  %vm239_vm2 = vcmask 1043456   ;;  %vm225_vm3 = vcmask 1014784  }
   0xe   : > { %s182_s19 = scalar_lea.vmem %s662_s0, %s469_s16  ;;  %536 = vset.pattern.permute.xlu0 %v570_v4  ;;  %vm231_vm4 = vcmask 1006592   ;;  %vm213_vm5 = vcmask 1031168   ;;  %vm219_vm6 = vcmask 1022976   ;;  %vm207_vm7 = vcmask 1039360   ;;  %v541_v31 = vld [vmem:[%s663_s1 + $0x8] sm:$0xff]   ;;  %s470_s11 = sshll.u32 %s671_s12, 4 }
   0xf   : > { %v617_v0 = vld [vmem:[%s182_s19] sm:$0xff]  ;;  %s190_s18 = scalar_lea.vmem %s665_s3, %s470_s11 }
  0x10   : > { %v457_v1 = vcombine.low %v617_v0, %v617_v0  ;;  %v458_v2 = vcombine.high %v617_v0, %v617_v0 }
  0x12   : > { %221 = vrot.lane.b32.xlu1 %v457_v1, %s566_s20  ;;  %233 = vrot.lane.b32.xlu0 %v457_v1, %s567_s21 }
  0x16   : > { %223 = vrot.lane.b32.xlu1 %v458_v2, %s566_s20  ;;  %235 = vrot.lane.b32.xlu0 %v458_v2, %s567_s21 }
  0x1a   : > { %229 = vrot.lane.b32.xlu1 %v458_v2, %s568_s22  ;;  %227 = vrot.lane.b32.xlu0 %v457_v1, %s568_s22 }
  0x1e   : > { %211 = vrot.lane.b32.xlu1 %v458_v2, %s569_s25  ;;  %209 = vrot.lane.b32.xlu0 %v457_v1, %s569_s25 }
  0x22   : > { %217 = vrot.lane.b32.xlu1 %v458_v2, %s571_s26  ;;  %215 = vrot.lane.b32.xlu0 %v457_v1, %s571_s26 }
  0x26   : > { %205 = vrot.lane.b32.xlu1 %v458_v2, %s572_s27  ;;  %203 = vrot.lane.b32.xlu0 %v457_v1, %s572_s27 }
  0x2a   : > { %267 = vperm.xlu1 %537, %v257_v5   ;;  %262 = vperm.xlu0 %536, %v256_v6  }
  0x2e   : > { %272 = vperm.xlu1 %537, %v258_v7   ;;  %277 = vperm.xlu0 %536, %v259_v8  }
  0x84   : > { %v222_v9 = vpop.permute.xlu1 %221  ;;  %v234_v10 = vpop.permute.xlu0 %233 }
  0x88   : > { %v224_v11 = vpop.permute.xlu1 %223  ;;  %v236_v12 = vpop.permute.xlu0 %235 }
  0x89   : > { %v238_v13 = vsel %vm237_vm1, %v234_v10, %v236_v12  ;;  %v226_v17 = vsel %vm225_vm3, %v222_v9, %v224_v11 }
  0x8a   : > { %504 = vmatprep.subr.msk.bf16.mxu0 %vm239_vm2, %v238_v13  ;;  %v298_v14 = vsel %vm239_vm2, %v238_v13, 0 }
  0x8b   : > { %493 = vmatpush3.bf16.msra.mxu0 %v298_v14 }
  0x8c   : > { %v230_v15 = vpop.permute.xlu1 %229  ;;  %v228_v16 = vpop.permute.xlu0 %227 }
  0x8d   : > { %v232_v18 = vsel %vm231_vm4, %v228_v16, %v230_v15 }
  0x8e   : > { %v250_v19 = vsel %vm239_vm2, %v226_v17, %v232_v18 }
  0x8f   : > { %494 = vmatprep.subr.bf16.mxu0 %v250_v19 }
  0x90   : > { %v212_v20 = vpop.permute.xlu1 %211  ;;  %495 = vmatpush3.bf16.msra.mxu0 %v250_v19  ;;  %v210_v21 = vpop.permute.xlu0 %209 }
  0x91   : > { %v214_v24 = vsel %vm213_vm5, %v210_v21, %v212_v20 }
  0x94   : > { %v218_v22 = vpop.permute.xlu1 %217  ;;  %v216_v23 = vpop.permute.xlu0 %215 }
  0x95   : > { %v220_v25 = vsel %vm219_vm6, %v216_v23, %v218_v22 }
  0x96   : > { %v246_v26 = vsel %vm239_vm2, %v214_v24, %v220_v25 }
  0x97   : > { %496 = vmatprep.subr.bf16.mxu0 %v246_v26 }
  0x98   : > { %v206_v27 = vpop.permute.xlu1 %205  ;;  %497 = vmatpush3.bf16.msra.mxu0 %v246_v26  ;;  %v204_v28 = vpop.permute.xlu0 %203 }
  0x99   : > { %v208_v29 = vsel %vm207_vm7, %v204_v28, %v206_v27 }
  0x9a   : > { %v242_v30 = vsel %vm239_vm2, %v617_v0, %v208_v29 }
  0x9b   : > { %498 = vmatprep.subr.bf16.mxu0 %v242_v30 }
  0x9c   : > { %499 = vmatpush3.bf16.msra.mxu0 %v242_v30 }
  0x9f   : > { %501 = vmatmul.mubr.msk.bf16.vlgmr.msra.gmra.mxu0 %vm290_vm0, %v541_v31 }
  0xa5   : > { %v268_v32 = vpop.permute.xlu1 %267  ;;  %v263_v33 = vpop.permute.xlu0 %262 }
  0xa9   : > { %v273_v35 = vpop.permute.xlu1 %272  ;;  %v278_v37 = vpop.permute.xlu0 %277 }
 0x15f   : > { %v502_v34 = vpop.f32.mrf.mxu0 }
 0x160   : > { %v343_v39 = vadd.f32 %v502_v34, %v273_v35 }
 0x161   : > { %v334_v36 = vpop.f32.mrf.mxu0 }
 0x162   : > { %v335_v42 = vadd.f32 %v334_v36, %v263_v33 }
 0x163   : > { %v503_v38 = vpop.f32.mrf.mxu0 }
 0x164   : > { %v346_v40 = vadd.f32 %v503_v38, %v278_v37 }
 0x165   : > { %v337_v41 = vpop.f32.mrf.mxu0 }
 0x166   : > { %v483_v43 = vpack.c.bf16 %v346_v40, %v343_v39  ;;  %v338_v44 = vadd.f32 %v337_v41, %v268_v32 }
 0x168   : > { %485 = vst [vmem:[%s190_s18 + $0x8] sm:$0xff] %v483_v43   ;;  %v478_v45 = vpack.c.bf16 %v338_v44, %v335_v42 }
 0x16a   : > { %479 = vst [vmem:[%s190_s18] sm:$0xff] %v478_v45  }
 0x16b PF: > { %s13_s14 = sadd.s32 1, %s564_s14   ;;  %s666_s12 = smov %s560_s13 }
 0x16c   : > { %p10_p5 = scmp.ge.s32.totalorder %s13_s14, 4   ;;  %s667_s13 = smov %s669_s15 }
 0x16e   :  { %12 = sbr.rel (!%p10_p5) target bundleno = 2 (0x2), region = 63 }

// kernel: generator_forward.17
= control target key start
LH: loop header
LB: loop body
LE: loop exit
PB: predicated region body
PF: predicated region fallthrough
CT: control target
= control target key end

     0   :  { %s953_s21 = smov 0   ;;  %s955_s22 = smov 0   ;;  %s1043_s0 = inlined_call_operand.vmem [shape: bf16[2,32,130], index: 0, kind: input, shape index: {}]   ;;  %s1044_s1 = inlined_call_operand.vmem [shape: bf16[16,64], index: 1, kind: input, shape index: {}]   ;;  %s1045_s2 = inlined_call_operand.vmem [shape: bf16[16,64], index: 2, kind: input, shape index: {}]   ;;  %s1046_s3 = inlined_call_operand.vmem [shape: bf16[16,64], index: 3, kind: input, shape index: {}]   ;;  %s1047_s4 = inlined_call_operand.vmem [shape: bf16[16,64], index: 4, kind: input, shape index: {}]   ;;  %s1048_s5 = inlined_call_operand.vmem [shape: f32[16,1], index: 5, kind: input, shape index: {}]   ;;  %s1049_s6 = inlined_call_operand.vmem [shape: bf16[2,4,16,128], index: 6, kind: output, shape index: {}]  }
   0x1   :  { %s957_s23 = smov 0  }
   0x2 LB: > { %s28_s24 = sadd.s32 1, %s908_s22  ;;  %p726_p0 = scmp.ge.s32.totalorder %s912_s23, 1  ;;  %s912_s23 = sphi %s957_s23, %s16_s23   ;;  %s908_s22 = sphi %s955_s22, %s1051_s22   ;;  %s904_s21 = sphi %s953_s21, %s1050_s21  }
   0x3   : > { %p30_p1 = scmp.ge.s32.totalorder %s28_s24, 2  ;;  %p226_p2 = scmp.lt.s32.totalorder %s912_s23, 3 }
   0x5   : > { %s1053_s24 = smov (%p30_p1, %s28_s24), 0  ;;  %p227_p3 = pnand %p726_p0, %p226_p2 }
   0x6   : > { %p259_p4 = scmp.lt.s32.totalorder (!%p227_p3), %s904_s21, 1  ;;  %s915_s29 = smov (!%p227_p3), 127  }
   0x7   : > { %230 = sbr.rel (%p227_p3) target bundleno = 476 (0x1dc), region = 44 }
   0xc   : > { %s1055_s21 = smov (!%p259_p4, %s904_s21), 1  ;;  %v914_v3 = vmov 0.0   ;;  %vm916_vm8 = vmmov 0   ;;  %vm330_vm9 = vcmask 1039360   ;;  %v338_v39 = vld [vmem:[%s1048_s5 + $0x8] sm:$0xff]  ;;  %v337_v40 = vld [vmem:[%s1048_s5] sm:$0xff] }
   0xd   : > { %s755_s25 = sshll.u32 %s1055_s21, 5  ;;  %808 = vmatprep.subr.bf16.mxu0 %v914_v3  ;;  %820 = vmatprep.subr.bf16.mxu1 %v914_v3  ;;  %v917_v41 = vmov 0   ;;  %v886_v42 = vld [vmem:[%s1044_s1] sm:$0xff]   ;;  %vm354_vm10 = vcmask 523264  }
   0xe   : > { %s263_s28 = scalar_lea.vmem %s1043_s0, %s755_s25  ;;  %816 = vmatprep.mubr.msk.bf16.mxu0 %vm916_vm8, %v914_v3  ;;  %828 = vmatprep.mubr.msk.bf16.mxu1 %vm916_vm8, %v914_v3  ;;  %v887_v43 = vld [vmem:[%s1045_s2] sm:$0xff]   ;;  %s271_s20 = scalar_lea.vmem %s1049_s6, %s755_s25 }
   0xf   : > { %v280_v0 = vld [vmem:[%s263_s28 + $0x10] sm:$0xff]  ;;  %v281_v1 = vld [vmem:[%s263_s28 + $0x18] sm:$0xff]  ;;  %v278_v2 = vld [vmem:[%s263_s28] sm:$0xff]  ;;  %885 = vset.pattern.permute.xlu1 %v917_v41  ;;  %884 = vset.pattern.permute.xlu0 %v917_v41 }
  0x10   : > { %v286_v4 = vunpack.c.l.bf16 %v280_v0  ;;  %v288_v5 = vunpack.c.l.bf16 %v281_v1  ;;  %v279_v6 = vld [vmem:[%s263_s28 + $0x8] sm:$0xff]  ;;  %v282_v7 = vunpack.c.l.bf16 %v278_v2  ;;  %v287_v8 = vunpack.c.h.bf16 %v280_v0  ;;  %v888_v50 = vld [vmem:[%s1046_s3] sm:$0xff]  }
  0x11   : > { %v284_v9 = vunpack.c.l.bf16 %v279_v6  ;;  %v289_v10 = vunpack.c.h.bf16 %v281_v1  ;;  %v283_v11 = vunpack.c.h.bf16 %v278_v2  ;;  %v285_v12 = vunpack.c.h.bf16 %v279_v6  ;;  %v889_v51 = vld [vmem:[%s1047_s4] sm:$0xff]  }
  0x12   : > { %vm294_vm0 = vcmp.ge.f32.partialorder %v286_v4, 0.0  ;;  %vm296_vm1 = vcmp.ge.f32.partialorder %v288_v5, 0.0  ;;  %v302_v13 = vmul.f32 0.1, %v286_v4  ;;  %v304_v14 = vmul.f32 0.1, %v288_v5 }
  0x13   : > { %vm290_vm2 = vcmp.ge.f32.partialorder %v282_v7, 0.0  ;;  %vm292_vm3 = vcmp.ge.f32.partialorder %v284_v9, 0.0  ;;  %v298_v15 = vmul.f32 0.1, %v282_v7  ;;  %v300_v16 = vmul.f32 0.1, %v284_v9 }
  0x14   : > { %v310_v17 = vsel %vm294_vm0, %v286_v4, %v302_v13  ;;  %v312_v18 = vsel %vm296_vm1, %v288_v5, %v304_v14  ;;  %vm295_vm4 = vcmp.ge.f32.partialorder %v287_v8, 0.0  ;;  %vm297_vm5 = vcmp.ge.f32.partialorder %v289_v10, 0.0 }
  0x15   : > { %v316_v19 = vpack.c.bf16 %v312_v18, %v310_v17  ;;  %v306_v20 = vsel %vm290_vm2, %v282_v7, %v298_v15  ;;  %v308_v21 = vsel %vm292_vm3, %v284_v9, %v300_v16  ;;  %v303_v22 = vmul.f32 0.1, %v287_v8 }
  0x16   : > { %v314_v23 = vpack.c.bf16 %v308_v21, %v306_v20  ;;  %v305_v24 = vmul.f32 0.1, %v289_v10  ;;  %vm291_vm6 = vcmp.ge.f32.partialorder %v283_v11, 0.0  ;;  %vm293_vm7 = vcmp.ge.f32.partialorder %v285_v12, 0.0 }
  0x17   : > { %326 = vrot.lane.b32.xlu0 %v316_v19, %s915_s29  ;;  %v311_v25 = vsel %vm295_vm4, %v287_v8, %v303_v22  ;;  %v299_v26 = vmul.f32 0.1, %v283_v11  ;;  %v301_v27 = vmul.f32 0.1, %v285_v12 }
  0x18   : > { %322 = vrot.lane.b32.xlu1 %v314_v23, %s915_s29  ;;  %v313_v28 = vsel %vm297_vm5, %v289_v10, %v305_v24 }
  0x19   : > { %v317_v29 = vpack.c.bf16 %v313_v28, %v311_v25  ;;  %v307_v30 = vsel %vm291_vm6, %v283_v11, %v299_v26  ;;  %v309_v31 = vsel %vm293_vm7, %v285_v12, %v301_v27 }
  0x1a   : > { %v315_v32 = vpack.c.bf16 %v309_v31, %v307_v30 }
  0x1b   : > { %328 = vrot.lane.b32.xlu0 %v317_v29, %s915_s29 }
  0x1c   : > { %324 = vrot.lane.b32.xlu1 %v315_v32, %s915_s29 }
  0x89   : > { %v327_v33 = vpop.permute.xlu0 %326 }
  0x8a   : > { %v323_v34 = vpop.permute.xlu1 %322 }
  0x8d   : > { %v329_v35 = vpop.permute.xlu0 %328 }
  0x8e   : > { %v332_v36 = vsel %vm330_vm9, %v327_v33, %v329_v35  ;;  %508 = vrot.lane.b32.xlu1 %v329_v35, %s915_s29  ;;  %v325_v37 = vpop.permute.xlu1 %324 }
  0x8f   : > { %506 = vrot.lane.b32.xlu0 %v332_v36, %s915_s29  ;;  %809 = vmatpush3.bf16.msra.mxu0 %v332_v36  ;;  %v331_v38 = vsel %vm330_vm9, %v323_v34, %v325_v37 }
  0x90   : > { %821 = vmatpush3.bf16.msra.mxu1 %v332_v36  ;;  %810 = vmatprep.subr.bf16.mxu0 %v914_v3 }
  0x91   : > { %822 = vmatprep.subr.bf16.mxu1 %v914_v3 }
  0x92   : > { %504 = vrot.lane.b32.xlu1 %v325_v37, %s915_s29 }
  0x93   : > { %502 = vrot.lane.b32.xlu0 %v331_v38, %s915_s29  ;;  %811 = vmatpush3.bf16.msra.mxu0 %v331_v38 }
  0x94   : > { %823 = vmatpush3.bf16.msra.mxu1 %v331_v38  ;;  %812 = vmatprep.subr.bf16.mxu0 %v914_v3 }
  0x95   : > { %824 = vmatprep.subr.bf16.mxu1 %v914_v3 }
  0x96   : > { %346 = vperm.xlu1 %885, %v338_v39  }
  0x97   : > { %813 = vmatpush3.bf16.msra.mxu0 %v316_v19  ;;  %341 = vperm.xlu0 %884, %v337_v40  }
  0x98   : > { %825 = vmatpush3.bf16.msra.mxu1 %v316_v19  ;;  %814 = vmatprep.subr.bf16.mxu0 %v914_v3 }
  0x99   : > { %826 = vmatprep.subr.bf16.mxu1 %v914_v3 }
  0x9a   : > { %415 = vperm.xlu1 %885, %v337_v40  }
  0x9b   : > { %815 = vmatpush3.bf16.msra.mxu0 %v314_v23  ;;  %420 = vperm.xlu0 %884, %v338_v39  }
  0x9c   : > { %827 = vmatpush3.bf16.msra.mxu1 %v314_v23  ;;  %832 = vmatprep.subr.bf16.mxu0 %v914_v3 }
  0x9d   : > { %844 = vmatprep.subr.bf16.mxu1 %v914_v3 }
  0x9e   : > { %817 = vmatmul.mubr.msk.bf16.vlgmr.msra.gmra.mxu0 %vm354_vm10, %v886_v42  ;;  %489 = vperm.xlu1 %885, %v337_v40  }
  0x9f   : > { %829 = vmatmul.mubr.msk.bf16.vlgmr.msra.gmra.mxu1 %vm354_vm10, %v887_v43  ;;  %840 = vmatprep.mubr.msk.bf16.mxu0 %vm916_vm8, %v914_v3 }
  0xa0   : > { %852 = vmatprep.mubr.msk.bf16.mxu1 %vm916_vm8, %v914_v3  ;;  %494 = vperm.xlu0 %884, %v338_v39  }
  0xa2   : > { %575 = vperm.xlu1 %885, %v337_v40  }
  0xa4   : > { %580 = vperm.xlu0 %884, %v338_v39  }
 0x100   : > { %v509_v44 = vpop.permute.xlu1 %508 }
 0x101   : > { %v507_v45 = vpop.permute.xlu0 %506 }
 0x102   : > { %v511_v46 = vsel %vm330_vm9, %v507_v45, %v509_v44 }
 0x103   : > { %833 = vmatpush3.bf16.msra.mxu0 %v511_v46  ;;  %845 = vmatpush3.bf16.msra.mxu1 %v511_v46 }
 0x104   : > { %v505_v47 = vpop.permute.xlu1 %504  ;;  %834 = vmatprep.subr.bf16.mxu0 %v914_v3  ;;  %846 = vmatprep.subr.bf16.mxu1 %v914_v3 }
 0x105   : > { %v503_v48 = vpop.permute.xlu0 %502 }
 0x106   : > { %v510_v49 = vsel %vm330_vm9, %v503_v48, %v505_v47 }
 0x107   : > { %835 = vmatpush3.bf16.msra.mxu0 %v510_v49  ;;  %847 = vmatpush3.bf16.msra.mxu1 %v510_v49 }
 0x108   : > { %836 = vmatprep.subr.bf16.mxu0 %v914_v3  ;;  %848 = vmatprep.subr.bf16.mxu1 %v914_v3 }
 0x10b   : > { %837 = vmatpush3.bf16.msra.mxu0 %v332_v36  ;;  %849 = vmatpush3.bf16.msra.mxu1 %v332_v36 }
 0x10c   : > { %838 = vmatprep.subr.bf16.mxu0 %v914_v3  ;;  %850 = vmatprep.subr.bf16.mxu1 %v914_v3 }
 0x10f   : > { %839 = vmatpush3.bf16.msra.mxu0 %v331_v38  ;;  %851 = vmatpush3.bf16.msra.mxu1 %v331_v38 }
 0x111   : > { %v347_v52 = vpop.permute.xlu1 %346 }
 0x112   : > { %841 = vmatmul.mubr.msk.bf16.vlgmr.msra.gmra.mxu0 %vm354_vm10, %v888_v50  ;;  %853 = vmatmul.mubr.msk.bf16.vlgmr.msra.gmra.mxu1 %vm354_vm10, %v889_v51  ;;  %v342_v53 = vpop.permute.xlu0 %341 }
 0x115   : > { %v416_v56 = vpop.permute.xlu1 %415 }
 0x116   : > { %v421_v60 = vpop.permute.xlu0 %420 }
 0x119   : > { %v490_v7 = vpop.permute.xlu1 %489 }
 0x11b   : > { %v495_v6 = vpop.permute.xlu0 %494 }
 0x11d   : > { %v576_v13 = vpop.permute.xlu1 %575 }
 0x11f   : > { %v581_v12 = vpop.permute.xlu0 %580 }
 0x15e   : > { %v392_v54 = vpop.f32.mrf.mxu0 }
 0x15f   : > { %v465_v55 = vpop.f32.mrf.mxu1  ;;  %v393_v58 = vadd.f32 %v392_v54, %v342_v53 }
 0x160   : > { %v818_v57 = vpop.f32.mrf.mxu0  ;;  %v466_v62 = vadd.f32 %v465_v55, %v416_v56 }
 0x161   : > { %v830_v59 = vpop.f32.mrf.mxu1 }
 0x162   : > { %v395_v61 = vpop.f32.mrf.mxu0 }
 0x163   : > { %v396_v63 = vadd.f32 %v395_v61, %v347_v52  ;;  %v468_v0 = vpop.f32.mrf.mxu1 }
 0x164   : > { %v469_v1 = vadd.f32 %v468_v0, %v421_v60  ;;  %v819_v2 = vpop.f32.mrf.mxu0 }
 0x165   : > { %v768_v3 = vpack.c.bf16 %v396_v63, %v393_v58  ;;  %v831_v4 = vpop.f32.mrf.mxu1 }
 0x166   : > { %v773_v5 = vpack.c.bf16 %v469_v1, %v466_v62 }
 0x167   : > { %769 = vst [vmem:[%s271_s20] sm:$0xff] %v768_v3  }
 0x168   : > { %785 = vst [vmem:[%s271_s20 + $0x8] sm:$0xff] %v773_v5  }
 0x1d2   : > { %v551_v8 = vpop.f32.mrf.mxu0  ;;  %v625_v9 = vpop.f32.mrf.mxu1 }
 0x1d3   : > { %v552_v16 = vadd.f32 %v551_v8, %v490_v7  ;;  %v626_v17 = vadd.f32 %v625_v9, %v576_v13 }
 0x1d4   : > { %v842_v10 = vpop.f32.mrf.mxu0  ;;  %v854_v11 = vpop.f32.mrf.mxu1 }
 0x1d6   : > { %v554_v14 = vpop.f32.mrf.mxu0  ;;  %v628_v15 = vpop.f32.mrf.mxu1 }
 0x1d7   : > { %v555_v18 = vadd.f32 %v554_v14, %v495_v6  ;;  %v629_v19 = vadd.f32 %v628_v15, %v581_v12 }
 0x1d8   : > { %v843_v20 = vpop.f32.mrf.mxu0  ;;  %v855_v21 = vpop.f32.mrf.mxu1 }
 0x1d9   : > { %v778_v22 = vpack.c.bf16 %v555_v18, %v552_v16  ;;  %v783_v23 = vpack.c.bf16 %v629_v19, %v626_v17 }
 0x1db   : > { %786 = vst [vmem:[%s271_s20 + $0x10] sm:$0xff] %v778_v22   ;;  %787 = vst [vmem:[%s271_s20 + $0x18] sm:$0xff] %v783_v23  }
 0x1dc PF: > { %s16_s23 = sadd.s32 1, %s912_s23   ;;  %s1050_s21 = smov %s908_s22 }
 0x1dd   : > { %p13_p5 = scmp.ge.s32.totalorder %s16_s23, 4   ;;  %s1051_s22 = smov %s1053_s24 }
 0x1df   :  { %15 = sbr.rel (!%p13_p5) target bundleno = 2 (0x2), region = 78 }

// kernel: generator_forward.18
= control target key start
LH: loop header
LB: loop body
LE: loop exit
PB: predicated region body
PF: predicated region fallthrough
CT: control target
= control target key end

     0   :  { %s719_s18 = smov 0   ;;  %s721_s19 = smov 0   ;;  %s816_s0 = inlined_call_operand.vmem [shape: bf16[2,16,132], index: 0, kind: input, shape index: {}]   ;;  %s817_s1 = inlined_call_operand.vmem [shape: bf16[16,48], index: 1, kind: input, shape index: {}]   ;;  %s818_s2 = inlined_call_operand.vmem [shape: f32[16,1], index: 2, kind: input, shape index: {}]   ;;  %s819_s3 = inlined_call_operand.vmem [shape: bf16[16,48], index: 3, kind: input, shape index: {}]   ;;  %s820_s4 = inlined_call_operand.vmem [shape: f32[16,1], index: 4, kind: input, shape index: {}]   ;;  %s821_s5 = inlined_call_operand.vmem [shape: bf16[2,16,128], index: 5, kind: output, shape index: {}]  }
   0x1   :  { %s723_s20 = smov 0  }
   0x2 LB: > { %s27_s21 = sadd.s32 1, %s677_s19  ;;  %p579_p0 = scmp.ge.s32.totalorder %s681_s20, 1  ;;  %s681_s20 = sphi %s723_s20, %s15_s20   ;;  %s677_s19 = sphi %s721_s19, %s823_s19   ;;  %s673_s18 = sphi %s719_s18, %s822_s18  }
   0x3   : > { %p29_p1 = scmp.ge.s32.totalorder %s27_s21, 2  ;;  %p201_p2 = scmp.lt.s32.totalorder %s681_s20, 3 }
   0x5   : > { %s825_s21 = smov (%p29_p1, %s27_s21), 0  ;;  %p202_p3 = pnand %p579_p0, %p201_p2 }
   0x6   : > { %p232_p4 = scmp.lt.s32.totalorder (!%p202_p3), %s673_s18, 1  ;;  %s683_s26 = smov (!%p202_p3), 127  }
   0x7   : > { %205 = sbr.rel (%p202_p3) target bundleno = 690 (0x2b2), region = 40  ;;  %s684_s27 = smov (!%p202_p3), 126  }
   0xc   : > { %s827_s18 = smov (!%p232_p4, %s673_s18), 1  ;;  %v685_v16 = vmov 0   ;;  %v291_v17 = vld [vmem:[%s818_s2] sm:$0xff]  ;;  %v292_v18 = vld [vmem:[%s818_s2 + $0x8] sm:$0xff]  ;;  %v686_v19 = vmov 0.0|0.0   ;;  %vm285_vm4 = vcmask 1031168   ;;  %v356_v28 = vlaneseq }
   0xd   : > { %s592_s22 = sshll.u32 %s827_s18, 4  ;;  %344 = vmatprep.mubr.bf16.mxu0 %v685_v16  ;;  %645 = vset.pattern.permute.xlu0 %v685_v16  ;;  %v407_v20 = vld [vmem:[%s820_s4 + $0x8] sm:$0xff]  ;;  %vm277_vm5 = vcmask 1039360   ;;  %v657_v27 = vld [vmem:[%s817_s1] sm:$0xff]   ;;  %vm308_vm6 = vcmask 392192   ;;  %v687_v33 = vmov 0.0  }
   0xe   : > { %s236_s25 = scalar_lea.vmem %s816_s0, %s592_s22  ;;  %646 = vset.pattern.permute.xlu1 %v685_v16  ;;  %v357_v29 = vand.u32 127, %v356_v28  ;;  %605 = vmatprep.subr.bf16.mxu1 %v687_v33  ;;  %vm688_vm12 = vmmov 0   ;;  %v406_v48 = vld [vmem:[%s820_s4] sm:$0xff]  ;;  %s593_s15 = sshll.u32 %s827_s18, 3 }
   0xf   : > { %v251_v0 = vld [vmem:[%s236_s25] sm:$0xff]  ;;  %v252_v1 = vld [vmem:[%s236_s25 + $0x8] sm:$0xff]  ;;  %611 = vmatprep.mubr.msk.bf16.mxu1 %vm688_vm12, %v687_v33  ;;  %s244_s22 = scalar_lea.vmem %s821_s5, %s593_s15 }
  0x10   : > { %v743_v2 = vunpack.c.l.bf16 %v251_v0  ;;  %v745_v3 = vunpack.c.l.bf16 %v252_v1  ;;  %v747_v4 = vunpack.c.h.bf16 %v251_v0  ;;  %v749_v5 = vunpack.c.h.bf16 %v252_v1  ;;  %v658_v56 = vld [vmem:[%s819_s3] sm:$0xff]  }
  0x11   : > { %v360_v30 = vadd.s32 4294967295, %v357_v29 }
  0x12   : > { %vm257_vm0 = vcmp.ge.f32.partialorder %v743_v2, 0.0  ;;  %vm259_vm1 = vcmp.ge.f32.partialorder %v745_v3, 0.0  ;;  %v261_v6 = vmul.f32 0.1, %v743_v2  ;;  %v263_v7 = vmul.f32 0.1, %v745_v3 }
  0x13   : > { %vm258_vm2 = vcmp.ge.f32.partialorder %v747_v4, 0.0  ;;  %vm260_vm3 = vcmp.ge.f32.partialorder %v749_v5, 0.0  ;;  %v262_v8 = vmul.f32 0.1, %v747_v4  ;;  %v264_v9 = vmul.f32 0.1, %v749_v5 }
  0x14   : > { %v265_v10 = vsel %vm257_vm0, %v743_v2, %v261_v6  ;;  %v267_v11 = vsel %vm259_vm1, %v745_v3, %v263_v7  ;;  %vm362_vm7 = vcmp.ge.s32.totalorder %v360_v30, 0  ;;  %vm364_vm8 = vcmp.lt.s32.totalorder %v360_v30, 64 }
  0x15   : > { %v269_v12 = vpack.c.bf16 %v267_v11, %v265_v10  ;;  %v266_v13 = vsel %vm258_vm2, %v747_v4, %v262_v8  ;;  %v268_v14 = vsel %vm260_vm3, %v749_v5, %v264_v9  ;;  %vm366_vm9 = vmand %vm362_vm7, %vm364_vm8  ;;  %v652_v47 = vpack.i.bf16 %v749_v5, %v745_v3 }
  0x16   : > { %v270_v15 = vpack.c.bf16 %v268_v14, %v266_v13  ;;  %v647_v49 = vpack.i.bf16 %v747_v4, %v743_v2 }
  0x17   : > { %273 = vrot.lane.b32.xlu1 %v269_v12, %s683_s26  ;;  %281 = vrot.lane.b32.xlu0 %v269_v12, %s684_s27 }
  0x1b   : > { %275 = vrot.lane.b32.xlu1 %v270_v15, %s683_s26  ;;  %283 = vrot.lane.b32.xlu0 %v270_v15, %s684_s27 }
  0x1f   : > { %295 = vperm.xlu0 %645, %v291_v17   ;;  %300 = vperm.xlu1 %646, %v292_v18  }
  0x23   : > { %400 = vrot.lane.b32.xlu0 %v686_v19, %s684_s27 }
  0x27   : > { %394 = vrot.lane.b32.xlu0 %v686_v19, %s683_s26 }
  0x2b   : > { %415 = vperm.xlu0 %645, %v407_v20  }
  0x2f   : > { %653 = vrot.lane.b32.xlu0 %v652_v47, %s684_s27 }
  0x89   : > { %v274_v21 = vpop.permute.xlu1 %273  ;;  %v282_v22 = vpop.permute.xlu0 %281 }
  0x8d   : > { %v284_v23 = vpop.permute.xlu0 %283  ;;  %v276_v25 = vpop.permute.xlu1 %275 }
  0x8e   : > { %322 = vmatprep.subr.bf16.mxu0 %v284_v23  ;;  %v286_v24 = vsel %vm285_vm4, %v282_v22, %v284_v23  ;;  %v278_v26 = vsel %vm277_vm5, %v274_v21, %v276_v25 }
  0x8f   : > { %323 = vmatpush1.bf16.msra.mxu0 %v286_v24 }
  0x90   : > { %324 = vmatprep.subr.bf16.mxu0 %v276_v25 }
  0x93   : > { %325 = vmatpush1.bf16.msra.mxu0 %v278_v26 }
  0x94   : > { %326 = vmatprep.subr.bf16.mxu0 %v270_v15 }
  0x97   : > { %327 = vmatpush1.bf16.msra.mxu0 %v269_v12 }
  0x9a   : > { %585 = vmatmul.mubr.msk.bf16.vlgmr.msra.gmra.mxu0 %vm308_vm6, %v657_v27  ;;  %v296_v31 = vpop.permute.xlu0 %295  ;;  %v301_v36 = vpop.permute.xlu1 %300 }
  0x9e   : > { %v401_v50 = vpop.permute.xlu0 %400 }
  0xa2   : > { %v395_v53 = vpop.permute.xlu0 %394 }
  0xa6   : > { %v416_v57 = vpop.permute.xlu0 %415 }
  0xaa   : > { %v654_v60 = vpop.permute.xlu0 %653 }
  0xab   : > { %v656_v0 = vunpack.i.h.bf16 %v654_v60  ;;  %v655_v1 = vunpack.i.l.bf16 %v654_v60 }
  0xad   : > { %v481_v6 = vsel %vm285_vm4, %v655_v1, %v656_v0 }
 0x15a   : > { %v346_v32 = vpop.f32.mrf.mxu0 }
 0x15b   : > { %v347_v34 = vadd.f32 %v346_v32, %v296_v31 }
 0x15c   : > { %v348_v35 = vpop.f32.mrf.mxu0 }
 0x15d   : > { %v372_v37 = vsel %vm366_vm9, %v347_v34, 0.0 }
 0x15e   : > { %v350_v38 = vpop.f32.mrf.mxu0  ;;  %v380_v40 = vmul.f32 0.1, %v372_v37  ;;  %vm376_vm10 = vcmp.ge.f32.partialorder %v372_v37, 0.0 }
 0x15f   : > { %v351_v39 = vadd.f32 %v350_v38, %v301_v36 }
 0x160   : > { %v352_v41 = vpop.f32.mrf.mxu0  ;;  %v384_v44 = vsel %vm376_vm10, %v372_v37, %v380_v40 }
 0x161   : > { %v374_v42 = vsel %vm366_vm9, %v351_v39, 0.0 }
 0x162   : > { %vm378_vm11 = vcmp.ge.f32.partialorder %v374_v42, 0.0  ;;  %v382_v43 = vmul.f32 0.1, %v374_v42 }
 0x164   : > { %v386_v45 = vsel %vm378_vm11, %v374_v42, %v382_v43 }
 0x165   : > { %v388_v46 = vpack.c.bf16 %v386_v45, %v384_v44 }
 0x167   : > { %398 = vrot.lane.b32.xlu1 %v388_v46, %s684_s27 }
 0x16b   : > { %392 = vrot.lane.b32.xlu1 %v388_v46, %s683_s26 }
 0x16f   : > { %410 = vperm.xlu1 %646, %v406_v48  }
 0x173   : > { %648 = vrot.lane.b32.xlu1 %v647_v49, %s684_s27 }
 0x1d9   : > { %v399_v51 = vpop.permute.xlu1 %398 }
 0x1da   : > { %v402_v52 = vsel %vm285_vm4, %v399_v51, %v401_v50 }
 0x1db   : > { %606 = vmatpush3.bf16.msra.mxu1 %v402_v52 }
 0x1dc   : > { %607 = vmatprep.subr.bf16.mxu1 %v687_v33 }
 0x1dd   : > { %v393_v54 = vpop.permute.xlu1 %392 }
 0x1de   : > { %v396_v55 = vsel %vm277_vm5, %v393_v54, %v395_v53 }
 0x1df   : > { %608 = vmatpush3.bf16.msra.mxu1 %v396_v55 }
 0x1e0   : > { %609 = vmatprep.subr.bf16.mxu1 %v687_v33 }
 0x1e3   : > { %610 = vmatpush3.bf16.msra.mxu1 %v388_v46 }
 0x1e6   : > { %612 = vmatmul.mubr.msk.bf16.vlgmr.msra.gmra.mxu1 %vm308_vm6, %v658_v56 }
 0x1ea   : > { %v411_v58 = vpop.permute.xlu1 %410 }
 0x1ee   : > { %v649_v59 = vpop.permute.xlu1 %648 }
 0x1ef   : > { %v651_v61 = vunpack.i.h.bf16 %v649_v59  ;;  %v650_v62 = vunpack.i.l.bf16 %v649_v59 }
 0x1f1   : > { %v480_v4 = vsel %vm285_vm4, %v650_v62, %v651_v61 }
 0x2a6   : > { %v460_v63 = vpop.f32.mrf.mxu1 }
 0x2a7   : > { %v461_v3 = vadd.f32 %v460_v63, %v411_v58 }
 0x2a8   : > { %v613_v2 = vpop.f32.mrf.mxu1 }
 0x2a9   : > { %v484_v9 = vadd.f32 %v480_v4, %v461_v3 }
 0x2aa   : > { %v463_v5 = vpop.f32.mrf.mxu1 }
 0x2ab   : > { %v464_v7 = vadd.f32 %v463_v5, %v416_v57 }
 0x2ac   : > { %v614_v8 = vpop.f32.mrf.mxu1 }
 0x2ad   : > { %v485_v10 = vadd.f32 %v481_v6, %v464_v7 }
 0x2af   : > { %v599_v11 = vpack.c.bf16 %v485_v10, %v484_v9 }
 0x2b1   : > { %600 = vst [vmem:[%s244_s22] sm:$0xff] %v599_v11  }
 0x2b2 PF: > { %s15_s20 = sadd.s32 1, %s681_s20   ;;  %s822_s18 = smov %s677_s19 }
 0x2b3   : > { %p12_p5 = scmp.ge.s32.totalorder %s15_s20, 4   ;;  %s823_s19 = smov %s825_s21 }
 0x2b5   :  { %14 = sbr.rel (!%p12_p5) target bundleno = 2 (0x2), region = 71 }

// kernel: generator_forward.19
= control target key start
LH: loop header
LB: loop body
LE: loop exit
PB: predicated region body
PF: predicated region fallthrough
CT: control target
= control target key end

     0   :  { %s727_s18 = smov 0   ;;  %s729_s19 = smov 0   ;;  %s812_s0 = inlined_call_operand.vmem [shape: bf16[2,16,136], index: 0, kind: input, shape index: {}]   ;;  %s813_s1 = inlined_call_operand.vmem [shape: bf16[16,48], index: 1, kind: input, shape index: {}]   ;;  %s814_s2 = inlined_call_operand.vmem [shape: f32[16,1], index: 2, kind: input, shape index: {}]   ;;  %s815_s3 = inlined_call_operand.vmem [shape: bf16[16,48], index: 3, kind: input, shape index: {}]   ;;  %s816_s4 = inlined_call_operand.vmem [shape: f32[16,1], index: 4, kind: input, shape index: {}]   ;;  %s817_s5 = inlined_call_operand.vmem [shape: bf16[2,16,128], index: 5, kind: output, shape index: {}]  }
   0x1   :  { %s731_s20 = smov 0  }
   0x2 LB: > { %s27_s21 = sadd.s32 1, %s682_s19  ;;  %p581_p0 = scmp.ge.s32.totalorder %s686_s20, 1  ;;  %s686_s20 = sphi %s731_s20, %s15_s20   ;;  %s682_s19 = sphi %s729_s19, %s819_s19   ;;  %s678_s18 = sphi %s727_s18, %s818_s18  }
   0x3   : > { %p29_p1 = scmp.ge.s32.totalorder %s27_s21, 2  ;;  %p201_p2 = scmp.lt.s32.totalorder %s686_s20, 3 }
   0x5   : > { %s821_s21 = smov (%p29_p1, %s27_s21), 0  ;;  %p202_p3 = pnand %p581_p0, %p201_p2 }
   0x6   : > { %p232_p4 = scmp.lt.s32.totalorder (!%p202_p3), %s678_s18, 1  ;;  %s688_s26 = smov (!%p202_p3), 125  }
   0x7   : > { %205 = sbr.rel (%p202_p3) target bundleno = 690 (0x2b2), region = 40  ;;  %s689_s27 = smov (!%p202_p3), 122  }
   0x8   : > { %s692_s7 = smov (!%p202_p3), 126   ;;  %s693_s8 = smov (!%p202_p3), 127  }
   0x9   : > { %s696_s15 = smov (!%p202_p3), 124  }
   0xc   : > { %s823_s18 = smov (!%p232_p4, %s678_s18), 1  ;;  %v690_v16 = vmov 0   ;;  %v291_v17 = vld [vmem:[%s814_s2] sm:$0xff]  ;;  %v292_v18 = vld [vmem:[%s814_s2 + $0x8] sm:$0xff]  ;;  %v691_v19 = vmov 0.0|0.0   ;;  %vm285_vm4 = vcmask 998400   ;;  %v356_v28 = vlaneseq }
   0xd   : > { %s594_s22 = sshll.u32 %s823_s18, 4  ;;  %344 = vmatprep.mubr.bf16.mxu0 %v690_v16  ;;  %650 = vset.pattern.permute.xlu0 %v690_v16  ;;  %v409_v20 = vld [vmem:[%s816_s4 + $0x8] sm:$0xff]  ;;  %vm277_vm5 = vcmask 1022976   ;;  %v662_v27 = vld [vmem:[%s813_s1] sm:$0xff]   ;;  %vm308_vm6 = vcmask 392192   ;;  %v694_v33 = vmov 0.0  }
   0xe   : > { %s236_s25 = scalar_lea.vmem %s812_s0, %s594_s22  ;;  %651 = vset.pattern.permute.xlu1 %v690_v16  ;;  %v357_v29 = vand.u32 127, %v356_v28  ;;  %607 = vmatprep.subr.bf16.mxu1 %v694_v33  ;;  %vm695_vm12 = vmmov 0   ;;  %v408_v48 = vld [vmem:[%s816_s4] sm:$0xff]  ;;  %vm403_vm13 = vcmask 1031168   ;;  %vm396_vm14 = vcmask 1039360   ;;  %s595_s22 = sshll.u32 %s823_s18, 3 }
   0xf   : > { %v251_v0 = vld [vmem:[%s236_s25] sm:$0xff]  ;;  %v252_v1 = vld [vmem:[%s236_s25 + $0x8] sm:$0xff]  ;;  %613 = vmatprep.mubr.msk.bf16.mxu1 %vm695_vm12, %v694_v33  ;;  %vm481_vm15 = vcmask 1014784   ;;  %s244_s25 = scalar_lea.vmem %s817_s5, %s595_s22 }
  0x10   : > { %v751_v2 = vunpack.c.l.bf16 %v251_v0  ;;  %v753_v3 = vunpack.c.l.bf16 %v252_v1  ;;  %v755_v4 = vunpack.c.h.bf16 %v251_v0  ;;  %v757_v5 = vunpack.c.h.bf16 %v252_v1  ;;  %v663_v56 = vld [vmem:[%s815_s3] sm:$0xff]  }
  0x11   : > { %v360_v30 = vadd.s32 4294967295, %v357_v29 }
  0x12   : > { %vm257_vm0 = vcmp.ge.f32.partialorder %v751_v2, 0.0  ;;  %vm259_vm1 = vcmp.ge.f32.partialorder %v753_v3, 0.0  ;;  %v261_v6 = vmul.f32 0.1, %v751_v2  ;;  %v263_v7 = vmul.f32 0.1, %v753_v3 }
  0x13   : > { %vm258_vm2 = vcmp.ge.f32.partialorder %v755_v4, 0.0  ;;  %vm260_vm3 = vcmp.ge.f32.partialorder %v757_v5, 0.0  ;;  %v262_v8 = vmul.f32 0.1, %v755_v4  ;;  %v264_v9 = vmul.f32 0.1, %v757_v5 }
  0x14   : > { %v265_v10 = vsel %vm257_vm0, %v751_v2, %v261_v6  ;;  %v267_v11 = vsel %vm259_vm1, %v753_v3, %v263_v7  ;;  %vm362_vm7 = vcmp.ge.s32.totalorder %v360_v30, 0  ;;  %vm364_vm8 = vcmp.lt.s32.totalorder %v360_v30, 64 }
  0x15   : > { %v269_v12 = vpack.c.bf16 %v267_v11, %v265_v10  ;;  %v266_v13 = vsel %vm258_vm2, %v755_v4, %v262_v8  ;;  %v268_v14 = vsel %vm260_vm3, %v757_v5, %v264_v9  ;;  %vm366_vm9 = vmand %vm362_vm7, %vm364_vm8  ;;  %v657_v47 = vpack.i.bf16 %v757_v5, %v753_v3 }
  0x16   : > { %v270_v15 = vpack.c.bf16 %v268_v14, %v266_v13  ;;  %v652_v49 = vpack.i.bf16 %v755_v4, %v751_v2 }
  0x17   : > { %273 = vrot.lane.b32.xlu1 %v269_v12, %s688_s26  ;;  %281 = vrot.lane.b32.xlu0 %v269_v12, %s689_s27 }
  0x1b   : > { %275 = vrot.lane.b32.xlu1 %v270_v15, %s688_s26  ;;  %283 = vrot.lane.b32.xlu0 %v270_v15, %s689_s27 }
  0x1f   : > { %295 = vperm.xlu0 %650, %v291_v17   ;;  %300 = vperm.xlu1 %651, %v292_v18  }
  0x23   : > { %401 = vrot.lane.b32.xlu0 %v691_v19, %s692_s7 }
  0x27   : > { %394 = vrot.lane.b32.xlu0 %v691_v19, %s693_s8 }
  0x2b   : > { %417 = vperm.xlu0 %650, %v409_v20  }
  0x2f   : > { %658 = vrot.lane.b32.xlu0 %v657_v47, %s696_s15 }
  0x89   : > { %v274_v21 = vpop.permute.xlu1 %273  ;;  %v282_v22 = vpop.permute.xlu0 %281 }
  0x8d   : > { %v284_v23 = vpop.permute.xlu0 %283  ;;  %v276_v25 = vpop.permute.xlu1 %275 }
  0x8e   : > { %322 = vmatprep.subr.bf16.mxu0 %v284_v23  ;;  %v286_v24 = vsel %vm285_vm4, %v282_v22, %v284_v23  ;;  %v278_v26 = vsel %vm277_vm5, %v274_v21, %v276_v25 }
  0x8f   : > { %323 = vmatpush1.bf16.msra.mxu0 %v286_v24 }
  0x90   : > { %324 = vmatprep.subr.bf16.mxu0 %v276_v25 }
  0x93   : > { %325 = vmatpush1.bf16.msra.mxu0 %v278_v26 }
  0x94   : > { %326 = vmatprep.subr.bf16.mxu0 %v270_v15 }
  0x97   : > { %327 = vmatpush1.bf16.msra.mxu0 %v269_v12 }
  0x9a   : > { %587 = vmatmul.mubr.msk.bf16.vlgmr.msra.gmra.mxu0 %vm308_vm6, %v662_v27  ;;  %v296_v31 = vpop.permute.xlu0 %295  ;;  %v301_v36 = vpop.permute.xlu1 %300 }
  0x9e   : > { %v402_v50 = vpop.permute.xlu0 %401 }
  0xa2   : > { %v395_v53 = vpop.permute.xlu0 %394 }
  0xa6   : > { %v418_v57 = vpop.permute.xlu0 %417 }
  0xaa   : > { %v659_v60 = vpop.permute.xlu0 %658 }
  0xab   : > { %v661_v0 = vunpack.i.h.bf16 %v659_v60  ;;  %v660_v1 = vunpack.i.l.bf16 %v659_v60 }
  0xad   : > { %v483_v6 = vsel %vm481_vm15, %v660_v1, %v661_v0 }
 0x15a   : > { %v346_v32 = vpop.f32.mrf.mxu0 }
 0x15b   : > { %v347_v34 = vadd.f32 %v346_v32, %v296_v31 }
 0x15c   : > { %v348_v35 = vpop.f32.mrf.mxu0 }
 0x15d   : > { %v372_v37 = vsel %vm366_vm9, %v347_v34, 0.0 }
 0x15e   : > { %v350_v38 = vpop.f32.mrf.mxu0  ;;  %v380_v40 = vmul.f32 0.1, %v372_v37  ;;  %vm376_vm10 = vcmp.ge.f32.partialorder %v372_v37, 0.0 }
 0x15f   : > { %v351_v39 = vadd.f32 %v350_v38, %v301_v36 }
 0x160   : > { %v352_v41 = vpop.f32.mrf.mxu0  ;;  %v384_v44 = vsel %vm376_vm10, %v372_v37, %v380_v40 }
 0x161   : > { %v374_v42 = vsel %vm366_vm9, %v351_v39, 0.0 }
 0x162   : > { %vm378_vm11 = vcmp.ge.f32.partialorder %v374_v42, 0.0  ;;  %v382_v43 = vmul.f32 0.1, %v374_v42 }
 0x164   : > { %v386_v45 = vsel %vm378_vm11, %v374_v42, %v382_v43 }
 0x165   : > { %v388_v46 = vpack.c.bf16 %v386_v45, %v384_v44 }
 0x167   : > { %399 = vrot.lane.b32.xlu1 %v388_v46, %s692_s7 }
 0x16b   : > { %392 = vrot.lane.b32.xlu1 %v388_v46, %s693_s8 }
 0x16f   : > { %412 = vperm.xlu1 %651, %v408_v48  }
 0x173   : > { %653 = vrot.lane.b32.xlu1 %v652_v49, %s696_s15 }
 0x1d9   : > { %v400_v51 = vpop.permute.xlu1 %399 }
 0x1da   : > { %v404_v52 = vsel %vm403_vm13, %v400_v51, %v402_v50 }
 0x1db   : > { %608 = vmatpush3.bf16.msra.mxu1 %v404_v52 }
 0x1dc   : > { %609 = vmatprep.subr.bf16.mxu1 %v694_v33 }
 0x1dd   : > { %v393_v54 = vpop.permute.xlu1 %392 }
 0x1de   : > { %v397_v55 = vsel %vm396_vm14, %v393_v54, %v395_v53 }
 0x1df   : > { %610 = vmatpush3.bf16.msra.mxu1 %v397_v55 }
 0x1e0   : > { %611 = vmatprep.subr.bf16.mxu1 %v694_v33 }
 0x1e3   : > { %612 = vmatpush3.bf16.msra.mxu1 %v388_v46 }
 0x1e6   : > { %614 = vmatmul.mubr.msk.bf16.vlgmr.msra.gmra.mxu1 %vm308_vm6, %v663_v56 }
 0x1ea   : > { %v413_v58 = vpop.permute.xlu1 %412 }
 0x1ee   : > { %v654_v59 = vpop.permute.xlu1 %653 }
 0x1ef   : > { %v656_v61 = vunpack.i.h.bf16 %v654_v59  ;;  %v655_v62 = vunpack.i.l.bf16 %v654_v59 }
 0x1f1   : > { %v482_v4 = vsel %vm481_vm15, %v655_v62, %v656_v61 }
 0x2a6   : > { %v462_v63 = vpop.f32.mrf.mxu1 }
 0x2a7   : > { %v463_v3 = vadd.f32 %v462_v63, %v413_v58 }
 0x2a8   : > { %v615_v2 = vpop.f32.mrf.mxu1 }
 0x2a9   : > { %v486_v9 = vadd.f32 %v482_v4, %v463_v3 }
 0x2aa   : > { %v465_v5 = vpop.f32.mrf.mxu1 }
 0x2ab   : > { %v466_v7 = vadd.f32 %v465_v5, %v418_v57 }
 0x2ac   : > { %v616_v8 = vpop.f32.mrf.mxu1 }
 0x2ad   : > { %v487_v10 = vadd.f32 %v483_v6, %v466_v7 }
 0x2af   : > { %v601_v11 = vpack.c.bf16 %v487_v10, %v486_v9 }
 0x2b1   : > { %602 = vst [vmem:[%s244_s25] sm:$0xff] %v601_v11  }
 0x2b2 PF: > { %s15_s20 = sadd.s32 1, %s686_s20   ;;  %s818_s18 = smov %s682_s19 }
 0x2b3   : > { %p12_p5 = scmp.ge.s32.totalorder %s15_s20, 4   ;;  %s819_s19 = smov %s821_s21 }
 0x2b5   :  { %14 = sbr.rel (!%p12_p5) target bundleno = 2 (0x2), region = 71 }

// kernel: generator_forward.20
= control target key start
LH: loop header
LB: loop body
LE: loop exit
PB: predicated region body
PF: predicated region fallthrough
CT: control target
= control target key end

     0   :  { %s727_s18 = smov 0   ;;  %s729_s19 = smov 0   ;;  %s812_s0 = inlined_call_operand.vmem [shape: bf16[2,16,140], index: 0, kind: input, shape index: {}]   ;;  %s813_s1 = inlined_call_operand.vmem [shape: bf16[16,48], index: 1, kind: input, shape index: {}]   ;;  %s814_s2 = inlined_call_operand.vmem [shape: f32[16,1], index: 2, kind: input, shape index: {}]   ;;  %s815_s3 = inlined_call_operand.vmem [shape: bf16[16,48], index: 3, kind: input, shape index: {}]   ;;  %s816_s4 = inlined_call_operand.vmem [shape: f32[16,1], index: 4, kind: input, shape index: {}]   ;;  %s817_s5 = inlined_call_operand.vmem [shape: bf16[2,16,128], index: 5, kind: output, shape index: {}]  }
   0x1   :  { %s731_s20 = smov 0  }
   0x2 LB: > { %s27_s21 = sadd.s32 1, %s682_s19  ;;  %p581_p0 = scmp.ge.s32.totalorder %s686_s20, 1  ;;  %s686_s20 = sphi %s731_s20, %s15_s20   ;;  %s682_s19 = sphi %s729_s19, %s819_s19   ;;  %s678_s18 = sphi %s727_s18, %s818_s18  }
   0x3   : > { %p29_p1 = scmp.ge.s32.totalorder %s27_s21, 2  ;;  %p201_p2 = scmp.lt.s32.totalorder %s686_s20, 3 }
   0x5   : > { %s821_s21 = smov (%p29_p1, %s27_s21), 0  ;;  %p202_p3 = pnand %p581_p0, %p201_p2 }
   0x6   : > { %p232_p4 = scmp.lt.s32.totalorder (!%p202_p3), %s678_s18, 1  ;;  %s688_s26 = smov (!%p202_p3), 123  }
   0x7   : > { %205 = sbr.rel (%p202_p3) target bundleno = 690 (0x2b2), region = 40  ;;  %s689_s27 = smov (!%p202_p3), 118  }
   0x8   : > { %s692_s7 = smov (!%p202_p3), 126   ;;  %s693_s8 = smov (!%p202_p3), 127  }
   0x9   : > { %s696_s15 = smov (!%p202_p3), 122  }
   0xc   : > { %s823_s18 = smov (!%p232_p4, %s678_s18), 1  ;;  %v690_v16 = vmov 0   ;;  %v291_v17 = vld [vmem:[%s814_s2] sm:$0xff]  ;;  %v292_v18 = vld [vmem:[%s814_s2 + $0x8] sm:$0xff]  ;;  %v691_v19 = vmov 0.0|0.0   ;;  %vm285_vm4 = vcmask 965632   ;;  %v356_v28 = vlaneseq }
   0xd   : > { %s594_s22 = sshll.u32 %s823_s18, 4  ;;  %344 = vmatprep.mubr.bf16.mxu0 %v690_v16  ;;  %650 = vset.pattern.permute.xlu0 %v690_v16  ;;  %v409_v20 = vld [vmem:[%s816_s4 + $0x8] sm:$0xff]  ;;  %vm277_vm5 = vcmask 1006592   ;;  %v662_v27 = vld [vmem:[%s813_s1] sm:$0xff]   ;;  %vm308_vm6 = vcmask 392192   ;;  %v694_v33 = vmov 0.0  }
   0xe   : > { %s236_s25 = scalar_lea.vmem %s812_s0, %s594_s22  ;;  %651 = vset.pattern.permute.xlu1 %v690_v16  ;;  %v357_v29 = vand.u32 127, %v356_v28  ;;  %607 = vmatprep.subr.bf16.mxu1 %v694_v33  ;;  %vm695_vm12 = vmmov 0   ;;  %v408_v48 = vld [vmem:[%s816_s4] sm:$0xff]  ;;  %vm403_vm13 = vcmask 1031168   ;;  %vm396_vm14 = vcmask 1039360   ;;  %s595_s22 = sshll.u32 %s823_s18, 3 }
   0xf   : > { %v251_v0 = vld [vmem:[%s236_s25] sm:$0xff]  ;;  %v252_v1 = vld [vmem:[%s236_s25 + $0x8] sm:$0xff]  ;;  %613 = vmatprep.mubr.msk.bf16.mxu1 %vm695_vm12, %v694_v33  ;;  %vm481_vm15 = vcmask 998400   ;;  %s244_s25 = scalar_lea.vmem %s817_s5, %s595_s22 }
  0x10   : > { %v751_v2 = vunpack.c.l.bf16 %v251_v0  ;;  %v753_v3 = vunpack.c.l.bf16 %v252_v1  ;;  %v755_v4 = vunpack.c.h.bf16 %v251_v0  ;;  %v757_v5 = vunpack.c.h.bf16 %v252_v1  ;;  %v663_v56 = vld [vmem:[%s815_s3] sm:$0xff]  }
  0x11   : > { %v360_v30 = vadd.s32 4294967295, %v357_v29 }
  0x12   : > { %vm257_vm0 = vcmp.ge.f32.partialorder %v751_v2, 0.0  ;;  %vm259_vm1 = vcmp.ge.f32.partialorder %v753_v3, 0.0  ;;  %v261_v6 = vmul.f32 0.1, %v751_v2  ;;  %v263_v7 = vmul.f32 0.1, %v753_v3 }
  0x13   : > { %vm258_vm2 = vcmp.ge.f32.partialorder %v755_v4, 0.0  ;;  %vm260_vm3 = vcmp.ge.f32.partialorder %v757_v5, 0.0  ;;  %v262_v8 = vmul.f32 0.1, %v755_v4  ;;  %v264_v9 = vmul.f32 0.1, %v757_v5 }
  0x14   : > { %v265_v10 = vsel %vm257_vm0, %v751_v2, %v261_v6  ;;  %v267_v11 = vsel %vm259_vm1, %v753_v3, %v263_v7  ;;  %vm362_vm7 = vcmp.ge.s32.totalorder %v360_v30, 0  ;;  %vm364_vm8 = vcmp.lt.s32.totalorder %v360_v30, 64 }
  0x15   : > { %v269_v12 = vpack.c.bf16 %v267_v11, %v265_v10  ;;  %v266_v13 = vsel %vm258_vm2, %v755_v4, %v262_v8  ;;  %v268_v14 = vsel %vm260_vm3, %v757_v5, %v264_v9  ;;  %vm366_vm9 = vmand %vm362_vm7, %vm364_vm8  ;;  %v657_v47 = vpack.i.bf16 %v757_v5, %v753_v3 }
  0x16   : > { %v270_v15 = vpack.c.bf16 %v268_v14, %v266_v13  ;;  %v652_v49 = vpack.i.bf16 %v755_v4, %v751_v2 }
  0x17   : > { %273 = vrot.lane.b32.xlu1 %v269_v12, %s688_s26  ;;  %281 = vrot.lane.b32.xlu0 %v269_v12, %s689_s27 }
  0x1b   : > { %275 = vrot.lane.b32.xlu1 %v270_v15, %s688_s26  ;;  %283 = vrot.lane.b32.xlu0 %v270_v15, %s689_s27 }
  0x1f   : > { %295 = vperm.xlu0 %650, %v291_v17   ;;  %300 = vperm.xlu1 %651, %v292_v18  }
  0x23   : > { %401 = vrot.lane.b32.xlu0 %v691_v19, %s692_s7 }
  0x27   : > { %394 = vrot.lane.b32.xlu0 %v691_v19, %s693_s8 }
  0x2b   : > { %417 = vperm.xlu0 %650, %v409_v20  }
  0x2f   : > { %658 = vrot.lane.b32.xlu0 %v657_v47, %s696_s15 }
  0x89   : > { %v274_v21 = vpop.permute.xlu1 %273  ;;  %v282_v22 = vpop.permute.xlu0 %281 }
  0x8d   : > { %v284_v23 = vpop.permute.xlu0 %283  ;;  %v276_v25 = vpop.permute.xlu1 %275 }
  0x8e   : > { %322 = vmatprep.subr.bf16.mxu0 %v284_v23  ;;  %v286_v24 = vsel %vm285_vm4, %v282_v22, %v284_v23  ;;  %v278_v26 = vsel %vm277_vm5, %v274_v21, %v276_v25 }
  0x8f   : > { %323 = vmatpush1.bf16.msra.mxu0 %v286_v24 }
  0x90   : > { %324 = vmatprep.subr.bf16.mxu0 %v276_v25 }
  0x93   : > { %325 = vmatpush1.bf16.msra.mxu0 %v278_v26 }
  0x94   : > { %326 = vmatprep.subr.bf16.mxu0 %v270_v15 }
  0x97   : > { %327 = vmatpush1.bf16.msra.mxu0 %v269_v12 }
  0x9a   : > { %587 = vmatmul.mubr.msk.bf16.vlgmr.msra.gmra.mxu0 %vm308_vm6, %v662_v27  ;;  %v296_v31 = vpop.permute.xlu0 %295  ;;  %v301_v36 = vpop.permute.xlu1 %300 }
  0x9e   : > { %v402_v50 = vpop.permute.xlu0 %401 }
  0xa2   : > { %v395_v53 = vpop.permute.xlu0 %394 }
  0xa6   : > { %v418_v57 = vpop.permute.xlu0 %417 }
  0xaa   : > { %v659_v60 = vpop.permute.xlu0 %658 }
  0xab   : > { %v661_v0 = vunpack.i.h.bf16 %v659_v60  ;;  %v660_v1 = vunpack.i.l.bf16 %v659_v60 }
  0xad   : > { %v483_v6 = vsel %vm481_vm15, %v660_v1, %v661_v0 }
 0x15a   : > { %v346_v32 = vpop.f32.mrf.mxu0 }
 0x15b   : > { %v347_v34 = vadd.f32 %v346_v32, %v296_v31 }
 0x15c   : > { %v348_v35 = vpop.f32.mrf.mxu0 }
 0x15d   : > { %v372_v37 = vsel %vm366_vm9, %v347_v34, 0.0 }
 0x15e   : > { %v350_v38 = vpop.f32.mrf.mxu0  ;;  %v380_v40 = vmul.f32 0.1, %v372_v37  ;;  %vm376_vm10 = vcmp.ge.f32.partialorder %v372_v37, 0.0 }
 0x15f   : > { %v351_v39 = vadd.f32 %v350_v38, %v301_v36 }
 0x160   : > { %v352_v41 = vpop.f32.mrf.mxu0  ;;  %v384_v44 = vsel %vm376_vm10, %v372_v37, %v380_v40 }
 0x161   : > { %v374_v42 = vsel %vm366_vm9, %v351_v39, 0.0 }
 0x162   : > { %vm378_vm11 = vcmp.ge.f32.partialorder %v374_v42, 0.0  ;;  %v382_v43 = vmul.f32 0.1, %v374_v42 }
 0x164   : > { %v386_v45 = vsel %vm378_vm11, %v374_v42, %v382_v43 }
 0x165   : > { %v388_v46 = vpack.c.bf16 %v386_v45, %v384_v44 }
 0x167   : > { %399 = vrot.lane.b32.xlu1 %v388_v46, %s692_s7 }
 0x16b   : > { %392 = vrot.lane.b32.xlu1 %v388_v46, %s693_s8 }
 0x16f   : > { %412 = vperm.xlu1 %651, %v408_v48  }
 0x173   : > { %653 = vrot.lane.b32.xlu1 %v652_v49, %s696_s15 }
 0x1d9   : > { %v400_v51 = vpop.permute.xlu1 %399 }
 0x1da   : > { %v404_v52 = vsel %vm403_vm13, %v400_v51, %v402_v50 }
 0x1db   : > { %608 = vmatpush3.bf16.msra.mxu1 %v404_v52 }
 0x1dc   : > { %609 = vmatprep.subr.bf16.mxu1 %v694_v33 }
 0x1dd   : > { %v393_v54 = vpop.permute.xlu1 %392 }
 0x1de   : > { %v397_v55 = vsel %vm396_vm14, %v393_v54, %v395_v53 }
 0x1df   : > { %610 = vmatpush3.bf16.msra.mxu1 %v397_v55 }
 0x1e0   : > { %611 = vmatprep.subr.bf16.mxu1 %v694_v33 }
 0x1e3   : > { %612 = vmatpush3.bf16.msra.mxu1 %v388_v46 }
 0x1e6   : > { %614 = vmatmul.mubr.msk.bf16.vlgmr.msra.gmra.mxu1 %vm308_vm6, %v663_v56 }
 0x1ea   : > { %v413_v58 = vpop.permute.xlu1 %412 }
 0x1ee   : > { %v654_v59 = vpop.permute.xlu1 %653 }
 0x1ef   : > { %v656_v61 = vunpack.i.h.bf16 %v654_v59  ;;  %v655_v62 = vunpack.i.l.bf16 %v654_v59 }
 0x1f1   : > { %v482_v4 = vsel %vm481_vm15, %v655_v62, %v656_v61 }
 0x2a6   : > { %v462_v63 = vpop.f32.mrf.mxu1 }
 0x2a7   : > { %v463_v3 = vadd.f32 %v462_v63, %v413_v58 }
 0x2a8   : > { %v615_v2 = vpop.f32.mrf.mxu1 }
 0x2a9   : > { %v486_v9 = vadd.f32 %v482_v4, %v463_v3 }
 0x2aa   : > { %v465_v5 = vpop.f32.mrf.mxu1 }
 0x2ab   : > { %v466_v7 = vadd.f32 %v465_v5, %v418_v57 }
 0x2ac   : > { %v616_v8 = vpop.f32.mrf.mxu1 }
 0x2ad   : > { %v487_v10 = vadd.f32 %v483_v6, %v466_v7 }
 0x2af   : > { %v601_v11 = vpack.c.bf16 %v487_v10, %v486_v9 }
 0x2b1   : > { %602 = vst [vmem:[%s244_s25] sm:$0xff] %v601_v11  }
 0x2b2 PF: > { %s15_s20 = sadd.s32 1, %s686_s20   ;;  %s818_s18 = smov %s682_s19 }
 0x2b3   : > { %p12_p5 = scmp.ge.s32.totalorder %s15_s20, 4   ;;  %s819_s19 = smov %s821_s21 }
 0x2b5   :  { %14 = sbr.rel (!%p12_p5) target bundleno = 2 (0x2), region = 71 }

// kernel: generator_forward.21
= control target key start
LH: loop header
LB: loop body
LE: loop exit
PB: predicated region body
PF: predicated region fallthrough
CT: control target
= control target key end

     0   :  { %s757_s18 = smov 0   ;;  %s759_s19 = smov 0   ;;  %s866_s0 = inlined_call_operand.vmem [shape: bf16[2,16,136], index: 0, kind: input, shape index: {}]   ;;  %s867_s1 = inlined_call_operand.vmem [shape: bf16[16,80], index: 1, kind: input, shape index: {}]   ;;  %s868_s2 = inlined_call_operand.vmem [shape: f32[16,1], index: 2, kind: input, shape index: {}]   ;;  %s869_s3 = inlined_call_operand.vmem [shape: bf16[16,80], index: 3, kind: input, shape index: {}]   ;;  %s870_s4 = inlined_call_operand.vmem [shape: f32[16,1], index: 4, kind: input, shape index: {}]   ;;  %s871_s5 = inlined_call_operand.vmem [shape: bf16[2,16,128], index: 5, kind: output, shape index: {}]  }
   0x1   :  { %s761_s20 = smov 0  }
   0x2 LB: > { %s27_s21 = sadd.s32 1, %s713_s19  ;;  %p607_p0 = scmp.ge.s32.totalorder %s717_s20, 1  ;;  %s717_s20 = sphi %s761_s20, %s15_s20   ;;  %s713_s19 = sphi %s759_s19, %s873_s19   ;;  %s709_s18 = sphi %s757_s18, %s872_s18  }
   0x3   : > { %p29_p1 = scmp.ge.s32.totalorder %s27_s21, 2  ;;  %p201_p2 = scmp.lt.s32.totalorder %s717_s20, 3 }
   0x5   : > { %s875_s21 = smov (%p29_p1, %s27_s21), 0  ;;  %p202_p3 = pnand %p607_p0, %p201_p2 }
   0x6   : > { %p232_p4 = scmp.lt.s32.totalorder (!%p202_p3), %s709_s18, 1  ;;  %s719_s26 = smov (!%p202_p3), 125  }
   0x7   : > { %205 = sbr.rel (%p202_p3) target bundleno = 706 (0x2c2), region = 40  ;;  %s720_s27 = smov (!%p202_p3), 124  }
   0x8   : > { %s721_s28 = smov (!%p202_p3), 126   ;;  %s723_s29 = smov (!%p202_p3), 127  }
   0xc   : > { %s877_s18 = smov (!%p232_p4, %s709_s18), 1  ;;  %v722_v16 = vmov 0   ;;  %v307_v17 = vld [vmem:[%s868_s2] sm:$0xff]  ;;  %v308_v18 = vld [vmem:[%s868_s2 + $0x8] sm:$0xff]  ;;  %v724_v19 = vmov 0.0|0.0   ;;  %vm301_vm4 = vcmask 1014784   ;;  %v372_v34 = vlaneseq }
   0xd   : > { %s620_s22 = sshll.u32 %s877_s18, 4  ;;  %360 = vmatprep.mubr.bf16.mxu0 %v722_v16  ;;  %681 = vset.pattern.permute.xlu0 %v722_v16  ;;  %v435_v20 = vld [vmem:[%s870_s4 + $0x8] sm:$0xff]  ;;  %vm293_vm5 = vcmask 1022976   ;;  %vm285_vm6 = vcmask 1031168   ;;  %vm277_vm7 = vcmask 1039360   ;;  %v693_v33 = vld [vmem:[%s867_s1] sm:$0xff]  }
   0xe   : > { %s236_s25 = scalar_lea.vmem %s866_s0, %s620_s22  ;;  %682 = vset.pattern.permute.xlu1 %v722_v16  ;;  %vm324_vm8 = vcmask 654336   ;;  %v373_v35 = vand.u32 127, %v372_v34  ;;  %v725_v39 = vmov 0.0   ;;  %vm726_vm14 = vmmov 0   ;;  %v434_v54 = vld [vmem:[%s870_s4] sm:$0xff]  ;;  %s621_s17 = sshll.u32 %s877_s18, 3 }
   0xf   : > { %v251_v0 = vld [vmem:[%s236_s25] sm:$0xff]  ;;  %v252_v1 = vld [vmem:[%s236_s25 + $0x8] sm:$0xff]  ;;  %635 = vmatprep.subr.bf16.mxu1 %v725_v39  ;;  %645 = vmatprep.mubr.msk.bf16.mxu1 %vm726_vm14, %v725_v39  ;;  %s244_s24 = scalar_lea.vmem %s871_s5, %s621_s17 }
  0x10   : > { %v781_v2 = vunpack.c.l.bf16 %v251_v0  ;;  %v783_v3 = vunpack.c.l.bf16 %v252_v1  ;;  %v785_v4 = vunpack.c.h.bf16 %v251_v0  ;;  %v787_v5 = vunpack.c.h.bf16 %v252_v1 }
  0x11   : > { %v376_v36 = vadd.s32 4294967294, %v373_v35 }
  0x12   : > { %vm257_vm0 = vcmp.ge.f32.partialorder %v781_v2, 0.0  ;;  %vm259_vm1 = vcmp.ge.f32.partialorder %v783_v3, 0.0  ;;  %v261_v6 = vmul.f32 0.1, %v781_v2  ;;  %v263_v7 = vmul.f32 0.1, %v783_v3 }
  0x13   : > { %vm258_vm2 = vcmp.ge.f32.partialorder %v785_v4, 0.0  ;;  %vm260_vm3 = vcmp.ge.f32.partialorder %v787_v5, 0.0  ;;  %v262_v8 = vmul.f32 0.1, %v785_v4  ;;  %v264_v9 = vmul.f32 0.1, %v787_v5 }
  0x14   : > { %v265_v10 = vsel %vm257_vm0, %v781_v2, %v261_v6  ;;  %v267_v11 = vsel %vm259_vm1, %v783_v3, %v263_v7  ;;  %vm378_vm9 = vcmp.ge.s32.totalorder %v376_v36, 0  ;;  %vm380_vm10 = vcmp.lt.s32.totalorder %v376_v36, 64 }
  0x15   : > { %v269_v12 = vpack.c.bf16 %v267_v11, %v265_v10  ;;  %v266_v13 = vsel %vm258_vm2, %v785_v4, %v262_v8  ;;  %v268_v14 = vsel %vm260_vm3, %v787_v5, %v264_v9  ;;  %vm382_vm11 = vmand %vm378_vm9, %vm380_vm10  ;;  %v688_v53 = vpack.i.bf16 %v787_v5, %v783_v3 }
  0x16   : > { %v270_v15 = vpack.c.bf16 %v268_v14, %v266_v13  ;;  %v683_v55 = vpack.i.bf16 %v785_v4, %v781_v2  ;;  %v694_v4 = vld [vmem:[%s869_s3] sm:$0xff]  }
  0x17   : > { %289 = vrot.lane.b32.xlu1 %v269_v12, %s719_s26  ;;  %297 = vrot.lane.b32.xlu0 %v269_v12, %s720_s27 }
  0x1b   : > { %291 = vrot.lane.b32.xlu1 %v270_v15, %s719_s26  ;;  %299 = vrot.lane.b32.xlu0 %v270_v15, %s720_s27 }
  0x1f   : > { %283 = vrot.lane.b32.xlu1 %v270_v15, %s721_s28  ;;  %281 = vrot.lane.b32.xlu0 %v269_v12, %s721_s28 }
  0x23   : > { %275 = vrot.lane.b32.xlu1 %v270_v15, %s723_s29  ;;  %273 = vrot.lane.b32.xlu0 %v269_v12, %s723_s29 }
  0x27   : > { %311 = vperm.xlu0 %681, %v307_v17   ;;  %316 = vperm.xlu1 %682, %v308_v18  }
  0x2b   : > { %428 = vrot.lane.b32.xlu0 %v724_v19, %s720_s27 }
  0x2f   : > { %422 = vrot.lane.b32.xlu0 %v724_v19, %s719_s26 }
  0x33   : > { %416 = vrot.lane.b32.xlu0 %v724_v19, %s721_s28 }
  0x37   : > { %410 = vrot.lane.b32.xlu0 %v724_v19, %s723_s29 }
  0x3b   : > { %443 = vperm.xlu0 %681, %v435_v20  }
  0x3f   : > { %689 = vrot.lane.b32.xlu0 %v688_v53, %s720_s27 }
  0x89   : > { %v290_v21 = vpop.permute.xlu1 %289  ;;  %v298_v22 = vpop.permute.xlu0 %297 }
  0x8d   : > { %v292_v23 = vpop.permute.xlu1 %291  ;;  %v300_v24 = vpop.permute.xlu0 %299 }
  0x8e   : > { %334 = vmatprep.subr.bf16.mxu0 %v300_v24  ;;  %v302_v25 = vsel %vm301_vm4, %v298_v22, %v300_v24  ;;  %v294_v28 = vsel %vm293_vm5, %v290_v21, %v292_v23 }
  0x8f   : > { %335 = vmatpush1.bf16.msra.mxu0 %v302_v25 }
  0x90   : > { %336 = vmatprep.subr.bf16.mxu0 %v292_v23 }
  0x91   : > { %v284_v26 = vpop.permute.xlu1 %283  ;;  %v282_v27 = vpop.permute.xlu0 %281 }
  0x92   : > { %v286_v29 = vsel %vm285_vm6, %v282_v27, %v284_v26 }
  0x93   : > { %337 = vmatpush1.bf16.msra.mxu0 %v294_v28 }
  0x94   : > { %338 = vmatprep.subr.bf16.mxu0 %v284_v26 }
  0x95   : > { %v276_v30 = vpop.permute.xlu1 %275  ;;  %v274_v31 = vpop.permute.xlu0 %273 }
  0x96   : > { %v278_v32 = vsel %vm277_vm7, %v274_v31, %v276_v30 }
  0x97   : > { %339 = vmatpush1.bf16.msra.mxu0 %v286_v29 }
  0x98   : > { %340 = vmatprep.subr.bf16.mxu0 %v276_v30 }
  0x9b   : > { %341 = vmatpush1.bf16.msra.mxu0 %v278_v32 }
  0x9c   : > { %342 = vmatprep.subr.bf16.mxu0 %v270_v15 }
  0x9f   : > { %343 = vmatpush1.bf16.msra.mxu0 %v269_v12 }
  0xa2   : > { %613 = vmatmul.mubr.msk.bf16.vlgmr.msra.gmra.mxu0 %vm324_vm8, %v693_v33  ;;  %v312_v37 = vpop.permute.xlu0 %311  ;;  %v317_v42 = vpop.permute.xlu1 %316 }
  0xa6   : > { %v429_v56 = vpop.permute.xlu0 %428 }
  0xaa   : > { %v423_v57 = vpop.permute.xlu0 %422 }
  0xae   : > { %v417_v62 = vpop.permute.xlu0 %416 }
  0xb2   : > { %v411_v1 = vpop.permute.xlu0 %410 }
  0xb6   : > { %v444_v5 = vpop.permute.xlu0 %443 }
  0xba   : > { %v690_v8 = vpop.permute.xlu0 %689 }
  0xbb   : > { %v692_v12 = vunpack.i.h.bf16 %v690_v8  ;;  %v691_v13 = vunpack.i.l.bf16 %v690_v8 }
  0xbd   : > { %v509_v18 = vsel %vm301_vm4, %v691_v13, %v692_v12 }
 0x162   : > { %v362_v38 = vpop.f32.mrf.mxu0 }
 0x163   : > { %v363_v40 = vadd.f32 %v362_v38, %v312_v37 }
 0x164   : > { %v364_v41 = vpop.f32.mrf.mxu0 }
 0x165   : > { %v388_v43 = vsel %vm382_vm11, %v363_v40, 0.0 }
 0x166   : > { %v366_v44 = vpop.f32.mrf.mxu0  ;;  %v396_v46 = vmul.f32 0.1, %v388_v43  ;;  %vm392_vm12 = vcmp.ge.f32.partialorder %v388_v43, 0.0 }
 0x167   : > { %v367_v45 = vadd.f32 %v366_v44, %v317_v42 }
 0x168   : > { %v368_v47 = vpop.f32.mrf.mxu0  ;;  %v400_v50 = vsel %vm392_vm12, %v388_v43, %v396_v46 }
 0x169   : > { %v390_v48 = vsel %vm382_vm11, %v367_v45, 0.0 }
 0x16a   : > { %vm394_vm13 = vcmp.ge.f32.partialorder %v390_v48, 0.0  ;;  %v398_v49 = vmul.f32 0.1, %v390_v48 }
 0x16c   : > { %v402_v51 = vsel %vm394_vm13, %v390_v48, %v398_v49 }
 0x16d   : > { %v404_v52 = vpack.c.bf16 %v402_v51, %v400_v50 }
 0x16f   : > { %426 = vrot.lane.b32.xlu1 %v404_v52, %s720_s27 }
 0x173   : > { %420 = vrot.lane.b32.xlu1 %v404_v52, %s719_s26 }
 0x177   : > { %414 = vrot.lane.b32.xlu1 %v404_v52, %s721_s28 }
 0x17b   : > { %408 = vrot.lane.b32.xlu1 %v404_v52, %s723_s29 }
 0x17f   : > { %438 = vperm.xlu1 %682, %v434_v54  }
 0x183   : > { %684 = vrot.lane.b32.xlu1 %v683_v55, %s720_s27 }
 0x1e1   : > { %v427_v58 = vpop.permute.xlu1 %426 }
 0x1e2   : > { %v430_v59 = vsel %vm301_vm4, %v427_v58, %v429_v56 }
 0x1e3   : > { %636 = vmatpush3.bf16.msra.mxu1 %v430_v59 }
 0x1e4   : > { %637 = vmatprep.subr.bf16.mxu1 %v725_v39 }
 0x1e5   : > { %v421_v60 = vpop.permute.xlu1 %420 }
 0x1e6   : > { %v424_v61 = vsel %vm293_vm5, %v421_v60, %v423_v57 }
 0x1e7   : > { %638 = vmatpush3.bf16.msra.mxu1 %v424_v61 }
 0x1e8   : > { %639 = vmatprep.subr.bf16.mxu1 %v725_v39 }
 0x1e9   : > { %v415_v63 = vpop.permute.xlu1 %414 }
 0x1ea   : > { %v418_v0 = vsel %vm285_vm6, %v415_v63, %v417_v62 }
 0x1eb   : > { %640 = vmatpush3.bf16.msra.mxu1 %v418_v0 }
 0x1ec   : > { %641 = vmatprep.subr.bf16.mxu1 %v725_v39 }
 0x1ed   : > { %v409_v2 = vpop.permute.xlu1 %408 }
 0x1ee   : > { %v412_v3 = vsel %vm277_vm7, %v409_v2, %v411_v1 }
 0x1ef   : > { %642 = vmatpush3.bf16.msra.mxu1 %v412_v3 }
 0x1f0   : > { %643 = vmatprep.subr.bf16.mxu1 %v725_v39 }
 0x1f3   : > { %644 = vmatpush3.bf16.msra.mxu1 %v404_v52 }
 0x1f6   : > { %646 = vmatmul.mubr.msk.bf16.vlgmr.msra.gmra.mxu1 %vm324_vm8, %v694_v4 }
 0x1fa   : > { %v439_v6 = vpop.permute.xlu1 %438 }
 0x1fe   : > { %v685_v7 = vpop.permute.xlu1 %684 }
 0x1ff   : > { %v687_v9 = vunpack.i.h.bf16 %v685_v7  ;;  %v686_v10 = vunpack.i.l.bf16 %v685_v7 }
 0x201   : > { %v508_v16 = vsel %vm301_vm4, %v686_v10, %v687_v9 }
 0x2b6   : > { %v488_v11 = vpop.f32.mrf.mxu1 }
 0x2b7   : > { %v489_v15 = vadd.f32 %v488_v11, %v439_v6 }
 0x2b8   : > { %v647_v14 = vpop.f32.mrf.mxu1 }
 0x2b9   : > { %v512_v21 = vadd.f32 %v508_v16, %v489_v15 }
 0x2ba   : > { %v491_v17 = vpop.f32.mrf.mxu1 }
 0x2bb   : > { %v492_v19 = vadd.f32 %v491_v17, %v444_v5 }
 0x2bc   : > { %v648_v20 = vpop.f32.mrf.mxu1 }
 0x2bd   : > { %v513_v22 = vadd.f32 %v509_v18, %v492_v19 }
 0x2bf   : > { %v627_v23 = vpack.c.bf16 %v513_v22, %v512_v21 }
 0x2c1   : > { %628 = vst [vmem:[%s244_s24] sm:$0xff] %v627_v23  }
 0x2c2 PF: > { %s15_s20 = sadd.s32 1, %s717_s20   ;;  %s872_s18 = smov %s713_s19 }
 0x2c3   : > { %p12_p5 = scmp.ge.s32.totalorder %s15_s20, 4   ;;  %s873_s19 = smov %s875_s21 }
 0x2c5   :  { %14 = sbr.rel (!%p12_p5) target bundleno = 2 (0x2), region = 71 }

// kernel: generator_forward.23
= control target key start
LH: loop header
LB: loop body
LE: loop exit
PB: predicated region body
PF: predicated region fallthrough
CT: control target
= control target key end

     0   :  { %s771_s18 = smov 0   ;;  %s773_s19 = smov 0   ;;  %s860_s0 = inlined_call_operand.vmem [shape: bf16[2,16,152], index: 0, kind: input, shape index: {}]   ;;  %s861_s1 = inlined_call_operand.vmem [shape: bf16[16,80], index: 1, kind: input, shape index: {}]   ;;  %s862_s2 = inlined_call_operand.vmem [shape: f32[16,1], index: 2, kind: input, shape index: {}]   ;;  %s863_s3 = inlined_call_operand.vmem [shape: bf16[16,80], index: 3, kind: input, shape index: {}]   ;;  %s864_s4 = inlined_call_operand.vmem [shape: f32[16,1], index: 4, kind: input, shape index: {}]   ;;  %s865_s5 = inlined_call_operand.vmem [shape: bf16[2,16,128], index: 5, kind: output, shape index: {}]  }
   0x1   :  { %s775_s20 = smov 0  }
   0x2 LB: > { %s27_s21 = sadd.s32 1, %s722_s19  ;;  %p611_p0 = scmp.ge.s32.totalorder %s726_s20, 1  ;;  %s726_s20 = sphi %s775_s20, %s15_s20   ;;  %s722_s19 = sphi %s773_s19, %s867_s19   ;;  %s718_s18 = sphi %s771_s18, %s866_s18  }
   0x3   : > { %p29_p1 = scmp.ge.s32.totalorder %s27_s21, 2  ;;  %p201_p2 = scmp.lt.s32.totalorder %s726_s20, 3 }
   0x5   : > { %s869_s21 = smov (%p29_p1, %s27_s21), 0  ;;  %p202_p3 = pnand %p611_p0, %p201_p2 }
   0x6   : > { %p232_p4 = scmp.lt.s32.totalorder (!%p202_p3), %s718_s18, 1  ;;  %s728_s26 = smov (!%p202_p3), 113  }
   0x7   : > { %205 = sbr.rel (%p202_p3) target bundleno = 706 (0x2c2), region = 40  ;;  %s729_s27 = smov (!%p202_p3), 108  }
   0x8   : > { %s730_s28 = smov (!%p202_p3), 118   ;;  %s732_s29 = smov (!%p202_p3), 123  }
   0x9   : > { %s734_s9 = smov (!%p202_p3), 124   ;;  %s735_s10 = smov (!%p202_p3), 125  }
   0xa   : > { %s736_s11 = smov (!%p202_p3), 126   ;;  %s737_s12 = smov (!%p202_p3), 127  }
   0xb   : > { %s740_s23 = smov (!%p202_p3), 116  }
   0xc   : > { %s871_s18 = smov (!%p232_p4, %s718_s18), 1  ;;  %v731_v16 = vmov 0   ;;  %v307_v17 = vld [vmem:[%s862_s2] sm:$0xff]  ;;  %v308_v18 = vld [vmem:[%s862_s2 + $0x8] sm:$0xff]  ;;  %v733_v19 = vmov 0.0|0.0   ;;  %vm301_vm4 = vcmask 883712   ;;  %v372_v34 = vlaneseq }
   0xd   : > { %s624_s22 = sshll.u32 %s871_s18, 4  ;;  %360 = vmatprep.mubr.bf16.mxu0 %v731_v16  ;;  %690 = vset.pattern.permute.xlu0 %v731_v16  ;;  %v439_v20 = vld [vmem:[%s864_s4 + $0x8] sm:$0xff]  ;;  %vm293_vm5 = vcmask 924672   ;;  %vm285_vm6 = vcmask 965632   ;;  %vm277_vm7 = vcmask 1006592   ;;  %v702_v33 = vld [vmem:[%s861_s1] sm:$0xff]  }
   0xe   : > { %s236_s25 = scalar_lea.vmem %s860_s0, %s624_s22  ;;  %691 = vset.pattern.permute.xlu1 %v731_v16  ;;  %vm324_vm8 = vcmask 654336   ;;  %v373_v35 = vand.u32 127, %v372_v34  ;;  %v738_v39 = vmov 0.0   ;;  %vm739_vm14 = vmmov 0   ;;  %v438_v54 = vld [vmem:[%s864_s4] sm:$0xff] }
   0xf   : > { %v251_v0 = vld [vmem:[%s236_s25] sm:$0xff]  ;;  %v252_v1 = vld [vmem:[%s236_s25 + $0x8] sm:$0xff]  ;;  %639 = vmatprep.subr.bf16.mxu1 %v738_v39  ;;  %649 = vmatprep.mubr.msk.bf16.mxu1 %vm739_vm14, %v738_v39  ;;  %vm433_vm15 = vcmask 1014784  }
  0x10   : > { %v795_v2 = vunpack.c.l.bf16 %v251_v0  ;;  %v797_v3 = vunpack.c.l.bf16 %v252_v1  ;;  %v799_v4 = vunpack.c.h.bf16 %v251_v0  ;;  %v801_v5 = vunpack.c.h.bf16 %v252_v1 }
  0x11   : > { %v376_v36 = vadd.s32 4294967294, %v373_v35 }
  0x12   : > { %vm257_vm0 = vcmp.ge.f32.partialorder %v795_v2, 0.0  ;;  %vm259_vm1 = vcmp.ge.f32.partialorder %v797_v3, 0.0  ;;  %v261_v6 = vmul.f32 0.1, %v795_v2  ;;  %v263_v7 = vmul.f32 0.1, %v797_v3 }
  0x13   : > { %vm258_vm2 = vcmp.ge.f32.partialorder %v799_v4, 0.0  ;;  %vm260_vm3 = vcmp.ge.f32.partialorder %v801_v5, 0.0  ;;  %v262_v8 = vmul.f32 0.1, %v799_v4  ;;  %v264_v9 = vmul.f32 0.1, %v801_v5 }
  0x14   : > { %v265_v10 = vsel %vm257_vm0, %v795_v2, %v261_v6  ;;  %v267_v11 = vsel %vm259_vm1, %v797_v3, %v263_v7  ;;  %vm378_vm9 = vcmp.ge.s32.totalorder %v376_v36, 0  ;;  %vm380_vm10 = vcmp.lt.s32.totalorder %v376_v36, 64 }
  0x15   : > { %v269_v12 = vpack.c.bf16 %v267_v11, %v265_v10  ;;  %v266_v13 = vsel %vm258_vm2, %v799_v4, %v262_v8  ;;  %v268_v14 = vsel %vm260_vm3, %v801_v5, %v264_v9  ;;  %vm382_vm11 = vmand %vm378_vm9, %vm380_vm10  ;;  %v697_v53 = vpack.i.bf16 %v801_v5, %v797_v3 }
  0x16   : > { %v270_v15 = vpack.c.bf16 %v268_v14, %v266_v13  ;;  %v692_v55 = vpack.i.bf16 %v799_v4, %v795_v2  ;;  %vm426_vm0 = vcmask 1022976   ;;  %vm419_vm1 = vcmask 1031168   ;;  %v703_v4 = vld [vmem:[%s863_s3] sm:$0xff]  }
  0x17   : > { %289 = vrot.lane.b32.xlu1 %v269_v12, %s728_s26  ;;  %297 = vrot.lane.b32.xlu0 %v269_v12, %s729_s27  ;;  %vm412_vm2 = vcmask 1039360   ;;  %vm511_vm3 = vcmask 949248  }
  0x1b   : > { %291 = vrot.lane.b32.xlu1 %v270_v15, %s728_s26  ;;  %299 = vrot.lane.b32.xlu0 %v270_v15, %s729_s27  ;;  %s625_s26 = sshll.u32 %s871_s18, 3 }
  0x1f   : > { %283 = vrot.lane.b32.xlu1 %v270_v15, %s730_s28  ;;  %281 = vrot.lane.b32.xlu0 %v269_v12, %s730_s28 }
  0x23   : > { %275 = vrot.lane.b32.xlu1 %v270_v15, %s732_s29  ;;  %273 = vrot.lane.b32.xlu0 %v269_v12, %s732_s29  ;;  %s244_s29 = scalar_lea.vmem %s865_s5, %s625_s26 }
  0x27   : > { %311 = vperm.xlu0 %690, %v307_v17   ;;  %316 = vperm.xlu1 %691, %v308_v18  }
  0x2b   : > { %431 = vrot.lane.b32.xlu0 %v733_v19, %s734_s9 }
  0x2f   : > { %424 = vrot.lane.b32.xlu0 %v733_v19, %s735_s10 }
  0x33   : > { %417 = vrot.lane.b32.xlu0 %v733_v19, %s736_s11 }
  0x37   : > { %410 = vrot.lane.b32.xlu0 %v733_v19, %s737_s12 }
  0x3b   : > { %447 = vperm.xlu0 %690, %v439_v20  }
  0x3f   : > { %698 = vrot.lane.b32.xlu0 %v697_v53, %s740_s23 }
  0x89   : > { %v290_v21 = vpop.permute.xlu1 %289  ;;  %v298_v22 = vpop.permute.xlu0 %297 }
  0x8d   : > { %v292_v23 = vpop.permute.xlu1 %291  ;;  %v300_v24 = vpop.permute.xlu0 %299 }
  0x8e   : > { %334 = vmatprep.subr.bf16.mxu0 %v300_v24  ;;  %v302_v25 = vsel %vm301_vm4, %v298_v22, %v300_v24  ;;  %v294_v28 = vsel %vm293_vm5, %v290_v21, %v292_v23 }
  0x8f   : > { %335 = vmatpush1.bf16.msra.mxu0 %v302_v25 }
  0x90   : > { %336 = vmatprep.subr.bf16.mxu0 %v292_v23 }
  0x91   : > { %v284_v26 = vpop.permute.xlu1 %283  ;;  %v282_v27 = vpop.permute.xlu0 %281 }
  0x92   : > { %v286_v29 = vsel %vm285_vm6, %v282_v27, %v284_v26 }
  0x93   : > { %337 = vmatpush1.bf16.msra.mxu0 %v294_v28 }
  0x94   : > { %338 = vmatprep.subr.bf16.mxu0 %v284_v26 }
  0x95   : > { %v276_v30 = vpop.permute.xlu1 %275  ;;  %v274_v31 = vpop.permute.xlu0 %273 }
  0x96   : > { %v278_v32 = vsel %vm277_vm7, %v274_v31, %v276_v30 }
  0x97   : > { %339 = vmatpush1.bf16.msra.mxu0 %v286_v29 }
  0x98   : > { %340 = vmatprep.subr.bf16.mxu0 %v276_v30 }
  0x9b   : > { %341 = vmatpush1.bf16.msra.mxu0 %v278_v32 }
  0x9c   : > { %342 = vmatprep.subr.bf16.mxu0 %v270_v15 }
  0x9f   : > { %343 = vmatpush1.bf16.msra.mxu0 %v269_v12 }
  0xa2   : > { %617 = vmatmul.mubr.msk.bf16.vlgmr.msra.gmra.mxu0 %vm324_vm8, %v702_v33  ;;  %v312_v37 = vpop.permute.xlu0 %311  ;;  %v317_v42 = vpop.permute.xlu1 %316 }
  0xa6   : > { %v432_v56 = vpop.permute.xlu0 %431 }
  0xaa   : > { %v425_v57 = vpop.permute.xlu0 %424 }
  0xae   : > { %v418_v62 = vpop.permute.xlu0 %417 }
  0xb2   : > { %v411_v1 = vpop.permute.xlu0 %410 }
  0xb6   : > { %v448_v5 = vpop.permute.xlu0 %447 }
  0xba   : > { %v699_v8 = vpop.permute.xlu0 %698 }
  0xbb   : > { %v701_v12 = vunpack.i.h.bf16 %v699_v8  ;;  %v700_v13 = vunpack.i.l.bf16 %v699_v8 }
  0xbd   : > { %v513_v18 = vsel %vm511_vm3, %v700_v13, %v701_v12 }
 0x162   : > { %v362_v38 = vpop.f32.mrf.mxu0 }
 0x163   : > { %v363_v40 = vadd.f32 %v362_v38, %v312_v37 }
 0x164   : > { %v364_v41 = vpop.f32.mrf.mxu0 }
 0x165   : > { %v388_v43 = vsel %vm382_vm11, %v363_v40, 0.0 }
 0x166   : > { %v366_v44 = vpop.f32.mrf.mxu0  ;;  %v396_v46 = vmul.f32 0.1, %v388_v43  ;;  %vm392_vm12 = vcmp.ge.f32.partialorder %v388_v43, 0.0 }
 0x167   : > { %v367_v45 = vadd.f32 %v366_v44, %v317_v42 }
 0x168   : > { %v368_v47 = vpop.f32.mrf.mxu0  ;;  %v400_v50 = vsel %vm392_vm12, %v388_v43, %v396_v46 }
 0x169   : > { %v390_v48 = vsel %vm382_vm11, %v367_v45, 0.0 }
 0x16a   : > { %vm394_vm13 = vcmp.ge.f32.partialorder %v390_v48, 0.0  ;;  %v398_v49 = vmul.f32 0.1, %v390_v48 }
 0x16c   : > { %v402_v51 = vsel %vm394_vm13, %v390_v48, %v398_v49 }
 0x16d   : > { %v404_v52 = vpack.c.bf16 %v402_v51, %v400_v50 }
 0x16f   : > { %429 = vrot.lane.b32.xlu1 %v404_v52, %s734_s9 }
 0x173   : > { %422 = vrot.lane.b32.xlu1 %v404_v52, %s735_s10 }
 0x177   : > { %415 = vrot.lane.b32.xlu1 %v404_v52, %s736_s11 }
 0x17b   : > { %408 = vrot.lane.b32.xlu1 %v404_v52, %s737_s12 }
 0x17f   : > { %442 = vperm.xlu1 %691, %v438_v54  }
 0x183   : > { %693 = vrot.lane.b32.xlu1 %v692_v55, %s740_s23 }
 0x1e1   : > { %v430_v58 = vpop.permute.xlu1 %429 }
 0x1e2   : > { %v434_v59 = vsel %vm433_vm15, %v430_v58, %v432_v56 }
 0x1e3   : > { %640 = vmatpush3.bf16.msra.mxu1 %v434_v59 }
 0x1e4   : > { %641 = vmatprep.subr.bf16.mxu1 %v738_v39 }
 0x1e5   : > { %v423_v60 = vpop.permute.xlu1 %422 }
 0x1e6   : > { %v427_v61 = vsel %vm426_vm0, %v423_v60, %v425_v57 }
 0x1e7   : > { %642 = vmatpush3.bf16.msra.mxu1 %v427_v61 }
 0x1e8   : > { %643 = vmatprep.subr.bf16.mxu1 %v738_v39 }
 0x1e9   : > { %v416_v63 = vpop.permute.xlu1 %415 }
 0x1ea   : > { %v420_v0 = vsel %vm419_vm1, %v416_v63, %v418_v62 }
 0x1eb   : > { %644 = vmatpush3.bf16.msra.mxu1 %v420_v0 }
 0x1ec   : > { %645 = vmatprep.subr.bf16.mxu1 %v738_v39 }
 0x1ed   : > { %v409_v2 = vpop.permute.xlu1 %408 }
 0x1ee   : > { %v413_v3 = vsel %vm412_vm2, %v409_v2, %v411_v1 }
 0x1ef   : > { %646 = vmatpush3.bf16.msra.mxu1 %v413_v3 }
 0x1f0   : > { %647 = vmatprep.subr.bf16.mxu1 %v738_v39 }
 0x1f3   : > { %648 = vmatpush3.bf16.msra.mxu1 %v404_v52 }
 0x1f6   : > { %650 = vmatmul.mubr.msk.bf16.vlgmr.msra.gmra.mxu1 %vm324_vm8, %v703_v4 }
 0x1fa   : > { %v443_v6 = vpop.permute.xlu1 %442 }
 0x1fe   : > { %v694_v7 = vpop.permute.xlu1 %693 }
 0x1ff   : > { %v696_v9 = vunpack.i.h.bf16 %v694_v7  ;;  %v695_v10 = vunpack.i.l.bf16 %v694_v7 }
 0x201   : > { %v512_v16 = vsel %vm511_vm3, %v695_v10, %v696_v9 }
 0x2b6   : > { %v492_v11 = vpop.f32.mrf.mxu1 }
 0x2b7   : > { %v493_v15 = vadd.f32 %v492_v11, %v443_v6 }
 0x2b8   : > { %v651_v14 = vpop.f32.mrf.mxu1 }
 0x2b9   : > { %v516_v21 = vadd.f32 %v512_v16, %v493_v15 }
 0x2ba   : > { %v495_v17 = vpop.f32.mrf.mxu1 }
 0x2bb   : > { %v496_v19 = vadd.f32 %v495_v17, %v448_v5 }
 0x2bc   : > { %v652_v20 = vpop.f32.mrf.mxu1 }
 0x2bd   : > { %v517_v22 = vadd.f32 %v513_v18, %v496_v19 }
 0x2bf   : > { %v631_v23 = vpack.c.bf16 %v517_v22, %v516_v21 }
 0x2c1   : > { %632 = vst [vmem:[%s244_s29] sm:$0xff] %v631_v23  }
 0x2c2 PF: > { %s15_s20 = sadd.s32 1, %s726_s20   ;;  %s866_s18 = smov %s722_s19 }
 0x2c3   : > { %p12_p5 = scmp.ge.s32.totalorder %s15_s20, 4   ;;  %s867_s19 = smov %s869_s21 }
 0x2c5   :  { %14 = sbr.rel (!%p12_p5) target bundleno = 2 (0x2), region = 71 }

// kernel: generator_forward.22
= control target key start
LH: loop header
LB: loop body
LE: loop exit
PB: predicated region body
PF: predicated region fallthrough
CT: control target
= control target key end

     0   :  { %s768_s18 = smov 0   ;;  %s770_s19 = smov 0   ;;  %s861_s0 = inlined_call_operand.vmem [shape: bf16[2,16,144], index: 0, kind: input, shape index: {}]   ;;  %s862_s1 = inlined_call_operand.vmem [shape: bf16[16,80], index: 1, kind: input, shape index: {}]   ;;  %s863_s2 = inlined_call_operand.vmem [shape: f32[16,1], index: 2, kind: input, shape index: {}]   ;;  %s864_s3 = inlined_call_operand.vmem [shape: bf16[16,80], index: 3, kind: input, shape index: {}]   ;;  %s865_s4 = inlined_call_operand.vmem [shape: f32[16,1], index: 4, kind: input, shape index: {}]   ;;  %s866_s5 = inlined_call_operand.vmem [shape: bf16[2,16,128], index: 5, kind: output, shape index: {}]  }
   0x1   :  { %s772_s20 = smov 0  }
   0x2 LB: > { %s27_s21 = sadd.s32 1, %s720_s19  ;;  %p610_p0 = scmp.ge.s32.totalorder %s724_s20, 1  ;;  %s724_s20 = sphi %s772_s20, %s15_s20   ;;  %s720_s19 = sphi %s770_s19, %s868_s19   ;;  %s716_s18 = sphi %s768_s18, %s867_s18  }
   0x3   : > { %p29_p1 = scmp.ge.s32.totalorder %s27_s21, 2  ;;  %p201_p2 = scmp.lt.s32.totalorder %s724_s20, 3 }
   0x5   : > { %s870_s21 = smov (%p29_p1, %s27_s21), 0  ;;  %p202_p3 = pnand %p610_p0, %p201_p2 }
   0x6   : > { %p232_p4 = scmp.lt.s32.totalorder (!%p202_p3), %s716_s18, 1  ;;  %s726_s26 = smov (!%p202_p3), 119  }
   0x7   : > { %205 = sbr.rel (%p202_p3) target bundleno = 706 (0x2c2), region = 40  ;;  %s727_s27 = smov (!%p202_p3), 116  }
   0x8   : > { %s728_s28 = smov (!%p202_p3), 122   ;;  %s730_s29 = smov (!%p202_p3), 125  }
   0x9   : > { %s732_s9 = smov (!%p202_p3), 124   ;;  %s733_s10 = smov (!%p202_p3), 126  }
   0xa   : > { %s734_s11 = smov (!%p202_p3), 127  }
   0xc   : > { %s872_s18 = smov (!%p232_p4, %s716_s18), 1  ;;  %v729_v16 = vmov 0   ;;  %v307_v17 = vld [vmem:[%s863_s2] sm:$0xff]  ;;  %v308_v18 = vld [vmem:[%s863_s2 + $0x8] sm:$0xff]  ;;  %v731_v19 = vmov 0.0|0.0   ;;  %vm301_vm4 = vcmask 949248   ;;  %v372_v34 = vlaneseq }
   0xd   : > { %s623_s22 = sshll.u32 %s872_s18, 4  ;;  %360 = vmatprep.mubr.bf16.mxu0 %v729_v16  ;;  %688 = vset.pattern.permute.xlu0 %v729_v16  ;;  %v438_v20 = vld [vmem:[%s865_s4 + $0x8] sm:$0xff]  ;;  %vm293_vm5 = vcmask 973824   ;;  %vm285_vm6 = vcmask 998400   ;;  %vm277_vm7 = vcmask 1022976   ;;  %v700_v33 = vld [vmem:[%s862_s1] sm:$0xff]  }
   0xe   : > { %s236_s25 = scalar_lea.vmem %s861_s0, %s623_s22  ;;  %689 = vset.pattern.permute.xlu1 %v729_v16  ;;  %vm324_vm8 = vcmask 654336   ;;  %v373_v35 = vand.u32 127, %v372_v34  ;;  %v735_v39 = vmov 0.0   ;;  %vm736_vm14 = vmmov 0   ;;  %v437_v54 = vld [vmem:[%s865_s4] sm:$0xff]  ;;  %s737_s22 = smov 120  }
   0xf   : > { %v251_v0 = vld [vmem:[%s236_s25] sm:$0xff]  ;;  %v252_v1 = vld [vmem:[%s236_s25 + $0x8] sm:$0xff]  ;;  %638 = vmatprep.subr.bf16.mxu1 %v735_v39  ;;  %648 = vmatprep.mubr.msk.bf16.mxu1 %vm736_vm14, %v735_v39  ;;  %vm432_vm15 = vcmask 1014784   ;;  %s624_s25 = sshll.u32 %s872_s18, 3 }
  0x10   : > { %v792_v2 = vunpack.c.l.bf16 %v251_v0  ;;  %v794_v3 = vunpack.c.l.bf16 %v252_v1  ;;  %v796_v4 = vunpack.c.h.bf16 %v251_v0  ;;  %v798_v5 = vunpack.c.h.bf16 %v252_v1 }
  0x11   : > { %v376_v36 = vadd.s32 4294967294, %v373_v35 }
  0x12   : > { %vm257_vm0 = vcmp.ge.f32.partialorder %v792_v2, 0.0  ;;  %vm259_vm1 = vcmp.ge.f32.partialorder %v794_v3, 0.0  ;;  %v261_v6 = vmul.f32 0.1, %v792_v2  ;;  %v263_v7 = vmul.f32 0.1, %v794_v3 }
  0x13   : > { %vm258_vm2 = vcmp.ge.f32.partialorder %v796_v4, 0.0  ;;  %vm260_vm3 = vcmp.ge.f32.partialorder %v798_v5, 0.0  ;;  %v262_v8 = vmul.f32 0.1, %v796_v4  ;;  %v264_v9 = vmul.f32 0.1, %v798_v5 }
  0x14   : > { %v265_v10 = vsel %vm257_vm0, %v792_v2, %v261_v6  ;;  %v267_v11 = vsel %vm259_vm1, %v794_v3, %v263_v7  ;;  %vm378_vm9 = vcmp.ge.s32.totalorder %v376_v36, 0  ;;  %vm380_vm10 = vcmp.lt.s32.totalorder %v376_v36, 64 }
  0x15   : > { %v269_v12 = vpack.c.bf16 %v267_v11, %v265_v10  ;;  %v266_v13 = vsel %vm258_vm2, %v796_v4, %v262_v8  ;;  %v268_v14 = vsel %vm260_vm3, %v798_v5, %v264_v9  ;;  %vm382_vm11 = vmand %vm378_vm9, %vm380_vm10  ;;  %v695_v53 = vpack.i.bf16 %v798_v5, %v794_v3 }
  0x16   : > { %v270_v15 = vpack.c.bf16 %v268_v14, %v266_v13  ;;  %v690_v55 = vpack.i.bf16 %v796_v4, %v792_v2  ;;  %vm419_vm0 = vcmask 1031168   ;;  %vm412_vm1 = vcmask 1039360   ;;  %v701_v4 = vld [vmem:[%s864_s3] sm:$0xff]  }
  0x17   : > { %289 = vrot.lane.b32.xlu1 %v269_v12, %s726_s26  ;;  %297 = vrot.lane.b32.xlu0 %v269_v12, %s727_s27  ;;  %vm510_vm2 = vcmask 982016  }
  0x1b   : > { %291 = vrot.lane.b32.xlu1 %v270_v15, %s726_s26  ;;  %299 = vrot.lane.b32.xlu0 %v270_v15, %s727_s27 }
  0x1f   : > { %283 = vrot.lane.b32.xlu1 %v270_v15, %s728_s28  ;;  %281 = vrot.lane.b32.xlu0 %v269_v12, %s728_s28  ;;  %s244_s28 = scalar_lea.vmem %s866_s5, %s624_s25 }
  0x23   : > { %275 = vrot.lane.b32.xlu1 %v270_v15, %s730_s29  ;;  %273 = vrot.lane.b32.xlu0 %v269_v12, %s730_s29 }
  0x27   : > { %311 = vperm.xlu0 %688, %v307_v17   ;;  %316 = vperm.xlu1 %689, %v308_v18  }
  0x2b   : > { %430 = vrot.lane.b32.xlu0 %v731_v19, %s732_s9 }
  0x2f   : > { %424 = vrot.lane.b32.xlu0 %v731_v19, %s730_s29 }
  0x33   : > { %417 = vrot.lane.b32.xlu0 %v731_v19, %s733_s10 }
  0x37   : > { %410 = vrot.lane.b32.xlu0 %v731_v19, %s734_s11 }
  0x3b   : > { %446 = vperm.xlu0 %688, %v438_v20  }
  0x3f   : > { %696 = vrot.lane.b32.xlu0 %v695_v53, %s737_s22 }
  0x89   : > { %v290_v21 = vpop.permute.xlu1 %289  ;;  %v298_v22 = vpop.permute.xlu0 %297 }
  0x8d   : > { %v292_v23 = vpop.permute.xlu1 %291  ;;  %v300_v24 = vpop.permute.xlu0 %299 }
  0x8e   : > { %334 = vmatprep.subr.bf16.mxu0 %v300_v24  ;;  %v302_v25 = vsel %vm301_vm4, %v298_v22, %v300_v24  ;;  %v294_v28 = vsel %vm293_vm5, %v290_v21, %v292_v23 }
  0x8f   : > { %335 = vmatpush1.bf16.msra.mxu0 %v302_v25 }
  0x90   : > { %336 = vmatprep.subr.bf16.mxu0 %v292_v23 }
  0x91   : > { %v284_v26 = vpop.permute.xlu1 %283  ;;  %v282_v27 = vpop.permute.xlu0 %281 }
  0x92   : > { %v286_v29 = vsel %vm285_vm6, %v282_v27, %v284_v26 }
  0x93   : > { %337 = vmatpush1.bf16.msra.mxu0 %v294_v28 }
  0x94   : > { %338 = vmatprep.subr.bf16.mxu0 %v284_v26 }
  0x95   : > { %v276_v30 = vpop.permute.xlu1 %275  ;;  %v274_v31 = vpop.permute.xlu0 %273 }
  0x96   : > { %v278_v32 = vsel %vm277_vm7, %v274_v31, %v276_v30 }
  0x97   : > { %339 = vmatpush1.bf16.msra.mxu0 %v286_v29 }
  0x98   : > { %340 = vmatprep.subr.bf16.mxu0 %v276_v30 }
  0x9b   : > { %341 = vmatpush1.bf16.msra.mxu0 %v278_v32 }
  0x9c   : > { %342 = vmatprep.subr.bf16.mxu0 %v270_v15 }
  0x9f   : > { %343 = vmatpush1.bf16.msra.mxu0 %v269_v12 }
  0xa2   : > { %616 = vmatmul.mubr.msk.bf16.vlgmr.msra.gmra.mxu0 %vm324_vm8, %v700_v33  ;;  %v312_v37 = vpop.permute.xlu0 %311  ;;  %v317_v42 = vpop.permute.xlu1 %316 }
  0xa6   : > { %v431_v56 = vpop.permute.xlu0 %430 }
  0xaa   : > { %v425_v57 = vpop.permute.xlu0 %424 }
  0xae   : > { %v418_v62 = vpop.permute.xlu0 %417 }
  0xb2   : > { %v411_v1 = vpop.permute.xlu0 %410 }
  0xb6   : > { %v447_v5 = vpop.permute.xlu0 %446 }
  0xba   : > { %v697_v8 = vpop.permute.xlu0 %696 }
  0xbb   : > { %v699_v12 = vunpack.i.h.bf16 %v697_v8  ;;  %v698_v13 = vunpack.i.l.bf16 %v697_v8 }
  0xbd   : > { %v512_v18 = vsel %vm510_vm2, %v698_v13, %v699_v12 }
 0x162   : > { %v362_v38 = vpop.f32.mrf.mxu0 }
 0x163   : > { %v363_v40 = vadd.f32 %v362_v38, %v312_v37 }
 0x164   : > { %v364_v41 = vpop.f32.mrf.mxu0 }
 0x165   : > { %v388_v43 = vsel %vm382_vm11, %v363_v40, 0.0 }
 0x166   : > { %v366_v44 = vpop.f32.mrf.mxu0  ;;  %v396_v46 = vmul.f32 0.1, %v388_v43  ;;  %vm392_vm12 = vcmp.ge.f32.partialorder %v388_v43, 0.0 }
 0x167   : > { %v367_v45 = vadd.f32 %v366_v44, %v317_v42 }
 0x168   : > { %v368_v47 = vpop.f32.mrf.mxu0  ;;  %v400_v50 = vsel %vm392_vm12, %v388_v43, %v396_v46 }
 0x169   : > { %v390_v48 = vsel %vm382_vm11, %v367_v45, 0.0 }
 0x16a   : > { %vm394_vm13 = vcmp.ge.f32.partialorder %v390_v48, 0.0  ;;  %v398_v49 = vmul.f32 0.1, %v390_v48 }
 0x16c   : > { %v402_v51 = vsel %vm394_vm13, %v390_v48, %v398_v49 }
 0x16d   : > { %v404_v52 = vpack.c.bf16 %v402_v51, %v400_v50 }
 0x16f   : > { %428 = vrot.lane.b32.xlu1 %v404_v52, %s732_s9 }
 0x173   : > { %422 = vrot.lane.b32.xlu1 %v404_v52, %s730_s29 }
 0x177   : > { %415 = vrot.lane.b32.xlu1 %v404_v52, %s733_s10 }
 0x17b   : > { %408 = vrot.lane.b32.xlu1 %v404_v52, %s734_s11 }
 0x17f   : > { %441 = vperm.xlu1 %689, %v437_v54  }
 0x183   : > { %691 = vrot.lane.b32.xlu1 %v690_v55, %s737_s22 }
 0x1e1   : > { %v429_v58 = vpop.permute.xlu1 %428 }
 0x1e2   : > { %v433_v59 = vsel %vm432_vm15, %v429_v58, %v431_v56 }
 0x1e3   : > { %639 = vmatpush3.bf16.msra.mxu1 %v433_v59 }
 0x1e4   : > { %640 = vmatprep.subr.bf16.mxu1 %v735_v39 }
 0x1e5   : > { %v423_v60 = vpop.permute.xlu1 %422 }
 0x1e6   : > { %v426_v61 = vsel %vm277_vm7, %v423_v60, %v425_v57 }
 0x1e7   : > { %641 = vmatpush3.bf16.msra.mxu1 %v426_v61 }
 0x1e8   : > { %642 = vmatprep.subr.bf16.mxu1 %v735_v39 }
 0x1e9   : > { %v416_v63 = vpop.permute.xlu1 %415 }
 0x1ea   : > { %v420_v0 = vsel %vm419_vm0, %v416_v63, %v418_v62 }
 0x1eb   : > { %643 = vmatpush3.bf16.msra.mxu1 %v420_v0 }
 0x1ec   : > { %644 = vmatprep.subr.bf16.mxu1 %v735_v39 }
 0x1ed   : > { %v409_v2 = vpop.permute.xlu1 %408 }
 0x1ee   : > { %v413_v3 = vsel %vm412_vm1, %v409_v2, %v411_v1 }
 0x1ef   : > { %645 = vmatpush3.bf16.msra.mxu1 %v413_v3 }
 0x1f0   : > { %646 = vmatprep.subr.bf16.mxu1 %v735_v39 }
 0x1f3   : > { %647 = vmatpush3.bf16.msra.mxu1 %v404_v52 }
 0x1f6   : > { %649 = vmatmul.mubr.msk.bf16.vlgmr.msra.gmra.mxu1 %vm324_vm8, %v701_v4 }
 0x1fa   : > { %v442_v6 = vpop.permute.xlu1 %441 }
 0x1fe   : > { %v692_v7 = vpop.permute.xlu1 %691 }
 0x1ff   : > { %v694_v9 = vunpack.i.h.bf16 %v692_v7  ;;  %v693_v10 = vunpack.i.l.bf16 %v692_v7 }
 0x201   : > { %v511_v16 = vsel %vm510_vm2, %v693_v10, %v694_v9 }
 0x2b6   : > { %v491_v11 = vpop.f32.mrf.mxu1 }
 0x2b7   : > { %v492_v15 = vadd.f32 %v491_v11, %v442_v6 }
 0x2b8   : > { %v650_v14 = vpop.f32.mrf.mxu1 }
 0x2b9   : > { %v515_v21 = vadd.f32 %v511_v16, %v492_v15 }
 0x2ba   : > { %v494_v17 = vpop.f32.mrf.mxu1 }
 0x2bb   : > { %v495_v19 = vadd.f32 %v494_v17, %v447_v5 }
 0x2bc   : > { %v651_v20 = vpop.f32.mrf.mxu1 }
 0x2bd   : > { %v516_v22 = vadd.f32 %v512_v18, %v495_v19 }
 0x2bf   : > { %v630_v23 = vpack.c.bf16 %v516_v22, %v515_v21 }
 0x2c1   : > { %631 = vst [vmem:[%s244_s28] sm:$0xff] %v630_v23  }
 0x2c2 PF: > { %s15_s20 = sadd.s32 1, %s724_s20   ;;  %s867_s18 = smov %s720_s19 }
 0x2c3   : > { %p12_p5 = scmp.ge.s32.totalorder %s15_s20, 4   ;;  %s868_s19 = smov %s870_s21 }
 0x2c5   :  { %14 = sbr.rel (!%p12_p5) target bundleno = 2 (0x2), region = 71 }

// kernel: generator_forward.24
= control target key start
LH: loop header
LB: loop body
LE: loop exit
PB: predicated region body
PF: predicated region fallthrough
CT: control target
= control target key end

     0   :  { %s675_s18 = smov 0   ;;  %s677_s19 = smov 0   ;;  %s741_s0 = inlined_call_operand.vmem [shape: bf16[2,16,130], index: 0, kind: input, shape index: {}]   ;;  %s742_s1 = inlined_call_operand.vmem [shape: bf16[8,32], index: 1, kind: input, shape index: {}]   ;;  %s743_s2 = inlined_call_operand.vmem [shape: bf16[8,48], index: 2, kind: input, shape index: {}]   ;;  %s744_s3 = inlined_call_operand.vmem [shape: bf16[8,32], index: 3, kind: input, shape index: {}]   ;;  %s745_s4 = inlined_call_operand.vmem [shape: f32[8,1], index: 4, kind: input, shape index: {}]   ;;  %s746_s5 = inlined_call_operand.vmem [shape: bf16[2,3,8,128], index: 5, kind: output, shape index: {}]  }
   0x1   :  { %s679_s20 = smov 0  }
   0x2 LB: > { %s27_s21 = sadd.s32 1, %s634_s19  ;;  %p536_p0 = scmp.ge.s32.totalorder %s638_s20, 1  ;;  %s638_s20 = sphi %s679_s20, %s15_s20   ;;  %s634_s19 = sphi %s677_s19, %s748_s19   ;;  %s630_s18 = sphi %s675_s18, %s747_s18  }
   0x3   : > { %p29_p1 = scmp.ge.s32.totalorder %s27_s21, 2  ;;  %p201_p2 = scmp.lt.s32.totalorder %s638_s20, 3 }
   0x5   : > { %s750_s21 = smov (%p29_p1, %s27_s21), 0  ;;  %p202_p3 = pnand %p536_p0, %p201_p2 }
   0x6   : > { %p232_p4 = scmp.lt.s32.totalorder (!%p202_p3), %s630_s18, 1  ;;  %s642_s26 = smov (!%p202_p3), 126  }
   0x7   : > { %205 = sbr.rel (%p202_p3) target bundleno = 465 (0x1d1), region = 40  ;;  %s643_s27 = smov (!%p202_p3), 127  }
   0xc   : > { %s752_s18 = smov (!%p232_p4, %s630_s18), 1  ;;  %v640_v0 = vmov 0.0   ;;  %vm641_vm4 = vmmov 0   ;;  %vm277_vm5 = vcmask 1039360   ;;  %vm337_vm6 = vcmask 1031168   ;;  %v281_v24 = vld [vmem:[%s745_s4] sm:$0xff] }
   0xd   : > { %s547_s22 = sshll.u32 %s752_s18, 4  ;;  %558 = vmatprep.subr.bf16.mxu0 %v640_v0  ;;  %566 = vmatprep.subr.bf16.mxu1 %v640_v0  ;;  %v644_v19 = vmov 0   ;;  %v280_v25 = vld [vmem:[%s742_s1] sm:$0xf]  ;;  %vm287_vm7 = vcmask 261120   ;;  %vm347_vm8 = vcmask 392192  }
   0xe   : > { %s236_s25 = scalar_lea.vmem %s741_s0, %s547_s22  ;;  %562 = vmatprep.mubr.msk.bf16.mxu0 %vm641_vm4, %v640_v0  ;;  %572 = vmatprep.mubr.msk.bf16.mxu1 %vm641_vm4, %v640_v0  ;;  %v340_v26 = vld [vmem:[%s743_s2] sm:$0xf]  ;;  %s584_s11 = smul.u32 12, %s752_s18 }
   0xf   : > { %v251_v1 = vld [vmem:[%s236_s25] sm:$0xff]  ;;  %v252_v2 = vld [vmem:[%s236_s25 + $0x8] sm:$0xff]  ;;  %614 = vset.pattern.permute.xlu0 %v644_v19  ;;  %615 = vset.pattern.permute.xlu1 %v644_v19 }
  0x10   : > { %v253_v3 = vunpack.c.l.bf16 %v251_v1  ;;  %v255_v4 = vunpack.c.l.bf16 %v252_v2  ;;  %v254_v5 = vunpack.c.h.bf16 %v251_v1  ;;  %v256_v6 = vunpack.c.h.bf16 %v252_v2  ;;  %v394_v30 = vld [vmem:[%s744_s3] sm:$0xf]  ;;  %s244_s14 = scalar_lea.vmem %s746_s5, %s584_s11 }
  0x12   : > { %vm257_vm0 = vcmp.ge.f32.partialorder %v253_v3, 0.0  ;;  %vm259_vm1 = vcmp.ge.f32.partialorder %v255_v4, 0.0  ;;  %v261_v7 = vmul.f32 0.1, %v253_v3  ;;  %v263_v8 = vmul.f32 0.1, %v255_v4 }
  0x13   : > { %vm258_vm2 = vcmp.ge.f32.partialorder %v254_v5, 0.0  ;;  %vm260_vm3 = vcmp.ge.f32.partialorder %v256_v6, 0.0  ;;  %v262_v9 = vmul.f32 0.1, %v254_v5  ;;  %v264_v10 = vmul.f32 0.1, %v256_v6 }
  0x14   : > { %v265_v11 = vsel %vm257_vm0, %v253_v3, %v261_v7  ;;  %v267_v12 = vsel %vm259_vm1, %v255_v4, %v263_v8 }
  0x15   : > { %v269_v13 = vpack.c.bf16 %v267_v12, %v265_v11  ;;  %v266_v14 = vsel %vm258_vm2, %v254_v5, %v262_v9  ;;  %v268_v15 = vsel %vm260_vm3, %v256_v6, %v264_v10 }
  0x16   : > { %v270_v16 = vpack.c.bf16 %v268_v15, %v266_v14 }
  0x17   : > { %333 = vrot.lane.b32.xlu1 %v269_v13, %s642_s26  ;;  %273 = vrot.lane.b32.xlu0 %v269_v13, %s643_s27 }
  0x1b   : > { %335 = vrot.lane.b32.xlu1 %v270_v16, %s642_s26  ;;  %275 = vrot.lane.b32.xlu0 %v270_v16, %s643_s27 }
  0x89   : > { %v334_v17 = vpop.permute.xlu1 %333  ;;  %v274_v18 = vpop.permute.xlu0 %273 }
  0x8d   : > { %v336_v20 = vpop.permute.xlu1 %335  ;;  %v276_v21 = vpop.permute.xlu0 %275 }
  0x8e   : > { %v278_v22 = vsel %vm277_vm5, %v274_v18, %v276_v21  ;;  %403 = vrot.lane.b32.xlu1 %v276_v21, %s643_s27  ;;  %v338_v23 = vsel %vm337_vm6, %v334_v17, %v336_v20 }
  0x8f   : > { %567 = vmatpush3.bf16.msra.mxu1 %v338_v23  ;;  %401 = vrot.lane.b32.xlu0 %v278_v22, %s643_s27 }
  0x90   : > { %559 = vmatpush3.bf16.msra.mxu0 %v278_v22  ;;  %568 = vmatprep.subr.bf16.mxu1 %v640_v0 }
  0x91   : > { %560 = vmatprep.subr.bf16.mxu0 %v640_v0 }
  0x92   : > { %344 = vperm.xlu1 %615, %v281_v24  }
  0x93   : > { %569 = vmatpush3.bf16.msra.mxu1 %v278_v22  ;;  %284 = vperm.xlu0 %614, %v281_v24  }
  0x94   : > { %561 = vmatpush3.bf16.msra.mxu0 %v269_v13  ;;  %570 = vmatprep.subr.bf16.mxu1 %v640_v0 }
  0x95   : > { %576 = vmatprep.subr.bf16.mxu0 %v640_v0 }
  0x96   : > { %398 = vperm.xlu1 %615, %v281_v24  }
  0x97   : > { %563 = vmatmul.mubr.msk.bf16.vlgmr.msra.gmra.mxu0 %vm287_vm7, %v280_v25  ;;  %571 = vmatpush3.bf16.msra.mxu1 %v269_v13 }
  0x98   : > { %580 = vmatprep.mubr.msk.bf16.mxu0 %vm641_vm4, %v640_v0 }
  0x9a   : > { %573 = vmatmul.mubr.msk.bf16.vlgmr.msra.gmra.mxu1 %vm347_vm8, %v340_v26 }
 0x100   : > { %v404_v27 = vpop.permute.xlu1 %403 }
 0x101   : > { %v402_v28 = vpop.permute.xlu0 %401 }
 0x102   : > { %v405_v29 = vsel %vm277_vm5, %v402_v28, %v404_v27 }
 0x103   : > { %577 = vmatpush3.bf16.msra.mxu0 %v405_v29 }
 0x104   : > { %578 = vmatprep.subr.bf16.mxu0 %v640_v0 }
 0x107   : > { %579 = vmatpush3.bf16.msra.mxu0 %v278_v22 }
 0x10a   : > { %581 = vmatmul.mubr.msk.bf16.vlgmr.msra.gmra.mxu0 %vm287_vm7, %v394_v30 }
 0x10d   : > { %v345_v36 = vpop.permute.xlu1 %344 }
 0x10e   : > { %v285_v31 = vpop.permute.xlu0 %284 }
 0x111   : > { %v399_v45 = vpop.permute.xlu1 %398 }
 0x157   : > { %v325_v32 = vpop.f32.mrf.mxu0 }
 0x158   : > { %v326_v33 = vadd.f32 %v325_v32, %v285_v31 }
 0x159   : > { %v564_v34 = vpop.f32.mrf.mxu0 }
 0x15a   : > { %v331_v35 = vpack.c.bf16 %v326_v33, %v326_v33  ;;  %v385_v37 = vpop.f32.mrf.mxu1 }
 0x15b   : > { %v328_v38 = vpop.f32.mrf.mxu0  ;;  %v386_v39 = vadd.f32 %v385_v37, %v345_v36 }
 0x15c   : > { %332 = vst [vmem:[%s244_s14] sm:$0xf] %v331_v35  ;;  %v574_v40 = vpop.f32.mrf.mxu1 }
 0x15d   : > { %v565_v41 = vpop.f32.mrf.mxu0  ;;  %v391_v42 = vpack.c.bf16 %v386_v39, %v386_v39 }
 0x15e   : > { %v388_v43 = vpop.f32.mrf.mxu1 }
 0x15f   : > { %542 = vst [vmem:[%s244_s14 + $0x4] sm:$0xf] %v391_v42 }
 0x160   : > { %v575_v44 = vpop.f32.mrf.mxu1 }
 0x1ca   : > { %v444_v46 = vpop.f32.mrf.mxu0 }
 0x1cb   : > { %v445_v47 = vadd.f32 %v444_v46, %v399_v45 }
 0x1cc   : > { %v582_v48 = vpop.f32.mrf.mxu0 }
 0x1cd   : > { %v450_v49 = vpack.c.bf16 %v445_v47, %v445_v47 }
 0x1ce   : > { %v447_v50 = vpop.f32.mrf.mxu0 }
 0x1cf   : > { %544 = vst [vmem:[%s244_s14 + $0x8] sm:$0xf] %v450_v49 }
 0x1d0   : > { %v583_v51 = vpop.f32.mrf.mxu0 }
 0x1d1 PF: > { %s15_s20 = sadd.s32 1, %s638_s20   ;;  %s747_s18 = smov %s634_s19 }
 0x1d2   : > { %p12_p5 = scmp.ge.s32.totalorder %s15_s20, 4   ;;  %s748_s19 = smov %s750_s21 }
 0x1d4   :  { %14 = sbr.rel (!%p12_p5) target bundleno = 2 (0x2), region = 73 }

// kernel: generator_forward.26
= control target key start
LH: loop header
LB: loop body
LE: loop exit
PB: predicated region body
PF: predicated region fallthrough
CT: control target
= control target key end

     0   :  { %s777_s18 = smov 0   ;;  %s779_s19 = smov 0   ;;  %s866_s0 = inlined_call_operand.vmem [shape: bf16[2,8,264], index: 0, kind: input, shape index: {}]   ;;  %s867_s1 = inlined_call_operand.vmem [shape: bf16[8,24], index: 1, kind: input, shape index: {}]   ;;  %s868_s2 = inlined_call_operand.vmem [shape: f32[8,1], index: 2, kind: input, shape index: {}]   ;;  %s869_s3 = inlined_call_operand.vmem [shape: bf16[8,24], index: 3, kind: input, shape index: {}]   ;;  %s870_s4 = inlined_call_operand.vmem [shape: f32[8,1], index: 4, kind: input, shape index: {}]   ;;  %s871_s5 = inlined_call_operand.vmem [shape: bf16[2,8,256], index: 5, kind: output, shape index: {}]  }
   0x1   :  { %s781_s20 = smov 0  }
   0x2 LB: > { %s27_s21 = sadd.s32 1, %s732_s19  ;;  %p649_p0 = scmp.ge.s32.totalorder %s736_s20, 1  ;;  %s736_s20 = sphi %s781_s20, %s15_s20   ;;  %s732_s19 = sphi %s779_s19, %s873_s19   ;;  %s728_s18 = sphi %s777_s18, %s872_s18  }
   0x3   : > { %p29_p1 = scmp.ge.s32.totalorder %s27_s21, 2  ;;  %p201_p2 = scmp.lt.s32.totalorder %s736_s20, 3 }
   0x5   : > { %s875_s21 = smov (%p29_p1, %s27_s21), 0  ;;  %p202_p3 = pnand %p649_p0, %p201_p2 }
   0x6   : > { %p233_p4 = scmp.lt.s32.totalorder (!%p202_p3), %s728_s18, 1  ;;  %s740_s26 = smov (!%p202_p3), 122  }
   0x7   : > { %205 = sbr.rel (%p202_p3) target bundleno = 688 (0x2b0), region = 40  ;;  %s741_s27 = smov (!%p202_p3), 125  }
   0x8   : > { %s743_s30 = smov (!%p202_p3), 126   ;;  %s744_s6 = smov (!%p202_p3), 127  }
   0x9   : > { %s746_s11 = smov (!%p202_p3), 124  }
   0xc   : > { %s877_s18 = smov (!%p233_p4, %s728_s18), 1  ;;  %v738_v0 = vmov 0.0   ;;  %v739_v15 = vmov 0   ;;  %v309_v19 = vld [vmem:[%s868_s2] sm:$0xff]  ;;  %v742_v20 = vmov 0.0|0.0   ;;  %vm295_vm3 = vcmask 1043456  }
   0xd   : > { %666 = vmatprep.subr.bf16.mxu1 %v738_v0  ;;  %s674_s22 = smul.u32 12, %s877_s18  ;;  %360 = vmatprep.mubr.bf16.mxu0 %v739_v15  ;;  %v453_v21 = vrot.slane %v742_v20, 4  ;;  %v481_v22 = vld [vmem:[%s870_s4] sm:$0xff]  ;;  %vm292_vm4 = vcmask 998400   ;;  %vm283_vm5 = vcmask 1022976   ;;  %vm315_vm6 = vcmask 195584  }
   0xe   : > { %708 = vset.pattern.permute.xlu0 %v739_v15  ;;  %v308_v38 = vld [vmem:[%s867_s1] sm:$0xf]  ;;  %v410_v39 = vlaneseq  ;;  %vm745_vm11 = vmmov 0   ;;  %vm469_vm12 = vcmask 1031168   ;;  %vm460_vm13 = vcmask 1039360   ;;  %s661_s14 = sshll.u32 %s877_s18, 3 }
   0xf   : > { %s237_s25 = scalar_lea.vmem %s866_s0, %s674_s22  ;;  %670 = vmatprep.mubr.msk.bf16.mxu1 %vm745_vm11, %v738_v0  ;;  %vm546_vm14 = vcmask 1014784   ;;  %s246_s17 = scalar_lea.vmem %s871_s5, %s661_s14 }
  0x10   : > { %v255_v1 = vld [vmem:[%s237_s25 + $0x8] sm:$0xf]  ;;  %v254_v2 = vld [vmem:[%s237_s25] sm:$0xff]  ;;  %v411_v40 = vand.u32 127, %v410_v39 }
  0x11   : > { %v802_v3 = vunpack.c.l.bf16 %v255_v1  ;;  %v804_v4 = vunpack.c.l.bf16 %v254_v2  ;;  %v806_v5 = vunpack.c.h.bf16 %v254_v2 }
  0x12   : > { %v412_v41 = vadd.s32 128, %v411_v40  ;;  %v415_v42 = vadd.s32 4294967295, %v411_v40 }
  0x13   : > { %vm261_vm0 = vcmp.ge.f32.partialorder %v802_v3, 0.0  ;;  %v264_v6 = vmul.f32 0.1, %v802_v3  ;;  %vm259_vm1 = vcmp.ge.f32.partialorder %v804_v4, 0.0  ;;  %v262_v7 = vmul.f32 0.1, %v804_v4 }
  0x14   : > { %vm260_vm2 = vcmp.ge.f32.partialorder %v806_v5, 0.0  ;;  %v263_v8 = vmul.f32 0.1, %v806_v5  ;;  %v416_v43 = vadd.s32 4294967295, %v412_v41  ;;  %vm418_vm7 = vcmp.ge.s32.totalorder %v415_v42, 0 }
  0x15   : > { %v267_v9 = vsel %vm261_vm0, %v802_v3, %v264_v6  ;;  %v265_v10 = vsel %vm259_vm1, %v804_v4, %v262_v7  ;;  %v709_v61 = vpack.i.bf16 %v806_v5, %v804_v4 }
  0x16   : > { %v270_v11 = vpack.c.bf16 %v267_v9, %v267_v9  ;;  %v268_v12 = vpack.c.bf16 %v265_v10, %v265_v10  ;;  %v266_v13 = vsel %vm260_vm2, %v806_v5, %v263_v8  ;;  %vm422_vm8 = vcmp.lt.s32.totalorder %v416_v43, 192 }
  0x17   : > { %v269_v14 = vpack.c.bf16 %v266_v13, %v266_v13 }
  0x18   : > { %290 = vrot.lane.b32.xlu1 %v270_v11, %s740_s26  ;;  %286 = vrot.lane.b32.xlu0 %v268_v12, %s740_s26  ;;  %v276_v17 = vrot.slane %v270_v11, 4  ;;  %v274_v18 = vrot.slane %v268_v12, 4 }
  0x19   : > { %v275_v16 = vrot.slane %v269_v14, 4 }
  0x1c   : > { %279 = vrot.lane.b32.xlu1 %v275_v16, %s741_s27  ;;  %288 = vrot.lane.b32.xlu0 %v269_v14, %s740_s26 }
  0x20   : > { %281 = vrot.lane.b32.xlu0 %v276_v17, %s741_s27  ;;  %277 = vrot.lane.b32.xlu1 %v274_v18, %s741_s27 }
  0x24   : > { %312 = vperm.xlu0 %708, %v309_v19  }
  0x28   : > { %467 = vrot.lane.b32.xlu0 %v742_v20, %s743_s30 }
  0x2c   : > { %458 = vrot.lane.b32.xlu0 %v453_v21, %s744_s6 }
  0x30   : > { %484 = vperm.xlu0 %708, %v481_v22  }
  0x34   : > { %544 = vrot.lane.b32.xlu0 %v802_v3, %s746_s11 }
  0x8a   : > { %v291_v23 = vpop.permute.xlu1 %290  ;;  %v287_v24 = vpop.permute.xlu0 %286 }
  0x8b   : > { %v326_v25 = vsel %vm295_vm3, %v291_v23, 0 }
  0x8c   : > { %667 = vmatpush3.bf16.msra.mxu1 %v326_v25 }
  0x8d   : > { %668 = vmatprep.subr.bf16.mxu1 %v738_v0 }
  0x8e   : > { %v280_v26 = vpop.permute.xlu1 %279  ;;  %v289_v27 = vpop.permute.xlu0 %288 }
  0x8f   : > { %v294_v28 = vsel %vm292_vm4, %v289_v27, %v291_v23  ;;  %v293_v29 = vsel %vm292_vm4, %v287_v24, %v289_v27 }
  0x90   : > { %653 = vmatprep.subr.msk.bf16.mxu0 %vm295_vm3, %v294_v28  ;;  %v320_v30 = vsel %vm295_vm3, %v293_v29, 0 }
  0x91   : > { %341 = vmatpush1.bf16.msra.mxu0 %v320_v30 }
  0x92   : > { %v282_v31 = vpop.permute.xlu0 %281  ;;  %v278_v32 = vpop.permute.xlu1 %277 }
  0x93   : > { %v285_v33 = vsel %vm283_vm5, %v280_v26, %v282_v31  ;;  %v284_v34 = vsel %vm283_vm5, %v278_v32, %v280_v26  ;;  %v306_v35 = vsel %vm295_vm3, %v270_v11, %v282_v31  ;;  %v480_v11 = vld [vmem:[%s869_s3] sm:$0xf] }
  0x94   : > { %669 = vmatpush3.bf16.msra.mxu1 %v306_v35  ;;  %v302_v36 = vsel %vm295_vm3, %v269_v14, %v285_v33  ;;  %v298_v37 = vsel %vm295_vm3, %v268_v12, %v284_v34 }
  0x95   : > { %342 = vmatprep.subr.bf16.mxu0 %v302_v36 }
  0x96   : > { %343 = vmatpush1.bf16.msra.mxu0 %v298_v37 }
  0x97   : > { %671 = vmatmul.mubr.msk.bf16.vlgmr.msra.gmra.mxu1 %vm315_vm6, %v308_v38 }
  0x99   : > { %654 = vmatmul.mubr.msk.bf16.vlgmr.msra.gmra.mxu0 %vm315_vm6, %v308_v38 }
  0x9a   : > { %528 = vmatprep.mubr.bf16.mxu0 %v739_v15 }
  0x9f   : > { %v313_v44 = vpop.permute.xlu0 %312 }
  0xa3   : > { %v468_v63 = vpop.permute.xlu0 %467 }
  0xa7   : > { %v459_v3 = vpop.permute.xlu0 %458 }
  0xab   : > { %v485_v16 = vpop.permute.xlu0 %484 }
  0xaf   : > { %v545_v20 = vpop.permute.xlu0 %544 }
 0x157   : > { %v403_v12 = vpop.f32.mrf.mxu1 }
 0x159   : > { %v362_v45 = vpop.f32.mrf.mxu0  ;;  %v672_v13 = vpop.f32.mrf.mxu1 }
 0x15a   : > { %v363_v46 = vadd.f32 %v362_v45, %v313_v44 }
 0x15b   : > { %v364_v47 = vpop.f32.mrf.mxu0  ;;  %v406_v14 = vpop.f32.mrf.mxu1 }
 0x15c   : > { %v433_v48 = vsel %vm418_vm7, %v363_v46, 0.0  ;;  %v365_v49 = vadd.f32 %v364_v47, %v313_v44 }
 0x15d   : > { %vm436_vm9 = vcmp.ge.f32.partialorder %v433_v48, 0.0  ;;  %v439_v50 = vmul.f32 0.1, %v433_v48  ;;  %v366_v51 = vpop.f32.mrf.mxu0  ;;  %v673_v15 = vpop.f32.mrf.mxu1 }
 0x15e   : > { %v434_v52 = vsel %vm422_vm8, %v365_v49, 0.0 }
 0x15f   : > { %vm437_vm10 = vcmp.ge.f32.partialorder %v434_v52, 0.0  ;;  %v440_v53 = vmul.f32 0.1, %v434_v52  ;;  %v367_v54 = vpop.f32.mrf.mxu0  ;;  %v442_v55 = vsel %vm436_vm9, %v433_v48, %v439_v50 }
 0x160   : > { %v445_v56 = vpack.c.bf16 %v442_v55, %v442_v55 }
 0x161   : > { %v443_v57 = vsel %vm437_vm10, %v434_v52, %v440_v53 }
 0x162   : > { %463 = vrot.lane.b32.xlu1 %v445_v56, %s743_s30  ;;  %v446_v58 = vpack.c.bf16 %v443_v57, %v443_v57  ;;  %v451_v60 = vrot.slane %v445_v56, 4 }
 0x164   : > { %v452_v59 = vrot.slane %v446_v58, 4 }
 0x166   : > { %465 = vrot.lane.b32.xlu1 %v446_v58, %s743_s30 }
 0x16a   : > { %456 = vrot.lane.b32.xlu1 %v452_v59, %s744_s6 }
 0x16e   : > { %454 = vrot.lane.b32.xlu1 %v451_v60, %s744_s6 }
 0x172   : > { %710 = vrot.lane.b32.xlu1 %v709_v61, %s746_s11 }
 0x1d4   : > { %v464_v62 = vpop.permute.xlu1 %463 }
 0x1d8   : > { %v466_v0 = vpop.permute.xlu1 %465 }
 0x1d9   : > { %v470_v1 = vsel %vm469_vm12, %v464_v62, %v466_v0  ;;  %v471_v2 = vsel %vm469_vm12, %v466_v0, %v468_v63 }
 0x1da   : > { %v491_v6 = vsel %vm295_vm3, %v470_v1, 0  ;;  %656 = vmatprep.subr.msk.bf16.mxu0 %vm295_vm3, %v471_v2 }
 0x1db   : > { %509 = vmatpush1.bf16.msra.mxu0 %v491_v6 }
 0x1dc   : > { %v457_v7 = vpop.permute.xlu1 %456 }
 0x1dd   : > { %v462_v8 = vsel %vm460_vm13, %v457_v7, %v459_v3 }
 0x1de   : > { %v478_v9 = vsel %vm295_vm3, %v446_v58, %v462_v8 }
 0x1df   : > { %510 = vmatprep.subr.bf16.mxu0 %v478_v9 }
 0x1e0   : > { %v455_v4 = vpop.permute.xlu1 %454 }
 0x1e1   : > { %v461_v5 = vsel %vm460_vm13, %v455_v4, %v457_v7 }
 0x1e2   : > { %v474_v10 = vsel %vm295_vm3, %v445_v56, %v461_v5 }
 0x1e3   : > { %511 = vmatpush1.bf16.msra.mxu0 %v474_v10 }
 0x1e4   : > { %v711_v17 = vpop.permute.xlu1 %710 }
 0x1e5   : > { %v713_v18 = vunpack.i.h.bf16 %v711_v17  ;;  %v712_v19 = vunpack.i.l.bf16 %v711_v17 }
 0x1e6   : > { %657 = vmatmul.mubr.msk.bf16.vlgmr.msra.gmra.mxu0 %vm315_vm6, %v480_v11 }
 0x1e7   : > { %v547_v23 = vsel %vm546_vm14, %v712_v19, %v713_v18  ;;  %v548_v25 = vsel %vm546_vm14, %v713_v18, %v545_v20 }
 0x2a6   : > { %v530_v21 = vpop.f32.mrf.mxu0 }
 0x2a7   : > { %v531_v22 = vadd.f32 %v530_v21, %v485_v16 }
 0x2a8   : > { %v532_v24 = vpop.f32.mrf.mxu0 }
 0x2a9   : > { %v533_v26 = vadd.f32 %v532_v24, %v485_v16  ;;  %v551_v28 = vadd.f32 %v547_v23, %v531_v22 }
 0x2aa   : > { %v534_v27 = vpop.f32.mrf.mxu0 }
 0x2ab   : > { %v552_v29 = vadd.f32 %v548_v25, %v533_v26 }
 0x2ac   : > { %v535_v30 = vpop.f32.mrf.mxu0 }
 0x2ad   : > { %v662_v31 = vpack.c.bf16 %v552_v29, %v551_v28 }
 0x2af   : > { %561 = vst [vmem:[%s246_s17] sm:$0xff] %v662_v31 }
 0x2b0 PF: > { %s15_s20 = sadd.s32 1, %s736_s20   ;;  %s872_s18 = smov %s732_s19 }
 0x2b1   : > { %p12_p5 = scmp.ge.s32.totalorder %s15_s20, 4   ;;  %s873_s19 = smov %s875_s21 }
 0x2b3   :  { %14 = sbr.rel (!%p12_p5) target bundleno = 2 (0x2), region = 71 }

// kernel: generator_forward.25
= control target key start
LH: loop header
LB: loop body
LE: loop exit
PB: predicated region body
PF: predicated region fallthrough
CT: control target
= control target key end

     0   :  { %s769_s18 = smov 0   ;;  %s771_s19 = smov 0   ;;  %s870_s0 = inlined_call_operand.vmem [shape: bf16[2,8,260], index: 0, kind: input, shape index: {}]   ;;  %s871_s1 = inlined_call_operand.vmem [shape: bf16[8,24], index: 1, kind: input, shape index: {}]   ;;  %s872_s2 = inlined_call_operand.vmem [shape: f32[8,1], index: 2, kind: input, shape index: {}]   ;;  %s873_s3 = inlined_call_operand.vmem [shape: bf16[8,24], index: 3, kind: input, shape index: {}]   ;;  %s874_s4 = inlined_call_operand.vmem [shape: f32[8,1], index: 4, kind: input, shape index: {}]   ;;  %s875_s5 = inlined_call_operand.vmem [shape: bf16[2,8,256], index: 5, kind: output, shape index: {}]  }
   0x1   :  { %s773_s20 = smov 0  }
   0x2 LB: > { %s27_s21 = sadd.s32 1, %s727_s19  ;;  %p647_p0 = scmp.ge.s32.totalorder %s731_s20, 1  ;;  %s731_s20 = sphi %s773_s20, %s15_s20   ;;  %s727_s19 = sphi %s771_s19, %s877_s19   ;;  %s723_s18 = sphi %s769_s18, %s876_s18  }
   0x3   : > { %p29_p1 = scmp.ge.s32.totalorder %s27_s21, 2  ;;  %p201_p2 = scmp.lt.s32.totalorder %s731_s20, 3 }
   0x5   : > { %s879_s21 = smov (%p29_p1, %s27_s21), 0  ;;  %p202_p3 = pnand %p647_p0, %p201_p2 }
   0x6   : > { %p233_p4 = scmp.lt.s32.totalorder (!%p202_p3), %s723_s18, 1  ;;  %s735_s26 = smov (!%p202_p3), 126  }
   0x7   : > { %205 = sbr.rel (%p202_p3) target bundleno = 688 (0x2b0), region = 40  ;;  %s736_s27 = smov (!%p202_p3), 127  }
   0xc   : > { %s881_s18 = smov (!%p233_p4, %s723_s18), 1  ;;  %v733_v0 = vmov 0.0   ;;  %v734_v15 = vmov 0   ;;  %v309_v19 = vld [vmem:[%s872_s2] sm:$0xff]  ;;  %v737_v20 = vmov 0.0|0.0   ;;  %vm295_vm3 = vcmask 1043456  }
   0xd   : > { %664 = vmatprep.subr.bf16.mxu1 %v733_v0  ;;  %s672_s22 = smul.u32 12, %s881_s18  ;;  %360 = vmatprep.mubr.bf16.mxu0 %v734_v15  ;;  %v453_v21 = vrot.slane %v737_v20, 4  ;;  %v479_v22 = vld [vmem:[%s874_s4] sm:$0xff]  ;;  %vm292_vm4 = vcmask 1031168   ;;  %vm283_vm5 = vcmask 1039360   ;;  %vm315_vm6 = vcmask 195584  }
   0xe   : > { %703 = vset.pattern.permute.xlu0 %v734_v15  ;;  %v308_v38 = vld [vmem:[%s871_s1] sm:$0xf]  ;;  %v410_v39 = vlaneseq  ;;  %vm738_vm11 = vmmov 0   ;;  %s659_s11 = sshll.u32 %s881_s18, 3 }
   0xf   : > { %s237_s25 = scalar_lea.vmem %s870_s0, %s672_s22  ;;  %668 = vmatprep.mubr.msk.bf16.mxu1 %vm738_vm11, %v733_v0  ;;  %s246_s14 = scalar_lea.vmem %s875_s5, %s659_s11 }
  0x10   : > { %v255_v1 = vld [vmem:[%s237_s25 + $0x8] sm:$0xf]  ;;  %v254_v2 = vld [vmem:[%s237_s25] sm:$0xff]  ;;  %v411_v40 = vand.u32 127, %v410_v39 }
  0x11   : > { %v258_v3 = vunpack.c.l.bf16 %v255_v1  ;;  %v794_v4 = vunpack.c.l.bf16 %v254_v2  ;;  %v796_v5 = vunpack.c.h.bf16 %v254_v2 }
  0x12   : > { %v412_v41 = vadd.s32 128, %v411_v40  ;;  %v415_v42 = vadd.s32 4294967295, %v411_v40 }
  0x13   : > { %vm261_vm0 = vcmp.ge.f32.partialorder %v258_v3, 0.0  ;;  %v264_v6 = vmul.f32 0.1, %v258_v3  ;;  %vm259_vm1 = vcmp.ge.f32.partialorder %v794_v4, 0.0  ;;  %v262_v7 = vmul.f32 0.1, %v794_v4 }
  0x14   : > { %vm260_vm2 = vcmp.ge.f32.partialorder %v796_v5, 0.0  ;;  %v263_v8 = vmul.f32 0.1, %v796_v5  ;;  %v416_v43 = vadd.s32 4294967295, %v412_v41  ;;  %vm418_vm7 = vcmp.ge.s32.totalorder %v415_v42, 0 }
  0x15   : > { %v267_v9 = vsel %vm261_vm0, %v258_v3, %v264_v6  ;;  %v265_v10 = vsel %vm259_vm1, %v794_v4, %v262_v7  ;;  %v704_v61 = vpack.i.bf16 %v796_v5, %v794_v4 }
  0x16   : > { %v270_v11 = vpack.c.bf16 %v267_v9, %v267_v9  ;;  %v268_v12 = vpack.c.bf16 %v265_v10, %v265_v10  ;;  %v266_v13 = vsel %vm260_vm2, %v796_v5, %v263_v8  ;;  %vm422_vm8 = vcmp.lt.s32.totalorder %v416_v43, 192 }
  0x17   : > { %v269_v14 = vpack.c.bf16 %v266_v13, %v266_v13 }
  0x18   : > { %290 = vrot.lane.b32.xlu1 %v270_v11, %s735_s26  ;;  %286 = vrot.lane.b32.xlu0 %v268_v12, %s735_s26  ;;  %v276_v17 = vrot.slane %v270_v11, 4  ;;  %v274_v18 = vrot.slane %v268_v12, 4 }
  0x19   : > { %v275_v16 = vrot.slane %v269_v14, 4 }
  0x1c   : > { %279 = vrot.lane.b32.xlu1 %v275_v16, %s736_s27  ;;  %288 = vrot.lane.b32.xlu0 %v269_v14, %s735_s26 }
  0x20   : > { %281 = vrot.lane.b32.xlu0 %v276_v17, %s736_s27  ;;  %277 = vrot.lane.b32.xlu1 %v274_v18, %s736_s27 }
  0x24   : > { %312 = vperm.xlu0 %703, %v309_v19  }
  0x28   : > { %466 = vrot.lane.b32.xlu0 %v737_v20, %s735_s26 }
  0x2c   : > { %458 = vrot.lane.b32.xlu0 %v453_v21, %s736_s27 }
  0x30   : > { %482 = vperm.xlu0 %703, %v479_v22  }
  0x34   : > { %542 = vrot.lane.b32.xlu0 %v258_v3, %s735_s26 }
  0x8a   : > { %v291_v23 = vpop.permute.xlu1 %290  ;;  %v287_v24 = vpop.permute.xlu0 %286 }
  0x8b   : > { %v326_v25 = vsel %vm295_vm3, %v291_v23, 0 }
  0x8c   : > { %665 = vmatpush3.bf16.msra.mxu1 %v326_v25 }
  0x8d   : > { %666 = vmatprep.subr.bf16.mxu1 %v733_v0 }
  0x8e   : > { %v280_v26 = vpop.permute.xlu1 %279  ;;  %v289_v27 = vpop.permute.xlu0 %288 }
  0x8f   : > { %v294_v28 = vsel %vm292_vm4, %v289_v27, %v291_v23  ;;  %v293_v29 = vsel %vm292_vm4, %v287_v24, %v289_v27 }
  0x90   : > { %651 = vmatprep.subr.msk.bf16.mxu0 %vm295_vm3, %v294_v28  ;;  %v320_v30 = vsel %vm295_vm3, %v293_v29, 0 }
  0x91   : > { %341 = vmatpush1.bf16.msra.mxu0 %v320_v30 }
  0x92   : > { %v282_v31 = vpop.permute.xlu0 %281  ;;  %v278_v32 = vpop.permute.xlu1 %277 }
  0x93   : > { %v285_v33 = vsel %vm283_vm5, %v280_v26, %v282_v31  ;;  %v284_v34 = vsel %vm283_vm5, %v278_v32, %v280_v26  ;;  %v306_v35 = vsel %vm295_vm3, %v270_v11, %v282_v31  ;;  %v478_v11 = vld [vmem:[%s873_s3] sm:$0xf] }
  0x94   : > { %667 = vmatpush3.bf16.msra.mxu1 %v306_v35  ;;  %v302_v36 = vsel %vm295_vm3, %v269_v14, %v285_v33  ;;  %v298_v37 = vsel %vm295_vm3, %v268_v12, %v284_v34 }
  0x95   : > { %342 = vmatprep.subr.bf16.mxu0 %v302_v36 }
  0x96   : > { %343 = vmatpush1.bf16.msra.mxu0 %v298_v37 }
  0x97   : > { %669 = vmatmul.mubr.msk.bf16.vlgmr.msra.gmra.mxu1 %vm315_vm6, %v308_v38 }
  0x99   : > { %652 = vmatmul.mubr.msk.bf16.vlgmr.msra.gmra.mxu0 %vm315_vm6, %v308_v38 }
  0x9a   : > { %526 = vmatprep.mubr.bf16.mxu0 %v734_v15 }
  0x9f   : > { %v313_v44 = vpop.permute.xlu0 %312 }
  0xa3   : > { %v467_v63 = vpop.permute.xlu0 %466 }
  0xa7   : > { %v459_v6 = vpop.permute.xlu0 %458 }
  0xab   : > { %v483_v16 = vpop.permute.xlu0 %482 }
  0xaf   : > { %v543_v20 = vpop.permute.xlu0 %542 }
 0x157   : > { %v403_v12 = vpop.f32.mrf.mxu1 }
 0x159   : > { %v362_v45 = vpop.f32.mrf.mxu0  ;;  %v670_v13 = vpop.f32.mrf.mxu1 }
 0x15a   : > { %v363_v46 = vadd.f32 %v362_v45, %v313_v44 }
 0x15b   : > { %v364_v47 = vpop.f32.mrf.mxu0  ;;  %v406_v14 = vpop.f32.mrf.mxu1 }
 0x15c   : > { %v433_v48 = vsel %vm418_vm7, %v363_v46, 0.0  ;;  %v365_v49 = vadd.f32 %v364_v47, %v313_v44 }
 0x15d   : > { %vm436_vm9 = vcmp.ge.f32.partialorder %v433_v48, 0.0  ;;  %v439_v50 = vmul.f32 0.1, %v433_v48  ;;  %v366_v51 = vpop.f32.mrf.mxu0  ;;  %v671_v15 = vpop.f32.mrf.mxu1 }
 0x15e   : > { %v434_v52 = vsel %vm422_vm8, %v365_v49, 0.0 }
 0x15f   : > { %vm437_vm10 = vcmp.ge.f32.partialorder %v434_v52, 0.0  ;;  %v440_v53 = vmul.f32 0.1, %v434_v52  ;;  %v367_v54 = vpop.f32.mrf.mxu0  ;;  %v442_v55 = vsel %vm436_vm9, %v433_v48, %v439_v50 }
 0x160   : > { %v445_v56 = vpack.c.bf16 %v442_v55, %v442_v55 }
 0x161   : > { %v443_v57 = vsel %vm437_vm10, %v434_v52, %v440_v53 }
 0x162   : > { %462 = vrot.lane.b32.xlu1 %v445_v56, %s735_s26  ;;  %v446_v58 = vpack.c.bf16 %v443_v57, %v443_v57  ;;  %v451_v60 = vrot.slane %v445_v56, 4 }
 0x164   : > { %v452_v59 = vrot.slane %v446_v58, 4 }
 0x166   : > { %464 = vrot.lane.b32.xlu1 %v446_v58, %s735_s26 }
 0x16a   : > { %456 = vrot.lane.b32.xlu1 %v452_v59, %s736_s27 }
 0x16e   : > { %454 = vrot.lane.b32.xlu1 %v451_v60, %s736_s27 }
 0x172   : > { %705 = vrot.lane.b32.xlu1 %v704_v61, %s735_s26 }
 0x1d4   : > { %v463_v62 = vpop.permute.xlu1 %462 }
 0x1d8   : > { %v465_v1 = vpop.permute.xlu1 %464 }
 0x1d9   : > { %v468_v0 = vsel %vm292_vm4, %v463_v62, %v465_v1  ;;  %v469_v2 = vsel %vm292_vm4, %v465_v1, %v467_v63 }
 0x1da   : > { %v489_v3 = vsel %vm295_vm3, %v468_v0, 0  ;;  %654 = vmatprep.subr.msk.bf16.mxu0 %vm295_vm3, %v469_v2 }
 0x1db   : > { %507 = vmatpush1.bf16.msra.mxu0 %v489_v3 }
 0x1dc   : > { %v457_v7 = vpop.permute.xlu1 %456 }
 0x1dd   : > { %v461_v8 = vsel %vm283_vm5, %v457_v7, %v459_v6 }
 0x1de   : > { %v476_v4 = vsel %vm295_vm3, %v446_v58, %v461_v8 }
 0x1df   : > { %508 = vmatprep.subr.bf16.mxu0 %v476_v4 }
 0x1e0   : > { %v455_v5 = vpop.permute.xlu1 %454 }
 0x1e1   : > { %v460_v9 = vsel %vm283_vm5, %v455_v5, %v457_v7 }
 0x1e2   : > { %v472_v10 = vsel %vm295_vm3, %v445_v56, %v460_v9 }
 0x1e3   : > { %509 = vmatpush1.bf16.msra.mxu0 %v472_v10 }
 0x1e4   : > { %v706_v17 = vpop.permute.xlu1 %705 }
 0x1e5   : > { %v708_v18 = vunpack.i.h.bf16 %v706_v17  ;;  %v707_v19 = vunpack.i.l.bf16 %v706_v17 }
 0x1e6   : > { %655 = vmatmul.mubr.msk.bf16.vlgmr.msra.gmra.mxu0 %vm315_vm6, %v478_v11 }
 0x1e7   : > { %v545_v23 = vsel %vm292_vm4, %v707_v19, %v708_v18  ;;  %v546_v25 = vsel %vm292_vm4, %v708_v18, %v543_v20 }
 0x2a6   : > { %v528_v21 = vpop.f32.mrf.mxu0 }
 0x2a7   : > { %v529_v22 = vadd.f32 %v528_v21, %v483_v16 }
 0x2a8   : > { %v530_v24 = vpop.f32.mrf.mxu0 }
 0x2a9   : > { %v531_v26 = vadd.f32 %v530_v24, %v483_v16  ;;  %v549_v28 = vadd.f32 %v545_v23, %v529_v22 }
 0x2aa   : > { %v532_v27 = vpop.f32.mrf.mxu0 }
 0x2ab   : > { %v550_v29 = vadd.f32 %v546_v25, %v531_v26 }
 0x2ac   : > { %v533_v30 = vpop.f32.mrf.mxu0 }
 0x2ad   : > { %v660_v31 = vpack.c.bf16 %v550_v29, %v549_v28 }
 0x2af   : > { %559 = vst [vmem:[%s246_s14] sm:$0xff] %v660_v31 }
 0x2b0 PF: > { %s15_s20 = sadd.s32 1, %s731_s20   ;;  %s876_s18 = smov %s727_s19 }
 0x2b1   : > { %p12_p5 = scmp.ge.s32.totalorder %s15_s20, 4   ;;  %s877_s19 = smov %s879_s21 }
 0x2b3   :  { %14 = sbr.rel (!%p12_p5) target bundleno = 2 (0x2), region = 71 }

// kernel: generator_forward.27
= control target key start
LH: loop header
LB: loop body
LE: loop exit
PB: predicated region body
PF: predicated region fallthrough
CT: control target
= control target key end

     0   :  { %s777_s18 = smov 0   ;;  %s779_s19 = smov 0   ;;  %s866_s0 = inlined_call_operand.vmem [shape: bf16[2,8,268], index: 0, kind: input, shape index: {}]   ;;  %s867_s1 = inlined_call_operand.vmem [shape: bf16[8,24], index: 1, kind: input, shape index: {}]   ;;  %s868_s2 = inlined_call_operand.vmem [shape: f32[8,1], index: 2, kind: input, shape index: {}]   ;;  %s869_s3 = inlined_call_operand.vmem [shape: bf16[8,24], index: 3, kind: input, shape index: {}]   ;;  %s870_s4 = inlined_call_operand.vmem [shape: f32[8,1], index: 4, kind: input, shape index: {}]   ;;  %s871_s5 = inlined_call_operand.vmem [shape: bf16[2,8,256], index: 5, kind: output, shape index: {}]  }
   0x1   :  { %s781_s20 = smov 0  }
   0x2 LB: > { %s27_s21 = sadd.s32 1, %s732_s19  ;;  %p649_p0 = scmp.ge.s32.totalorder %s736_s20, 1  ;;  %s736_s20 = sphi %s781_s20, %s15_s20   ;;  %s732_s19 = sphi %s779_s19, %s873_s19   ;;  %s728_s18 = sphi %s777_s18, %s872_s18  }
   0x3   : > { %p29_p1 = scmp.ge.s32.totalorder %s27_s21, 2  ;;  %p201_p2 = scmp.lt.s32.totalorder %s736_s20, 3 }
   0x5   : > { %s875_s21 = smov (%p29_p1, %s27_s21), 0  ;;  %p202_p3 = pnand %p649_p0, %p201_p2 }
   0x6   : > { %p233_p4 = scmp.lt.s32.totalorder (!%p202_p3), %s728_s18, 1  ;;  %s740_s26 = smov (!%p202_p3), 118  }
   0x7   : > { %205 = sbr.rel (%p202_p3) target bundleno = 688 (0x2b0), region = 40  ;;  %s741_s27 = smov (!%p202_p3), 123  }
   0x8   : > { %s743_s30 = smov (!%p202_p3), 126   ;;  %s744_s6 = smov (!%p202_p3), 127  }
   0x9   : > { %s746_s11 = smov (!%p202_p3), 122  }
   0xc   : > { %s877_s18 = smov (!%p233_p4, %s728_s18), 1  ;;  %v738_v0 = vmov 0.0   ;;  %v739_v15 = vmov 0   ;;  %v309_v19 = vld [vmem:[%s868_s2] sm:$0xff]  ;;  %v742_v20 = vmov 0.0|0.0   ;;  %vm295_vm3 = vcmask 1043456  }
   0xd   : > { %666 = vmatprep.subr.bf16.mxu1 %v738_v0  ;;  %s674_s22 = smul.u32 12, %s877_s18  ;;  %360 = vmatprep.mubr.bf16.mxu0 %v739_v15  ;;  %v453_v21 = vrot.slane %v742_v20, 4  ;;  %v481_v22 = vld [vmem:[%s870_s4] sm:$0xff]  ;;  %vm292_vm4 = vcmask 965632   ;;  %vm283_vm5 = vcmask 1006592   ;;  %vm315_vm6 = vcmask 195584  }
   0xe   : > { %708 = vset.pattern.permute.xlu0 %v739_v15  ;;  %v308_v38 = vld [vmem:[%s867_s1] sm:$0xf]  ;;  %v410_v39 = vlaneseq  ;;  %vm745_vm11 = vmmov 0   ;;  %vm469_vm12 = vcmask 1031168   ;;  %vm460_vm13 = vcmask 1039360   ;;  %s661_s14 = sshll.u32 %s877_s18, 3 }
   0xf   : > { %s237_s25 = scalar_lea.vmem %s866_s0, %s674_s22  ;;  %670 = vmatprep.mubr.msk.bf16.mxu1 %vm745_vm11, %v738_v0  ;;  %vm546_vm14 = vcmask 998400   ;;  %s246_s17 = scalar_lea.vmem %s871_s5, %s661_s14 }
  0x10   : > { %v255_v1 = vld [vmem:[%s237_s25 + $0x8] sm:$0xf]  ;;  %v254_v2 = vld [vmem:[%s237_s25] sm:$0xff]  ;;  %v411_v40 = vand.u32 127, %v410_v39 }
  0x11   : > { %v802_v3 = vunpack.c.l.bf16 %v255_v1  ;;  %v804_v4 = vunpack.c.l.bf16 %v254_v2  ;;  %v806_v5 = vunpack.c.h.bf16 %v254_v2 }
  0x12   : > { %v412_v41 = vadd.s32 128, %v411_v40  ;;  %v415_v42 = vadd.s32 4294967295, %v411_v40 }
  0x13   : > { %vm261_vm0 = vcmp.ge.f32.partialorder %v802_v3, 0.0  ;;  %v264_v6 = vmul.f32 0.1, %v802_v3  ;;  %vm259_vm1 = vcmp.ge.f32.partialorder %v804_v4, 0.0  ;;  %v262_v7 = vmul.f32 0.1, %v804_v4 }
  0x14   : > { %vm260_vm2 = vcmp.ge.f32.partialorder %v806_v5, 0.0  ;;  %v263_v8 = vmul.f32 0.1, %v806_v5  ;;  %v416_v43 = vadd.s32 4294967295, %v412_v41  ;;  %vm418_vm7 = vcmp.ge.s32.totalorder %v415_v42, 0 }
  0x15   : > { %v267_v9 = vsel %vm261_vm0, %v802_v3, %v264_v6  ;;  %v265_v10 = vsel %vm259_vm1, %v804_v4, %v262_v7  ;;  %v709_v61 = vpack.i.bf16 %v806_v5, %v804_v4 }
  0x16   : > { %v270_v11 = vpack.c.bf16 %v267_v9, %v267_v9  ;;  %v268_v12 = vpack.c.bf16 %v265_v10, %v265_v10  ;;  %v266_v13 = vsel %vm260_vm2, %v806_v5, %v263_v8  ;;  %vm422_vm8 = vcmp.lt.s32.totalorder %v416_v43, 192 }
  0x17   : > { %v269_v14 = vpack.c.bf16 %v266_v13, %v266_v13 }
  0x18   : > { %290 = vrot.lane.b32.xlu1 %v270_v11, %s740_s26  ;;  %286 = vrot.lane.b32.xlu0 %v268_v12, %s740_s26  ;;  %v276_v17 = vrot.slane %v270_v11, 4  ;;  %v274_v18 = vrot.slane %v268_v12, 4 }
  0x19   : > { %v275_v16 = vrot.slane %v269_v14, 4 }
  0x1c   : > { %279 = vrot.lane.b32.xlu1 %v275_v16, %s741_s27  ;;  %288 = vrot.lane.b32.xlu0 %v269_v14, %s740_s26 }
  0x20   : > { %281 = vrot.lane.b32.xlu0 %v276_v17, %s741_s27  ;;  %277 = vrot.lane.b32.xlu1 %v274_v18, %s741_s27 }
  0x24   : > { %312 = vperm.xlu0 %708, %v309_v19  }
  0x28   : > { %467 = vrot.lane.b32.xlu0 %v742_v20, %s743_s30 }
  0x2c   : > { %458 = vrot.lane.b32.xlu0 %v453_v21, %s744_s6 }
  0x30   : > { %484 = vperm.xlu0 %708, %v481_v22  }
  0x34   : > { %544 = vrot.lane.b32.xlu0 %v802_v3, %s746_s11 }
  0x8a   : > { %v291_v23 = vpop.permute.xlu1 %290  ;;  %v287_v24 = vpop.permute.xlu0 %286 }
  0x8b   : > { %v326_v25 = vsel %vm295_vm3, %v291_v23, 0 }
  0x8c   : > { %667 = vmatpush3.bf16.msra.mxu1 %v326_v25 }
  0x8d   : > { %668 = vmatprep.subr.bf16.mxu1 %v738_v0 }
  0x8e   : > { %v280_v26 = vpop.permute.xlu1 %279  ;;  %v289_v27 = vpop.permute.xlu0 %288 }
  0x8f   : > { %v294_v28 = vsel %vm292_vm4, %v289_v27, %v291_v23  ;;  %v293_v29 = vsel %vm292_vm4, %v287_v24, %v289_v27 }
  0x90   : > { %653 = vmatprep.subr.msk.bf16.mxu0 %vm295_vm3, %v294_v28  ;;  %v320_v30 = vsel %vm295_vm3, %v293_v29, 0 }
  0x91   : > { %341 = vmatpush1.bf16.msra.mxu0 %v320_v30 }
  0x92   : > { %v282_v31 = vpop.permute.xlu0 %281  ;;  %v278_v32 = vpop.permute.xlu1 %277 }
  0x93   : > { %v285_v33 = vsel %vm283_vm5, %v280_v26, %v282_v31  ;;  %v284_v34 = vsel %vm283_vm5, %v278_v32, %v280_v26  ;;  %v306_v35 = vsel %vm295_vm3, %v270_v11, %v282_v31  ;;  %v480_v11 = vld [vmem:[%s869_s3] sm:$0xf] }
  0x94   : > { %669 = vmatpush3.bf16.msra.mxu1 %v306_v35  ;;  %v302_v36 = vsel %vm295_vm3, %v269_v14, %v285_v33  ;;  %v298_v37 = vsel %vm295_vm3, %v268_v12, %v284_v34 }
  0x95   : > { %342 = vmatprep.subr.bf16.mxu0 %v302_v36 }
  0x96   : > { %343 = vmatpush1.bf16.msra.mxu0 %v298_v37 }
  0x97   : > { %671 = vmatmul.mubr.msk.bf16.vlgmr.msra.gmra.mxu1 %vm315_vm6, %v308_v38 }
  0x99   : > { %654 = vmatmul.mubr.msk.bf16.vlgmr.msra.gmra.mxu0 %vm315_vm6, %v308_v38 }
  0x9a   : > { %528 = vmatprep.mubr.bf16.mxu0 %v739_v15 }
  0x9f   : > { %v313_v44 = vpop.permute.xlu0 %312 }
  0xa3   : > { %v468_v63 = vpop.permute.xlu0 %467 }
  0xa7   : > { %v459_v3 = vpop.permute.xlu0 %458 }
  0xab   : > { %v485_v16 = vpop.permute.xlu0 %484 }
  0xaf   : > { %v545_v20 = vpop.permute.xlu0 %544 }
 0x157   : > { %v403_v12 = vpop.f32.mrf.mxu1 }
 0x159   : > { %v362_v45 = vpop.f32.mrf.mxu0  ;;  %v672_v13 = vpop.f32.mrf.mxu1 }
 0x15a   : > { %v363_v46 = vadd.f32 %v362_v45, %v313_v44 }
 0x15b   : > { %v364_v47 = vpop.f32.mrf.mxu0  ;;  %v406_v14 = vpop.f32.mrf.mxu1 }
 0x15c   : > { %v433_v48 = vsel %vm418_vm7, %v363_v46, 0.0  ;;  %v365_v49 = vadd.f32 %v364_v47, %v313_v44 }
 0x15d   : > { %vm436_vm9 = vcmp.ge.f32.partialorder %v433_v48, 0.0  ;;  %v439_v50 = vmul.f32 0.1, %v433_v48  ;;  %v366_v51 = vpop.f32.mrf.mxu0  ;;  %v673_v15 = vpop.f32.mrf.mxu1 }
 0x15e   : > { %v434_v52 = vsel %vm422_vm8, %v365_v49, 0.0 }
 0x15f   : > { %vm437_vm10 = vcmp.ge.f32.partialorder %v434_v52, 0.0  ;;  %v440_v53 = vmul.f32 0.1, %v434_v52  ;;  %v367_v54 = vpop.f32.mrf.mxu0  ;;  %v442_v55 = vsel %vm436_vm9, %v433_v48, %v439_v50 }
 0x160   : > { %v445_v56 = vpack.c.bf16 %v442_v55, %v442_v55 }
 0x161   : > { %v443_v57 = vsel %vm437_vm10, %v434_v52, %v440_v53 }
 0x162   : > { %463 = vrot.lane.b32.xlu1 %v445_v56, %s743_s30  ;;  %v446_v58 = vpack.c.bf16 %v443_v57, %v443_v57  ;;  %v451_v60 = vrot.slane %v445_v56, 4 }
 0x164   : > { %v452_v59 = vrot.slane %v446_v58, 4 }
 0x166   : > { %465 = vrot.lane.b32.xlu1 %v446_v58, %s743_s30 }
 0x16a   : > { %456 = vrot.lane.b32.xlu1 %v452_v59, %s744_s6 }
 0x16e   : > { %454 = vrot.lane.b32.xlu1 %v451_v60, %s744_s6 }
 0x172   : > { %710 = vrot.lane.b32.xlu1 %v709_v61, %s746_s11 }
 0x1d4   : > { %v464_v62 = vpop.permute.xlu1 %463 }
 0x1d8   : > { %v466_v0 = vpop.permute.xlu1 %465 }
 0x1d9   : > { %v470_v1 = vsel %vm469_vm12, %v464_v62, %v466_v0  ;;  %v471_v2 = vsel %vm469_vm12, %v466_v0, %v468_v63 }
 0x1da   : > { %v491_v6 = vsel %vm295_vm3, %v470_v1, 0  ;;  %656 = vmatprep.subr.msk.bf16.mxu0 %vm295_vm3, %v471_v2 }
 0x1db   : > { %509 = vmatpush1.bf16.msra.mxu0 %v491_v6 }
 0x1dc   : > { %v457_v7 = vpop.permute.xlu1 %456 }
 0x1dd   : > { %v462_v8 = vsel %vm460_vm13, %v457_v7, %v459_v3 }
 0x1de   : > { %v478_v9 = vsel %vm295_vm3, %v446_v58, %v462_v8 }
 0x1df   : > { %510 = vmatprep.subr.bf16.mxu0 %v478_v9 }
 0x1e0   : > { %v455_v4 = vpop.permute.xlu1 %454 }
 0x1e1   : > { %v461_v5 = vsel %vm460_vm13, %v455_v4, %v457_v7 }
 0x1e2   : > { %v474_v10 = vsel %vm295_vm3, %v445_v56, %v461_v5 }
 0x1e3   : > { %511 = vmatpush1.bf16.msra.mxu0 %v474_v10 }
 0x1e4   : > { %v711_v17 = vpop.permute.xlu1 %710 }
 0x1e5   : > { %v713_v18 = vunpack.i.h.bf16 %v711_v17  ;;  %v712_v19 = vunpack.i.l.bf16 %v711_v17 }
 0x1e6   : > { %657 = vmatmul.mubr.msk.bf16.vlgmr.msra.gmra.mxu0 %vm315_vm6, %v480_v11 }
 0x1e7   : > { %v547_v23 = vsel %vm546_vm14, %v712_v19, %v713_v18  ;;  %v548_v25 = vsel %vm546_vm14, %v713_v18, %v545_v20 }
 0x2a6   : > { %v530_v21 = vpop.f32.mrf.mxu0 }
 0x2a7   : > { %v531_v22 = vadd.f32 %v530_v21, %v485_v16 }
 0x2a8   : > { %v532_v24 = vpop.f32.mrf.mxu0 }
 0x2a9   : > { %v533_v26 = vadd.f32 %v532_v24, %v485_v16  ;;  %v551_v28 = vadd.f32 %v547_v23, %v531_v22 }
 0x2aa   : > { %v534_v27 = vpop.f32.mrf.mxu0 }
 0x2ab   : > { %v552_v29 = vadd.f32 %v548_v25, %v533_v26 }
 0x2ac   : > { %v535_v30 = vpop.f32.mrf.mxu0 }
 0x2ad   : > { %v662_v31 = vpack.c.bf16 %v552_v29, %v551_v28 }
 0x2af   : > { %561 = vst [vmem:[%s246_s17] sm:$0xff] %v662_v31 }
 0x2b0 PF: > { %s15_s20 = sadd.s32 1, %s736_s20   ;;  %s872_s18 = smov %s732_s19 }
 0x2b1   : > { %p12_p5 = scmp.ge.s32.totalorder %s15_s20, 4   ;;  %s873_s19 = smov %s875_s21 }
 0x2b3   :  { %14 = sbr.rel (!%p12_p5) target bundleno = 2 (0x2), region = 71 }

// kernel: generator_forward.28
= control target key start
LH: loop header
LB: loop body
LE: loop exit
PB: predicated region body
PF: predicated region fallthrough
CT: control target
= control target key end

     0   :  { %s830_s18 = smov 0   ;;  %s832_s19 = smov 0   ;;  %s984_s0 = inlined_call_operand.vmem [shape: bf16[2,8,264], index: 0, kind: input, shape index: {}]   ;;  %s985_s1 = inlined_call_operand.vmem [shape: bf16[8,40], index: 1, kind: input, shape index: {}]   ;;  %s986_s2 = inlined_call_operand.vmem [shape: f32[8,1], index: 2, kind: input, shape index: {}]   ;;  %s987_s3 = inlined_call_operand.vmem [shape: bf16[8,40], index: 3, kind: input, shape index: {}]   ;;  %s988_s4 = inlined_call_operand.vmem [shape: f32[8,1], index: 4, kind: input, shape index: {}]   ;;  %s989_s5 = inlined_call_operand.vmem [shape: bf16[2,8,256], index: 5, kind: output, shape index: {}]  }
   0x1   :  { %s834_s20 = smov 0  }
   0x2 LB: > { %s27_s21 = sadd.s32 1, %s786_s19  ;;  %p701_p0 = scmp.ge.s32.totalorder %s790_s20, 1  ;;  %s790_s20 = sphi %s834_s20, %s15_s20   ;;  %s786_s19 = sphi %s832_s19, %s991_s19   ;;  %s782_s18 = sphi %s830_s18, %s990_s18  }
   0x3   : > { %p29_p1 = scmp.ge.s32.totalorder %s27_s21, 2  ;;  %p201_p2 = scmp.lt.s32.totalorder %s790_s20, 3 }
   0x5   : > { %s993_s21 = smov (%p29_p1, %s27_s21), 0  ;;  %p202_p3 = pnand %p701_p0, %p201_p2 }
   0x6   : > { %p233_p4 = scmp.lt.s32.totalorder (!%p202_p3), %s782_s18, 1  ;;  %s793_s26 = smov (!%p202_p3), 124  }
   0x7   : > { %205 = sbr.rel (%p202_p3) target bundleno = 712 (0x2c8), region = 40  ;;  %s794_s27 = smov (!%p202_p3), 126  }
   0x8   : > { %s796_s28 = smov (!%p202_p3), 125   ;;  %s797_s29 = smov (!%p202_p3), 127  }
   0xc   : > { %s995_s18 = smov (!%p233_p4, %s782_s18), 1  ;;  %v792_v0 = vmov 0.0   ;;  %v795_v17 = vmov 0   ;;  %v339_v19 = vld [vmem:[%s986_s2] sm:$0xff]  ;;  %v798_v20 = vmov 0.0|0.0   ;;  %vm313_vm3 = vcmask 1043456  }
   0xd   : > { %719 = vmatprep.subr.bf16.mxu1 %v792_v0  ;;  %s729_s22 = smul.u32 12, %s995_s18  ;;  %390 = vmatprep.mubr.bf16.mxu0 %v795_v17  ;;  %vm310_vm4 = vcmask 1014784   ;;  %vm292_vm5 = vcmask 1031168   ;;  %vm301_vm6 = vcmask 1022976   ;;  %vm283_vm7 = vcmask 1039360   ;;  %s713_s13 = sshll.u32 %s995_s18, 3 }
   0xe   : > { %762 = vset.pattern.permute.xlu0 %v795_v17  ;;  %v338_v49 = vld [vmem:[%s985_s1] sm:$0xf]  ;;  %vm345_vm8 = vcmask 326656   ;;  %v483_v50 = vrot.slane %v798_v20, 4  ;;  %v440_v51 = vlaneseq  ;;  %vm799_vm13 = vmmov 0   ;;  %s246_s16 = scalar_lea.vmem %s989_s5, %s713_s13 }
   0xf   : > { %s237_s25 = scalar_lea.vmem %s984_s0, %s729_s22  ;;  %725 = vmatprep.mubr.msk.bf16.mxu1 %vm799_vm13, %v792_v0 }
  0x10   : > { %v255_v1 = vld [vmem:[%s237_s25 + $0x8] sm:$0xf]  ;;  %v254_v2 = vld [vmem:[%s237_s25] sm:$0xff]  ;;  %v441_v52 = vand.u32 127, %v440_v51 }
  0x11   : > { %v855_v3 = vunpack.c.l.bf16 %v255_v1  ;;  %v857_v4 = vunpack.c.l.bf16 %v254_v2  ;;  %v859_v5 = vunpack.c.h.bf16 %v254_v2 }
  0x12   : > { %v442_v53 = vadd.s32 128, %v441_v52  ;;  %v445_v54 = vadd.s32 4294967294, %v441_v52 }
  0x13   : > { %vm261_vm0 = vcmp.ge.f32.partialorder %v855_v3, 0.0  ;;  %v264_v6 = vmul.f32 0.1, %v855_v3  ;;  %vm259_vm1 = vcmp.ge.f32.partialorder %v857_v4, 0.0  ;;  %v262_v7 = vmul.f32 0.1, %v857_v4 }
  0x14   : > { %vm260_vm2 = vcmp.ge.f32.partialorder %v859_v5, 0.0  ;;  %v263_v8 = vmul.f32 0.1, %v859_v5  ;;  %v446_v56 = vadd.s32 4294967294, %v442_v53  ;;  %vm448_vm9 = vcmp.ge.s32.totalorder %v445_v54, 0 }
  0x15   : > { %v267_v9 = vsel %vm261_vm0, %v855_v3, %v264_v6  ;;  %v265_v10 = vsel %vm259_vm1, %v857_v4, %v262_v7 }
  0x16   : > { %v869_v11 = vpack.c.bf16 %v267_v9, %v267_v9  ;;  %v871_v12 = vpack.c.bf16 %v265_v10, %v265_v10  ;;  %v266_v13 = vsel %vm260_vm2, %v859_v5, %v263_v8  ;;  %vm452_vm10 = vcmp.lt.s32.totalorder %v446_v56, 192 }
  0x17   : > { %v878_v14 = vpack.c.bf16 %v266_v13, %v266_v13 }
  0x18   : > { %308 = vrot.lane.b32.xlu1 %v869_v11, %s793_s26  ;;  %304 = vrot.lane.b32.xlu0 %v871_v12, %s793_s26  ;;  %v276_v16 = vrot.slane %v869_v11, 4  ;;  %v274_v18 = vrot.slane %v871_v12, 4 }
  0x19   : > { %v275_v15 = vrot.slane %v878_v14, 4 }
  0x1c   : > { %288 = vrot.lane.b32.xlu1 %v878_v14, %s794_s27  ;;  %306 = vrot.lane.b32.xlu0 %v878_v14, %s793_s26 }
  0x20   : > { %286 = vrot.lane.b32.xlu1 %v871_v12, %s794_s27  ;;  %290 = vrot.lane.b32.xlu0 %v869_v11, %s794_s27 }
  0x24   : > { %297 = vrot.lane.b32.xlu1 %v275_v15, %s796_s28  ;;  %299 = vrot.lane.b32.xlu0 %v276_v16, %s796_s28 }
  0x28   : > { %279 = vrot.lane.b32.xlu1 %v275_v15, %s797_s29  ;;  %295 = vrot.lane.b32.xlu0 %v274_v18, %s796_s28 }
  0x2c   : > { %277 = vrot.lane.b32.xlu1 %v274_v18, %s797_s29  ;;  %281 = vrot.lane.b32.xlu0 %v276_v16, %s797_s29 }
  0x30   : > { %342 = vperm.xlu0 %762, %v339_v19  }
  0x34   : > { %512 = vrot.lane.b32.xlu0 %v798_v20, %s793_s26 }
  0x38   : > { %496 = vrot.lane.b32.xlu0 %v798_v20, %s794_s27 }
  0x3c   : > { %504 = vrot.lane.b32.xlu0 %v483_v50, %s796_s28 }
  0x8a   : > { %v309_v21 = vpop.permute.xlu1 %308  ;;  %v305_v22 = vpop.permute.xlu0 %304 }
  0x8b   : > { %v356_v23 = vsel %vm313_vm3, %v309_v21, 0 }
  0x8c   : > { %720 = vmatpush3.bf16.msra.mxu1 %v356_v23 }
  0x8d   : > { %721 = vmatprep.subr.bf16.mxu1 %v792_v0 }
  0x8e   : > { %v289_v24 = vpop.permute.xlu1 %288  ;;  %v307_v25 = vpop.permute.xlu0 %306 }
  0x8f   : > { %v312_v26 = vsel %vm310_vm4, %v307_v25, %v309_v21  ;;  %v311_v27 = vsel %vm310_vm4, %v305_v22, %v307_v25 }
  0x90   : > { %705 = vmatprep.subr.msk.bf16.mxu0 %vm313_vm3, %v312_v26  ;;  %v350_v28 = vsel %vm313_vm3, %v311_v27, 0 }
  0x91   : > { %369 = vmatpush1.bf16.msra.mxu0 %v350_v28 }
  0x92   : > { %v287_v29 = vpop.permute.xlu1 %286  ;;  %v291_v30 = vpop.permute.xlu0 %290 }
  0x93   : > { %v294_v33 = vsel %vm292_vm5, %v289_v24, %v291_v30  ;;  %v293_v39 = vsel %vm292_vm5, %v287_v29, %v289_v24 }
  0x96   : > { %v298_v31 = vpop.permute.xlu1 %297  ;;  %v300_v32 = vpop.permute.xlu0 %299 }
  0x97   : > { %v303_v34 = vsel %vm301_vm6, %v298_v31, %v300_v32  ;;  %v336_v35 = vsel %vm313_vm3, %v291_v30, %v300_v32 }
  0x98   : > { %722 = vmatpush3.bf16.msra.mxu1 %v336_v35  ;;  %v332_v36 = vsel %vm313_vm3, %v294_v33, %v303_v34 }
  0x99   : > { %370 = vmatprep.subr.bf16.mxu0 %v332_v36  ;;  %723 = vmatprep.subr.bf16.mxu1 %v792_v0  ;;  %v532_v36 = vld [vmem:[%s987_s3] sm:$0xf] }
  0x9a   : > { %v280_v37 = vpop.permute.xlu1 %279  ;;  %v296_v38 = vpop.permute.xlu0 %295 }
  0x9b   : > { %v302_v40 = vsel %vm301_vm6, %v296_v38, %v298_v31 }
  0x9c   : > { %v328_v41 = vsel %vm313_vm3, %v293_v39, %v302_v40 }
  0x9d   : > { %371 = vmatpush1.bf16.msra.mxu0 %v328_v41 }
  0x9e   : > { %v278_v42 = vpop.permute.xlu1 %277  ;;  %v282_v43 = vpop.permute.xlu0 %281 }
  0x9f   : > { %v284_v44 = vsel %vm283_vm7, %v278_v42, %v280_v37  ;;  %v285_v45 = vsel %vm283_vm7, %v280_v37, %v282_v43  ;;  %v324_v46 = vsel %vm313_vm3, %v869_v11, %v282_v43 }
  0xa0   : > { %724 = vmatpush3.bf16.msra.mxu1 %v324_v46  ;;  %v320_v47 = vsel %vm313_vm3, %v878_v14, %v285_v45  ;;  %v316_v48 = vsel %vm313_vm3, %v871_v12, %v284_v44  ;;  %v533_v12 = vld [vmem:[%s988_s4] sm:$0xff]  ;;  %v763_v14 = vpack.i.bf16 %v859_v5, %v857_v4 }
  0xa1   : > { %372 = vmatprep.subr.bf16.mxu0 %v320_v47 }
  0xa2   : > { %373 = vmatpush1.bf16.msra.mxu0 %v316_v48 }
  0xa3   : > { %726 = vmatmul.mubr.msk.bf16.vlgmr.msra.gmra.mxu1 %vm345_vm8, %v338_v49 }
  0xa5   : > { %706 = vmatmul.mubr.msk.bf16.vlgmr.msra.gmra.mxu0 %vm345_vm8, %v338_v49 }
  0xa6   : > { %580 = vmatprep.mubr.bf16.mxu0 %v795_v17 }
  0xab   : > { %v343_v55 = vpop.permute.xlu0 %342 }
  0xaf   : > { %v513_v15 = vpop.permute.xlu0 %512 }
  0xb3   : > { %v497_v0 = vpop.permute.xlu0 %496 }
  0xb7   : > { %v505_v20 = vpop.permute.xlu0 %504 }
 0x163   : > { %v433_v37 = vpop.f32.mrf.mxu1 }
 0x165   : > { %v392_v57 = vpop.f32.mrf.mxu0  ;;  %v727_v38 = vpop.f32.mrf.mxu1 }
 0x166   : > { %v393_v58 = vadd.f32 %v392_v57, %v343_v55 }
 0x167   : > { %v394_v59 = vpop.f32.mrf.mxu0  ;;  %v436_v39 = vpop.f32.mrf.mxu1 }
 0x168   : > { %v463_v60 = vsel %vm448_vm9, %v393_v58, 0.0  ;;  %v395_v61 = vadd.f32 %v394_v59, %v343_v55 }
 0x169   : > { %vm466_vm11 = vcmp.ge.f32.partialorder %v463_v60, 0.0  ;;  %v469_v62 = vmul.f32 0.1, %v463_v60  ;;  %v396_v63 = vpop.f32.mrf.mxu0  ;;  %v728_v40 = vpop.f32.mrf.mxu1 }
 0x16a   : > { %v464_v1 = vsel %vm452_vm10, %v395_v61, 0.0 }
 0x16b   : > { %v472_v2 = vsel %vm466_vm11, %v463_v60, %v469_v62  ;;  %v397_v6 = vpop.f32.mrf.mxu0  ;;  %v470_v8 = vmul.f32 0.1, %v464_v1  ;;  %vm467_vm12 = vcmp.ge.f32.partialorder %v464_v1, 0.0 }
 0x16c   : > { %v475_v7 = vpack.c.bf16 %v472_v2, %v472_v2 }
 0x16d   : > { %v473_v10 = vsel %vm467_vm12, %v464_v1, %v470_v8 }
 0x16e   : > { %508 = vrot.lane.b32.xlu1 %v475_v7, %s793_s26  ;;  %v481_v9 = vrot.slane %v475_v7, 4  ;;  %v476_v11 = vpack.c.bf16 %v473_v10, %v473_v10 }
 0x170   : > { %500 = vrot.lane.b32.xlu0 %v481_v9, %s796_s28  ;;  %v482_v13 = vrot.slane %v476_v11, 4 }
 0x172   : > { %492 = vrot.lane.b32.xlu1 %v475_v7, %s794_s27 }
 0x174   : > { %488 = vrot.lane.b32.xlu0 %v483_v50, %s797_s29 }
 0x176   : > { %510 = vrot.lane.b32.xlu1 %v476_v11, %s793_s26 }
 0x178   : > { %536 = vperm.xlu0 %762, %v533_v12  }
 0x17a   : > { %494 = vrot.lane.b32.xlu1 %v476_v11, %s794_s27 }
 0x17c   : > { %596 = vrot.lane.b32.xlu0 %v855_v3, %s793_s26 }
 0x17e   : > { %502 = vrot.lane.b32.xlu1 %v482_v13, %s796_s28 }
 0x182   : > { %486 = vrot.lane.b32.xlu1 %v482_v13, %s797_s29 }
 0x186   : > { %484 = vrot.lane.b32.xlu1 %v481_v9, %s797_s29 }
 0x18a   : > { %764 = vrot.lane.b32.xlu1 %v763_v14, %s793_s26 }
 0x1e0   : > { %v509_v16 = vpop.permute.xlu1 %508 }
 0x1e2   : > { %v501_v23 = vpop.permute.xlu0 %500 }
 0x1e4   : > { %v493_v17 = vpop.permute.xlu1 %492 }
 0x1e6   : > { %v489_v29 = vpop.permute.xlu0 %488 }
 0x1e8   : > { %v511_v18 = vpop.permute.xlu1 %510 }
 0x1e9   : > { %v514_v19 = vsel %vm310_vm4, %v509_v16, %v511_v18  ;;  %v515_v3 = vsel %vm310_vm4, %v511_v18, %v513_v15 }
 0x1ea   : > { %v543_v21 = vsel %vm313_vm3, %v514_v19, 0  ;;  %708 = vmatprep.subr.msk.bf16.mxu0 %vm313_vm3, %v515_v3 }
 0x1eb   : > { %559 = vmatpush1.bf16.msra.mxu0 %v543_v21 }
 0x1ec   : > { %v495_v22 = vpop.permute.xlu1 %494 }
 0x1ed   : > { %v498_v5 = vsel %vm292_vm5, %v493_v17, %v495_v22  ;;  %v499_v24 = vsel %vm292_vm5, %v495_v22, %v497_v0 }
 0x1f0   : > { %v503_v4 = vpop.permute.xlu1 %502 }
 0x1f1   : > { %v506_v25 = vsel %vm301_vm6, %v501_v23, %v503_v4  ;;  %v507_v26 = vsel %vm301_vm6, %v503_v4, %v505_v20 }
 0x1f2   : > { %v530_v27 = vsel %vm313_vm3, %v499_v24, %v507_v26  ;;  %v526_v28 = vsel %vm313_vm3, %v498_v5, %v506_v25 }
 0x1f3   : > { %560 = vmatprep.subr.bf16.mxu0 %v530_v27  ;;  %v537_v41 = vpop.permute.xlu0 %536 }
 0x1f4   : > { %v487_v30 = vpop.permute.xlu1 %486  ;;  %561 = vmatpush1.bf16.msra.mxu0 %v526_v28 }
 0x1f5   : > { %v491_v31 = vsel %vm283_vm7, %v487_v30, %v489_v29 }
 0x1f6   : > { %v522_v32 = vsel %vm313_vm3, %v476_v11, %v491_v31 }
 0x1f7   : > { %562 = vmatprep.subr.bf16.mxu0 %v522_v32  ;;  %v597_v45 = vpop.permute.xlu0 %596 }
 0x1f8   : > { %v485_v33 = vpop.permute.xlu1 %484 }
 0x1f9   : > { %v490_v34 = vsel %vm283_vm7, %v485_v33, %v487_v30 }
 0x1fa   : > { %v518_v35 = vsel %vm313_vm3, %v475_v7, %v490_v34 }
 0x1fb   : > { %563 = vmatpush1.bf16.msra.mxu0 %v518_v35 }
 0x1fc   : > { %v765_v42 = vpop.permute.xlu1 %764 }
 0x1fd   : > { %v767_v43 = vunpack.i.h.bf16 %v765_v42  ;;  %v766_v44 = vunpack.i.l.bf16 %v765_v42 }
 0x1fe   : > { %709 = vmatmul.mubr.msk.bf16.vlgmr.msra.gmra.mxu0 %vm345_vm8, %v532_v36 }
 0x1ff   : > { %v599_v48 = vsel %vm310_vm4, %v766_v44, %v767_v43  ;;  %v600_v50 = vsel %vm310_vm4, %v767_v43, %v597_v45 }
 0x2be   : > { %v582_v46 = vpop.f32.mrf.mxu0 }
 0x2bf   : > { %v583_v47 = vadd.f32 %v582_v46, %v537_v41 }
 0x2c0   : > { %v584_v49 = vpop.f32.mrf.mxu0 }
 0x2c1   : > { %v585_v51 = vadd.f32 %v584_v49, %v537_v41  ;;  %v603_v53 = vadd.f32 %v599_v48, %v583_v47 }
 0x2c2   : > { %v586_v52 = vpop.f32.mrf.mxu0 }
 0x2c3   : > { %v604_v54 = vadd.f32 %v600_v50, %v585_v51 }
 0x2c4   : > { %v587_v55 = vpop.f32.mrf.mxu0 }
 0x2c5   : > { %v714_v56 = vpack.c.bf16 %v604_v54, %v603_v53 }
 0x2c7   : > { %613 = vst [vmem:[%s246_s16] sm:$0xff] %v714_v56 }
 0x2c8 PF: > { %s15_s20 = sadd.s32 1, %s790_s20   ;;  %s990_s18 = smov %s786_s19 }
 0x2c9   : > { %p12_p5 = scmp.ge.s32.totalorder %s15_s20, 4   ;;  %s991_s19 = smov %s993_s21 }
 0x2cb   :  { %14 = sbr.rel (!%p12_p5) target bundleno = 2 (0x2), region = 71 }

// kernel: generator_forward.29
= control target key start
LH: loop header
LB: loop body
LE: loop exit
PB: predicated region body
PF: predicated region fallthrough
CT: control target
= control target key end

     0   :  { %s841_s18 = smov 0   ;;  %s843_s19 = smov 0   ;;  %s967_s0 = inlined_call_operand.vmem [shape: bf16[2,8,272], index: 0, kind: input, shape index: {}]   ;;  %s968_s1 = inlined_call_operand.vmem [shape: bf16[8,40], index: 1, kind: input, shape index: {}]   ;;  %s969_s2 = inlined_call_operand.vmem [shape: f32[8,1], index: 2, kind: input, shape index: {}]   ;;  %s970_s3 = inlined_call_operand.vmem [shape: bf16[8,40], index: 3, kind: input, shape index: {}]   ;;  %s971_s4 = inlined_call_operand.vmem [shape: f32[8,1], index: 4, kind: input, shape index: {}]   ;;  %s972_s5 = inlined_call_operand.vmem [shape: bf16[2,8,256], index: 5, kind: output, shape index: {}]  }
   0x1   :  { %s845_s20 = smov 0  }
   0x2 LB: > { %s27_s21 = sadd.s32 1, %s793_s19  ;;  %p704_p0 = scmp.ge.s32.totalorder %s797_s20, 1  ;;  %s797_s20 = sphi %s845_s20, %s15_s20   ;;  %s793_s19 = sphi %s843_s19, %s974_s19   ;;  %s789_s18 = sphi %s841_s18, %s973_s18  }
   0x3   : > { %p29_p1 = scmp.ge.s32.totalorder %s27_s21, 2  ;;  %p201_p2 = scmp.lt.s32.totalorder %s797_s20, 3 }
   0x5   : > { %s976_s21 = smov (%p29_p1, %s27_s21), 0  ;;  %p202_p3 = pnand %p704_p0, %p201_p2 }
   0x6   : > { %p233_p4 = scmp.lt.s32.totalorder (!%p202_p3), %s789_s18, 1  ;;  %s800_s26 = smov (!%p202_p3), 116  }
   0x7   : > { %205 = sbr.rel (%p202_p3) target bundleno = 712 (0x2c8), region = 40  ;;  %s801_s27 = smov (!%p202_p3), 122  }
   0x8   : > { %s803_s28 = smov (!%p202_p3), 119   ;;  %s804_s29 = smov (!%p202_p3), 125  }
   0x9   : > { %s806_s7 = smov (!%p202_p3), 124   ;;  %s807_s10 = smov (!%p202_p3), 126  }
   0xa   : > { %s808_s11 = smov (!%p202_p3), 127   ;;  %s810_s14 = smov (!%p202_p3), 120  }
   0xc   : > { %s978_s18 = smov (!%p233_p4, %s789_s18), 1  ;;  %v799_v0 = vmov 0.0   ;;  %v802_v17 = vmov 0   ;;  %v339_v19 = vld [vmem:[%s969_s2] sm:$0xff]  ;;  %v805_v20 = vmov 0.0|0.0   ;;  %vm313_vm3 = vcmask 1043456  }
   0xd   : > { %722 = vmatprep.subr.bf16.mxu1 %v799_v0  ;;  %s732_s22 = smul.u32 12, %s978_s18  ;;  %390 = vmatprep.mubr.bf16.mxu0 %v802_v17  ;;  %vm310_vm4 = vcmask 949248   ;;  %vm292_vm5 = vcmask 998400   ;;  %vm301_vm6 = vcmask 973824   ;;  %vm283_vm7 = vcmask 1022976   ;;  %s716_s17 = sshll.u32 %s978_s18, 3 }
   0xe   : > { %769 = vset.pattern.permute.xlu0 %v802_v17  ;;  %v338_v49 = vld [vmem:[%s968_s1] sm:$0xf]  ;;  %vm345_vm8 = vcmask 326656   ;;  %v483_v50 = vrot.slane %v805_v20, 4  ;;  %v440_v51 = vlaneseq  ;;  %vm809_vm13 = vmmov 0   ;;  %s246_s24 = scalar_lea.vmem %s972_s5, %s716_s17 }
   0xf   : > { %s237_s25 = scalar_lea.vmem %s967_s0, %s732_s22  ;;  %728 = vmatprep.mubr.msk.bf16.mxu1 %vm809_vm13, %v799_v0  ;;  %vm516_vm14 = vcmask 1014784   ;;  %vm499_vm15 = vcmask 1031168  }
  0x10   : > { %v255_v1 = vld [vmem:[%s237_s25 + $0x8] sm:$0xf]  ;;  %v254_v2 = vld [vmem:[%s237_s25] sm:$0xff]  ;;  %v441_v52 = vand.u32 127, %v440_v51 }
  0x11   : > { %v866_v3 = vunpack.c.l.bf16 %v255_v1  ;;  %v868_v4 = vunpack.c.l.bf16 %v254_v2  ;;  %v870_v5 = vunpack.c.h.bf16 %v254_v2 }
  0x12   : > { %v442_v53 = vadd.s32 128, %v441_v52  ;;  %v445_v54 = vadd.s32 4294967294, %v441_v52 }
  0x13   : > { %vm261_vm0 = vcmp.ge.f32.partialorder %v866_v3, 0.0  ;;  %v264_v6 = vmul.f32 0.1, %v866_v3  ;;  %vm259_vm1 = vcmp.ge.f32.partialorder %v868_v4, 0.0  ;;  %v262_v7 = vmul.f32 0.1, %v868_v4 }
  0x14   : > { %vm260_vm2 = vcmp.ge.f32.partialorder %v870_v5, 0.0  ;;  %v263_v8 = vmul.f32 0.1, %v870_v5  ;;  %v446_v56 = vadd.s32 4294967294, %v442_v53  ;;  %vm448_vm9 = vcmp.ge.s32.totalorder %v445_v54, 0 }
  0x15   : > { %v267_v9 = vsel %vm261_vm0, %v866_v3, %v264_v6  ;;  %v265_v10 = vsel %vm259_vm1, %v868_v4, %v262_v7  ;;  %vm490_vm0 = vcmask 1039360   ;;  %vm601_vm1 = vcmask 982016  }
  0x16   : > { %v880_v11 = vpack.c.bf16 %v267_v9, %v267_v9  ;;  %v882_v12 = vpack.c.bf16 %v265_v10, %v265_v10  ;;  %v266_v13 = vsel %vm260_vm2, %v870_v5, %v263_v8  ;;  %vm452_vm10 = vcmp.lt.s32.totalorder %v446_v56, 192 }
  0x17   : > { %v887_v14 = vpack.c.bf16 %v266_v13, %v266_v13 }
  0x18   : > { %308 = vrot.lane.b32.xlu1 %v880_v11, %s800_s26  ;;  %304 = vrot.lane.b32.xlu0 %v882_v12, %s800_s26  ;;  %v276_v16 = vrot.slane %v880_v11, 4  ;;  %v274_v18 = vrot.slane %v882_v12, 4 }
  0x19   : > { %v275_v15 = vrot.slane %v887_v14, 4 }
  0x1c   : > { %288 = vrot.lane.b32.xlu1 %v887_v14, %s801_s27  ;;  %306 = vrot.lane.b32.xlu0 %v887_v14, %s800_s26 }
  0x20   : > { %286 = vrot.lane.b32.xlu1 %v882_v12, %s801_s27  ;;  %290 = vrot.lane.b32.xlu0 %v880_v11, %s801_s27 }
  0x24   : > { %297 = vrot.lane.b32.xlu1 %v275_v15, %s803_s28  ;;  %299 = vrot.lane.b32.xlu0 %v276_v16, %s803_s28 }
  0x28   : > { %279 = vrot.lane.b32.xlu1 %v275_v15, %s804_s29  ;;  %295 = vrot.lane.b32.xlu0 %v274_v18, %s803_s28 }
  0x2c   : > { %277 = vrot.lane.b32.xlu1 %v274_v18, %s804_s29  ;;  %281 = vrot.lane.b32.xlu0 %v276_v16, %s804_s29 }
  0x30   : > { %342 = vperm.xlu0 %769, %v339_v19  }
  0x34   : > { %514 = vrot.lane.b32.xlu0 %v805_v20, %s806_s7 }
  0x38   : > { %497 = vrot.lane.b32.xlu0 %v805_v20, %s807_s10 }
  0x3c   : > { %506 = vrot.lane.b32.xlu0 %v483_v50, %s804_s29 }
  0x8a   : > { %v309_v21 = vpop.permute.xlu1 %308  ;;  %v305_v22 = vpop.permute.xlu0 %304 }
  0x8b   : > { %v356_v23 = vsel %vm313_vm3, %v309_v21, 0 }
  0x8c   : > { %723 = vmatpush3.bf16.msra.mxu1 %v356_v23 }
  0x8d   : > { %724 = vmatprep.subr.bf16.mxu1 %v799_v0 }
  0x8e   : > { %v289_v24 = vpop.permute.xlu1 %288  ;;  %v307_v25 = vpop.permute.xlu0 %306 }
  0x8f   : > { %v312_v26 = vsel %vm310_vm4, %v307_v25, %v309_v21  ;;  %v311_v27 = vsel %vm310_vm4, %v305_v22, %v307_v25 }
  0x90   : > { %708 = vmatprep.subr.msk.bf16.mxu0 %vm313_vm3, %v312_v26  ;;  %v350_v28 = vsel %vm313_vm3, %v311_v27, 0 }
  0x91   : > { %369 = vmatpush1.bf16.msra.mxu0 %v350_v28 }
  0x92   : > { %v287_v29 = vpop.permute.xlu1 %286  ;;  %v291_v30 = vpop.permute.xlu0 %290 }
  0x93   : > { %v294_v33 = vsel %vm292_vm5, %v289_v24, %v291_v30  ;;  %v293_v39 = vsel %vm292_vm5, %v287_v29, %v289_v24 }
  0x96   : > { %v298_v31 = vpop.permute.xlu1 %297  ;;  %v300_v32 = vpop.permute.xlu0 %299 }
  0x97   : > { %v303_v34 = vsel %vm301_vm6, %v298_v31, %v300_v32  ;;  %v336_v35 = vsel %vm313_vm3, %v291_v30, %v300_v32 }
  0x98   : > { %725 = vmatpush3.bf16.msra.mxu1 %v336_v35  ;;  %v332_v36 = vsel %vm313_vm3, %v294_v33, %v303_v34 }
  0x99   : > { %370 = vmatprep.subr.bf16.mxu0 %v332_v36  ;;  %726 = vmatprep.subr.bf16.mxu1 %v799_v0  ;;  %v535_v36 = vld [vmem:[%s970_s3] sm:$0xf] }
  0x9a   : > { %v280_v37 = vpop.permute.xlu1 %279  ;;  %v296_v38 = vpop.permute.xlu0 %295 }
  0x9b   : > { %v302_v40 = vsel %vm301_vm6, %v296_v38, %v298_v31 }
  0x9c   : > { %v328_v41 = vsel %vm313_vm3, %v293_v39, %v302_v40 }
  0x9d   : > { %371 = vmatpush1.bf16.msra.mxu0 %v328_v41 }
  0x9e   : > { %v278_v42 = vpop.permute.xlu1 %277  ;;  %v282_v43 = vpop.permute.xlu0 %281 }
  0x9f   : > { %v284_v44 = vsel %vm283_vm7, %v278_v42, %v280_v37  ;;  %v285_v45 = vsel %vm283_vm7, %v280_v37, %v282_v43  ;;  %v324_v46 = vsel %vm313_vm3, %v880_v11, %v282_v43 }
  0xa0   : > { %727 = vmatpush3.bf16.msra.mxu1 %v324_v46  ;;  %v320_v47 = vsel %vm313_vm3, %v887_v14, %v285_v45  ;;  %v316_v48 = vsel %vm313_vm3, %v882_v12, %v284_v44  ;;  %v536_v12 = vld [vmem:[%s971_s4] sm:$0xff]  ;;  %v770_v14 = vpack.i.bf16 %v870_v5, %v868_v4 }
  0xa1   : > { %372 = vmatprep.subr.bf16.mxu0 %v320_v47 }
  0xa2   : > { %373 = vmatpush1.bf16.msra.mxu0 %v316_v48 }
  0xa3   : > { %729 = vmatmul.mubr.msk.bf16.vlgmr.msra.gmra.mxu1 %vm345_vm8, %v338_v49 }
  0xa5   : > { %709 = vmatmul.mubr.msk.bf16.vlgmr.msra.gmra.mxu0 %vm345_vm8, %v338_v49 }
  0xa6   : > { %583 = vmatprep.mubr.bf16.mxu0 %v802_v17 }
  0xab   : > { %v343_v55 = vpop.permute.xlu0 %342 }
  0xaf   : > { %v515_v15 = vpop.permute.xlu0 %514 }
  0xb3   : > { %v498_v17 = vpop.permute.xlu0 %497 }
  0xb7   : > { %v507_v21 = vpop.permute.xlu0 %506 }
 0x163   : > { %v433_v37 = vpop.f32.mrf.mxu1 }
 0x165   : > { %v392_v57 = vpop.f32.mrf.mxu0  ;;  %v730_v38 = vpop.f32.mrf.mxu1 }
 0x166   : > { %v393_v58 = vadd.f32 %v392_v57, %v343_v55 }
 0x167   : > { %v394_v59 = vpop.f32.mrf.mxu0  ;;  %v436_v39 = vpop.f32.mrf.mxu1 }
 0x168   : > { %v463_v60 = vsel %vm448_vm9, %v393_v58, 0.0  ;;  %v395_v61 = vadd.f32 %v394_v59, %v343_v55 }
 0x169   : > { %vm466_vm11 = vcmp.ge.f32.partialorder %v463_v60, 0.0  ;;  %v469_v62 = vmul.f32 0.1, %v463_v60  ;;  %v396_v63 = vpop.f32.mrf.mxu0  ;;  %v731_v40 = vpop.f32.mrf.mxu1 }
 0x16a   : > { %v464_v1 = vsel %vm452_vm10, %v395_v61, 0.0 }
 0x16b   : > { %v472_v2 = vsel %vm466_vm11, %v463_v60, %v469_v62  ;;  %v397_v6 = vpop.f32.mrf.mxu0  ;;  %v470_v8 = vmul.f32 0.1, %v464_v1  ;;  %vm467_vm12 = vcmp.ge.f32.partialorder %v464_v1, 0.0 }
 0x16c   : > { %v475_v7 = vpack.c.bf16 %v472_v2, %v472_v2 }
 0x16d   : > { %v473_v10 = vsel %vm467_vm12, %v464_v1, %v470_v8 }
 0x16e   : > { %510 = vrot.lane.b32.xlu1 %v475_v7, %s806_s7  ;;  %v481_v9 = vrot.slane %v475_v7, 4  ;;  %v476_v11 = vpack.c.bf16 %v473_v10, %v473_v10 }
 0x170   : > { %502 = vrot.lane.b32.xlu0 %v481_v9, %s804_s29  ;;  %v482_v13 = vrot.slane %v476_v11, 4 }
 0x172   : > { %493 = vrot.lane.b32.xlu1 %v475_v7, %s807_s10 }
 0x174   : > { %488 = vrot.lane.b32.xlu0 %v483_v50, %s808_s11 }
 0x176   : > { %512 = vrot.lane.b32.xlu1 %v476_v11, %s806_s7 }
 0x178   : > { %539 = vperm.xlu0 %769, %v536_v12  }
 0x17a   : > { %495 = vrot.lane.b32.xlu1 %v476_v11, %s807_s10 }
 0x17c   : > { %599 = vrot.lane.b32.xlu0 %v866_v3, %s810_s14 }
 0x17e   : > { %504 = vrot.lane.b32.xlu1 %v482_v13, %s804_s29 }
 0x182   : > { %486 = vrot.lane.b32.xlu1 %v482_v13, %s808_s11 }
 0x186   : > { %484 = vrot.lane.b32.xlu1 %v481_v9, %s808_s11 }
 0x18a   : > { %771 = vrot.lane.b32.xlu1 %v770_v14, %s810_s14 }
 0x1e0   : > { %v511_v16 = vpop.permute.xlu1 %510 }
 0x1e2   : > { %v503_v23 = vpop.permute.xlu0 %502 }
 0x1e4   : > { %v494_v18 = vpop.permute.xlu1 %493 }
 0x1e6   : > { %v489_v29 = vpop.permute.xlu0 %488 }
 0x1e8   : > { %v513_v0 = vpop.permute.xlu1 %512 }
 0x1e9   : > { %v517_v19 = vsel %vm516_vm14, %v511_v16, %v513_v0  ;;  %v518_v20 = vsel %vm516_vm14, %v513_v0, %v515_v15 }
 0x1ea   : > { %v546_v22 = vsel %vm313_vm3, %v517_v19, 0  ;;  %711 = vmatprep.subr.msk.bf16.mxu0 %vm313_vm3, %v518_v20 }
 0x1eb   : > { %562 = vmatpush1.bf16.msra.mxu0 %v546_v22 }
 0x1ec   : > { %v496_v3 = vpop.permute.xlu1 %495 }
 0x1ed   : > { %v500_v4 = vsel %vm499_vm15, %v494_v18, %v496_v3  ;;  %v501_v5 = vsel %vm499_vm15, %v496_v3, %v498_v17 }
 0x1f0   : > { %v505_v24 = vpop.permute.xlu1 %504 }
 0x1f1   : > { %v508_v25 = vsel %vm283_vm7, %v503_v23, %v505_v24  ;;  %v509_v26 = vsel %vm283_vm7, %v505_v24, %v507_v21 }
 0x1f2   : > { %v533_v27 = vsel %vm313_vm3, %v501_v5, %v509_v26  ;;  %v529_v28 = vsel %vm313_vm3, %v500_v4, %v508_v25 }
 0x1f3   : > { %563 = vmatprep.subr.bf16.mxu0 %v533_v27  ;;  %v540_v41 = vpop.permute.xlu0 %539 }
 0x1f4   : > { %v487_v30 = vpop.permute.xlu1 %486  ;;  %564 = vmatpush1.bf16.msra.mxu0 %v529_v28 }
 0x1f5   : > { %v492_v31 = vsel %vm490_vm0, %v487_v30, %v489_v29 }
 0x1f6   : > { %v525_v32 = vsel %vm313_vm3, %v476_v11, %v492_v31 }
 0x1f7   : > { %565 = vmatprep.subr.bf16.mxu0 %v525_v32  ;;  %v600_v45 = vpop.permute.xlu0 %599 }
 0x1f8   : > { %v485_v33 = vpop.permute.xlu1 %484 }
 0x1f9   : > { %v491_v34 = vsel %vm490_vm0, %v485_v33, %v487_v30 }
 0x1fa   : > { %v521_v35 = vsel %vm313_vm3, %v475_v7, %v491_v34 }
 0x1fb   : > { %566 = vmatpush1.bf16.msra.mxu0 %v521_v35 }
 0x1fc   : > { %v772_v42 = vpop.permute.xlu1 %771 }
 0x1fd   : > { %v774_v43 = vunpack.i.h.bf16 %v772_v42  ;;  %v773_v44 = vunpack.i.l.bf16 %v772_v42 }
 0x1fe   : > { %712 = vmatmul.mubr.msk.bf16.vlgmr.msra.gmra.mxu0 %vm345_vm8, %v535_v36 }
 0x1ff   : > { %v602_v48 = vsel %vm601_vm1, %v773_v44, %v774_v43  ;;  %v603_v50 = vsel %vm601_vm1, %v774_v43, %v600_v45 }
 0x2be   : > { %v585_v46 = vpop.f32.mrf.mxu0 }
 0x2bf   : > { %v586_v47 = vadd.f32 %v585_v46, %v540_v41 }
 0x2c0   : > { %v587_v49 = vpop.f32.mrf.mxu0 }
 0x2c1   : > { %v588_v51 = vadd.f32 %v587_v49, %v540_v41  ;;  %v606_v53 = vadd.f32 %v602_v48, %v586_v47 }
 0x2c2   : > { %v589_v52 = vpop.f32.mrf.mxu0 }
 0x2c3   : > { %v607_v54 = vadd.f32 %v603_v50, %v588_v51 }
 0x2c4   : > { %v590_v55 = vpop.f32.mrf.mxu0 }
 0x2c5   : > { %v717_v56 = vpack.c.bf16 %v607_v54, %v606_v53 }
 0x2c7   : > { %616 = vst [vmem:[%s246_s24] sm:$0xff] %v717_v56 }
 0x2c8 PF: > { %s15_s20 = sadd.s32 1, %s797_s20   ;;  %s973_s18 = smov %s793_s19 }
 0x2c9   : > { %p12_p5 = scmp.ge.s32.totalorder %s15_s20, 4   ;;  %s974_s19 = smov %s976_s21 }
 0x2cb   :  { %14 = sbr.rel (!%p12_p5) target bundleno = 2 (0x2), region = 71 }

// kernel: generator_forward.31
= control target key start
LH: loop header
LB: loop body
LE: loop exit
PB: predicated region body
PF: predicated region fallthrough
CT: control target
= control target key end

     0   :  { %s788_s0 = inlined_call_operand.vmem [shape: bf16[2,8,262], index: 0, kind: input, shape index: {}]   ;;  %s789_s1 = inlined_call_operand.vmem [shape: bf16[1,56], index: 1, kind: input, shape index: {}]   ;;  %s790_s2 = inlined_call_operand.<no memory space> [shape: f32[1,1], index: 2, kind: input, shape index: {}]   ;;  %s791_s3 = inlined_call_operand.hbm [shape: f32[2,1,256], index: 3, kind: output, shape index: {}]  }
   0x1   :  { %v8_v0 = vstv %s790_s2 }
   0x2   :  { %9 = vst [vmem:[#allocation2] sm:$0x1] %v8_v0 }
   0x3   :  { %10 = vsyncpa [#allocation4], 0 }
   0x4   :  { %12 = vsyncpa [#allocation4 + $0x1], 0  ;;  %s664_s14 = smov 0   ;;  %s666_s15 = smov 0  }
   0x5   :  { %s668_s16 = smov 0   ;;  %s670_s17 = smov 0  }
   0x6   :  { %s672_s18 = smov 0   ;;  %s674_s19 = smov 0  }
   0x7 LB: > { %s470_s2 = sadd.s32 4294967295, %s630_s19   ;;  %s471_s20 = sadd.s32 4294967294, %s630_s19   ;;  %s630_s19 = sphi %s674_s19, %s18_s19   ;;  %s626_s18 = sphi %s672_s18, %s798_s18   ;;  %s622_s17 = sphi %s670_s17, %s797_s17   ;;  %s618_s16 = sphi %s668_s16, %s796_s16   ;;  %s614_s15 = sphi %s666_s15, %s795_s15   ;;  %s610_s14 = sphi %s664_s14, %s794_s14  }
   0x8   : > { %s30_s21 = sadd.s32 1, %s626_s18  ;;  %s107_s22 = sadd.s32 1, %s618_s16 }
   0x9   : > { %p32_p0 = scmp.ge.s32.totalorder %s30_s21, 2  ;;  %p117_p1 = scmp.ne.s32.totalorder %s618_s16, %s614_s15 }
   0xa   : > { %p118_p2 = scmp.eq.s32.totalorder %s470_s2, 1  ;;  %p123_p3 = scmp.ne.s32.totalorder %s614_s15, %s610_s14 }
   0xb   : > { %s800_s21 = smov (%p32_p0, %s30_s21), 0  ;;  %p124_p5 = scmp.eq.s32.totalorder %s471_s20, 1 }
   0xc   : > { %p704_p4 = por %p118_p2, %p117_p1  ;;  %s102_s24 = ssub.s32 %s626_s18, %s800_s21 }
   0xd   : > { %p474_p6 = scmp.ge.s32.totalorder %s630_s19, 1  ;;  %p105_p7 = scmp.eq.s32.totalorder %s102_s24, 0 }
   0xe   : > { %p711_p8 = por %p124_p5, %p123_p3  ;;  %p156_p9 = scmp.lt.s32.totalorder %s630_s19, 3 }
   0xf   : > { %s717_s26 = scalar_select %p105_p7, %s618_s16, %s107_s22  }
  0x10   : > { %p157_p10 = pnand %p474_p6, %p156_p9 }
  0x11   : > { %p180_p11 = scmp.lt.s32.totalorder (!%p157_p10), %s622_s17, 1  ;;  %s632_s5 = smov (!%p157_p10), 122  }
  0x12   : > { %160 = sbr.rel (%p157_p10) target bundleno = 419 (0x1a3), region = 32  ;;  %s633_s6 = smov (!%p157_p10), 124  }
  0x13   : > { %s634_s7 = smov (!%p157_p10), 126   ;;  %s635_s8 = smov (!%p157_p10), 123  }
  0x14   : > { %s636_s9 = smov (!%p157_p10), 125   ;;  %s638_s10 = smov (!%p157_p10), 127  }
  0x15   : > { %s177_s13 = sand.u32 (!%p157_p10), 1, %s614_s15   ;;  %s484_s20 = sshll.u32 (!%p157_p10), %s622_s17, 5 }
  0x16   : > { %s475_s2 = sshll.u32 (!%p157_p10), %s177_s13, 1  ;;  %s396_s29 = scalar_lea.hbm (!%p157_p10), %s791_s3, %s484_s20 }
  0x17   : > { %s181_s27 = scalar_select %p180_p11, %s622_s17, 1  ;;  %v637_v18 = vmov 0   ;;  %v295_v19 = vld [vmem:[#allocation2] sm:$0x1]  ;;  %vm266_vm3 = vcmask 998400   ;;  %vm269_vm4 = vcmask 1043456   ;;  %v301_v58 = vlaneseq }
  0x18   : > { %347 = vmatprep.mubr.bf16.mxu0 %v637_v18  ;;  %549 = vset.pattern.permute.xlu0 %v637_v18  ;;  %vm248_vm5 = vcmask 1014784   ;;  %vm257_vm6 = vcmask 1006592   ;;  %vm230_vm7 = vcmask 1031168   ;;  %vm239_vm8 = vcmask 1022976   ;;  %v294_v57 = vld [vmem:[%s789_s1] sm:$0x1] }
  0x19   : > { %s485_s28 = smul.u32 12, %s181_s27  ;;  %vm221_vm9 = vcmask 1039360   ;;  %vm305_vm10 = vcmask 457728   ;;  %v302_v59 = vshrl.u32 %v301_v58, 7  ;;  %s179_s22 = scalar_lea.vmem [#allocation3], %s475_s2  ;;  %vm378_vm11 = vcmp.lt.s32.totalorder %v301_v58, 256 }
  0x1a   : > { %s398_s24 = sshll.u32 %s179_s22, 4  ;;  %s382_s30 = scalar_lea.sflag [#allocation4], %s177_s13  ;;  %s399_s24 = int_to_ptr.vmem [resolvable:$true] %s398_s24 }
  0x1b   : > { %s184_s4 = scalar_lea.vmem %s788_s0, %s485_s28  ;;  %v303_v60 = vsub.s32 0, %v302_v59 }
  0x1c   : > { %v193_v1 = vld [vmem:[%s184_s4 + $0x8] sm:$0xf]  ;;  %v192_v2 = vld [vmem:[%s184_s4] sm:$0xff]  ;;  %s554_s4 = scalar_lea.vmem %s399_s24, 32 }
  0x1d   : > { %v196_v3 = vunpack.c.l.bf16 %v193_v1  ;;  %v194_v4 = vunpack.c.l.bf16 %v192_v2  ;;  %v195_v5 = vunpack.c.h.bf16 %v192_v2  ;;  %p555_p12 = scmp.ne.s32.totalorder %s399_s24, %s554_s4 }
  0x1f   : > { %vm199_vm0 = vcmp.ge.f32.partialorder %v196_v3, 0.0  ;;  %v202_v6 = vmul.f32 0.01, %v196_v3  ;;  %vm197_vm1 = vcmp.ge.f32.partialorder %v194_v4, 0.0  ;;  %v200_v7 = vmul.f32 0.01, %v194_v4  ;;  %p556_p13 = pnand %p555_p12, %p704_p4 }
  0x20   : > { %vm198_vm2 = vcmp.ge.f32.partialorder %v195_v5, 0.0  ;;  %v201_v8 = vmul.f32 0.01, %v195_v5 }
  0x21   : > { %v205_v9 = vsel %vm199_vm0, %v196_v3, %v202_v6  ;;  %v203_v10 = vsel %vm197_vm1, %v194_v4, %v200_v7  ;;  %p557_p0 = pneg %p556_p13 }
  0x22   : > { %v208_v11 = vpack.c.bf16 %v205_v9, %v205_v9  ;;  %v724_v12 = vpack.c.bf16 %v203_v10, %v203_v10  ;;  %v204_v13 = vsel %vm198_vm2, %v195_v5, %v201_v8  ;;  %v639_v5 = vmov 1966171168  }
  0x23   : > { %v727_v14 = vpack.c.bf16 %v204_v13, %v204_v13  ;;  %v362_v6 = vunpack.c.l.s4 %v639_v5 }
  0x24   : > { %264 = vrot.lane.b32.xlu1 %v208_v11, %s632_s5  ;;  %260 = vrot.lane.b32.xlu0 %v724_v12, %s632_s5  ;;  %v214_v15 = vrot.slane %v208_v11, 4  ;;  %v212_v17 = vrot.slane %v724_v12, 4 }
  0x25   : > { %v213_v16 = vrot.slane %v727_v14, 4  ;;  %v363_v7 = vunpack.c.0.s8 %v362_v6 }
  0x27   : > { %v366_v9 = vsub.s32 %v363_v7, %v302_v59 }
  0x28   : > { %244 = vrot.lane.b32.xlu1 %v727_v14, %s633_s6  ;;  %262 = vrot.lane.b32.xlu0 %v727_v14, %s632_s5  ;;  %s640_s5 = smov [#allocation3]  }
  0x2c   : > { %242 = vrot.lane.b32.xlu1 %v724_v12, %s633_s6  ;;  %246 = vrot.lane.b32.xlu0 %v208_v11, %s633_s6  ;;  %s558_s6 = sshll.u32 %s640_s5, 4  ;;  %s559_s6 = int_to_ptr.vmem [resolvable:$false] %s558_s6 }
  0x2d   : > { %s560_s17 = scalar_lea.vmem %s559_s6, 64  ;;  %p561_p1 = scmp.lt.s32.totalorder %s399_s24, %s559_s6 }
  0x2e   : > { %p562_p2 = scmp.lt.s32.totalorder %s560_s17, %s554_s4 }
  0x30   : > { %226 = vrot.lane.b32.xlu1 %v727_v14, %s634_s7  ;;  %255 = vrot.lane.b32.xlu0 %v214_v15, %s635_s8  ;;  %p563_p3 = por %p562_p2, %p561_p1 }
  0x32   : > { %p564_p5 = pnand %p563_p3, %p557_p0 }
  0x34   : > { %253 = vrot.lane.b32.xlu1 %v213_v16, %s635_s8  ;;  %251 = vrot.lane.b32.xlu0 %v212_v17, %s635_s8 }
  0x38   : > { %235 = vrot.lane.b32.xlu1 %v213_v16, %s636_s9  ;;  %228 = vrot.lane.b32.xlu0 %v208_v11, %s634_s7 }
  0x3c   : > { %224 = vrot.lane.b32.xlu1 %v724_v12, %s634_s7  ;;  %237 = vrot.lane.b32.xlu0 %v214_v15, %s636_s9 }
  0x40   : > { %217 = vrot.lane.b32.xlu1 %v213_v16, %s638_s10  ;;  %233 = vrot.lane.b32.xlu0 %v212_v17, %s636_s9 }
  0x44   : > { %215 = vrot.lane.b32.xlu1 %v212_v17, %s638_s10  ;;  %219 = vrot.lane.b32.xlu0 %v214_v15, %s638_s10 }
  0x48   : > { %298 = vperm.xlu0 %549, %v295_v19  }
  0x96   : > { %v265_v20 = vpop.permute.xlu1 %264  ;;  %v261_v21 = vpop.permute.xlu0 %260 }
  0x9a   : > { %v245_v22 = vpop.permute.xlu1 %244  ;;  %v263_v23 = vpop.permute.xlu0 %262 }
  0x9b   : > { %v268_v24 = vsel %vm266_vm3, %v263_v23, %v265_v20  ;;  %v267_v25 = vsel %vm266_vm3, %v261_v21, %v263_v23 }
  0x9c   : > { %477 = vmatprep.subr.msk.bf16.mxu0 %vm269_vm4, %v268_v24  ;;  %v310_v26 = vsel %vm269_vm4, %v267_v25, 0 }
  0x9d   : > { %324 = vmatpush1.bf16.msra.mxu0 %v310_v26 }
  0x9e   : > { %v243_v27 = vpop.permute.xlu1 %242  ;;  %v247_v28 = vpop.permute.xlu0 %246 }
  0x9f   : > { %v249_v33 = vsel %vm248_vm5, %v243_v27, %v245_v22  ;;  %v250_v34 = vsel %vm248_vm5, %v245_v22, %v247_v28 }
  0xa2   : > { %v227_v29 = vpop.permute.xlu1 %226  ;;  %v256_v30 = vpop.permute.xlu0 %255 }
  0xa6   : > { %v254_v31 = vpop.permute.xlu1 %253  ;;  %v252_v32 = vpop.permute.xlu0 %251 }
  0xa7   : > { %v259_v35 = vsel %vm257_vm6, %v254_v31, %v256_v30  ;;  %v258_v36 = vsel %vm257_vm6, %v252_v32, %v254_v31 }
  0xa8   : > { %v292_v37 = vsel %vm269_vm4, %v250_v34, %v259_v35  ;;  %v288_v38 = vsel %vm269_vm4, %v249_v33, %v258_v36 }
  0xa9   : > { %325 = vmatprep.subr.bf16.mxu0 %v292_v37 }
  0xaa   : > { %v236_v39 = vpop.permute.xlu1 %235  ;;  %326 = vmatpush1.bf16.msra.mxu0 %v288_v38  ;;  %v229_v40 = vpop.permute.xlu0 %228 }
  0xab   : > { %v232_v43 = vsel %vm230_vm7, %v227_v29, %v229_v40 }
  0xae   : > { %v225_v41 = vpop.permute.xlu1 %224  ;;  %v238_v42 = vpop.permute.xlu0 %237 }
  0xaf   : > { %v241_v44 = vsel %vm239_vm8, %v236_v39, %v238_v42  ;;  %v231_v48 = vsel %vm230_vm7, %v225_v41, %v227_v29 }
  0xb0   : > { %v284_v45 = vsel %vm269_vm4, %v232_v43, %v241_v44 }
  0xb1   : > { %327 = vmatprep.subr.bf16.mxu0 %v284_v45 }
  0xb2   : > { %v218_v46 = vpop.permute.xlu1 %217  ;;  %v234_v47 = vpop.permute.xlu0 %233 }
  0xb3   : > { %v240_v49 = vsel %vm239_vm8, %v234_v47, %v236_v39 }
  0xb4   : > { %v280_v50 = vsel %vm269_vm4, %v231_v48, %v240_v49 }
  0xb5   : > { %328 = vmatpush1.bf16.msra.mxu0 %v280_v50 }
  0xb6   : > { %v216_v51 = vpop.permute.xlu1 %215  ;;  %v220_v52 = vpop.permute.xlu0 %219 }
  0xb7   : > { %v222_v53 = vsel %vm221_vm9, %v216_v51, %v218_v46  ;;  %v223_v54 = vsel %vm221_vm9, %v218_v46, %v220_v52 }
  0xb8   : > { %v276_v55 = vsel %vm269_vm4, %v727_v14, %v223_v54  ;;  %v272_v56 = vsel %vm269_vm4, %v724_v12, %v222_v53 }
  0xb9   : > { %329 = vmatprep.subr.bf16.mxu0 %v276_v55 }
  0xba   : > { %330 = vmatpush1.bf16.msra.mxu0 %v272_v56 }
  0xbd   : > { %478 = vmatmul.mubr.msk.bf16.vlgmr.msra.gmra.mxu0 %vm305_vm10, %v294_v57 }
  0xc3   : > { %v299_v61 = vpop.permute.xlu0 %298 }
  0xc4   : > { %v304_v62 = vrot.slane %v299_v61, %v303_v60 }
 0x17d   : > { %v349_v63 = vpop.f32.mrf.mxu0 }
 0x17e   : > { %v350_v0 = vadd.f32 %v349_v63, %v304_v62 }
 0x17f   : > { %v351_v1 = vpop.f32.mrf.mxu0 }
 0x180   : > { %v352_v2 = vadd.f32 %v351_v1, %v304_v62  ;;  %550 = vtanh.f32 %v350_v0 }
 0x181   : > { %v353_v3 = vpop.f32.mrf.mxu0 }
 0x182   : > { %552 = vtanh.f32 %v352_v2 }
 0x183   : > { %v354_v4 = vpop.f32.mrf.mxu0 }
 0x18d   : > { %v551_v8 = vpop.eup %550 }
 0x18f   : > { %v553_v10 = vpop.eup %552 }
 0x190   : > { %v360_v11 = vcombine.low %v551_v8, %v553_v10 }
 0x192   : > { %v367_v12 = vrot.slane %v360_v11, %v366_v9 }
 0x194   : > { %v374_v13 = vrot.slane %v367_v12, %v366_v9 }
 0x196   : > { %380 = vst.msk [vmem:[%s179_s22] sm:$0x3] %vm378_vm11, %v374_v13 }
 0x197   : > { %567 = shalt.err (!%p564_p5)
}
 0x198   : > { %s568_s7 = scalar_lea.hbm %s396_s29, 32  ;;  %s572_s10 = scalar_lea.hbm %s791_s3, 64 }
 0x199   : > { %p569_p6 = scmp.ne.s32.totalorder %s396_s29, %s568_s7  ;;  %p573_p10 = scmp.lt.s32.totalorder %s396_s29, %s791_s3 }
 0x19a   : > { %p574_p11 = scmp.lt.s32.totalorder %s572_s10, %s568_s7 }
 0x19b   : > { %p570_p7 = pnand %p569_p6, %p704_p4 }
 0x19c   : > { %p575_p12 = por %p574_p11, %p573_p10 }
 0x19d   : > { %p571_p9 = pneg %p570_p7 }
 0x19f   : > { %p576_p13 = pnand %p575_p12, %p571_p9 }
 0x1a1   : > { %579 = shalt.err (!%p576_p13)
}
 0x1a2   : > { %486 = dma.vmem_to_hbm [thread:$0]  (%p704_p4), %s399_s24, 32, %s396_s29, %s382_s30  }
 0x1a3 PF: > { %p492_p0 = scmp.ge.s32.totalorder %s630_s19, 2  ;;  %s410_s13 = sand.u32 1, %s610_s14  }
 0x1a4   : > { %s411_s2 = scalar_lea.sflag [#allocation4], %s410_s13 }
 0x1a5   : > { %p489_p1 = pnand %p492_p0, %p711_p8 }
 0x1a7   : > { %p490_p2 = pneg %p489_p1 }
 0x1a9   : > { %605 = dma.done.wait (%p490_p2), %s411_s2, 32  }
 0x1aa   : > { %607 = vsyncadd (%p490_p2), %s411_s2, 4294967264  ;;  %s18_s19 = sadd.s32 1, %s630_s19   ;;  %s794_s14 = smov %s614_s15 }
 0x1ab   : > { %p15_p3 = scmp.ge.s32.totalorder %s18_s19, 4   ;;  %s795_s15 = smov %s618_s16 }
 0x1ac   : > { %s796_s16 = smov %s717_s26  ;;  %s797_s17 = smov %s626_s18 }
 0x1ad   : > { %s798_s18 = smov %s800_s21  ;;  %17 = sbr.rel (!%p15_p3) target bundleno = 7 (0x7), region = 68 }
 0x1b2   :  { %416 = vsyncpa [#allocation4], 1 }
 0x1b3   :  { %418 = vsyncpa [#allocation4 + $0x1], 1 }

// kernel: generator_forward.30
= control target key start
LH: loop header
LB: loop body
LE: loop exit
PB: predicated region body
PF: predicated region fallthrough
CT: control target
= control target key end

     0   :  { %s844_s18 = smov 0   ;;  %s846_s19 = smov 0   ;;  %s963_s0 = inlined_call_operand.vmem [shape: bf16[2,8,280], index: 0, kind: input, shape index: {}]   ;;  %s964_s1 = inlined_call_operand.vmem [shape: bf16[8,40], index: 1, kind: input, shape index: {}]   ;;  %s965_s2 = inlined_call_operand.vmem [shape: f32[8,1], index: 2, kind: input, shape index: {}]   ;;  %s966_s3 = inlined_call_operand.vmem [shape: bf16[8,40], index: 3, kind: input, shape index: {}]   ;;  %s967_s4 = inlined_call_operand.vmem [shape: f32[8,1], index: 4, kind: input, shape index: {}]   ;;  %s968_s5 = inlined_call_operand.vmem [shape: bf16[2,8,256], index: 5, kind: output, shape index: {}]  }
   0x1   :  { %s848_s20 = smov 0  }
   0x2 LB: > { %s27_s21 = sadd.s32 1, %s795_s19  ;;  %p705_p0 = scmp.ge.s32.totalorder %s799_s20, 1  ;;  %s799_s20 = sphi %s848_s20, %s15_s20   ;;  %s795_s19 = sphi %s846_s19, %s970_s19   ;;  %s791_s18 = sphi %s844_s18, %s969_s18  }
   0x3   : > { %p29_p1 = scmp.ge.s32.totalorder %s27_s21, 2  ;;  %p201_p2 = scmp.lt.s32.totalorder %s799_s20, 3 }
   0x5   : > { %s972_s21 = smov (%p29_p1, %s27_s21), 0  ;;  %p202_p3 = pnand %p705_p0, %p201_p2 }
   0x6   : > { %p233_p4 = scmp.lt.s32.totalorder (!%p202_p3), %s791_s18, 1  ;;  %s802_s26 = smov (!%p202_p3), 108  }
   0x7   : > { %205 = sbr.rel (%p202_p3) target bundleno = 712 (0x2c8), region = 40  ;;  %s803_s27 = smov (!%p202_p3), 118  }
   0x8   : > { %s805_s28 = smov (!%p202_p3), 113   ;;  %s806_s29 = smov (!%p202_p3), 123  }
   0x9   : > { %s808_s7 = smov (!%p202_p3), 124   ;;  %s809_s10 = smov (!%p202_p3), 126  }
   0xa   : > { %s810_s11 = smov (!%p202_p3), 125   ;;  %s811_s12 = smov (!%p202_p3), 127  }
   0xb   : > { %s813_s15 = smov (!%p202_p3), 116  }
   0xc   : > { %s974_s18 = smov (!%p233_p4, %s791_s18), 1  ;;  %v801_v0 = vmov 0.0   ;;  %v804_v17 = vmov 0   ;;  %v339_v19 = vld [vmem:[%s965_s2] sm:$0xff]  ;;  %v807_v20 = vmov 0.0|0.0   ;;  %vm313_vm3 = vcmask 1043456  }
   0xd   : > { %723 = vmatprep.subr.bf16.mxu1 %v801_v0  ;;  %s733_s22 = smul.u32 12, %s974_s18  ;;  %390 = vmatprep.mubr.bf16.mxu0 %v804_v17  ;;  %vm310_vm4 = vcmask 883712   ;;  %vm292_vm5 = vcmask 965632   ;;  %vm301_vm6 = vcmask 924672   ;;  %vm283_vm7 = vcmask 1006592  }
   0xe   : > { %771 = vset.pattern.permute.xlu0 %v804_v17  ;;  %v338_v49 = vld [vmem:[%s964_s1] sm:$0xf]  ;;  %vm345_vm8 = vcmask 326656   ;;  %v483_v50 = vrot.slane %v807_v20, 4  ;;  %v440_v51 = vlaneseq  ;;  %vm812_vm13 = vmmov 0  }
   0xf   : > { %s237_s25 = scalar_lea.vmem %s963_s0, %s733_s22  ;;  %729 = vmatprep.mubr.msk.bf16.mxu1 %vm812_vm13, %v801_v0  ;;  %vm517_vm14 = vcmask 1014784   ;;  %vm499_vm15 = vcmask 1031168   ;;  %s717_s22 = sshll.u32 %s974_s18, 3 }
  0x10   : > { %v255_v1 = vld [vmem:[%s237_s25 + $0x8] sm:$0xf]  ;;  %v254_v2 = vld [vmem:[%s237_s25] sm:$0xff]  ;;  %v441_v52 = vand.u32 127, %v440_v51  ;;  %s246_s25 = scalar_lea.vmem %s968_s5, %s717_s22 }
  0x11   : > { %v869_v3 = vunpack.c.l.bf16 %v255_v1  ;;  %v871_v4 = vunpack.c.l.bf16 %v254_v2  ;;  %v873_v5 = vunpack.c.h.bf16 %v254_v2 }
  0x12   : > { %v442_v53 = vadd.s32 128, %v441_v52  ;;  %v445_v54 = vadd.s32 4294967294, %v441_v52 }
  0x13   : > { %vm261_vm0 = vcmp.ge.f32.partialorder %v869_v3, 0.0  ;;  %v264_v6 = vmul.f32 0.1, %v869_v3  ;;  %vm259_vm1 = vcmp.ge.f32.partialorder %v871_v4, 0.0  ;;  %v262_v7 = vmul.f32 0.1, %v871_v4 }
  0x14   : > { %vm260_vm2 = vcmp.ge.f32.partialorder %v873_v5, 0.0  ;;  %v263_v8 = vmul.f32 0.1, %v873_v5  ;;  %v446_v56 = vadd.s32 4294967294, %v442_v53  ;;  %vm448_vm9 = vcmp.ge.s32.totalorder %v445_v54, 0 }
  0x15   : > { %v267_v9 = vsel %vm261_vm0, %v869_v3, %v264_v6  ;;  %v265_v10 = vsel %vm259_vm1, %v871_v4, %v262_v7  ;;  %vm508_vm0 = vcmask 1022976   ;;  %vm490_vm1 = vcmask 1039360  }
  0x16   : > { %v883_v11 = vpack.c.bf16 %v267_v9, %v267_v9  ;;  %v885_v12 = vpack.c.bf16 %v265_v10, %v265_v10  ;;  %v266_v13 = vsel %vm260_vm2, %v873_v5, %v263_v8  ;;  %vm452_vm10 = vcmp.lt.s32.totalorder %v446_v56, 192 }
  0x17   : > { %v890_v14 = vpack.c.bf16 %v266_v13, %v266_v13  ;;  %vm602_vm2 = vcmask 949248  }
  0x18   : > { %308 = vrot.lane.b32.xlu1 %v883_v11, %s802_s26  ;;  %304 = vrot.lane.b32.xlu0 %v885_v12, %s802_s26  ;;  %v276_v16 = vrot.slane %v883_v11, 4  ;;  %v274_v18 = vrot.slane %v885_v12, 4 }
  0x19   : > { %v275_v15 = vrot.slane %v890_v14, 4 }
  0x1c   : > { %288 = vrot.lane.b32.xlu1 %v890_v14, %s803_s27  ;;  %306 = vrot.lane.b32.xlu0 %v890_v14, %s802_s26 }
  0x20   : > { %286 = vrot.lane.b32.xlu1 %v885_v12, %s803_s27  ;;  %290 = vrot.lane.b32.xlu0 %v883_v11, %s803_s27 }
  0x24   : > { %297 = vrot.lane.b32.xlu1 %v275_v15, %s805_s28  ;;  %299 = vrot.lane.b32.xlu0 %v276_v16, %s805_s28 }
  0x28   : > { %279 = vrot.lane.b32.xlu1 %v275_v15, %s806_s29  ;;  %295 = vrot.lane.b32.xlu0 %v274_v18, %s805_s28 }
  0x2c   : > { %277 = vrot.lane.b32.xlu1 %v274_v18, %s806_s29  ;;  %281 = vrot.lane.b32.xlu0 %v276_v16, %s806_s29 }
  0x30   : > { %342 = vperm.xlu0 %771, %v339_v19  }
  0x34   : > { %515 = vrot.lane.b32.xlu0 %v807_v20, %s808_s7 }
  0x38   : > { %497 = vrot.lane.b32.xlu0 %v807_v20, %s809_s10 }
  0x3c   : > { %506 = vrot.lane.b32.xlu0 %v483_v50, %s810_s11 }
  0x8a   : > { %v309_v21 = vpop.permute.xlu1 %308  ;;  %v305_v22 = vpop.permute.xlu0 %304 }
  0x8b   : > { %v356_v23 = vsel %vm313_vm3, %v309_v21, 0 }
  0x8c   : > { %724 = vmatpush3.bf16.msra.mxu1 %v356_v23 }
  0x8d   : > { %725 = vmatprep.subr.bf16.mxu1 %v801_v0 }
  0x8e   : > { %v289_v24 = vpop.permute.xlu1 %288  ;;  %v307_v25 = vpop.permute.xlu0 %306 }
  0x8f   : > { %v312_v26 = vsel %vm310_vm4, %v307_v25, %v309_v21  ;;  %v311_v27 = vsel %vm310_vm4, %v305_v22, %v307_v25 }
  0x90   : > { %709 = vmatprep.subr.msk.bf16.mxu0 %vm313_vm3, %v312_v26  ;;  %v350_v28 = vsel %vm313_vm3, %v311_v27, 0 }
  0x91   : > { %369 = vmatpush1.bf16.msra.mxu0 %v350_v28 }
  0x92   : > { %v287_v29 = vpop.permute.xlu1 %286  ;;  %v291_v30 = vpop.permute.xlu0 %290 }
  0x93   : > { %v294_v33 = vsel %vm292_vm5, %v289_v24, %v291_v30  ;;  %v293_v39 = vsel %vm292_vm5, %v287_v29, %v289_v24 }
  0x96   : > { %v298_v31 = vpop.permute.xlu1 %297  ;;  %v300_v32 = vpop.permute.xlu0 %299 }
  0x97   : > { %v303_v34 = vsel %vm301_vm6, %v298_v31, %v300_v32  ;;  %v336_v35 = vsel %vm313_vm3, %v291_v30, %v300_v32 }
  0x98   : > { %726 = vmatpush3.bf16.msra.mxu1 %v336_v35  ;;  %v332_v36 = vsel %vm313_vm3, %v294_v33, %v303_v34 }
  0x99   : > { %370 = vmatprep.subr.bf16.mxu0 %v332_v36  ;;  %727 = vmatprep.subr.bf16.mxu1 %v801_v0  ;;  %v536_v36 = vld [vmem:[%s966_s3] sm:$0xf] }
  0x9a   : > { %v280_v37 = vpop.permute.xlu1 %279  ;;  %v296_v38 = vpop.permute.xlu0 %295 }
  0x9b   : > { %v302_v40 = vsel %vm301_vm6, %v296_v38, %v298_v31 }
  0x9c   : > { %v328_v41 = vsel %vm313_vm3, %v293_v39, %v302_v40 }
  0x9d   : > { %371 = vmatpush1.bf16.msra.mxu0 %v328_v41 }
  0x9e   : > { %v278_v42 = vpop.permute.xlu1 %277  ;;  %v282_v43 = vpop.permute.xlu0 %281 }
  0x9f   : > { %v284_v44 = vsel %vm283_vm7, %v278_v42, %v280_v37  ;;  %v285_v45 = vsel %vm283_vm7, %v280_v37, %v282_v43  ;;  %v324_v46 = vsel %vm313_vm3, %v883_v11, %v282_v43 }
  0xa0   : > { %728 = vmatpush3.bf16.msra.mxu1 %v324_v46  ;;  %v320_v47 = vsel %vm313_vm3, %v890_v14, %v285_v45  ;;  %v316_v48 = vsel %vm313_vm3, %v885_v12, %v284_v44  ;;  %v537_v12 = vld [vmem:[%s967_s4] sm:$0xff]  ;;  %v772_v14 = vpack.i.bf16 %v873_v5, %v871_v4 }
  0xa1   : > { %372 = vmatprep.subr.bf16.mxu0 %v320_v47 }
  0xa2   : > { %373 = vmatpush1.bf16.msra.mxu0 %v316_v48 }
  0xa3   : > { %730 = vmatmul.mubr.msk.bf16.vlgmr.msra.gmra.mxu1 %vm345_vm8, %v338_v49 }
  0xa5   : > { %710 = vmatmul.mubr.msk.bf16.vlgmr.msra.gmra.mxu0 %vm345_vm8, %v338_v49 }
  0xa6   : > { %584 = vmatprep.mubr.bf16.mxu0 %v804_v17 }
  0xab   : > { %v343_v55 = vpop.permute.xlu0 %342 }
  0xaf   : > { %v516_v15 = vpop.permute.xlu0 %515 }
  0xb3   : > { %v498_v17 = vpop.permute.xlu0 %497 }
  0xb7   : > { %v507_v21 = vpop.permute.xlu0 %506 }
 0x163   : > { %v433_v37 = vpop.f32.mrf.mxu1 }
 0x165   : > { %v392_v57 = vpop.f32.mrf.mxu0  ;;  %v731_v38 = vpop.f32.mrf.mxu1 }
 0x166   : > { %v393_v58 = vadd.f32 %v392_v57, %v343_v55 }
 0x167   : > { %v394_v59 = vpop.f32.mrf.mxu0  ;;  %v436_v39 = vpop.f32.mrf.mxu1 }
 0x168   : > { %v463_v60 = vsel %vm448_vm9, %v393_v58, 0.0  ;;  %v395_v61 = vadd.f32 %v394_v59, %v343_v55 }
 0x169   : > { %vm466_vm11 = vcmp.ge.f32.partialorder %v463_v60, 0.0  ;;  %v469_v62 = vmul.f32 0.1, %v463_v60  ;;  %v396_v63 = vpop.f32.mrf.mxu0  ;;  %v732_v40 = vpop.f32.mrf.mxu1 }
 0x16a   : > { %v464_v1 = vsel %vm452_vm10, %v395_v61, 0.0 }
 0x16b   : > { %v472_v2 = vsel %vm466_vm11, %v463_v60, %v469_v62  ;;  %v397_v6 = vpop.f32.mrf.mxu0  ;;  %v470_v8 = vmul.f32 0.1, %v464_v1  ;;  %vm467_vm12 = vcmp.ge.f32.partialorder %v464_v1, 0.0 }
 0x16c   : > { %v475_v7 = vpack.c.bf16 %v472_v2, %v472_v2 }
 0x16d   : > { %v473_v10 = vsel %vm467_vm12, %v464_v1, %v470_v8 }
 0x16e   : > { %511 = vrot.lane.b32.xlu1 %v475_v7, %s808_s7  ;;  %v481_v9 = vrot.slane %v475_v7, 4  ;;  %v476_v11 = vpack.c.bf16 %v473_v10, %v473_v10 }
 0x170   : > { %502 = vrot.lane.b32.xlu0 %v481_v9, %s810_s11  ;;  %v482_v13 = vrot.slane %v476_v11, 4 }
 0x172   : > { %493 = vrot.lane.b32.xlu1 %v475_v7, %s809_s10 }
 0x174   : > { %488 = vrot.lane.b32.xlu0 %v483_v50, %s811_s12 }
 0x176   : > { %513 = vrot.lane.b32.xlu1 %v476_v11, %s808_s7 }
 0x178   : > { %540 = vperm.xlu0 %771, %v537_v12  }
 0x17a   : > { %495 = vrot.lane.b32.xlu1 %v476_v11, %s809_s10 }
 0x17c   : > { %600 = vrot.lane.b32.xlu0 %v869_v3, %s813_s15 }
 0x17e   : > { %504 = vrot.lane.b32.xlu1 %v482_v13, %s810_s11 }
 0x182   : > { %486 = vrot.lane.b32.xlu1 %v482_v13, %s811_s12 }
 0x186   : > { %484 = vrot.lane.b32.xlu1 %v481_v9, %s811_s12 }
 0x18a   : > { %773 = vrot.lane.b32.xlu1 %v772_v14, %s813_s15 }
 0x1e0   : > { %v512_v16 = vpop.permute.xlu1 %511 }
 0x1e2   : > { %v503_v23 = vpop.permute.xlu0 %502 }
 0x1e4   : > { %v494_v18 = vpop.permute.xlu1 %493 }
 0x1e6   : > { %v489_v29 = vpop.permute.xlu0 %488 }
 0x1e8   : > { %v514_v0 = vpop.permute.xlu1 %513 }
 0x1e9   : > { %v518_v19 = vsel %vm517_vm14, %v512_v16, %v514_v0  ;;  %v519_v20 = vsel %vm517_vm14, %v514_v0, %v516_v15 }
 0x1ea   : > { %v547_v22 = vsel %vm313_vm3, %v518_v19, 0  ;;  %712 = vmatprep.subr.msk.bf16.mxu0 %vm313_vm3, %v519_v20 }
 0x1eb   : > { %563 = vmatpush1.bf16.msra.mxu0 %v547_v22 }
 0x1ec   : > { %v496_v3 = vpop.permute.xlu1 %495 }
 0x1ed   : > { %v500_v5 = vsel %vm499_vm15, %v494_v18, %v496_v3  ;;  %v501_v24 = vsel %vm499_vm15, %v496_v3, %v498_v17 }
 0x1f0   : > { %v505_v4 = vpop.permute.xlu1 %504 }
 0x1f1   : > { %v509_v25 = vsel %vm508_vm0, %v503_v23, %v505_v4  ;;  %v510_v26 = vsel %vm508_vm0, %v505_v4, %v507_v21 }
 0x1f2   : > { %v534_v27 = vsel %vm313_vm3, %v501_v24, %v510_v26  ;;  %v530_v28 = vsel %vm313_vm3, %v500_v5, %v509_v25 }
 0x1f3   : > { %564 = vmatprep.subr.bf16.mxu0 %v534_v27  ;;  %v541_v41 = vpop.permute.xlu0 %540 }
 0x1f4   : > { %v487_v30 = vpop.permute.xlu1 %486  ;;  %565 = vmatpush1.bf16.msra.mxu0 %v530_v28 }
 0x1f5   : > { %v492_v31 = vsel %vm490_vm1, %v487_v30, %v489_v29 }
 0x1f6   : > { %v526_v32 = vsel %vm313_vm3, %v476_v11, %v492_v31 }
 0x1f7   : > { %566 = vmatprep.subr.bf16.mxu0 %v526_v32  ;;  %v601_v45 = vpop.permute.xlu0 %600 }
 0x1f8   : > { %v485_v33 = vpop.permute.xlu1 %484 }
 0x1f9   : > { %v491_v34 = vsel %vm490_vm1, %v485_v33, %v487_v30 }
 0x1fa   : > { %v522_v35 = vsel %vm313_vm3, %v475_v7, %v491_v34 }
 0x1fb   : > { %567 = vmatpush1.bf16.msra.mxu0 %v522_v35 }
 0x1fc   : > { %v774_v42 = vpop.permute.xlu1 %773 }
 0x1fd   : > { %v776_v43 = vunpack.i.h.bf16 %v774_v42  ;;  %v775_v44 = vunpack.i.l.bf16 %v774_v42 }
 0x1fe   : > { %713 = vmatmul.mubr.msk.bf16.vlgmr.msra.gmra.mxu0 %vm345_vm8, %v536_v36 }
 0x1ff   : > { %v603_v48 = vsel %vm602_vm2, %v775_v44, %v776_v43  ;;  %v604_v50 = vsel %vm602_vm2, %v776_v43, %v601_v45 }
 0x2be   : > { %v586_v46 = vpop.f32.mrf.mxu0 }
 0x2bf   : > { %v587_v47 = vadd.f32 %v586_v46, %v541_v41 }
 0x2c0   : > { %v588_v49 = vpop.f32.mrf.mxu0 }
 0x2c1   : > { %v589_v51 = vadd.f32 %v588_v49, %v541_v41  ;;  %v607_v53 = vadd.f32 %v603_v48, %v587_v47 }
 0x2c2   : > { %v590_v52 = vpop.f32.mrf.mxu0 }
 0x2c3   : > { %v608_v54 = vadd.f32 %v604_v50, %v589_v51 }
 0x2c4   : > { %v591_v55 = vpop.f32.mrf.mxu0 }
 0x2c5   : > { %v718_v56 = vpack.c.bf16 %v608_v54, %v607_v53 }
 0x2c7   : > { %617 = vst [vmem:[%s246_s25] sm:$0xff] %v718_v56 }
 0x2c8 PF: > { %s15_s20 = sadd.s32 1, %s799_s20   ;;  %s969_s18 = smov %s795_s19 }
 0x2c9   : > { %p12_p5 = scmp.ge.s32.totalorder %s15_s20, 4   ;;  %s970_s19 = smov %s972_s21 }
 0x2cb   :  { %14 = sbr.rel (!%p12_p5) target bundleno = 2 (0x2), region = 71 }

</bundles_post_ra>
